<compile_context>
chip_gen: v6e
topology: v6e:2x2x1
jax: 0.10.0
libtpu: 0.0.40
codegen_flags: <defaults>
</compile_context>

<pallas_src>
import functools
import numpy as np
import jax
import jax.numpy as jnp
from jax import lax
from jax.experimental import pallas as pl
from jax.experimental.pallas import tpu as pltpu


# Safe scoped-VMEM budget on every generation (v7x has 64 MiB physical); raise on v5e/v6e
# for full-size configs, keep <= ~48 MiB on v7x.
VMEM_LIMIT = 32 * 1024 * 1024

_SQRT_2_OVER_PI = 0.7978845608028654


def _gelu(x):
    # TODO(synk): tanh-approx GELU inside Pallas kernels (exact-erf lowering in Mosaic is not
    # guaranteed); deviates from torch.nn.GELU() default by <~1e-3.
    return 0.5 * x * (1.0 + jnp.tanh(_SQRT_2_OVER_PI * (x + 0.044715 * (x * x * x))))


def _round_up(x, m):
    return ((x + m - 1) // m) * m


# ----------------------------------------------------------------------------
# Fused matmul kernel (conv-as-matmul path): o = act((a @ b) * scale + shift)
# ----------------------------------------------------------------------------
def matmul_fused(a, b, scale=None, shift=None, act=None, out_dtype=jnp.float32,
                 tm=256, tn=256, tk=512):
    """a:(M,K), b:(K,N); scale/shift broadcast per output column.

    bf16 MXU operands, f32 accumulation.  Small dims use full-dim blocks (no padding,
    no result slice); the f32 VMEM accumulator is only allocated when K needs tiling."""
    M, K = a.shape
    K2, N = b.shape
    assert K == K2

    if a.dtype != jnp.bfloat16:
        a = a.astype(jnp.bfloat16)
    if b.dtype != jnp.bfloat16:
        b = b.astype(jnp.bfloat16)

    # --- block shapes: full-dim (unpadded) when the dim fits in one tile ---
    if M <= tm:
        tm, Mp = M, M
    else:
        tm = min(tm, _round_up(M, 8))
        Mp = _round_up(M, tm)
    if N <= tn:
        tn, Np = N, N
    else:
        Np = _round_up(N, tn)
    if K <= tk:
        tk, Kp = K, K
    else:
        Kp = _round_up(K, tk)

    # Expose >=2 parallel M blocks when the problem would otherwise be a single grid step
    # (keeps v7x's second TensorCore busy on the bigger conv matmuls).
    if Mp == M and Mp // tm == 1 and M >= 128 and M % 16 == 0:
        tm = M // 2

    if (Mp, Kp) != (M, K):
        a = jnp.pad(a, ((0, Mp - M), (0, Kp - K)))
    if (Kp, Np) != (K, N):
        b = jnp.pad(b, ((0, Kp - K), (0, Np - N)))

    has_scale = scale is not None
    has_shift = shift is not None
    nkt = Kp // tk
    single_k = nkt == 1

    ins = [a, b]
    in_specs = [pl.BlockSpec((tm, tk), lambda i, j, k: (i, k)),
                pl.BlockSpec((tk, tn), lambda i, j, k: (k, j))]
    if has_scale:
        sc = jnp.asarray(scale, jnp.float32).reshape(1, N)
        if Np != N:
            sc = jnp.pad(sc, ((0, 0), (0, Np - N)))
        ins.append(sc)
        in_specs.append(pl.BlockSpec((1, tn), lambda i, j, k: (0, j)))
    if has_shift:
        sh = jnp.asarray(shift, jnp.float32).reshape(1, N)
        if Np != N:
            sh = jnp.pad(sh, ((0, 0), (0, Np - N)))
        ins.append(sh)
        in_specs.append(pl.BlockSpec((1, tn), lambda i, j, k: (0, j)))

    def _epilogue(r, sc_ref, sh_ref):
        if has_scale:
            r = r * sc_ref[...]
        if has_shift:
            r = r + sh_ref[...]
        if act == 'gelu':
            r = _gelu(r)
        return r

    if single_k:
        def kernel(*refs):
            a_ref, b_ref = refs[0], refs[1]
            idx = 2
            sc_ref = sh_ref = None
            if has_scale:
                sc_ref = refs[idx]; idx += 1
            if has_shift:
                sh_ref = refs[idx]; idx += 1
            o_ref = refs[idx]
            r = jnp.dot(a_ref[...], b_ref[...], preferred_element_type=jnp.float32)
            o_ref[...] = _epilogue(r, sc_ref, sh_ref).astype(o_ref.dtype)
        scratch = []
    else:
        def kernel(*refs):
            a_ref, b_ref = refs[0], refs[1]
            idx = 2
            sc_ref = sh_ref = None
            if has_scale:
                sc_ref = refs[idx]; idx += 1
            if has_shift:
                sh_ref = refs[idx]; idx += 1
            o_ref, acc_ref = refs[idx], refs[idx + 1]

            @pl.when(pl.program_id(2) == 0)
            def _init():
                acc_ref[...] = jnp.zeros_like(acc_ref)

            acc_ref[...] += jnp.dot(a_ref[...], b_ref[...],
                                    preferred_element_type=jnp.float32)

            @pl.when(pl.program_id(2) == pl.num_programs(2) - 1)
            def _finalize():
                o_ref[...] = _epilogue(acc_ref[...], sc_ref, sh_ref).astype(o_ref.dtype)
        scratch = [pltpu.VMEM((tm, tn), jnp.float32)]

    out = pl.pallas_call(
        kernel,
        out_shape=jax.ShapeDtypeStruct((Mp, Np), out_dtype),
        grid=(Mp // tm, Np // tn, nkt),
        in_specs=in_specs,
        out_specs=pl.BlockSpec((tm, tn), lambda i, j, k: (i, j)),
        scratch_shapes=scratch,
        compiler_params=pltpu.CompilerParams(
            dimension_semantics=("parallel", "parallel", "arbitrary"),
            vmem_limit_bytes=VMEM_LIMIT),
    )(*ins)

    if (Mp, Np) != (M, N):
        out = out[:M, :N]
    return out


# ----------------------------------------------------------------------------
# Fully fused transformer block (one pallas_call per block, grid over batch)
# ----------------------------------------------------------------------------
def _make_block_kernel(num_heads, scale, has_mask, eps=1e-6):
    def kernel(*refs):
        idx = 0
        x_ref = refs[idx]; idx += 1
        if has_mask:
            m_ref = refs[idx]; idx += 1
        else:
            m_ref = None
        (qkv_w_ref, qkv_b_ref, proj_w_ref, proj_b_ref,
         ln1_g_ref, ln1_b_ref, fc1_w_ref, fc1_b_ref,
         fc2_w_ref, fc2_b_ref, ln2_g_ref, ln2_b_ref,
         se_w1_ref, se_vec_ref, se_w2_ref, se_b2_ref,
         o_ref) = refs[idx:]

        x = x_ref[0].astype(jnp.float32)                       # (N, C)
        N, C = x.shape
        D = C // num_heads

        # ---- Attention mixer (heads stay packed along the channel axis) ----
        qkv = jnp.dot(x.astype(jnp.bfloat16), qkv_w_ref[...],
                      preferred_element_type=jnp.float32) + qkv_b_ref[...]   # (N, 3C)
        qkvb = qkv.astype(jnp.bfloat16)
        proj_w = proj_w_ref[...]                                # (C, C) bf16

        acc = jnp.zeros((N, C), jnp.float32)
        for h in range(num_heads):                              # static unroll
            q = qkvb[:, h * D:(h + 1) * D]
            k = qkvb[:, C + h * D:C + (h + 1) * D]
            v = qkvb[:, 2 * C + h * D:2 * C + (h + 1) * D]
            s = lax.dot_general(q, k, (((1,), (1,)), ((), ())),
                                preferred_element_type=jnp.float32) * scale
            if has_mask:
                s = s + m_ref[...]
            s = s - jnp.max(s, axis=-1, keepdims=True)
            p = jnp.exp(s)
            l = jnp.sum(p, axis=-1, keepdims=True)
            oh = jnp.dot(p.astype(jnp.bfloat16), v,
                         preferred_element_type=jnp.float32) / l            # exact softmax
            # fold this head's output straight into the projection (no concat):
            acc = acc + jnp.dot(oh.astype(jnp.bfloat16), proj_w[h * D:(h + 1) * D, :],
                                preferred_element_type=jnp.float32)
        mixer_out = acc + proj_b_ref[...]

        # ---- post-norm 1: x = LN(x + mixer(x)) ----
        x1 = x + mixer_out
        mu = jnp.mean(x1, axis=-1, keepdims=True)
        xc = x1 - mu
        var = jnp.mean(xc * xc, axis=-1, keepdims=True)
        xn = xc * lax.rsqrt(var + eps) * ln1_g_ref[...] + ln1_b_ref[...]

        # ---- MLP (GELU fused) ----
        h1 = _gelu(jnp.dot(xn.astype(jnp.bfloat16), fc1_w_ref[...],
                           preferred_element_type=jnp.float32) + fc1_b_ref[...])
        mlp = jnp.dot(h1.astype(jnp.bfloat16), fc2_w_ref[...],
                      preferred_element_type=jnp.float32) + fc2_b_ref[...]

        # ---- post-norm 2 ----
        x2 = xn + mlp
        mu2 = jnp.mean(x2, axis=-1, keepdims=True)
        xc2 = x2 - mu2
        var2 = jnp.mean(xc2 * xc2, axis=-1, keepdims=True)
        xo = xc2 * lax.rsqrt(var2 + eps) * ln2_g_ref[...] + ln2_b_ref[...]

        # ---- ShapeAwareSE (1-D branch), fused: pool over N, tiny channel MLP, gate ----
        sv = se_vec_ref[...]                                    # (5, rd): bn1_s, bn1_sh, dw, bn2_s, bn2_sh
        y = jnp.mean(xo, axis=0, keepdims=True)                 # (1, C)
        y = jnp.dot(y, se_w1_ref[...], preferred_element_type=jnp.float32)   # (1, rd)
        y = _gelu(y * sv[0:1, :] + sv[1:2, :])
        y = _gelu((y * sv[2:3, :]) * sv[3:4, :] + sv[4:5, :])
        y = jnp.dot(y, se_w2_ref[...], preferred_element_type=jnp.float32) + se_b2_ref[...]
        y = 1.0 / (1.0 + jnp.exp(-y))                           # sigmoid
        o_ref[0] = (xo * y).astype(o_ref.dtype)

    return kernel


def block_pallas(x, bp, mask, num_heads, eps=1e-6):
    """One SVTRv2 transformer block (Attention mixer + MLP + SE), fully fused."""
    B, N, C = x.shape
    has_mask = mask is not None
    scale = (C // num_heads) ** -0.5
    se = bp['se']

    ins = [x.astype(jnp.float32)]
    in_specs = [pl.BlockSpec((1, N, C), lambda b: (b, 0, 0))]
    if has_mask:
        ins.append(mask.astype(jnp.float32))
        in_specs.append(pl.BlockSpec(mask.shape, lambda b: (0, 0)))

    weights = [bp['qkv_wT'], bp['qkv_b'], bp['proj_wT'], bp['proj_b'],
               bp['ln1_g'], bp['ln1_b'], bp['fc1_wT'], bp['fc1_b'],
               bp['fc2_wT'], bp['fc2_b'], bp['ln2_g'], bp['ln2_b'],
               se['w1T'], se['vec'], se['w2T'], se['b2']]
    for w in weights:
        ins.append(w)
        in_specs.append(pl.BlockSpec(w.shape, lambda b: (0, 0)))

    return pl.pallas_call(
        _make_block_kernel(num_heads, scale, has_mask, eps),
        out_shape=jax.ShapeDtypeStruct((B, N, C), jnp.float32),
        grid=(B,),
        in_specs=in_specs,
        out_specs=pl.BlockSpec((1, N, C), lambda b: (b, 0, 0)),
        compiler_params=pltpu.CompilerParams(
            dimension_semantics=("parallel",),
            vmem_limit_bytes=VMEM_LIMIT),
    )(*ins)


# ----------------------------------------------------------------------------
# LayerNorm (post-downsample sub_norm only)
# ----------------------------------------------------------------------------
def layernorm_pallas(x, gamma, beta, eps=1e-6):
    M, C = x.shape
    if M <= 512:
        tm, Mp = M, M
    else:
        tm = 512
        Mp = _round_up(M, tm)
        if Mp != M:
            x = jnp.pad(x, ((0, Mp - M), (0, 0)))
    g = gamma.reshape(1, C).astype(jnp.float32)
    b = beta.reshape(1, C).astype(jnp.float32)

    def kernel(x_ref, g_ref, b_ref, o_ref):
        xs = x_ref[...].astype(jnp.float32)
        mu = jnp.mean(xs, axis=-1, keepdims=True)
        xc = xs - mu
        var = jnp.mean(xc * xc, axis=-1, keepdims=True)
        o_ref[...] = xc * lax.rsqrt(var + eps) * g_ref[...] + b_ref[...]

    out = pl.pallas_call(
        kernel,
        out_shape=jax.ShapeDtypeStruct((Mp, C), jnp.float32),
        grid=(Mp // tm,),
        in_specs=[pl.BlockSpec((tm, C), lambda i: (i, 0)),
                  pl.BlockSpec((1, C), lambda i: (0, 0)),
                  pl.BlockSpec((1, C), lambda i: (0, 0))],
        out_specs=pl.BlockSpec((tm, C), lambda i: (i, 0)),
        compiler_params=pltpu.CompilerParams(
            dimension_semantics=("parallel",),
            vmem_limit_bytes=VMEM_LIMIT),
    )(x.astype(jnp.float32), g, b)
    return out[:M] if Mp != M else out


# ----------------------------------------------------------------------------
# JAX glue (im2col, conv wrapper, mask construction)
# ----------------------------------------------------------------------------
def im2col_nhwc(x, kh, kw, stride, pad):
    """x: (B, H, W, C) -> patches (B*Ho*Wo, C*kh*kw), C-major feature order."""
    # TODO(synk): for production input sizes fuse patch construction into the conv matmul
    # kernel (DMA NHWC rows, build kh*kw patches in VMEM) to avoid the 9x im2col HBM copy.
    B, H, W, C = x.shape
    sh, sw = stride
    xp = jnp.pad(x, ((0, 0), (pad, pad), (pad, pad), (0, 0)))
    Ho = (H + 2 * pad - kh) // sh + 1
    Wo = (W + 2 * pad - kw) // sw + 1
    cols = []
    for i in range(kh):
        for j in range(kw):
            cols.append(xp[:, i:i + sh * (Ho - 1) + 1:sh, j:j + sw * (Wo - 1) + 1:sw, :])
    p = jnp.stack(cols, axis=-1)              # (B, Ho, Wo, C, kh*kw)
    return p.reshape(B * Ho * Wo, C * kh * kw), Ho, Wo


def conv2d_pallas(x_nhwc, w_mat, scale, shift, stride, pad, kh, kw, act=None,
                  out_dtype=jnp.float32):
    """Conv2d (NHWC) as bf16 im2col + fused Pallas matmul (BN scale/shift + GELU epilogue)."""
    B = x_nhwc.shape[0]
    Cout = w_mat.shape[1]
    patches, Ho, Wo = im2col_nhwc(x_nhwc.astype(jnp.bfloat16), kh, kw, stride, pad)
    y = matmul_fused(patches, w_mat, scale=scale, shift=shift, act=act, out_dtype=out_dtype)
    return y.reshape(B, Ho, Wo, Cout)


def bn_fold(channels, eps=1e-5):
    """Eval-mode BatchNorm with default init (gamma=1, beta=0, mean=0, var=1)."""
    gamma = jnp.ones((channels,), jnp.float32)
    beta = jnp.zeros((channels,), jnp.float32)
    rm = jnp.zeros((channels,), jnp.float32)
    rv = jnp.ones((channels,), jnp.float32)
    scale = gamma / jnp.sqrt(rv + eps)
    shift = beta - rm * scale
    return scale, shift


def get_max2d_mask(H, W, local_k):
    hk, wk = local_k
    mask = np.ones((H * W, H + hk - 1, W + wk - 1), np.float32)
    for h in range(H):
        for w in range(W):
            mask[h * W + w, h:h + hk, w:w + wk] = 0.0
    mask = mask[:, hk // 2:H + hk // 2, wk // 2:W + wk // 2]
    mask[mask >= 1] = -np.inf
    # equality branch of get_2d_mask (feat size == feat_max_size): flatten to (N, N)
    return mask.reshape(H * W, H * W)


# ----------------------------------------------------------------------------
# Network forward
# ----------------------------------------------------------------------------
def stage_forward(x, sz, sp, dim, num_heads, sub_k):
    B = x.shape[0]
    # Same additive mask for every block in the stage (matches the torch SVTRStage loop,
    # which passes the stage mask to all blocks including 'Global'-mixer ones).
    mask = sp['mask']
    for bp in sp['blocks']:
        x = block_pallas(x, bp, mask, num_heads)
    if sp['ds_wm'] is not None:
        x4 = x.reshape(B, sz[0], sz[1], dim)                          # NHWC, no transpose
        x4 = conv2d_pallas(x4, sp['ds_wm'], None, sp['ds_b'], tuple(sub_k), 1, 3, 3)
        sz = (x4.shape[1], x4.shape[2])
        out_dim = x4.shape[3]
        x2 = layernorm_pallas(x4.reshape(B * sz[0] * sz[1], out_dim),
                              sp['sub_ln_g'], sp['sub_ln_b'])
        x = x2.reshape(B, sz[0] * sz[1], out_dim)
    return x, sz


def svtrv2_forward(x, params, cfg):
    B = x.shape[0]
    ed = cfg['dims'][0]
    p = params['pope']
    x = x.transpose(0, 2, 3, 1)                                       # NCHW -> NHWC once
    # POPatchEmbed: two Conv(3x3,s2,p1)+BN+GELU, fused into the conv-matmul epilogue.
    # conv1 output emitted in bf16 (only feeds the next im2col).
    x = conv2d_pallas(x, p['conv1_wm'], p['bn1_scale'], p['bn1_shift'], (2, 2), 1, 3, 3,
                      act='gelu', out_dtype=jnp.bfloat16)
    x = conv2d_pallas(x, p['conv2_wm'], p['bn2_scale'], p['bn2_shift'], (2, 2), 1, 3, 3,
                      act='gelu')
    H, W = x.shape[1], x.shape[2]
    x = x + p['pos_embed'][:, :H, :W, :]
    x = x.reshape(B, H * W, ed)                                       # flatten(2).transpose(1,2)
    sz = (H, W)
    for i, sp in enumerate(params['stages']):
        x, sz = stage_forward(x, sz, sp, cfg['dims'][i], cfg['num_heads'][i], cfg['sub_k'][i])
    return x


# ----------------------------------------------------------------------------
# Deterministic parameter init (linear / conv weights stored pre-transposed)
# ----------------------------------------------------------------------------
class KeyGen:
    def __init__(self, key):
        self.key = key

    def __call__(self):
        self.key, sub = jax.random.split(self.key)
        return sub


def trunc_normal(key, shape, std=0.02):
    return std * jax.random.truncated_normal(key, -2.0, 2.0, shape, jnp.float32)


def kaiming_conv(key, shape):
    cout, cin, kh, kw = shape
    std = (2.0 / (cout * kh * kw)) ** 0.5
    return std * jax.random.normal(key, shape, jnp.float32)


def conv_matrix(w):
    """(Cout, Cin, kh, kw) -> (Cin*kh*kw, Cout) bf16 matmul operand."""
    return w.reshape(w.shape[0], -1).T.astype(jnp.bfloat16)


def init_se(kg, dim, ratio):
    rd = int(dim * ratio)
    s1, sh1 = bn_fold(rd)
    s2, sh2 = bn_fold(rd)
    w1 = 0.02 * jax.random.normal(kg(), (rd, dim), jnp.float32)
    dw_center = 0.02 * jax.random.normal(kg(), (rd,), jnp.float32)    # dw Conv1d k=3,p=1 on length-1
    w2 = 0.02 * jax.random.normal(kg(), (dim, rd), jnp.float32)
    return dict(
        w1T=w1.T,                                                     # (dim, rd) f32
        vec=jnp.stack([s1, sh1, dw_center, s2, sh2], axis=0),         # (5, rd) f32
        w2T=w2.T,                                                     # (rd, dim) f32
        b2=jnp.zeros((1, dim), jnp.float32),
    )


def init_block(kg, dim, mlp_ratio, se_ratio):
    hidden = int(dim * mlp_ratio)
    return dict(
        qkv_wT=trunc_normal(kg(), (dim, 3 * dim)).astype(jnp.bfloat16),
        qkv_b=jnp.zeros((1, 3 * dim), jnp.float32),
        proj_wT=trunc_normal(kg(), (dim, dim)).astype(jnp.bfloat16),
        proj_b=jnp.zeros((1, dim), jnp.float32),
        ln1_g=jnp.ones((1, dim), jnp.float32), ln1_b=jnp.zeros((1, dim), jnp.float32),
        fc1_wT=trunc_normal(kg(), (dim, hidden)).astype(jnp.bfloat16),
        fc1_b=jnp.zeros((1, hidden), jnp.float32),
        fc2_wT=trunc_normal(kg(), (hidden, dim)).astype(jnp.bfloat16),
        fc2_b=jnp.zeros((1, dim), jnp.float32),
        ln2_g=jnp.ones((1, dim), jnp.float32), ln2_b=jnp.zeros((1, dim), jnp.float32),
        se=init_se(kg, dim, se_ratio),
    )


def init_params(key, cfg):
    kg = KeyGen(key)
    dims = cfg['dims']
    ed = dims[0]
    fm = [cfg['max_sz'][0] // 4, cfg['max_sz'][1] // 4]
    bn1_s, bn1_sh = bn_fold(ed // 2)
    bn2_s, bn2_sh = bn_fold(ed)
    params = {
        'pope': dict(
            conv1_wm=conv_matrix(kaiming_conv(kg(), (ed // 2, cfg['in_channels'], 3, 3))),
            bn1_scale=bn1_s, bn1_shift=bn1_sh,
            conv2_wm=conv_matrix(kaiming_conv(kg(), (ed, ed // 2, 3, 3))),
            bn2_scale=bn2_s, bn2_shift=bn2_sh,
            pos_embed=trunc_normal(kg(), (1, fm[0], fm[1], ed)),      # stored NHWC
        )
    }
    stages = []
    num_stages = len(cfg['depths'])
    for i in range(num_stages):
        dim = dims[i]
        out_dim = dims[i + 1] if i < num_stages - 1 else 0
        mixer = cfg['mixer'][i]
        sp = {}
        if 'Local' in mixer:
            sp['mask'] = jnp.asarray(get_max2d_mask(fm[0], fm[1], cfg['local_k'][i]))
        else:
            sp['mask'] = None
        sp['blocks'] = [init_block(kg, dim, cfg['mlp_ratio'], cfg['se_ratio'])
                        for _ in range(cfg['depths'][i])]
        if i < num_stages - 1:
            sp['ds_wm'] = conv_matrix(kaiming_conv(kg(), (out_dim, dim, 3, 3)))
            sp['ds_b'] = jnp.zeros((out_dim,), jnp.float32)
            sp['sub_ln_g'] = jnp.ones((out_dim,), jnp.float32)
            sp['sub_ln_b'] = jnp.zeros((out_dim,), jnp.float32)
        else:
            sp['ds_wm'] = None
        stages.append(sp)
        fm = [fm[0] // cfg['sub_k'][i][0], fm[1] // cfg['sub_k'][i][1]]
    params['stages'] = stages
    return params


# ----------------------------------------------------------------------------
# Main
# ----------------------------------------------------------------------------
if __name__ == "__main__":
    # Small SVTRv2 config (same structure as defaults, reduced dims/depths/input).
    CFG = dict(
        max_sz=[16, 32],
        in_channels=3,
        dims=[32, 64, 128],
        depths=[1, 2, 1],
        num_heads=[2, 4, 8],
        mixer=[['Local'], ['Local', 'Global'], ['Global']],
        local_k=[[7, 11], [7, 11], [-1, -1]],
        sub_k=[[1, 1], [2, 1], [1, 1]],
        mlp_ratio=4,
        se_ratio=0.25,
    )

    key = jax.random.PRNGKey(0)
    kx, kp = jax.random.split(key)
    x = jax.random.normal(kx, (2, CFG['in_channels'], CFG['max_sz'][0], CFG['max_sz'][1]),
                          jnp.float32)
    params = init_params(kp, CFG)

    fwd = jax.jit(functools.partial(svtrv2_forward, cfg=CFG))
    out = fwd(x, params)
    out = jax.block_until_ready(out)

    # Expected: (B, (16/4/1/2/1) * (32/4), dims[-1]) = (2, 16, 128)
    assert out.shape == (2, 16, 128), out.shape
    assert bool(jnp.all(jnp.isfinite(out)))
    print("KERNEL_OK")
</pallas_src>

<mosaic_0001>
module attributes {stable_mosaic.version = 11 : i64} {
  func.func @kernel(%arg0: i32, %arg1: i32, %arg2: i32, %arg3: memref<128x27xbf16, #tpu.memory_space<vmem>>, %arg4: memref<27x16xbf16, #tpu.memory_space<vmem>>, %arg5: memref<1x16xf32, #tpu.memory_space<vmem>>, %arg6: memref<1x16xf32, #tpu.memory_space<vmem>>, %arg7: memref<128x16xbf16, #tpu.memory_space<vmem>>) attributes {dimension_semantics = [#tpu.dimension_semantics<parallel>, #tpu.dimension_semantics<parallel>, #tpu.dimension_semantics<arbitrary>], iteration_bounds = array<i64: 2, 1, 1>, scalar_prefetch = 0 : i64, scratch_operands = 0 : i64, tpu.core_type = #tpu.core_type<tc>, window_params = [{transform_indices = @transform_0, window_bounds = array<i64: 128, 27>}, {transform_indices = @transform_1, window_bounds = array<i64: 27, 16>}, {transform_indices = @transform_2, window_bounds = array<i64: 1, 16>}, {transform_indices = @transform_3, window_bounds = array<i64: 1, 16>}, {transform_indices = @transform_4, window_bounds = array<i64: 128, 16>}]} {
    %c0 = arith.constant 0 : index
    %c0_0 = arith.constant 0 : index
    %0 = vector.load %arg3[%c0, %c0_0] : memref<128x27xbf16, #tpu.memory_space<vmem>>, vector<128x27xbf16>
    %c0_1 = arith.constant 0 : index
    %c0_2 = arith.constant 0 : index
    %1 = vector.load %arg4[%c0_1, %c0_2] : memref<27x16xbf16, #tpu.memory_space<vmem>>, vector<27x16xbf16>
    %cst = arith.constant dense<0.000000e+00> : vector<128x16xf32>
    %2 = tpu.matmul %0, %1, %cst {dimension_numbers = #tpu.dot_dimension_numbers<[1], [0], [0], [1], [0, 0, 1, 1], [], []>} : vector<128x27xbf16>, vector<27x16xbf16>, vector<128x16xf32> -> vector<128x16xf32>
    %c0_3 = arith.constant 0 : index
    %c0_4 = arith.constant 0 : index
    %3 = vector.load %arg5[%c0_3, %c0_4] : memref<1x16xf32, #tpu.memory_space<vmem>>, vector<1x16xf32>
    %4 = vector.broadcast %3 : vector<1x16xf32> to vector<128x16xf32>
    %5 = arith.mulf %2, %4 : vector<128x16xf32>
    %c0_5 = arith.constant 0 : index
    %c0_6 = arith.constant 0 : index
    %6 = vector.load %arg6[%c0_5, %c0_6] : memref<1x16xf32, #tpu.memory_space<vmem>>, vector<1x16xf32>
    %7 = vector.broadcast %6 : vector<1x16xf32> to vector<128x16xf32>
    %8 = arith.addf %5, %7 : vector<128x16xf32>
    %cst_7 = arith.constant 5.000000e-01 : f32
    %9 = vector.broadcast %cst_7 : f32 to vector<128x16xf32>
    %10 = arith.mulf %9, %8 : vector<128x16xf32>
    %11 = arith.mulf %8, %8 : vector<128x16xf32>
    %12 = arith.mulf %11, %8 : vector<128x16xf32>
    %cst_8 = arith.constant 4.471500e-02 : f32
    %13 = vector.broadcast %cst_8 : f32 to vector<128x16xf32>
    %14 = arith.mulf %13, %12 : vector<128x16xf32>
    %15 = arith.addf %8, %14 : vector<128x16xf32>
    %cst_9 = arith.constant 0.797884583 : f32
    %16 = vector.broadcast %cst_9 : f32 to vector<128x16xf32>
    %17 = arith.mulf %16, %15 : vector<128x16xf32>
    %18 = math.tanh %17 : vector<128x16xf32>
    %cst_10 = arith.constant 1.000000e+00 : f32
    %19 = vector.broadcast %cst_10 : f32 to vector<128x16xf32>
    %20 = arith.addf %19, %18 : vector<128x16xf32>
    %21 = arith.mulf %10, %20 : vector<128x16xf32>
    %22 = arith.truncf %21 : vector<128x16xf32> to vector<128x16xbf16>
    %c0_11 = arith.constant 0 : index
    %c0_12 = arith.constant 0 : index
    %23 = vector.load %arg7[%c0_11, %c0_12] : memref<128x16xbf16, #tpu.memory_space<vmem>>, vector<128x16xbf16>
    tpu.vector_store %arg7[%c0_11, %c0_12], %22 {strides = array<i32>} : memref<128x16xbf16, #tpu.memory_space<vmem>>, vector<128x16xbf16>,
    return
  }
  func.func @transform_0(%arg0: i32, %arg1: i32, %arg2: i32) -> (i32, i32) {
    %c0_i32 = arith.constant 0 : i32
    return %arg0, %arg2 : i32, i32
  }
  func.func @transform_1(%arg0: i32, %arg1: i32, %arg2: i32) -> (i32, i32) {
    %c0_i32 = arith.constant 0 : i32
    return %arg2, %arg1 : i32, i32
  }
  func.func @transform_2(%arg0: i32, %arg1: i32, %arg2: i32) -> (i32, i32) {
    %c0_i32 = arith.constant 0 : i32
    %c0_i32_0 = arith.constant 0 : i32
    return %c0_i32, %arg1 : i32, i32
  }
  func.func @transform_3(%arg0: i32, %arg1: i32, %arg2: i32) -> (i32, i32) {
    %c0_i32 = arith.constant 0 : i32
    %c0_i32_0 = arith.constant 0 : i32
    return %c0_i32, %arg1 : i32, i32
  }
  func.func @transform_4(%arg0: i32, %arg1: i32, %arg2: i32) -> (i32, i32) {
    %c0_i32 = arith.constant 0 : i32
    return %arg0, %arg1 : i32, i32
  }
}

module attributes {stable_mosaic.version = 11 : i64} {
  func.func @kernel(%arg0: i32, %arg1: i32, %arg2: i32, %arg3: memref<64x144xbf16, #tpu.memory_space<vmem>>, %arg4: memref<144x32xbf16, #tpu.memory_space<vmem>>, %arg5: memref<1x32xf32, #tpu.memory_space<vmem>>, %arg6: memref<1x32xf32, #tpu.memory_space<vmem>>, %arg7: memref<64x32xf32, #tpu.memory_space<vmem>>) attributes {dimension_semantics = [#tpu.dimension_semantics<parallel>, #tpu.dimension_semantics<parallel>, #tpu.dimension_semantics<arbitrary>], iteration_bounds = array<i64: 1, 1, 1>, scalar_prefetch = 0 : i64, scratch_operands = 0 : i64, tpu.core_type = #tpu.core_type<tc>, window_params = [{transform_indices = @transform_0, window_bounds = array<i64: 64, 144>}, {transform_indices = @transform_1, window_bounds = array<i64: 144, 32>}, {transform_indices = @transform_2, window_bounds = array<i64: 1, 32>}, {transform_indices = @transform_3, window_bounds = array<i64: 1, 32>}, {transform_indices = @transform_4, window_bounds = array<i64: 64, 32>}]} {
    %c0 = arith.constant 0 : index
    %c0_0 = arith.constant 0 : index
    %0 = vector.load %arg3[%c0, %c0_0] : memref<64x144xbf16, #tpu.memory_space<vmem>>, vector<64x144xbf16>
    %c0_1 = arith.constant 0 : index
    %c0_2 = arith.constant 0 : index
    %1 = vector.load %arg4[%c0_1, %c0_2] : memref<144x32xbf16, #tpu.memory_space<vmem>>, vector<144x32xbf16>
    %cst = arith.constant dense<0.000000e+00> : vector<64x32xf32>
    %2 = tpu.matmul %0, %1, %cst {dimension_numbers = #tpu.dot_dimension_numbers<[1], [0], [0], [1], [0, 0, 1, 1], [], []>} : vector<64x144xbf16>, vector<144x32xbf16>, vector<64x32xf32> -> vector<64x32xf32>
    %c0_3 = arith.constant 0 : index
    %c0_4 = arith.constant 0 : index
    %3 = vector.load %arg5[%c0_3, %c0_4] : memref<1x32xf32, #tpu.memory_space<vmem>>, vector<1x32xf32>
    %4 = vector.broadcast %3 : vector<1x32xf32> to vector<64x32xf32>
    %5 = arith.mulf %2, %4 : vector<64x32xf32>
    %c0_5 = arith.constant 0 : index
    %c0_6 = arith.constant 0 : index
    %6 = vector.load %arg6[%c0_5, %c0_6] : memref<1x32xf32, #tpu.memory_space<vmem>>, vector<1x32xf32>
    %7 = vector.broadcast %6 : vector<1x32xf32> to vector<64x32xf32>
    %8 = arith.addf %5, %7 : vector<64x32xf32>
    %cst_7 = arith.constant 5.000000e-01 : f32
    %9 = vector.broadcast %cst_7 : f32 to vector<64x32xf32>
    %10 = arith.mulf %9, %8 : vector<64x32xf32>
    %11 = arith.mulf %8, %8 : vector<64x32xf32>
    %12 = arith.mulf %11, %8 : vector<64x32xf32>
    %cst_8 = arith.constant 4.471500e-02 : f32
    %13 = vector.broadcast %cst_8 : f32 to vector<64x32xf32>
    %14 = arith.mulf %13, %12 : vector<64x32xf32>
    %15 = arith.addf %8, %14 : vector<64x32xf32>
    %cst_9 = arith.constant 0.797884583 : f32
    %16 = vector.broadcast %cst_9 : f32 to vector<64x32xf32>
    %17 = arith.mulf %16, %15 : vector<64x32xf32>
    %18 = math.tanh %17 : vector<64x32xf32>
    %cst_10 = arith.constant 1.000000e+00 : f32
    %19 = vector.broadcast %cst_10 : f32 to vector<64x32xf32>
    %20 = arith.addf %19, %18 : vector<64x32xf32>
    %21 = arith.mulf %10, %20 : vector<64x32xf32>
    %c0_11 = arith.constant 0 : index
    %c0_12 = arith.constant 0 : index
    %22 = vector.load %arg7[%c0_11, %c0_12] : memref<64x32xf32, #tpu.memory_space<vmem>>, vector<64x32xf32>
    tpu.vector_store %arg7[%c0_11, %c0_12], %21 {strides = array<i32>} : memref<64x32xf32, #tpu.memory_space<vmem>>, vector<64x32xf32>,
    return
  }
  func.func @transform_0(%arg0: i32, %arg1: i32, %arg2: i32) -> (i32, i32) {
    %c0_i32 = arith.constant 0 : i32
    return %arg0, %arg2 : i32, i32
  }
  func.func @transform_1(%arg0: i32, %arg1: i32, %arg2: i32) -> (i32, i32) {
    %c0_i32 = arith.constant 0 : i32
    return %arg2, %arg1 : i32, i32
  }
  func.func @transform_2(%arg0: i32, %arg1: i32, %arg2: i32) -> (i32, i32) {
    %c0_i32 = arith.constant 0 : i32
    %c0_i32_0 = arith.constant 0 : i32
    return %c0_i32, %arg1 : i32, i32
  }
  func.func @transform_3(%arg0: i32, %arg1: i32, %arg2: i32) -> (i32, i32) {
    %c0_i32 = arith.constant 0 : i32
    %c0_i32_0 = arith.constant 0 : i32
    return %c0_i32, %arg1 : i32, i32
  }
  func.func @transform_4(%arg0: i32, %arg1: i32, %arg2: i32) -> (i32, i32) {
    %c0_i32 = arith.constant 0 : i32
    return %arg0, %arg1 : i32, i32
  }
}

module attributes {stable_mosaic.version = 11 : i64} {
  func.func @kernel(%arg0: i32, %arg1: memref<1x32x32xf32, #tpu.memory_space<vmem>>, %arg2: memref<32x32xf32, #tpu.memory_space<vmem>>, %arg3: memref<32x96xbf16, #tpu.memory_space<vmem>>, %arg4: memref<1x96xf32, #tpu.memory_space<vmem>>, %arg5: memref<32x32xbf16, #tpu.memory_space<vmem>>, %arg6: memref<1x32xf32, #tpu.memory_space<vmem>>, %arg7: memref<1x32xf32, #tpu.memory_space<vmem>>, %arg8: memref<1x32xf32, #tpu.memory_space<vmem>>, %arg9: memref<32x128xbf16, #tpu.memory_space<vmem>>, %arg10: memref<1x128xf32, #tpu.memory_space<vmem>>, %arg11: memref<128x32xbf16, #tpu.memory_space<vmem>>, %arg12: memref<1x32xf32, #tpu.memory_space<vmem>>, %arg13: memref<1x32xf32, #tpu.memory_space<vmem>>, %arg14: memref<1x32xf32, #tpu.memory_space<vmem>>, %arg15: memref<32x8xf32, #tpu.memory_space<vmem>>, %arg16: memref<5x8xf32, #tpu.memory_space<vmem>>, %arg17: memref<8x32xf32, #tpu.memory_space<vmem>>, %arg18: memref<1x32xf32, #tpu.memory_space<vmem>>, %arg19: memref<1x32x32xf32, #tpu.memory_space<vmem>>) attributes {dimension_semantics = [#tpu.dimension_semantics<parallel>], iteration_bounds = array<i64: 2>, scalar_prefetch = 0 : i64, scratch_operands = 0 : i64, tpu.core_type = #tpu.core_type<tc>, window_params = [{transform_indices = @transform_0, window_bounds = array<i64: 1, 32, 32>}, {pipeline_mode = #tpu.pipeline_mode<synchronous>, transform_indices = @transform_1, window_bounds = array<i64: 32, 32>}, {pipeline_mode = #tpu.pipeline_mode<synchronous>, transform_indices = @transform_2, window_bounds = array<i64: 32, 96>}, {pipeline_mode = #tpu.pipeline_mode<synchronous>, transform_indices = @transform_3, window_bounds = array<i64: 1, 96>}, {pipeline_mode = #tpu.pipeline_mode<synchronous>, transform_indices = @transform_4, window_bounds = array<i64: 32, 32>}, {pipeline_mode = #tpu.pipeline_mode<synchronous>, transform_indices = @transform_5, window_bounds = array<i64: 1, 32>}, {pipeline_mode = #tpu.pipeline_mode<synchronous>, transform_indices = @transform_6, window_bounds = array<i64: 1, 32>}, {pipeline_mode = #tpu.pipeline_mode<synchronous>, transform_indices = @transform_7, window_bounds = array<i64: 1, 32>}, {pipeline_mode = #tpu.pipeline_mode<synchronous>, transform_indices = @transform_8, window_bounds = array<i64: 32, 128>}, {pipeline_mode = #tpu.pipeline_mode<synchronous>, transform_indices = @transform_9, window_bounds = array<i64: 1, 128>}, {pipeline_mode = #tpu.pipeline_mode<synchronous>, transform_indices = @transform_10, window_bounds = array<i64: 128, 32>}, {pipeline_mode = #tpu.pipeline_mode<synchronous>, transform_indices = @transform_11, window_bounds = array<i64: 1, 32>}, {pipeline_mode = #tpu.pipeline_mode<synchronous>, transform_indices = @transform_12, window_bounds = array<i64: 1, 32>}, {pipeline_mode = #tpu.pipeline_mode<synchronous>, transform_indices = @transform_13, window_bounds = array<i64: 1, 32>}, {pipeline_mode = #tpu.pipeline_mode<synchronous>, transform_indices = @transform_14, window_bounds = array<i64: 32, 8>}, {pipeline_mode = #tpu.pipeline_mode<synchronous>, transform_indices = @transform_15, window_bounds = array<i64: 5, 8>}, {pipeline_mode = #tpu.pipeline_mode<synchronous>, transform_indices = @transform_16, window_bounds = array<i64: 8, 32>}, {pipeline_mode = #tpu.pipeline_mode<synchronous>, transform_indices = @transform_17, window_bounds = array<i64: 1, 32>}, {transform_indices = @transform_18, window_bounds = array<i64: 1, 32, 32>}]} {
    %c0 = arith.constant 0 : index
    %c0_0 = arith.constant 0 : index
    %c0_1 = arith.constant 0 : index
    %0 = vector.load %arg1[%c0, %c0_0, %c0_1] : memref<1x32x32xf32, #tpu.memory_space<vmem>>, vector<1x32x32xf32>
    %1 = vector.shape_cast %0 : vector<1x32x32xf32> to vector<32x32xf32>
    %2 = arith.truncf %1 : vector<32x32xf32> to vector<32x32xbf16>
    %c0_2 = arith.constant 0 : index
    %c0_3 = arith.constant 0 : index
    %3 = vector.load %arg3[%c0_2, %c0_3] : memref<32x96xbf16, #tpu.memory_space<vmem>>, vector<32x96xbf16>
    %cst = arith.constant dense<0.000000e+00> : vector<32x96xf32>
    %4 = tpu.matmul %2, %3, %cst {dimension_numbers = #tpu.dot_dimension_numbers<[1], [0], [0], [1], [0, 0, 1, 1], [], []>} : vector<32x32xbf16>, vector<32x96xbf16>, vector<32x96xf32> -> vector<32x96xf32>
    %c0_4 = arith.constant 0 : index
    %c0_5 = arith.constant 0 : index
    %5 = vector.load %arg4[%c0_4, %c0_5] : memref<1x96xf32, #tpu.memory_space<vmem>>, vector<1x96xf32>
    %6 = vector.broadcast %5 : vector<1x96xf32> to vector<32x96xf32>
    %7 = arith.addf %4, %6 : vector<32x96xf32>
    %8 = arith.truncf %7 : vector<32x96xf32> to vector<32x96xbf16>
    %c0_6 = arith.constant 0 : index
    %c0_7 = arith.constant 0 : index
    %9 = vector.load %arg5[%c0_6, %c0_7] : memref<32x32xbf16, #tpu.memory_space<vmem>>, vector<32x32xbf16>
    %cst_8 = arith.constant 0.000000e+00 : f32
    %10 = vector.broadcast %cst_8 : f32 to vector<32x32xf32>
    %11 = vector.extract_strided_slice %8 {offsets = [0, 0], sizes = [32, 16], strides = [1, 1]} : vector<32x96xbf16> to vector<32x16xbf16>
    %12 = vector.extract_strided_slice %8 {offsets = [0, 32], sizes = [32, 16], strides = [1, 1]} : vector<32x96xbf16> to vector<32x16xbf16>
    %13 = vector.extract_strided_slice %8 {offsets = [0, 64], sizes = [32, 16], strides = [1, 1]} : vector<32x96xbf16> to vector<32x16xbf16>
    %cst_9 = arith.constant dense<0.000000e+00> : vector<32x32xf32>
    %14 = tpu.matmul %11, %12, %cst_9 {dimension_numbers = #tpu.dot_dimension_numbers<[1], [1], [0], [0], [0, 0, 1, 0], [], []>} : vector<32x16xbf16>, vector<32x16xbf16>, vector<32x32xf32> -> vector<32x32xf32>
    %cst_10 = arith.constant 2.500000e-01 : f32
    %15 = vector.broadcast %cst_10 : f32 to vector<32x32xf32>
    %16 = arith.mulf %14, %15 : vector<32x32xf32>
    %c0_11 = arith.constant 0 : index
    %c0_12 = arith.constant 0 : index
    %17 = vector.load %arg2[%c0_11, %c0_12] : memref<32x32xf32, #tpu.memory_space<vmem>>, vector<32x32xf32>
    %18 = arith.addf %16, %17 : vector<32x32xf32>
    %cst_13 = arith.constant dense<0xFF800000> : vector<32xf32>
    %19 = vector.multi_reduction <maximumf>, %18, %cst_13 [1] : vector<32x32xf32> to vector<32xf32>
    %20 = vector.shape_cast %19 : vector<32xf32> to vector<32x1xf32>
    %21 = vector.broadcast %20 : vector<32x1xf32> to vector<32x32xf32>
    %22 = arith.subf %18, %21 : vector<32x32xf32>
    %23 = math.exp %22 : vector<32x32xf32>
    %cst_14 = arith.constant dense<0.000000e+00> : vector<32xf32>
    %24 = vector.multi_reduction <add>, %23, %cst_14 [1] : vector<32x32xf32> to vector<32xf32>
    %25 = vector.shape_cast %24 : vector<32xf32> to vector<32x1xf32>
    %26 = arith.truncf %23 : vector<32x32xf32> to vector<32x32xbf16>
    %cst_15 = arith.constant dense<0.000000e+00> : vector<32x16xf32>
    %27 = tpu.matmul %26, %13, %cst_15 {dimension_numbers = #tpu.dot_dimension_numbers<[1], [0], [0], [1], [0, 0, 1, 1], [], []>} : vector<32x32xbf16>, vector<32x16xbf16>, vector<32x16xf32> -> vector<32x16xf32>
    %28 = vector.broadcast %25 : vector<32x1xf32> to vector<32x16xf32>
    %29 = arith.divf %27, %28 : vector<32x16xf32>
    %30 = arith.truncf %29 : vector<32x16xf32> to vector<32x16xbf16>
    %31 = vector.extract_strided_slice %9 {offsets = [0, 0], sizes = [16, 32], strides = [1, 1]} : vector<32x32xbf16> to vector<16x32xbf16>
    %cst_16 = arith.constant dense<0.000000e+00> : vector<32x32xf32>
    %32 = tpu.matmul %30, %31, %cst_16 {dimension_numbers = #tpu.dot_dimension_numbers<[1], [0], [0], [1], [0, 0, 1, 1], [], []>} : vector<32x16xbf16>, vector<16x32xbf16>, vector<32x32xf32> -> vector<32x32xf32>
    %33 = arith.addf %10, %32 : vector<32x32xf32>
    %34 = vector.extract_strided_slice %8 {offsets = [0, 16], sizes = [32, 16], strides = [1, 1]} : vector<32x96xbf16> to vector<32x16xbf16>
    %35 = vector.extract_strided_slice %8 {offsets = [0, 48], sizes = [32, 16], strides = [1, 1]} : vector<32x96xbf16> to vector<32x16xbf16>
    %36 = vector.extract_strided_slice %8 {offsets = [0, 80], sizes = [32, 16], strides = [1, 1]} : vector<32x96xbf16> to vector<32x16xbf16>
    %cst_17 = arith.constant dense<0.000000e+00> : vector<32x32xf32>
    %37 = tpu.matmul %34, %35, %cst_17 {dimension_numbers = #tpu.dot_dimension_numbers<[1], [1], [0], [0], [0, 0, 1, 0], [], []>} : vector<32x16xbf16>, vector<32x16xbf16>, vector<32x32xf32> -> vector<32x32xf32>
    %cst_18 = arith.constant 2.500000e-01 : f32
    %38 = vector.broadcast %cst_18 : f32 to vector<32x32xf32>
    %39 = arith.mulf %37, %38 : vector<32x32xf32>
    %c0_19 = arith.constant 0 : index
    %c0_20 = arith.constant 0 : index
    %40 = vector.load %arg2[%c0_19, %c0_20] : memref<32x32xf32, #tpu.memory_space<vmem>>, vector<32x32xf32>
    %41 = arith.addf %39, %40 : vector<32x32xf32>
    %cst_21 = arith.constant dense<0xFF800000> : vector<32xf32>
    %42 = vector.multi_reduction <maximumf>, %41, %cst_21 [1] : vector<32x32xf32> to vector<32xf32>
    %43 = vector.shape_cast %42 : vector<32xf32> to vector<32x1xf32>
    %44 = vector.broadcast %43 : vector<32x1xf32> to vector<32x32xf32>
    %45 = arith.subf %41, %44 : vector<32x32xf32>
    %46 = math.exp %45 : vector<32x32xf32>
    %cst_22 = arith.constant dense<0.000000e+00> : vector<32xf32>
    %47 = vector.multi_reduction <add>, %46, %cst_22 [1] : vector<32x32xf32> to vector<32xf32>
    %48 = vector.shape_cast %47 : vector<32xf32> to vector<32x1xf32>
    %49 = arith.truncf %46 : vector<32x32xf32> to vector<32x32xbf16>
    %cst_23 = arith.constant dense<0.000000e+00> : vector<32x16xf32>
    %50 = tpu.matmul %49, %36, %cst_23 {dimension_numbers = #tpu.dot_dimension_numbers<[1], [0], [0], [1], [0, 0, 1, 1], [], []>} : vector<32x32xbf16>, vector<32x16xbf16>, vector<32x16xf32> -> vector<32x16xf32>
    %51 = vector.broadcast %48 : vector<32x1xf32> to vector<32x16xf32>
    %52 = arith.divf %50, %51 : vector<32x16xf32>
    %53 = arith.truncf %52 : vector<32x16xf32> to vector<32x16xbf16>
    %54 = vector.extract_strided_slice %9 {offsets = [16, 0], sizes = [16, 32], strides = [1, 1]} : vector<32x32xbf16> to vector<16x32xbf16>
    %cst_24 = arith.constant dense<0.000000e+00> : vector<32x32xf32>
    %55 = tpu.matmul %53, %54, %cst_24 {dimension_numbers = #tpu.dot_dimension_numbers<[1], [0], [0], [1], [0, 0, 1, 1], [], []>} : vector<32x16xbf16>, vector<16x32xbf16>, vector<32x32xf32> -> vector<32x32xf32>
    %56 = arith.addf %33, %55 : vector<32x32xf32>
    %c0_25 = arith.constant 0 : index
    %c0_26 = arith.constant 0 : index
    %57 = vector.load %arg6[%c0_25, %c0_26] : memref<1x32xf32, #tpu.memory_space<vmem>>, vector<1x32xf32>
    %58 = vector.broadcast %57 : vector<1x32xf32> to vector<32x32xf32>
    %59 = arith.addf %56, %58 : vector<32x32xf32>
    %60 = arith.addf %1, %59 : vector<32x32xf32>
    %cst_27 = arith.constant dense<0.000000e+00> : vector<32xf32>
    %61 = vector.multi_reduction <add>, %60, %cst_27 [1] : vector<32x32xf32> to vector<32xf32>
    %62 = vector.shape_cast %61 : vector<32xf32> to vector<32x1xf32>
    %cst_28 = arith.constant 3.200000e+01 : f32
    %63 = vector.broadcast %cst_28 : f32 to vector<32x1xf32>
    %64 = arith.divf %62, %63 : vector<32x1xf32>
    %65 = vector.broadcast %64 : vector<32x1xf32> to vector<32x32xf32>
    %66 = arith.subf %60, %65 : vector<32x32xf32>
    %67 = arith.mulf %66, %66 : vector<32x32xf32>
    %cst_29 = arith.constant dense<0.000000e+00> : vector<32xf32>
    %68 = vector.multi_reduction <add>, %67, %cst_29 [1] : vector<32x32xf32> to vector<32xf32>
    %69 = vector.shape_cast %68 : vector<32xf32> to vector<32x1xf32>
    %cst_30 = arith.constant 3.200000e+01 : f32
    %70 = vector.broadcast %cst_30 : f32 to vector<32x1xf32>
    %71 = arith.divf %69, %70 : vector<32x1xf32>
    %cst_31 = arith.constant 9.99999997E-7 : f32
    %72 = vector.broadcast %cst_31 : f32 to vector<32x1xf32>
    %73 = arith.addf %71, %72 : vector<32x1xf32>
    %74 = math.rsqrt %73 : vector<32x1xf32>
    %75 = vector.broadcast %74 : vector<32x1xf32> to vector<32x32xf32>
    %76 = arith.mulf %66, %75 : vector<32x32xf32>
    %c0_32 = arith.constant 0 : index
    %c0_33 = arith.constant 0 : index
    %77 = vector.load %arg7[%c0_32, %c0_33] : memref<1x32xf32, #tpu.memory_space<vmem>>, vector<1x32xf32>
    %78 = vector.broadcast %77 : vector<1x32xf32> to vector<32x32xf32>
    %79 = arith.mulf %76, %78 : vector<32x32xf32>
    %c0_34 = arith.constant 0 : index
    %c0_35 = arith.constant 0 : index
    %80 = vector.load %arg8[%c0_34, %c0_35] : memref<1x32xf32, #tpu.memory_space<vmem>>, vector<1x32xf32>
    %81 = vector.broadcast %80 : vector<1x32xf32> to vector<32x32xf32>
    %82 = arith.addf %79, %81 : vector<32x32xf32>
    %83 = arith.truncf %82 : vector<32x32xf32> to vector<32x32xbf16>
    %c0_36 = arith.constant 0 : index
    %c0_37 = arith.constant 0 : index
    %84 = vector.load %arg9[%c0_36, %c0_37] : memref<32x128xbf16, #tpu.memory_space<vmem>>, vector<32x128xbf16>
    %cst_38 = arith.constant dense<0.000000e+00> : vector<32x128xf32>
    %85 = tpu.matmul %83, %84, %cst_38 {dimension_numbers = #tpu.dot_dimension_numbers<[1], [0], [0], [1], [0, 0, 1, 1], [], []>} : vector<32x32xbf16>, vector<32x128xbf16>, vector<32x128xf32> -> vector<32x128xf32>
    %c0_39 = arith.constant 0 : index
    %c0_40 = arith.constant 0 : index
    %86 = vector.load %arg10[%c0_39, %c0_40] : memref<1x128xf32, #tpu.memory_space<vmem>>, vector<1x128xf32>
    %87 = vector.broadcast %86 : vector<1x128xf32> to vector<32x128xf32>
    %88 = arith.addf %85, %87 : vector<32x128xf32>
    %cst_41 = arith.constant 5.000000e-01 : f32
    %89 = vector.broadcast %cst_41 : f32 to vector<32x128xf32>
    %90 = arith.mulf %89, %88 : vector<32x128xf32>
    %91 = arith.mulf %88, %88 : vector<32x128xf32>
    %92 = arith.mulf %91, %88 : vector<32x128xf32>
    %cst_42 = arith.constant 4.471500e-02 : f32
    %93 = vector.broadcast %cst_42 : f32 to vector<32x128xf32>
    %94 = arith.mulf %93, %92 : vector<32x128xf32>
    %95 = arith.addf %88, %94 : vector<32x128xf32>
    %cst_43 = arith.constant 0.797884583 : f32
    %96 = vector.broadcast %cst_43 : f32 to vector<32x128xf32>
    %97 = arith.mulf %96, %95 : vector<32x128xf32>
    %98 = math.tanh %97 : vector<32x128xf32>
    %cst_44 = arith.constant 1.000000e+00 : f32
    %99 = vector.broadcast %cst_44 : f32 to vector<32x128xf32>
    %100 = arith.addf %99, %98 : vector<32x128xf32>
    %101 = arith.mulf %90, %100 : vector<32x128xf32>
    %102 = arith.truncf %101 : vector<32x128xf32> to vector<32x128xbf16>
    %c0_45 = arith.constant 0 : index
    %c0_46 = arith.constant 0 : index
    %103 = vector.load %arg11[%c0_45, %c0_46] : memref<128x32xbf16, #tpu.memory_space<vmem>>, vector<128x32xbf16>
    %cst_47 = arith.constant dense<0.000000e+00> : vector<32x32xf32>
    %104 = tpu.matmul %102, %103, %cst_47 {dimension_numbers = #tpu.dot_dimension_numbers<[1], [0], [0], [1], [0, 0, 1, 1], [], []>} : vector<32x128xbf16>, vector<128x32xbf16>, vector<32x32xf32> -> vector<32x32xf32>
    %c0_48 = arith.constant 0 : index
    %c0_49 = arith.constant 0 : index
    %105 = vector.load %arg12[%c0_48, %c0_49] : memref<1x32xf32, #tpu.memory_space<vmem>>, vector<1x32xf32>
    %106 = vector.broadcast %105 : vector<1x32xf32> to vector<32x32xf32>
    %107 = arith.addf %104, %106 : vector<32x32xf32>
    %108 = arith.addf %82, %107 : vector<32x32xf32>
    %cst_50 = arith.constant dense<0.000000e+00> : vector<32xf32>
    %109 = vector.multi_reduction <add>, %108, %cst_50 [1] : vector<32x32xf32> to vector<32xf32>
    %110 = vector.shape_cast %109 : vector<32xf32> to vector<32x1xf32>
    %cst_51 = arith.constant 3.200000e+01 : f32
    %111 = vector.broadcast %cst_51 : f32 to vector<32x1xf32>
    %112 = arith.divf %110, %111 : vector<32x1xf32>
    %113 = vector.broadcast %112 : vector<32x1xf32> to vector<32x32xf32>
    %114 = arith.subf %108, %113 : vector<32x32xf32>
    %115 = arith.mulf %114, %114 : vector<32x32xf32>
    %cst_52 = arith.constant dense<0.000000e+00> : vector<32xf32>
    %116 = vector.multi_reduction <add>, %115, %cst_52 [1] : vector<32x32xf32> to vector<32xf32>
    %117 = vector.shape_cast %116 : vector<32xf32> to vector<32x1xf32>
    %cst_53 = arith.constant 3.200000e+01 : f32
    %118 = vector.broadcast %cst_53 : f32 to vector<32x1xf32>
    %119 = arith.divf %117, %118 : vector<32x1xf32>
    %cst_54 = arith.constant 9.99999997E-7 : f32
    %120 = vector.broadcast %cst_54 : f32 to vector<32x1xf32>
    %121 = arith.addf %119, %120 : vector<32x1xf32>
    %122 = math.rsqrt %121 : vector<32x1xf32>
    %123 = vector.broadcast %122 : vector<32x1xf32> to vector<32x32xf32>
    %124 = arith.mulf %114, %123 : vector<32x32xf32>
    %c0_55 = arith.constant 0 : index
    %c0_56 = arith.constant 0 : index
    %125 = vector.load %arg13[%c0_55, %c0_56] : memref<1x32xf32, #tpu.memory_space<vmem>>, vector<1x32xf32>
    %126 = vector.broadcast %125 : vector<1x32xf32> to vector<32x32xf32>
    %127 = arith.mulf %124, %126 : vector<32x32xf32>
    %c0_57 = arith.constant 0 : index
    %c0_58 = arith.constant 0 : index
    %128 = vector.load %arg14[%c0_57, %c0_58] : memref<1x32xf32, #tpu.memory_space<vmem>>, vector<1x32xf32>
    %129 = vector.broadcast %128 : vector<1x32xf32> to vector<32x32xf32>
    %130 = arith.addf %127, %129 : vector<32x32xf32>
    %c0_59 = arith.constant 0 : index
    %c0_60 = arith.constant 0 : index
    %131 = vector.load %arg16[%c0_59, %c0_60] : memref<5x8xf32, #tpu.memory_space<vmem>>, vector<5x8xf32>
    %cst_61 = arith.constant dense<0.000000e+00> : vector<32xf32>
    %132 = vector.multi_reduction <add>, %130, %cst_61 [0] : vector<32x32xf32> to vector<32xf32>
    %133 = vector.shape_cast %132 : vector<32xf32> to vector<1x32xf32>
    %cst_62 = arith.constant 3.200000e+01 : f32
    %134 = vector.broadcast %cst_62 : f32 to vector<1x32xf32>
    %135 = arith.divf %133, %134 : vector<1x32xf32>
    %c0_63 = arith.constant 0 : index
    %c0_64 = arith.constant 0 : index
    %136 = vector.load %arg15[%c0_63, %c0_64] : memref<32x8xf32, #tpu.memory_space<vmem>>, vector<32x8xf32>
    %cst_65 = arith.constant dense<0.000000e+00> : vector<1x8xf32>
    %137 = tpu.matmul %135, %136, %cst_65 {dimension_numbers = #tpu.dot_dimension_numbers<[1], [0], [0], [1], [0, 0, 1, 1], [], []>} : vector<1x32xf32>, vector<32x8xf32>, vector<1x8xf32> -> vector<1x8xf32>
    %138 = vector.extract_strided_slice %131 {offsets = [0, 0], sizes = [1, 8], strides = [1, 1]} : vector<5x8xf32> to vector<1x8xf32>
    %139 = arith.mulf %137, %138 : vector<1x8xf32>
    %140 = vector.extract_strided_slice %131 {offsets = [1, 0], sizes = [1, 8], strides = [1, 1]} : vector<5x8xf32> to vector<1x8xf32>
    %141 = arith.addf %139, %140 : vector<1x8xf32>
    %cst_66 = arith.constant 5.000000e-01 : f32
    %142 = vector.broadcast %cst_66 : f32 to vector<1x8xf32>
    %143 = arith.mulf %142, %141 : vector<1x8xf32>
    %144 = arith.mulf %141, %141 : vector<1x8xf32>
    %145 = arith.mulf %144, %141 : vector<1x8xf32>
    %cst_67 = arith.constant 4.471500e-02 : f32
    %146 = vector.broadcast %cst_67 : f32 to vector<1x8xf32>
    %147 = arith.mulf %146, %145 : vector<1x8xf32>
    %148 = arith.addf %141, %147 : vector<1x8xf32>
    %cst_68 = arith.constant 0.797884583 : f32
    %149 = vector.broadcast %cst_68 : f32 to vector<1x8xf32>
    %150 = arith.mulf %149, %148 : vector<1x8xf32>
    %151 = math.tanh %150 : vector<1x8xf32>
    %cst_69 = arith.constant 1.000000e+00 : f32
    %152 = vector.broadcast %cst_69 : f32 to vector<1x8xf32>
    %153 = arith.addf %152, %151 : vector<1x8xf32>
    %154 = arith.mulf %143, %153 : vector<1x8xf32>
    %155 = vector.extract_strided_slice %131 {offsets = [2, 0], sizes = [1, 8], strides = [1, 1]} : vector<5x8xf32> to vector<1x8xf32>
    %156 = arith.mulf %154, %155 : vector<1x8xf32>
    %157 = vector.extract_strided_slice %131 {offsets = [3, 0], sizes = [1, 8], strides = [1, 1]} : vector<5x8xf32> to vector<1x8xf32>
    %158 = arith.mulf %156, %157 : vector<1x8xf32>
    %159 = vector.extract_strided_slice %131 {offsets = [4, 0], sizes = [1, 8], strides = [1, 1]} : vector<5x8xf32> to vector<1x8xf32>
    %160 = arith.addf %158, %159 : vector<1x8xf32>
    %cst_70 = arith.constant 5.000000e-01 : f32
    %161 = vector.broadcast %cst_70 : f32 to vector<1x8xf32>
    %162 = arith.mulf %161, %160 : vector<1x8xf32>
    %163 = arith.mulf %160, %160 : vector<1x8xf32>
    %164 = arith.mulf %163, %160 : vector<1x8xf32>
    %cst_71 = arith.constant 4.471500e-02 : f32
    %165 = vector.broadcast %cst_71 : f32 to vector<1x8xf32>
    %166 = arith.mulf %165, %164 : vector<1x8xf32>
    %167 = arith.addf %160, %166 : vector<1x8xf32>
    %cst_72 = arith.constant 0.797884583 : f32
    %168 = vector.broadcast %cst_72 : f32 to vector<1x8xf32>
    %169 = arith.mulf %168, %167 : vector<1x8xf32>
    %170 = math.tanh %169 : vector<1x8xf32>
    %cst_73 = arith.constant 1.000000e+00 : f32
    %171 = vector.broadcast %cst_73 : f32 to vector<1x8xf32>
    %172 = arith.addf %171, %170 : vector<1x8xf32>
    %173 = arith.mulf %162, %172 : vector<1x8xf32>
    %c0_74 = arith.constant 0 : index
    %c0_75 = arith.constant 0 : index
    %174 = vector.load %arg17[%c0_74, %c0_75] : memref<8x32xf32, #tpu.memory_space<vmem>>, vector<8x32xf32>
    %cst_76 = arith.constant dense<0.000000e+00> : vector<1x32xf32>
    %175 = tpu.matmul %173, %174, %cst_76 {dimension_numbers = #tpu.dot_dimension_numbers<[1], [0], [0], [1], [0, 0, 1, 1], [], []>} : vector<1x8xf32>, vector<8x32xf32>, vector<1x32xf32> -> vector<1x32xf32>
    %c0_77 = arith.constant 0 : index
    %c0_78 = arith.constant 0 : index
    %176 = vector.load %arg18[%c0_77, %c0_78] : memref<1x32xf32, #tpu.memory_space<vmem>>, vector<1x32xf32>
    %177 = arith.addf %175, %176 : vector<1x32xf32>
    %cst_79 = arith.constant 0.000000e+00 : f32
    %178 = vector.broadcast %cst_79 : f32 to vector<1x32xf32>
    %179 = arith.subf %178, %177 : vector<1x32xf32>
    %180 = math.exp %179 : vector<1x32xf32>
    %cst_80 = arith.constant 1.000000e+00 : f32
    %181 = vector.broadcast %cst_80 : f32 to vector<1x32xf32>
    %182 = arith.addf %181, %180 : vector<1x32xf32>
    %cst_81 = arith.constant 1.000000e+00 : f32
    %183 = vector.broadcast %cst_81 : f32 to vector<1x32xf32>
    %184 = arith.divf %183, %182 : vector<1x32xf32>
    %185 = vector.broadcast %184 : vector<1x32xf32> to vector<32x32xf32>
    %186 = arith.mulf %130, %185 : vector<32x32xf32>
    %c0_82 = arith.constant 0 : index
    %c0_83 = arith.constant 0 : index
    %c0_84 = arith.constant 0 : index
    %187 = vector.load %arg19[%c0_82, %c0_83, %c0_84] : memref<1x32x32xf32, #tpu.memory_space<vmem>>, vector<1x32x32xf32>
    %188 = vector.shape_cast %187 : vector<1x32x32xf32> to vector<32x32xf32>
    %189 = vector.shape_cast %186 : vector<32x32xf32> to vector<1x32x32xf32>
    tpu.vector_store %arg19[%c0_82, %c0_83, %c0_84], %189 {strides = array<i32>} : memref<1x32x32xf32, #tpu.memory_space<vmem>>, vector<1x32x32xf32>,
    return
  }
  func.func @transform_0(%arg0: i32) -> (i32, i32, i32) {
    %c0_i32 = arith.constant 0 : i32
    %c0_i32_0 = arith.constant 0 : i32
    %c0_i32_1 = arith.constant 0 : i32
    return %arg0, %c0_i32, %c0_i32_0 : i32, i32, i32
  }
  func.func @transform_1(%arg0: i32) -> (i32, i32) {
    %c0_i32 = arith.constant 0 : i32
    %c0_i32_0 = arith.constant 0 : i32
    %c0_i32_1 = arith.constant 0 : i32
    return %c0_i32, %c0_i32_0 : i32, i32
  }
  func.func @transform_2(%arg0: i32) -> (i32, i32) {
    %c0_i32 = arith.constant 0 : i32
    %c0_i32_0 = arith.constant 0 : i32
    %c0_i32_1 = arith.constant 0 : i32
    return %c0_i32, %c0_i32_0 : i32, i32
  }
  func.func @transform_3(%arg0: i32) -> (i32, i32) {
    %c0_i32 = arith.constant 0 : i32
    %c0_i32_0 = arith.constant 0 : i32
    %c0_i32_1 = arith.constant 0 : i32
    return %c0_i32, %c0_i32_0 : i32, i32
  }
  func.func @transform_4(%arg0: i32) -> (i32, i32) {
    %c0_i32 = arith.constant 0 : i32
    %c0_i32_0 = arith.constant 0 : i32
    %c0_i32_1 = arith.constant 0 : i32
    return %c0_i32, %c0_i32_0 : i32, i32
  }
  func.func @transform_5(%arg0: i32) -> (i32, i32) {
    %c0_i32 = arith.constant 0 : i32
    %c0_i32_0 = arith.constant 0 : i32
    %c0_i32_1 = arith.constant 0 : i32
    return %c0_i32, %c0_i32_0 : i32, i32
  }
  func.func @transform_6(%arg0: i32) -> (i32, i32) {
    %c0_i32 = arith.constant 0 : i32
    %c0_i32_0 = arith.constant 0 : i32
    %c0_i32_1 = arith.constant 0 : i32
    return %c0_i32, %c0_i32_0 : i32, i32
  }
  func.func @transform_7(%arg0: i32) -> (i32, i32) {
    %c0_i32 = arith.constant 0 : i32
    %c0_i32_0 = arith.constant 0 : i32
    %c0_i32_1 = arith.constant 0 : i32
    return %c0_i32, %c0_i32_0 : i32, i32
  }
  func.func @transform_8(%arg0: i32) -> (i32, i32) {
    %c0_i32 = arith.constant 0 : i32
    %c0_i32_0 = arith.constant 0 : i32
    %c0_i32_1 = arith.constant 0 : i32
    return %c0_i32, %c0_i32_0 : i32, i32
  }
  func.func @transform_9(%arg0: i32) -> (i32, i32) {
    %c0_i32 = arith.constant 0 : i32
    %c0_i32_0 = arith.constant 0 : i32
    %c0_i32_1 = arith.constant 0 : i32
    return %c0_i32, %c0_i32_0 : i32, i32
  }
  func.func @transform_10(%arg0: i32) -> (i32, i32) {
    %c0_i32 = arith.constant 0 : i32
    %c0_i32_0 = arith.constant 0 : i32
    %c0_i32_1 = arith.constant 0 : i32
    return %c0_i32, %c0_i32_0 : i32, i32
  }
  func.func @transform_11(%arg0: i32) -> (i32, i32) {
    %c0_i32 = arith.constant 0 : i32
    %c0_i32_0 = arith.constant 0 : i32
    %c0_i32_1 = arith.constant 0 : i32
    return %c0_i32, %c0_i32_0 : i32, i32
  }
  func.func @transform_12(%arg0: i32) -> (i32, i32) {
    %c0_i32 = arith.constant 0 : i32
    %c0_i32_0 = arith.constant 0 : i32
    %c0_i32_1 = arith.constant 0 : i32
    return %c0_i32, %c0_i32_0 : i32, i32
  }
  func.func @transform_13(%arg0: i32) -> (i32, i32) {
    %c0_i32 = arith.constant 0 : i32
    %c0_i32_0 = arith.constant 0 : i32
    %c0_i32_1 = arith.constant 0 : i32
    return %c0_i32, %c0_i32_0 : i32, i32
  }
  func.func @transform_14(%arg0: i32) -> (i32, i32) {
    %c0_i32 = arith.constant 0 : i32
    %c0_i32_0 = arith.constant 0 : i32
    %c0_i32_1 = arith.constant 0 : i32
    return %c0_i32, %c0_i32_0 : i32, i32
  }
  func.func @transform_15(%arg0: i32) -> (i32, i32) {
    %c0_i32 = arith.constant 0 : i32
    %c0_i32_0 = arith.constant 0 : i32
    %c0_i32_1 = arith.constant 0 : i32
    return %c0_i32, %c0_i32_0 : i32, i32
  }
  func.func @transform_16(%arg0: i32) -> (i32, i32) {
    %c0_i32 = arith.constant 0 : i32
    %c0_i32_0 = arith.constant 0 : i32
    %c0_i32_1 = arith.constant 0 : i32
    return %c0_i32, %c0_i32_0 : i32, i32
  }
  func.func @transform_17(%arg0: i32) -> (i32, i32) {
    %c0_i32 = arith.constant 0 : i32
    %c0_i32_0 = arith.constant 0 : i32
    %c0_i32_1 = arith.constant 0 : i32
    return %c0_i32, %c0_i32_0 : i32, i32
  }
  func.func @transform_18(%arg0: i32) -> (i32, i32, i32) {
    %c0_i32 = arith.constant 0 : i32
    %c0_i32_0 = arith.constant 0 : i32
    %c0_i32_1 = arith.constant 0 : i32
    return %arg0, %c0_i32, %c0_i32_0 : i32, i32, i32
  }
}

module attributes {stable_mosaic.version = 11 : i64} {
  func.func @kernel(%arg0: i32, %arg1: i32, %arg2: i32, %arg3: memref<64x288xbf16, #tpu.memory_space<vmem>>, %arg4: memref<288x64xbf16, #tpu.memory_space<vmem>>, %arg5: memref<1x64xf32, #tpu.memory_space<vmem>>, %arg6: memref<64x64xf32, #tpu.memory_space<vmem>>) attributes {dimension_semantics = [#tpu.dimension_semantics<parallel>, #tpu.dimension_semantics<parallel>, #tpu.dimension_semantics<arbitrary>], iteration_bounds = array<i64: 1, 1, 1>, scalar_prefetch = 0 : i64, scratch_operands = 0 : i64, tpu.core_type = #tpu.core_type<tc>, window_params = [{transform_indices = @transform_0, window_bounds = array<i64: 64, 288>}, {transform_indices = @transform_1, window_bounds = array<i64: 288, 64>}, {transform_indices = @transform_2, window_bounds = array<i64: 1, 64>}, {transform_indices = @transform_3, window_bounds = array<i64: 64, 64>}]} {
    %c0 = arith.constant 0 : index
    %c0_0 = arith.constant 0 : index
    %0 = vector.load %arg3[%c0, %c0_0] : memref<64x288xbf16, #tpu.memory_space<vmem>>, vector<64x288xbf16>
    %c0_1 = arith.constant 0 : index
    %c0_2 = arith.constant 0 : index
    %1 = vector.load %arg4[%c0_1, %c0_2] : memref<288x64xbf16, #tpu.memory_space<vmem>>, vector<288x64xbf16>
    %cst = arith.constant dense<0.000000e+00> : vector<64x64xf32>
    %2 = tpu.matmul %0, %1, %cst {dimension_numbers = #tpu.dot_dimension_numbers<[1], [0], [0], [1], [0, 0, 1, 1], [], []>} : vector<64x288xbf16>, vector<288x64xbf16>, vector<64x64xf32> -> vector<64x64xf32>
    %c0_3 = arith.constant 0 : index
    %c0_4 = arith.constant 0 : index
    %3 = vector.load %arg5[%c0_3, %c0_4] : memref<1x64xf32, #tpu.memory_space<vmem>>, vector<1x64xf32>
    %4 = vector.broadcast %3 : vector<1x64xf32> to vector<64x64xf32>
    %5 = arith.addf %2, %4 : vector<64x64xf32>
    %c0_5 = arith.constant 0 : index
    %c0_6 = arith.constant 0 : index
    %6 = vector.load %arg6[%c0_5, %c0_6] : memref<64x64xf32, #tpu.memory_space<vmem>>, vector<64x64xf32>
    tpu.vector_store %arg6[%c0_5, %c0_6], %5 {strides = array<i32>} : memref<64x64xf32, #tpu.memory_space<vmem>>, vector<64x64xf32>,
    return
  }
  func.func @transform_0(%arg0: i32, %arg1: i32, %arg2: i32) -> (i32, i32) {
    %c0_i32 = arith.constant 0 : i32
    return %arg0, %arg2 : i32, i32
  }
  func.func @transform_1(%arg0: i32, %arg1: i32, %arg2: i32) -> (i32, i32) {
    %c0_i32 = arith.constant 0 : i32
    return %arg2, %arg1 : i32, i32
  }
  func.func @transform_2(%arg0: i32, %arg1: i32, %arg2: i32) -> (i32, i32) {
    %c0_i32 = arith.constant 0 : i32
    %c0_i32_0 = arith.constant 0 : i32
    return %c0_i32, %arg1 : i32, i32
  }
  func.func @transform_3(%arg0: i32, %arg1: i32, %arg2: i32) -> (i32, i32) {
    %c0_i32 = arith.constant 0 : i32
    return %arg0, %arg1 : i32, i32
  }
}

module attributes {stable_mosaic.version = 11 : i64} {
  func.func @kernel(%arg0: i32, %arg1: memref<64x64xf32, #tpu.memory_space<vmem>>, %arg2: memref<1x64xf32, #tpu.memory_space<vmem>>, %arg3: memref<1x64xf32, #tpu.memory_space<vmem>>, %arg4: memref<64x64xf32, #tpu.memory_space<vmem>>) attributes {dimension_semantics = [#tpu.dimension_semantics<parallel>], iteration_bounds = array<i64: 1>, scalar_prefetch = 0 : i64, scratch_operands = 0 : i64, tpu.core_type = #tpu.core_type<tc>, window_params = [{transform_indices = @transform_0, window_bounds = array<i64: 64, 64>}, {pipeline_mode = #tpu.pipeline_mode<synchronous>, transform_indices = @transform_1, window_bounds = array<i64: 1, 64>}, {pipeline_mode = #tpu.pipeline_mode<synchronous>, transform_indices = @transform_2, window_bounds = array<i64: 1, 64>}, {transform_indices = @transform_3, window_bounds = array<i64: 64, 64>}]} {
    %c0 = arith.constant 0 : index
    %c0_0 = arith.constant 0 : index
    %0 = vector.load %arg1[%c0, %c0_0] : memref<64x64xf32, #tpu.memory_space<vmem>>, vector<64x64xf32>
    %cst = arith.constant dense<0.000000e+00> : vector<64xf32>
    %1 = vector.multi_reduction <add>, %0, %cst [1] : vector<64x64xf32> to vector<64xf32>
    %2 = vector.shape_cast %1 : vector<64xf32> to vector<64x1xf32>
    %cst_1 = arith.constant 6.400000e+01 : f32
    %3 = vector.broadcast %cst_1 : f32 to vector<64x1xf32>
    %4 = arith.divf %2, %3 : vector<64x1xf32>
    %5 = vector.broadcast %4 : vector<64x1xf32> to vector<64x64xf32>
    %6 = arith.subf %0, %5 : vector<64x64xf32>
    %7 = arith.mulf %6, %6 : vector<64x64xf32>
    %cst_2 = arith.constant dense<0.000000e+00> : vector<64xf32>
    %8 = vector.multi_reduction <add>, %7, %cst_2 [1] : vector<64x64xf32> to vector<64xf32>
    %9 = vector.shape_cast %8 : vector<64xf32> to vector<64x1xf32>
    %cst_3 = arith.constant 6.400000e+01 : f32
    %10 = vector.broadcast %cst_3 : f32 to vector<64x1xf32>
    %11 = arith.divf %9, %10 : vector<64x1xf32>
    %cst_4 = arith.constant 9.99999997E-7 : f32
    %12 = vector.broadcast %cst_4 : f32 to vector<64x1xf32>
    %13 = arith.addf %11, %12 : vector<64x1xf32>
    %14 = math.rsqrt %13 : vector<64x1xf32>
    %15 = vector.broadcast %14 : vector<64x1xf32> to vector<64x64xf32>
    %16 = arith.mulf %6, %15 : vector<64x64xf32>
    %c0_5 = arith.constant 0 : index
    %c0_6 = arith.constant 0 : index
    %17 = vector.load %arg2[%c0_5, %c0_6] : memref<1x64xf32, #tpu.memory_space<vmem>>, vector<1x64xf32>
    %18 = vector.broadcast %17 : vector<1x64xf32> to vector<64x64xf32>
    %19 = arith.mulf %16, %18 : vector<64x64xf32>
    %c0_7 = arith.constant 0 : index
    %c0_8 = arith.constant 0 : index
    %20 = vector.load %arg3[%c0_7, %c0_8] : memref<1x64xf32, #tpu.memory_space<vmem>>, vector<1x64xf32>
    %21 = vector.broadcast %20 : vector<1x64xf32> to vector<64x64xf32>
    %22 = arith.addf %19, %21 : vector<64x64xf32>
    %c0_9 = arith.constant 0 : index
    %c0_10 = arith.constant 0 : index
    %23 = vector.load %arg4[%c0_9, %c0_10] : memref<64x64xf32, #tpu.memory_space<vmem>>, vector<64x64xf32>
    tpu.vector_store %arg4[%c0_9, %c0_10], %22 {strides = array<i32>} : memref<64x64xf32, #tpu.memory_space<vmem>>, vector<64x64xf32>,
    return
  }
  func.func @transform_0(%arg0: i32) -> (i32, i32) {
    %c0_i32 = arith.constant 0 : i32
    %c0_i32_0 = arith.constant 0 : i32
    return %arg0, %c0_i32 : i32, i32
  }
  func.func @transform_1(%arg0: i32) -> (i32, i32) {
    %c0_i32 = arith.constant 0 : i32
    %c0_i32_0 = arith.constant 0 : i32
    %c0_i32_1 = arith.constant 0 : i32
    return %c0_i32, %c0_i32_0 : i32, i32
  }
  func.func @transform_2(%arg0: i32) -> (i32, i32) {
    %c0_i32 = arith.constant 0 : i32
    %c0_i32_0 = arith.constant 0 : i32
    %c0_i32_1 = arith.constant 0 : i32
    return %c0_i32, %c0_i32_0 : i32, i32
  }
  func.func @transform_3(%arg0: i32) -> (i32, i32) {
    %c0_i32 = arith.constant 0 : i32
    %c0_i32_0 = arith.constant 0 : i32
    return %arg0, %c0_i32 : i32, i32
  }
}

module attributes {stable_mosaic.version = 11 : i64} {
  func.func @kernel(%arg0: i32, %arg1: memref<1x32x64xf32, #tpu.memory_space<vmem>>, %arg2: memref<32x32xf32, #tpu.memory_space<vmem>>, %arg3: memref<64x192xbf16, #tpu.memory_space<vmem>>, %arg4: memref<1x192xf32, #tpu.memory_space<vmem>>, %arg5: memref<64x64xbf16, #tpu.memory_space<vmem>>, %arg6: memref<1x64xf32, #tpu.memory_space<vmem>>, %arg7: memref<1x64xf32, #tpu.memory_space<vmem>>, %arg8: memref<1x64xf32, #tpu.memory_space<vmem>>, %arg9: memref<64x256xbf16, #tpu.memory_space<vmem>>, %arg10: memref<1x256xf32, #tpu.memory_space<vmem>>, %arg11: memref<256x64xbf16, #tpu.memory_space<vmem>>, %arg12: memref<1x64xf32, #tpu.memory_space<vmem>>, %arg13: memref<1x64xf32, #tpu.memory_space<vmem>>, %arg14: memref<1x64xf32, #tpu.memory_space<vmem>>, %arg15: memref<64x16xf32, #tpu.memory_space<vmem>>, %arg16: memref<5x16xf32, #tpu.memory_space<vmem>>, %arg17: memref<16x64xf32, #tpu.memory_space<vmem>>, %arg18: memref<1x64xf32, #tpu.memory_space<vmem>>, %arg19: memref<1x32x64xf32, #tpu.memory_space<vmem>>) attributes {dimension_semantics = [#tpu.dimension_semantics<parallel>], iteration_bounds = array<i64: 2>, scalar_prefetch = 0 : i64, scratch_operands = 0 : i64, tpu.core_type = #tpu.core_type<tc>, window_params = [{transform_indices = @transform_0, window_bounds = array<i64: 1, 32, 64>}, {pipeline_mode = #tpu.pipeline_mode<synchronous>, transform_indices = @transform_1, window_bounds = array<i64: 32, 32>}, {pipeline_mode = #tpu.pipeline_mode<synchronous>, transform_indices = @transform_2, window_bounds = array<i64: 64, 192>}, {pipeline_mode = #tpu.pipeline_mode<synchronous>, transform_indices = @transform_3, window_bounds = array<i64: 1, 192>}, {pipeline_mode = #tpu.pipeline_mode<synchronous>, transform_indices = @transform_4, window_bounds = array<i64: 64, 64>}, {pipeline_mode = #tpu.pipeline_mode<synchronous>, transform_indices = @transform_5, window_bounds = array<i64: 1, 64>}, {pipeline_mode = #tpu.pipeline_mode<synchronous>, transform_indices = @transform_6, window_bounds = array<i64: 1, 64>}, {pipeline_mode = #tpu.pipeline_mode<synchronous>, transform_indices = @transform_7, window_bounds = array<i64: 1, 64>}, {pipeline_mode = #tpu.pipeline_mode<synchronous>, transform_indices = @transform_8, window_bounds = array<i64: 64, 256>}, {pipeline_mode = #tpu.pipeline_mode<synchronous>, transform_indices = @transform_9, window_bounds = array<i64: 1, 256>}, {pipeline_mode = #tpu.pipeline_mode<synchronous>, transform_indices = @transform_10, window_bounds = array<i64: 256, 64>}, {pipeline_mode = #tpu.pipeline_mode<synchronous>, transform_indices = @transform_11, window_bounds = array<i64: 1, 64>}, {pipeline_mode = #tpu.pipeline_mode<synchronous>, transform_indices = @transform_12, window_bounds = array<i64: 1, 64>}, {pipeline_mode = #tpu.pipeline_mode<synchronous>, transform_indices = @transform_13, window_bounds = array<i64: 1, 64>}, {pipeline_mode = #tpu.pipeline_mode<synchronous>, transform_indices = @transform_14, window_bounds = array<i64: 64, 16>}, {pipeline_mode = #tpu.pipeline_mode<synchronous>, transform_indices = @transform_15, window_bounds = array<i64: 5, 16>}, {pipeline_mode = #tpu.pipeline_mode<synchronous>, transform_indices = @transform_16, window_bounds = array<i64: 16, 64>}, {pipeline_mode = #tpu.pipeline_mode<synchronous>, transform_indices = @transform_17, window_bounds = array<i64: 1, 64>}, {transform_indices = @transform_18, window_bounds = array<i64: 1, 32, 64>}]} {
    %c0 = arith.constant 0 : index
    %c0_0 = arith.constant 0 : index
    %c0_1 = arith.constant 0 : index
    %0 = vector.load %arg1[%c0, %c0_0, %c0_1] : memref<1x32x64xf32, #tpu.memory_space<vmem>>, vector<1x32x64xf32>
    %1 = vector.shape_cast %0 : vector<1x32x64xf32> to vector<32x64xf32>
    %2 = arith.truncf %1 : vector<32x64xf32> to vector<32x64xbf16>
    %c0_2 = arith.constant 0 : index
    %c0_3 = arith.constant 0 : index
    %3 = vector.load %arg3[%c0_2, %c0_3] : memref<64x192xbf16, #tpu.memory_space<vmem>>, vector<64x192xbf16>
    %cst = arith.constant dense<0.000000e+00> : vector<32x192xf32>
    %4 = tpu.matmul %2, %3, %cst {dimension_numbers = #tpu.dot_dimension_numbers<[1], [0], [0], [1], [0, 0, 1, 1], [], []>} : vector<32x64xbf16>, vector<64x192xbf16>, vector<32x192xf32> -> vector<32x192xf32>
    %c0_4 = arith.constant 0 : index
    %c0_5 = arith.constant 0 : index
    %5 = vector.load %arg4[%c0_4, %c0_5] : memref<1x192xf32, #tpu.memory_space<vmem>>, vector<1x192xf32>
    %6 = vector.broadcast %5 : vector<1x192xf32> to vector<32x192xf32>
    %7 = arith.addf %4, %6 : vector<32x192xf32>
    %8 = arith.truncf %7 : vector<32x192xf32> to vector<32x192xbf16>
    %c0_6 = arith.constant 0 : index
    %c0_7 = arith.constant 0 : index
    %9 = vector.load %arg5[%c0_6, %c0_7] : memref<64x64xbf16, #tpu.memory_space<vmem>>, vector<64x64xbf16>
    %cst_8 = arith.constant 0.000000e+00 : f32
    %10 = vector.broadcast %cst_8 : f32 to vector<32x64xf32>
    %11 = vector.extract_strided_slice %8 {offsets = [0, 0], sizes = [32, 16], strides = [1, 1]} : vector<32x192xbf16> to vector<32x16xbf16>
    %12 = vector.extract_strided_slice %8 {offsets = [0, 64], sizes = [32, 16], strides = [1, 1]} : vector<32x192xbf16> to vector<32x16xbf16>
    %13 = vector.extract_strided_slice %8 {offsets = [0, 128], sizes = [32, 16], strides = [1, 1]} : vector<32x192xbf16> to vector<32x16xbf16>
    %cst_9 = arith.constant dense<0.000000e+00> : vector<32x32xf32>
    %14 = tpu.matmul %11, %12, %cst_9 {dimension_numbers = #tpu.dot_dimension_numbers<[1], [1], [0], [0], [0, 0, 1, 0], [], []>} : vector<32x16xbf16>, vector<32x16xbf16>, vector<32x32xf32> -> vector<32x32xf32>
    %cst_10 = arith.constant 2.500000e-01 : f32
    %15 = vector.broadcast %cst_10 : f32 to vector<32x32xf32>
    %16 = arith.mulf %14, %15 : vector<32x32xf32>
    %c0_11 = arith.constant 0 : index
    %c0_12 = arith.constant 0 : index
    %17 = vector.load %arg2[%c0_11, %c0_12] : memref<32x32xf32, #tpu.memory_space<vmem>>, vector<32x32xf32>
    %18 = arith.addf %16, %17 : vector<32x32xf32>
    %cst_13 = arith.constant dense<0xFF800000> : vector<32xf32>
    %19 = vector.multi_reduction <maximumf>, %18, %cst_13 [1] : vector<32x32xf32> to vector<32xf32>
    %20 = vector.shape_cast %19 : vector<32xf32> to vector<32x1xf32>
    %21 = vector.broadcast %20 : vector<32x1xf32> to vector<32x32xf32>
    %22 = arith.subf %18, %21 : vector<32x32xf32>
    %23 = math.exp %22 : vector<32x32xf32>
    %cst_14 = arith.constant dense<0.000000e+00> : vector<32xf32>
    %24 = vector.multi_reduction <add>, %23, %cst_14 [1] : vector<32x32xf32> to vector<32xf32>
    %25 = vector.shape_cast %24 : vector<32xf32> to vector<32x1xf32>
    %26 = arith.truncf %23 : vector<32x32xf32> to vector<32x32xbf16>
    %cst_15 = arith.constant dense<0.000000e+00> : vector<32x16xf32>
    %27 = tpu.matmul %26, %13, %cst_15 {dimension_numbers = #tpu.dot_dimension_numbers<[1], [0], [0], [1], [0, 0, 1, 1], [], []>} : vector<32x32xbf16>, vector<32x16xbf16>, vector<32x16xf32> -> vector<32x16xf32>
    %28 = vector.broadcast %25 : vector<32x1xf32> to vector<32x16xf32>
    %29 = arith.divf %27, %28 : vector<32x16xf32>
    %30 = arith.truncf %29 : vector<32x16xf32> to vector<32x16xbf16>
    %31 = vector.extract_strided_slice %9 {offsets = [0, 0], sizes = [16, 64], strides = [1, 1]} : vector<64x64xbf16> to vector<16x64xbf16>
    %cst_16 = arith.constant dense<0.000000e+00> : vector<32x64xf32>
    %32 = tpu.matmul %30, %31, %cst_16 {dimension_numbers = #tpu.dot_dimension_numbers<[1], [0], [0], [1], [0, 0, 1, 1], [], []>} : vector<32x16xbf16>, vector<16x64xbf16>, vector<32x64xf32> -> vector<32x64xf32>
    %33 = arith.addf %10, %32 : vector<32x64xf32>
    %34 = vector.extract_strided_slice %8 {offsets = [0, 16], sizes = [32, 16], strides = [1, 1]} : vector<32x192xbf16> to vector<32x16xbf16>
    %35 = vector.extract_strided_slice %8 {offsets = [0, 80], sizes = [32, 16], strides = [1, 1]} : vector<32x192xbf16> to vector<32x16xbf16>
    %36 = vector.extract_strided_slice %8 {offsets = [0, 144], sizes = [32, 16], strides = [1, 1]} : vector<32x192xbf16> to vector<32x16xbf16>
    %cst_17 = arith.constant dense<0.000000e+00> : vector<32x32xf32>
    %37 = tpu.matmul %34, %35, %cst_17 {dimension_numbers = #tpu.dot_dimension_numbers<[1], [1], [0], [0], [0, 0, 1, 0], [], []>} : vector<32x16xbf16>, vector<32x16xbf16>, vector<32x32xf32> -> vector<32x32xf32>
    %cst_18 = arith.constant 2.500000e-01 : f32
    %38 = vector.broadcast %cst_18 : f32 to vector<32x32xf32>
    %39 = arith.mulf %37, %38 : vector<32x32xf32>
    %c0_19 = arith.constant 0 : index
    %c0_20 = arith.constant 0 : index
    %40 = vector.load %arg2[%c0_19, %c0_20] : memref<32x32xf32, #tpu.memory_space<vmem>>, vector<32x32xf32>
    %41 = arith.addf %39, %40 : vector<32x32xf32>
    %cst_21 = arith.constant dense<0xFF800000> : vector<32xf32>
    %42 = vector.multi_reduction <maximumf>, %41, %cst_21 [1] : vector<32x32xf32> to vector<32xf32>
    %43 = vector.shape_cast %42 : vector<32xf32> to vector<32x1xf32>
    %44 = vector.broadcast %43 : vector<32x1xf32> to vector<32x32xf32>
    %45 = arith.subf %41, %44 : vector<32x32xf32>
    %46 = math.exp %45 : vector<32x32xf32>
    %cst_22 = arith.constant dense<0.000000e+00> : vector<32xf32>
    %47 = vector.multi_reduction <add>, %46, %cst_22 [1] : vector<32x32xf32> to vector<32xf32>
    %48 = vector.shape_cast %47 : vector<32xf32> to vector<32x1xf32>
    %49 = arith.truncf %46 : vector<32x32xf32> to vector<32x32xbf16>
    %cst_23 = arith.constant dense<0.000000e+00> : vector<32x16xf32>
    %50 = tpu.matmul %49, %36, %cst_23 {dimension_numbers = #tpu.dot_dimension_numbers<[1], [0], [0], [1], [0, 0, 1, 1], [], []>} : vector<32x32xbf16>, vector<32x16xbf16>, vector<32x16xf32> -> vector<32x16xf32>
    %51 = vector.broadcast %48 : vector<32x1xf32> to vector<32x16xf32>
    %52 = arith.divf %50, %51 : vector<32x16xf32>
    %53 = arith.truncf %52 : vector<32x16xf32> to vector<32x16xbf16>
    %54 = vector.extract_strided_slice %9 {offsets = [16, 0], sizes = [16, 64], strides = [1, 1]} : vector<64x64xbf16> to vector<16x64xbf16>
    %cst_24 = arith.constant dense<0.000000e+00> : vector<32x64xf32>
    %55 = tpu.matmul %53, %54, %cst_24 {dimension_numbers = #tpu.dot_dimension_numbers<[1], [0], [0], [1], [0, 0, 1, 1], [], []>} : vector<32x16xbf16>, vector<16x64xbf16>, vector<32x64xf32> -> vector<32x64xf32>
    %56 = arith.addf %33, %55 : vector<32x64xf32>
    %57 = vector.extract_strided_slice %8 {offsets = [0, 32], sizes = [32, 16], strides = [1, 1]} : vector<32x192xbf16> to vector<32x16xbf16>
    %58 = vector.extract_strided_slice %8 {offsets = [0, 96], sizes = [32, 16], strides = [1, 1]} : vector<32x192xbf16> to vector<32x16xbf16>
    %59 = vector.extract_strided_slice %8 {offsets = [0, 160], sizes = [32, 16], strides = [1, 1]} : vector<32x192xbf16> to vector<32x16xbf16>
    %cst_25 = arith.constant dense<0.000000e+00> : vector<32x32xf32>
    %60 = tpu.matmul %57, %58, %cst_25 {dimension_numbers = #tpu.dot_dimension_numbers<[1], [1], [0], [0], [0, 0, 1, 0], [], []>} : vector<32x16xbf16>, vector<32x16xbf16>, vector<32x32xf32> -> vector<32x32xf32>
    %cst_26 = arith.constant 2.500000e-01 : f32
    %61 = vector.broadcast %cst_26 : f32 to vector<32x32xf32>
    %62 = arith.mulf %60, %61 : vector<32x32xf32>
    %c0_27 = arith.constant 0 : index
    %c0_28 = arith.constant 0 : index
    %63 = vector.load %arg2[%c0_27, %c0_28] : memref<32x32xf32, #tpu.memory_space<vmem>>, vector<32x32xf32>
    %64 = arith.addf %62, %63 : vector<32x32xf32>
    %cst_29 = arith.constant dense<0xFF800000> : vector<32xf32>
    %65 = vector.multi_reduction <maximumf>, %64, %cst_29 [1] : vector<32x32xf32> to vector<32xf32>
    %66 = vector.shape_cast %65 : vector<32xf32> to vector<32x1xf32>
    %67 = vector.broadcast %66 : vector<32x1xf32> to vector<32x32xf32>
    %68 = arith.subf %64, %67 : vector<32x32xf32>
    %69 = math.exp %68 : vector<32x32xf32>
    %cst_30 = arith.constant dense<0.000000e+00> : vector<32xf32>
    %70 = vector.multi_reduction <add>, %69, %cst_30 [1] : vector<32x32xf32> to vector<32xf32>
    %71 = vector.shape_cast %70 : vector<32xf32> to vector<32x1xf32>
    %72 = arith.truncf %69 : vector<32x32xf32> to vector<32x32xbf16>
    %cst_31 = arith.constant dense<0.000000e+00> : vector<32x16xf32>
    %73 = tpu.matmul %72, %59, %cst_31 {dimension_numbers = #tpu.dot_dimension_numbers<[1], [0], [0], [1], [0, 0, 1, 1], [], []>} : vector<32x32xbf16>, vector<32x16xbf16>, vector<32x16xf32> -> vector<32x16xf32>
    %74 = vector.broadcast %71 : vector<32x1xf32> to vector<32x16xf32>
    %75 = arith.divf %73, %74 : vector<32x16xf32>
    %76 = arith.truncf %75 : vector<32x16xf32> to vector<32x16xbf16>
    %77 = vector.extract_strided_slice %9 {offsets = [32, 0], sizes = [16, 64], strides = [1, 1]} : vector<64x64xbf16> to vector<16x64xbf16>
    %cst_32 = arith.constant dense<0.000000e+00> : vector<32x64xf32>
    %78 = tpu.matmul %76, %77, %cst_32 {dimension_numbers = #tpu.dot_dimension_numbers<[1], [0], [0], [1], [0, 0, 1, 1], [], []>} : vector<32x16xbf16>, vector<16x64xbf16>, vector<32x64xf32> -> vector<32x64xf32>
    %79 = arith.addf %56, %78 : vector<32x64xf32>
    %80 = vector.extract_strided_slice %8 {offsets = [0, 48], sizes = [32, 16], strides = [1, 1]} : vector<32x192xbf16> to vector<32x16xbf16>
    %81 = vector.extract_strided_slice %8 {offsets = [0, 112], sizes = [32, 16], strides = [1, 1]} : vector<32x192xbf16> to vector<32x16xbf16>
    %82 = vector.extract_strided_slice %8 {offsets = [0, 176], sizes = [32, 16], strides = [1, 1]} : vector<32x192xbf16> to vector<32x16xbf16>
    %cst_33 = arith.constant dense<0.000000e+00> : vector<32x32xf32>
    %83 = tpu.matmul %80, %81, %cst_33 {dimension_numbers = #tpu.dot_dimension_numbers<[1], [1], [0], [0], [0, 0, 1, 0], [], []>} : vector<32x16xbf16>, vector<32x16xbf16>, vector<32x32xf32> -> vector<32x32xf32>
    %cst_34 = arith.constant 2.500000e-01 : f32
    %84 = vector.broadcast %cst_34 : f32 to vector<32x32xf32>
    %85 = arith.mulf %83, %84 : vector<32x32xf32>
    %c0_35 = arith.constant 0 : index
    %c0_36 = arith.constant 0 : index
    %86 = vector.load %arg2[%c0_35, %c0_36] : memref<32x32xf32, #tpu.memory_space<vmem>>, vector<32x32xf32>
    %87 = arith.addf %85, %86 : vector<32x32xf32>
    %cst_37 = arith.constant dense<0xFF800000> : vector<32xf32>
    %88 = vector.multi_reduction <maximumf>, %87, %cst_37 [1] : vector<32x32xf32> to vector<32xf32>
    %89 = vector.shape_cast %88 : vector<32xf32> to vector<32x1xf32>
    %90 = vector.broadcast %89 : vector<32x1xf32> to vector<32x32xf32>
    %91 = arith.subf %87, %90 : vector<32x32xf32>
    %92 = math.exp %91 : vector<32x32xf32>
    %cst_38 = arith.constant dense<0.000000e+00> : vector<32xf32>
    %93 = vector.multi_reduction <add>, %92, %cst_38 [1] : vector<32x32xf32> to vector<32xf32>
    %94 = vector.shape_cast %93 : vector<32xf32> to vector<32x1xf32>
    %95 = arith.truncf %92 : vector<32x32xf32> to vector<32x32xbf16>
    %cst_39 = arith.constant dense<0.000000e+00> : vector<32x16xf32>
    %96 = tpu.matmul %95, %82, %cst_39 {dimension_numbers = #tpu.dot_dimension_numbers<[1], [0], [0], [1], [0, 0, 1, 1], [], []>} : vector<32x32xbf16>, vector<32x16xbf16>, vector<32x16xf32> -> vector<32x16xf32>
    %97 = vector.broadcast %94 : vector<32x1xf32> to vector<32x16xf32>
    %98 = arith.divf %96, %97 : vector<32x16xf32>
    %99 = arith.truncf %98 : vector<32x16xf32> to vector<32x16xbf16>
    %100 = vector.extract_strided_slice %9 {offsets = [48, 0], sizes = [16, 64], strides = [1, 1]} : vector<64x64xbf16> to vector<16x64xbf16>
    %cst_40 = arith.constant dense<0.000000e+00> : vector<32x64xf32>
    %101 = tpu.matmul %99, %100, %cst_40 {dimension_numbers = #tpu.dot_dimension_numbers<[1], [0], [0], [1], [0, 0, 1, 1], [], []>} : vector<32x16xbf16>, vector<16x64xbf16>, vector<32x64xf32> -> vector<32x64xf32>
    %102 = arith.addf %79, %101 : vector<32x64xf32>
    %c0_41 = arith.constant 0 : index
    %c0_42 = arith.constant 0 : index
    %103 = vector.load %arg6[%c0_41, %c0_42] : memref<1x64xf32, #tpu.memory_space<vmem>>, vector<1x64xf32>
    %104 = vector.broadcast %103 : vector<1x64xf32> to vector<32x64xf32>
    %105 = arith.addf %102, %104 : vector<32x64xf32>
    %106 = arith.addf %1, %105 : vector<32x64xf32>
    %cst_43 = arith.constant dense<0.000000e+00> : vector<32xf32>
    %107 = vector.multi_reduction <add>, %106, %cst_43 [1] : vector<32x64xf32> to vector<32xf32>
    %108 = vector.shape_cast %107 : vector<32xf32> to vector<32x1xf32>
    %cst_44 = arith.constant 6.400000e+01 : f32
    %109 = vector.broadcast %cst_44 : f32 to vector<32x1xf32>
    %110 = arith.divf %108, %109 : vector<32x1xf32>
    %111 = vector.broadcast %110 : vector<32x1xf32> to vector<32x64xf32>
    %112 = arith.subf %106, %111 : vector<32x64xf32>
    %113 = arith.mulf %112, %112 : vector<32x64xf32>
    %cst_45 = arith.constant dense<0.000000e+00> : vector<32xf32>
    %114 = vector.multi_reduction <add>, %113, %cst_45 [1] : vector<32x64xf32> to vector<32xf32>
    %115 = vector.shape_cast %114 : vector<32xf32> to vector<32x1xf32>
    %cst_46 = arith.constant 6.400000e+01 : f32
    %116 = vector.broadcast %cst_46 : f32 to vector<32x1xf32>
    %117 = arith.divf %115, %116 : vector<32x1xf32>
    %cst_47 = arith.constant 9.99999997E-7 : f32
    %118 = vector.broadcast %cst_47 : f32 to vector<32x1xf32>
    %119 = arith.addf %117, %118 : vector<32x1xf32>
    %120 = math.rsqrt %119 : vector<32x1xf32>
    %121 = vector.broadcast %120 : vector<32x1xf32> to vector<32x64xf32>
    %122 = arith.mulf %112, %121 : vector<32x64xf32>
    %c0_48 = arith.constant 0 : index
    %c0_49 = arith.constant 0 : index
    %123 = vector.load %arg7[%c0_48, %c0_49] : memref<1x64xf32, #tpu.memory_space<vmem>>, vector<1x64xf32>
    %124 = vector.broadcast %123 : vector<1x64xf32> to vector<32x64xf32>
    %125 = arith.mulf %122, %124 : vector<32x64xf32>
    %c0_50 = arith.constant 0 : index
    %c0_51 = arith.constant 0 : index
    %126 = vector.load %arg8[%c0_50, %c0_51] : memref<1x64xf32, #tpu.memory_space<vmem>>, vector<1x64xf32>
    %127 = vector.broadcast %126 : vector<1x64xf32> to vector<32x64xf32>
    %128 = arith.addf %125, %127 : vector<32x64xf32>
    %129 = arith.truncf %128 : vector<32x64xf32> to vector<32x64xbf16>
    %c0_52 = arith.constant 0 : index
    %c0_53 = arith.constant 0 : index
    %130 = vector.load %arg9[%c0_52, %c0_53] : memref<64x256xbf16, #tpu.memory_space<vmem>>, vector<64x256xbf16>
    %cst_54 = arith.constant dense<0.000000e+00> : vector<32x256xf32>
    %131 = tpu.matmul %129, %130, %cst_54 {dimension_numbers = #tpu.dot_dimension_numbers<[1], [0], [0], [1], [0, 0, 1, 1], [], []>} : vector<32x64xbf16>, vector<64x256xbf16>, vector<32x256xf32> -> vector<32x256xf32>
    %c0_55 = arith.constant 0 : index
    %c0_56 = arith.constant 0 : index
    %132 = vector.load %arg10[%c0_55, %c0_56] : memref<1x256xf32, #tpu.memory_space<vmem>>, vector<1x256xf32>
    %133 = vector.broadcast %132 : vector<1x256xf32> to vector<32x256xf32>
    %134 = arith.addf %131, %133 : vector<32x256xf32>
    %cst_57 = arith.constant 5.000000e-01 : f32
    %135 = vector.broadcast %cst_57 : f32 to vector<32x256xf32>
    %136 = arith.mulf %135, %134 : vector<32x256xf32>
    %137 = arith.mulf %134, %134 : vector<32x256xf32>
    %138 = arith.mulf %137, %134 : vector<32x256xf32>
    %cst_58 = arith.constant 4.471500e-02 : f32
    %139 = vector.broadcast %cst_58 : f32 to vector<32x256xf32>
    %140 = arith.mulf %139, %138 : vector<32x256xf32>
    %141 = arith.addf %134, %140 : vector<32x256xf32>
    %cst_59 = arith.constant 0.797884583 : f32
    %142 = vector.broadcast %cst_59 : f32 to vector<32x256xf32>
    %143 = arith.mulf %142, %141 : vector<32x256xf32>
    %144 = math.tanh %143 : vector<32x256xf32>
    %cst_60 = arith.constant 1.000000e+00 : f32
    %145 = vector.broadcast %cst_60 : f32 to vector<32x256xf32>
    %146 = arith.addf %145, %144 : vector<32x256xf32>
    %147 = arith.mulf %136, %146 : vector<32x256xf32>
    %148 = arith.truncf %147 : vector<32x256xf32> to vector<32x256xbf16>
    %c0_61 = arith.constant 0 : index
    %c0_62 = arith.constant 0 : index
    %149 = vector.load %arg11[%c0_61, %c0_62] : memref<256x64xbf16, #tpu.memory_space<vmem>>, vector<256x64xbf16>
    %cst_63 = arith.constant dense<0.000000e+00> : vector<32x64xf32>
    %150 = tpu.matmul %148, %149, %cst_63 {dimension_numbers = #tpu.dot_dimension_numbers<[1], [0], [0], [1], [0, 0, 1, 1], [], []>} : vector<32x256xbf16>, vector<256x64xbf16>, vector<32x64xf32> -> vector<32x64xf32>
    %c0_64 = arith.constant 0 : index
    %c0_65 = arith.constant 0 : index
    %151 = vector.load %arg12[%c0_64, %c0_65] : memref<1x64xf32, #tpu.memory_space<vmem>>, vector<1x64xf32>
    %152 = vector.broadcast %151 : vector<1x64xf32> to vector<32x64xf32>
    %153 = arith.addf %150, %152 : vector<32x64xf32>
    %154 = arith.addf %128, %153 : vector<32x64xf32>
    %cst_66 = arith.constant dense<0.000000e+00> : vector<32xf32>
    %155 = vector.multi_reduction <add>, %154, %cst_66 [1] : vector<32x64xf32> to vector<32xf32>
    %156 = vector.shape_cast %155 : vector<32xf32> to vector<32x1xf32>
    %cst_67 = arith.constant 6.400000e+01 : f32
    %157 = vector.broadcast %cst_67 : f32 to vector<32x1xf32>
    %158 = arith.divf %156, %157 : vector<32x1xf32>
    %159 = vector.broadcast %158 : vector<32x1xf32> to vector<32x64xf32>
    %160 = arith.subf %154, %159 : vector<32x64xf32>
    %161 = arith.mulf %160, %160 : vector<32x64xf32>
    %cst_68 = arith.constant dense<0.000000e+00> : vector<32xf32>
    %162 = vector.multi_reduction <add>, %161, %cst_68 [1] : vector<32x64xf32> to vector<32xf32>
    %163 = vector.shape_cast %162 : vector<32xf32> to vector<32x1xf32>
    %cst_69 = arith.constant 6.400000e+01 : f32
    %164 = vector.broadcast %cst_69 : f32 to vector<32x1xf32>
    %165 = arith.divf %163, %164 : vector<32x1xf32>
    %cst_70 = arith.constant 9.99999997E-7 : f32
    %166 = vector.broadcast %cst_70 : f32 to vector<32x1xf32>
    %167 = arith.addf %165, %166 : vector<32x1xf32>
    %168 = math.rsqrt %167 : vector<32x1xf32>
    %169 = vector.broadcast %168 : vector<32x1xf32> to vector<32x64xf32>
    %170 = arith.mulf %160, %169 : vector<32x64xf32>
    %c0_71 = arith.constant 0 : index
    %c0_72 = arith.constant 0 : index
    %171 = vector.load %arg13[%c0_71, %c0_72] : memref<1x64xf32, #tpu.memory_space<vmem>>, vector<1x64xf32>
    %172 = vector.broadcast %171 : vector<1x64xf32> to vector<32x64xf32>
    %173 = arith.mulf %170, %172 : vector<32x64xf32>
    %c0_73 = arith.constant 0 : index
    %c0_74 = arith.constant 0 : index
    %174 = vector.load %arg14[%c0_73, %c0_74] : memref<1x64xf32, #tpu.memory_space<vmem>>, vector<1x64xf32>
    %175 = vector.broadcast %174 : vector<1x64xf32> to vector<32x64xf32>
    %176 = arith.addf %173, %175 : vector<32x64xf32>
    %c0_75 = arith.constant 0 : index
    %c0_76 = arith.constant 0 : index
    %177 = vector.load %arg16[%c0_75, %c0_76] : memref<5x16xf32, #tpu.memory_space<vmem>>, vector<5x16xf32>
    %cst_77 = arith.constant dense<0.000000e+00> : vector<64xf32>
    %178 = vector.multi_reduction <add>, %176, %cst_77 [0] : vector<32x64xf32> to vector<64xf32>
    %179 = vector.shape_cast %178 : vector<64xf32> to vector<1x64xf32>
    %cst_78 = arith.constant 3.200000e+01 : f32
    %180 = vector.broadcast %cst_78 : f32 to vector<1x64xf32>
    %181 = arith.divf %179, %180 : vector<1x64xf32>
    %c0_79 = arith.constant 0 : index
    %c0_80 = arith.constant 0 : index
    %182 = vector.load %arg15[%c0_79, %c0_80] : memref<64x16xf32, #tpu.memory_space<vmem>>, vector<64x16xf32>
    %cst_81 = arith.constant dense<0.000000e+00> : vector<1x16xf32>
    %183 = tpu.matmul %181, %182, %cst_81 {dimension_numbers = #tpu.dot_dimension_numbers<[1], [0], [0], [1], [0, 0, 1, 1], [], []>} : vector<1x64xf32>, vector<64x16xf32>, vector<1x16xf32> -> vector<1x16xf32>
    %184 = vector.extract_strided_slice %177 {offsets = [0, 0], sizes = [1, 16], strides = [1, 1]} : vector<5x16xf32> to vector<1x16xf32>
    %185 = arith.mulf %183, %184 : vector<1x16xf32>
    %186 = vector.extract_strided_slice %177 {offsets = [1, 0], sizes = [1, 16], strides = [1, 1]} : vector<5x16xf32> to vector<1x16xf32>
    %187 = arith.addf %185, %186 : vector<1x16xf32>
    %cst_82 = arith.constant 5.000000e-01 : f32
    %188 = vector.broadcast %cst_82 : f32 to vector<1x16xf32>
    %189 = arith.mulf %188, %187 : vector<1x16xf32>
    %190 = arith.mulf %187, %187 : vector<1x16xf32>
    %191 = arith.mulf %190, %187 : vector<1x16xf32>
    %cst_83 = arith.constant 4.471500e-02 : f32
    %192 = vector.broadcast %cst_83 : f32 to vector<1x16xf32>
    %193 = arith.mulf %192, %191 : vector<1x16xf32>
    %194 = arith.addf %187, %193 : vector<1x16xf32>
    %cst_84 = arith.constant 0.797884583 : f32
    %195 = vector.broadcast %cst_84 : f32 to vector<1x16xf32>
    %196 = arith.mulf %195, %194 : vector<1x16xf32>
    %197 = math.tanh %196 : vector<1x16xf32>
    %cst_85 = arith.constant 1.000000e+00 : f32
    %198 = vector.broadcast %cst_85 : f32 to vector<1x16xf32>
    %199 = arith.addf %198, %197 : vector<1x16xf32>
    %200 = arith.mulf %189, %199 : vector<1x16xf32>
    %201 = vector.extract_strided_slice %177 {offsets = [2, 0], sizes = [1, 16], strides = [1, 1]} : vector<5x16xf32> to vector<1x16xf32>
    %202 = arith.mulf %200, %201 : vector<1x16xf32>
    %203 = vector.extract_strided_slice %177 {offsets = [3, 0], sizes = [1, 16], strides = [1, 1]} : vector<5x16xf32> to vector<1x16xf32>
    %204 = arith.mulf %202, %203 : vector<1x16xf32>
    %205 = vector.extract_strided_slice %177 {offsets = [4, 0], sizes = [1, 16], strides = [1, 1]} : vector<5x16xf32> to vector<1x16xf32>
    %206 = arith.addf %204, %205 : vector<1x16xf32>
    %cst_86 = arith.constant 5.000000e-01 : f32
    %207 = vector.broadcast %cst_86 : f32 to vector<1x16xf32>
    %208 = arith.mulf %207, %206 : vector<1x16xf32>
    %209 = arith.mulf %206, %206 : vector<1x16xf32>
    %210 = arith.mulf %209, %206 : vector<1x16xf32>
    %cst_87 = arith.constant 4.471500e-02 : f32
    %211 = vector.broadcast %cst_87 : f32 to vector<1x16xf32>
    %212 = arith.mulf %211, %210 : vector<1x16xf32>
    %213 = arith.addf %206, %212 : vector<1x16xf32>
    %cst_88 = arith.constant 0.797884583 : f32
    %214 = vector.broadcast %cst_88 : f32 to vector<1x16xf32>
    %215 = arith.mulf %214, %213 : vector<1x16xf32>
    %216 = math.tanh %215 : vector<1x16xf32>
    %cst_89 = arith.constant 1.000000e+00 : f32
    %217 = vector.broadcast %cst_89 : f32 to vector<1x16xf32>
    %218 = arith.addf %217, %216 : vector<1x16xf32>
    %219 = arith.mulf %208, %218 : vector<1x16xf32>
    %c0_90 = arith.constant 0 : index
    %c0_91 = arith.constant 0 : index
    %220 = vector.load %arg17[%c0_90, %c0_91] : memref<16x64xf32, #tpu.memory_space<vmem>>, vector<16x64xf32>
    %cst_92 = arith.constant dense<0.000000e+00> : vector<1x64xf32>
    %221 = tpu.matmul %219, %220, %cst_92 {dimension_numbers = #tpu.dot_dimension_numbers<[1], [0], [0], [1], [0, 0, 1, 1], [], []>} : vector<1x16xf32>, vector<16x64xf32>, vector<1x64xf32> -> vector<1x64xf32>
    %c0_93 = arith.constant 0 : index
    %c0_94 = arith.constant 0 : index
    %222 = vector.load %arg18[%c0_93, %c0_94] : memref<1x64xf32, #tpu.memory_space<vmem>>, vector<1x64xf32>
    %223 = arith.addf %221, %222 : vector<1x64xf32>
    %cst_95 = arith.constant 0.000000e+00 : f32
    %224 = vector.broadcast %cst_95 : f32 to vector<1x64xf32>
    %225 = arith.subf %224, %223 : vector<1x64xf32>
    %226 = math.exp %225 : vector<1x64xf32>
    %cst_96 = arith.constant 1.000000e+00 : f32
    %227 = vector.broadcast %cst_96 : f32 to vector<1x64xf32>
    %228 = arith.addf %227, %226 : vector<1x64xf32>
    %cst_97 = arith.constant 1.000000e+00 : f32
    %229 = vector.broadcast %cst_97 : f32 to vector<1x64xf32>
    %230 = arith.divf %229, %228 : vector<1x64xf32>
    %231 = vector.broadcast %230 : vector<1x64xf32> to vector<32x64xf32>
    %232 = arith.mulf %176, %231 : vector<32x64xf32>
    %c0_98 = arith.constant 0 : index
    %c0_99 = arith.constant 0 : index
    %c0_100 = arith.constant 0 : index
    %233 = vector.load %arg19[%c0_98, %c0_99, %c0_100] : memref<1x32x64xf32, #tpu.memory_space<vmem>>, vector<1x32x64xf32>
    %234 = vector.shape_cast %233 : vector<1x32x64xf32> to vector<32x64xf32>
    %235 = vector.shape_cast %232 : vector<32x64xf32> to vector<1x32x64xf32>
    tpu.vector_store %arg19[%c0_98, %c0_99, %c0_100], %235 {strides = array<i32>} : memref<1x32x64xf32, #tpu.memory_space<vmem>>, vector<1x32x64xf32>,
    return
  }
  func.func @transform_0(%arg0: i32) -> (i32, i32, i32) {
    %c0_i32 = arith.constant 0 : i32
    %c0_i32_0 = arith.constant 0 : i32
    %c0_i32_1 = arith.constant 0 : i32
    return %arg0, %c0_i32, %c0_i32_0 : i32, i32, i32
  }
  func.func @transform_1(%arg0: i32) -> (i32, i32) {
    %c0_i32 = arith.constant 0 : i32
    %c0_i32_0 = arith.constant 0 : i32
    %c0_i32_1 = arith.constant 0 : i32
    return %c0_i32, %c0_i32_0 : i32, i32
  }
  func.func @transform_2(%arg0: i32) -> (i32, i32) {
    %c0_i32 = arith.constant 0 : i32
    %c0_i32_0 = arith.constant 0 : i32
    %c0_i32_1 = arith.constant 0 : i32
    return %c0_i32, %c0_i32_0 : i32, i32
  }
  func.func @transform_3(%arg0: i32) -> (i32, i32) {
    %c0_i32 = arith.constant 0 : i32
    %c0_i32_0 = arith.constant 0 : i32
    %c0_i32_1 = arith.constant 0 : i32
    return %c0_i32, %c0_i32_0 : i32, i32
  }
  func.func @transform_4(%arg0: i32) -> (i32, i32) {
    %c0_i32 = arith.constant 0 : i32
    %c0_i32_0 = arith.constant 0 : i32
    %c0_i32_1 = arith.constant 0 : i32
    return %c0_i32, %c0_i32_0 : i32, i32
  }
  func.func @transform_5(%arg0: i32) -> (i32, i32) {
    %c0_i32 = arith.constant 0 : i32
    %c0_i32_0 = arith.constant 0 : i32
    %c0_i32_1 = arith.constant 0 : i32
    return %c0_i32, %c0_i32_0 : i32, i32
  }
  func.func @transform_6(%arg0: i32) -> (i32, i32) {
    %c0_i32 = arith.constant 0 : i32
    %c0_i32_0 = arith.constant 0 : i32
    %c0_i32_1 = arith.constant 0 : i32
    return %c0_i32, %c0_i32_0 : i32, i32
  }
  func.func @transform_7(%arg0: i32) -> (i32, i32) {
    %c0_i32 = arith.constant 0 : i32
    %c0_i32_0 = arith.constant 0 : i32
    %c0_i32_1 = arith.constant 0 : i32
    return %c0_i32, %c0_i32_0 : i32, i32
  }
  func.func @transform_8(%arg0: i32) -> (i32, i32) {
    %c0_i32 = arith.constant 0 : i32
    %c0_i32_0 = arith.constant 0 : i32
    %c0_i32_1 = arith.constant 0 : i32
    return %c0_i32, %c0_i32_0 : i32, i32
  }
  func.func @transform_9(%arg0: i32) -> (i32, i32) {
    %c0_i32 = arith.constant 0 : i32
    %c0_i32_0 = arith.constant 0 : i32
    %c0_i32_1 = arith.constant 0 : i32
    return %c0_i32, %c0_i32_0 : i32, i32
  }
  func.func @transform_10(%arg0: i32) -> (i32, i32) {
    %c0_i32 = arith.constant 0 : i32
    %c0_i32_0 = arith.constant 0 : i32
    %c0_i32_1 = arith.constant 0 : i32
    return %c0_i32, %c0_i32_0 : i32, i32
  }
  func.func @transform_11(%arg0: i32) -> (i32, i32) {
    %c0_i32 = arith.constant 0 : i32
    %c0_i32_0 = arith.constant 0 : i32
    %c0_i32_1 = arith.constant 0 : i32
    return %c0_i32, %c0_i32_0 : i32, i32
  }
  func.func @transform_12(%arg0: i32) -> (i32, i32) {
    %c0_i32 = arith.constant 0 : i32
    %c0_i32_0 = arith.constant 0 : i32
    %c0_i32_1 = arith.constant 0 : i32
    return %c0_i32, %c0_i32_0 : i32, i32
  }
  func.func @transform_13(%arg0: i32) -> (i32, i32) {
    %c0_i32 = arith.constant 0 : i32
    %c0_i32_0 = arith.constant 0 : i32
    %c0_i32_1 = arith.constant 0 : i32
    return %c0_i32, %c0_i32_0 : i32, i32
  }
  func.func @transform_14(%arg0: i32) -> (i32, i32) {
    %c0_i32 = arith.constant 0 : i32
    %c0_i32_0 = arith.constant 0 : i32
    %c0_i32_1 = arith.constant 0 : i32
    return %c0_i32, %c0_i32_0 : i32, i32
  }
  func.func @transform_15(%arg0: i32) -> (i32, i32) {
    %c0_i32 = arith.constant 0 : i32
    %c0_i32_0 = arith.constant 0 : i32
    %c0_i32_1 = arith.constant 0 : i32
    return %c0_i32, %c0_i32_0 : i32, i32
  }
  func.func @transform_16(%arg0: i32) -> (i32, i32) {
    %c0_i32 = arith.constant 0 : i32
    %c0_i32_0 = arith.constant 0 : i32
    %c0_i32_1 = arith.constant 0 : i32
    return %c0_i32, %c0_i32_0 : i32, i32
  }
  func.func @transform_17(%arg0: i32) -> (i32, i32) {
    %c0_i32 = arith.constant 0 : i32
    %c0_i32_0 = arith.constant 0 : i32
    %c0_i32_1 = arith.constant 0 : i32
    return %c0_i32, %c0_i32_0 : i32, i32
  }
  func.func @transform_18(%arg0: i32) -> (i32, i32, i32) {
    %c0_i32 = arith.constant 0 : i32
    %c0_i32_0 = arith.constant 0 : i32
    %c0_i32_1 = arith.constant 0 : i32
    return %arg0, %c0_i32, %c0_i32_0 : i32, i32, i32
  }
}

module attributes {stable_mosaic.version = 11 : i64} {
  func.func @kernel(%arg0: i32, %arg1: i32, %arg2: i32, %arg3: memref<32x512xbf16, #tpu.memory_space<vmem>>, %arg4: memref<512x128xbf16, #tpu.memory_space<vmem>>, %arg5: memref<1x128xf32, #tpu.memory_space<vmem>>, %arg6: memref<32x128xf32, #tpu.memory_space<vmem>>, %arg7: memref<32x128xf32, #tpu.memory_space<vmem>>) attributes {dimension_semantics = [#tpu.dimension_semantics<parallel>, #tpu.dimension_semantics<parallel>, #tpu.dimension_semantics<arbitrary>], iteration_bounds = array<i64: 1, 1, 2>, scalar_prefetch = 0 : i64, scratch_operands = 1 : i64, tpu.core_type = #tpu.core_type<tc>, window_params = [{transform_indices = @transform_0, window_bounds = array<i64: 32, 512>}, {transform_indices = @transform_1, window_bounds = array<i64: 512, 128>}, {transform_indices = @transform_2, window_bounds = array<i64: 1, 128>}, {transform_indices = @transform_3, window_bounds = array<i64: 32, 128>}]} {
    %c0_i32 = arith.constant 0 : i32
    %0 = arith.cmpi eq, %arg2, %c0_i32 : i32
    %1 = arith.extui %0 : i1 to i32
    %c0_i32_0 = arith.constant 0 : i32
    %2 = arith.cmpi ne, %1, %c0_i32_0 : i32
    scf.if %2 {
      %cst_9 = arith.constant 0.000000e+00 : f32
      %12 = vector.broadcast %cst_9 : f32 to vector<32x128xf32>
      %c0_10 = arith.constant 0 : index
      %c0_11 = arith.constant 0 : index
      %13 = vector.load %arg7[%c0_10, %c0_11] : memref<32x128xf32, #tpu.memory_space<vmem>>, vector<32x128xf32>
      tpu.vector_store %arg7[%c0_10, %c0_11], %12 {strides = array<i32>} : memref<32x128xf32, #tpu.memory_space<vmem>>, vector<32x128xf32>,
    } else {
    }
    %c0 = arith.constant 0 : index
    %c0_1 = arith.constant 0 : index
    %3 = vector.load %arg7[%c0, %c0_1] : memref<32x128xf32, #tpu.memory_space<vmem>>, vector<32x128xf32>
    %c0_2 = arith.constant 0 : index
    %c0_3 = arith.constant 0 : index
    %4 = vector.load %arg3[%c0_2, %c0_3] : memref<32x512xbf16, #tpu.memory_space<vmem>>, vector<32x512xbf16>
    %c0_4 = arith.constant 0 : index
    %c0_5 = arith.constant 0 : index
    %5 = vector.load %arg4[%c0_4, %c0_5] : memref<512x128xbf16, #tpu.memory_space<vmem>>, vector<512x128xbf16>
    %cst = arith.constant dense<0.000000e+00> : vector<32x128xf32>
    %6 = tpu.matmul %4, %5, %cst {dimension_numbers = #tpu.dot_dimension_numbers<[1], [0], [0], [1], [0, 0, 1, 1], [], []>} : vector<32x512xbf16>, vector<512x128xbf16>, vector<32x128xf32> -> vector<32x128xf32>
    %7 = arith.addf %3, %6 : vector<32x128xf32>
    %c0_6 = arith.constant 0 : index
    %c0_7 = arith.constant 0 : index
    %8 = vector.load %arg7[%c0_6, %c0_7] : memref<32x128xf32, #tpu.memory_space<vmem>>, vector<32x128xf32>
    tpu.vector_store %arg7[%c0_6, %c0_7], %7 {strides = array<i32>} : memref<32x128xf32, #tpu.memory_space<vmem>>, vector<32x128xf32>,
    %c1_i32 = arith.constant 1 : i32
    %9 = arith.cmpi eq, %arg2, %c1_i32 : i32
    %10 = arith.extui %9 : i1 to i32
    %c0_i32_8 = arith.constant 0 : i32
    %11 = arith.cmpi ne, %10, %c0_i32_8 : i32
    scf.if %11 {
      %c0_9 = arith.constant 0 : index
      %c0_10 = arith.constant 0 : index
      %12 = vector.load %arg7[%c0_9, %c0_10] : memref<32x128xf32, #tpu.memory_space<vmem>>, vector<32x128xf32>
      %c0_11 = arith.constant 0 : index
      %c0_12 = arith.constant 0 : index
      %13 = vector.load %arg5[%c0_11, %c0_12] : memref<1x128xf32, #tpu.memory_space<vmem>>, vector<1x128xf32>
      %14 = vector.broadcast %13 : vector<1x128xf32> to vector<32x128xf32>
      %15 = arith.addf %12, %14 : vector<32x128xf32>
      %c0_13 = arith.constant 0 : index
      %c0_14 = arith.constant 0 : index
      %16 = vector.load %arg6[%c0_13, %c0_14] : memref<32x128xf32, #tpu.memory_space<vmem>>, vector<32x128xf32>
      tpu.vector_store %arg6[%c0_13, %c0_14], %15 {strides = array<i32>} : memref<32x128xf32, #tpu.memory_space<vmem>>, vector<32x128xf32>,
    } else {
    }
    return
  }
  func.func @transform_0(%arg0: i32, %arg1: i32, %arg2: i32) -> (i32, i32) {
    %c0_i32 = arith.constant 0 : i32
    return %arg0, %arg2 : i32, i32
  }
  func.func @transform_1(%arg0: i32, %arg1: i32, %arg2: i32) -> (i32, i32) {
    %c0_i32 = arith.constant 0 : i32
    return %arg2, %arg1 : i32, i32
  }
  func.func @transform_2(%arg0: i32, %arg1: i32, %arg2: i32) -> (i32, i32) {
    %c0_i32 = arith.constant 0 : i32
    %c0_i32_0 = arith.constant 0 : i32
    return %c0_i32, %arg1 : i32, i32
  }
  func.func @transform_3(%arg0: i32, %arg1: i32, %arg2: i32) -> (i32, i32) {
    %c0_i32 = arith.constant 0 : i32
    return %arg0, %arg1 : i32, i32
  }
}

module attributes {stable_mosaic.version = 11 : i64} {
  func.func @kernel(%arg0: i32, %arg1: memref<32x128xf32, #tpu.memory_space<vmem>>, %arg2: memref<1x128xf32, #tpu.memory_space<vmem>>, %arg3: memref<1x128xf32, #tpu.memory_space<vmem>>, %arg4: memref<32x128xf32, #tpu.memory_space<vmem>>) attributes {dimension_semantics = [#tpu.dimension_semantics<parallel>], iteration_bounds = array<i64: 1>, scalar_prefetch = 0 : i64, scratch_operands = 0 : i64, tpu.core_type = #tpu.core_type<tc>, window_params = [{transform_indices = @transform_0, window_bounds = array<i64: 32, 128>}, {pipeline_mode = #tpu.pipeline_mode<synchronous>, transform_indices = @transform_1, window_bounds = array<i64: 1, 128>}, {pipeline_mode = #tpu.pipeline_mode<synchronous>, transform_indices = @transform_2, window_bounds = array<i64: 1, 128>}, {transform_indices = @transform_3, window_bounds = array<i64: 32, 128>}]} {
    %c0 = arith.constant 0 : index
    %c0_0 = arith.constant 0 : index
    %0 = vector.load %arg1[%c0, %c0_0] : memref<32x128xf32, #tpu.memory_space<vmem>>, vector<32x128xf32>
    %cst = arith.constant dense<0.000000e+00> : vector<32xf32>
    %1 = vector.multi_reduction <add>, %0, %cst [1] : vector<32x128xf32> to vector<32xf32>
    %2 = vector.shape_cast %1 : vector<32xf32> to vector<32x1xf32>
    %cst_1 = arith.constant 1.280000e+02 : f32
    %3 = vector.broadcast %cst_1 : f32 to vector<32x1xf32>
    %4 = arith.divf %2, %3 : vector<32x1xf32>
    %5 = vector.broadcast %4 : vector<32x1xf32> to vector<32x128xf32>
    %6 = arith.subf %0, %5 : vector<32x128xf32>
    %7 = arith.mulf %6, %6 : vector<32x128xf32>
    %cst_2 = arith.constant dense<0.000000e+00> : vector<32xf32>
    %8 = vector.multi_reduction <add>, %7, %cst_2 [1] : vector<32x128xf32> to vector<32xf32>
    %9 = vector.shape_cast %8 : vector<32xf32> to vector<32x1xf32>
    %cst_3 = arith.constant 1.280000e+02 : f32
    %10 = vector.broadcast %cst_3 : f32 to vector<32x1xf32>
    %11 = arith.divf %9, %10 : vector<32x1xf32>
    %cst_4 = arith.constant 9.99999997E-7 : f32
    %12 = vector.broadcast %cst_4 : f32 to vector<32x1xf32>
    %13 = arith.addf %11, %12 : vector<32x1xf32>
    %14 = math.rsqrt %13 : vector<32x1xf32>
    %15 = vector.broadcast %14 : vector<32x1xf32> to vector<32x128xf32>
    %16 = arith.mulf %6, %15 : vector<32x128xf32>
    %c0_5 = arith.constant 0 : index
    %c0_6 = arith.constant 0 : index
    %17 = vector.load %arg2[%c0_5, %c0_6] : memref<1x128xf32, #tpu.memory_space<vmem>>, vector<1x128xf32>
    %18 = vector.broadcast %17 : vector<1x128xf32> to vector<32x128xf32>
    %19 = arith.mulf %16, %18 : vector<32x128xf32>
    %c0_7 = arith.constant 0 : index
    %c0_8 = arith.constant 0 : index
    %20 = vector.load %arg3[%c0_7, %c0_8] : memref<1x128xf32, #tpu.memory_space<vmem>>, vector<1x128xf32>
    %21 = vector.broadcast %20 : vector<1x128xf32> to vector<32x128xf32>
    %22 = arith.addf %19, %21 : vector<32x128xf32>
    %c0_9 = arith.constant 0 : index
    %c0_10 = arith.constant 0 : index
    %23 = vector.load %arg4[%c0_9, %c0_10] : memref<32x128xf32, #tpu.memory_space<vmem>>, vector<32x128xf32>
    tpu.vector_store %arg4[%c0_9, %c0_10], %22 {strides = array<i32>} : memref<32x128xf32, #tpu.memory_space<vmem>>, vector<32x128xf32>,
    return
  }
  func.func @transform_0(%arg0: i32) -> (i32, i32) {
    %c0_i32 = arith.constant 0 : i32
    %c0_i32_0 = arith.constant 0 : i32
    return %arg0, %c0_i32 : i32, i32
  }
  func.func @transform_1(%arg0: i32) -> (i32, i32) {
    %c0_i32 = arith.constant 0 : i32
    %c0_i32_0 = arith.constant 0 : i32
    %c0_i32_1 = arith.constant 0 : i32
    return %c0_i32, %c0_i32_0 : i32, i32
  }
  func.func @transform_2(%arg0: i32) -> (i32, i32) {
    %c0_i32 = arith.constant 0 : i32
    %c0_i32_0 = arith.constant 0 : i32
    %c0_i32_1 = arith.constant 0 : i32
    return %c0_i32, %c0_i32_0 : i32, i32
  }
  func.func @transform_3(%arg0: i32) -> (i32, i32) {
    %c0_i32 = arith.constant 0 : i32
    %c0_i32_0 = arith.constant 0 : i32
    return %arg0, %c0_i32 : i32, i32
  }
}

module attributes {stable_mosaic.version = 11 : i64} {
  func.func @kernel(%arg0: i32, %arg1: memref<1x16x128xf32, #tpu.memory_space<vmem>>, %arg2: memref<128x384xbf16, #tpu.memory_space<vmem>>, %arg3: memref<1x384xf32, #tpu.memory_space<vmem>>, %arg4: memref<128x128xbf16, #tpu.memory_space<vmem>>, %arg5: memref<1x128xf32, #tpu.memory_space<vmem>>, %arg6: memref<1x128xf32, #tpu.memory_space<vmem>>, %arg7: memref<1x128xf32, #tpu.memory_space<vmem>>, %arg8: memref<128x512xbf16, #tpu.memory_space<vmem>>, %arg9: memref<1x512xf32, #tpu.memory_space<vmem>>, %arg10: memref<512x128xbf16, #tpu.memory_space<vmem>>, %arg11: memref<1x128xf32, #tpu.memory_space<vmem>>, %arg12: memref<1x128xf32, #tpu.memory_space<vmem>>, %arg13: memref<1x128xf32, #tpu.memory_space<vmem>>, %arg14: memref<128x32xf32, #tpu.memory_space<vmem>>, %arg15: memref<5x32xf32, #tpu.memory_space<vmem>>, %arg16: memref<32x128xf32, #tpu.memory_space<vmem>>, %arg17: memref<1x128xf32, #tpu.memory_space<vmem>>, %arg18: memref<1x16x128xf32, #tpu.memory_space<vmem>>) attributes {dimension_semantics = [#tpu.dimension_semantics<parallel>], iteration_bounds = array<i64: 2>, scalar_prefetch = 0 : i64, scratch_operands = 0 : i64, tpu.core_type = #tpu.core_type<tc>, window_params = [{transform_indices = @transform_0, window_bounds = array<i64: 1, 16, 128>}, {pipeline_mode = #tpu.pipeline_mode<synchronous>, transform_indices = @transform_1, window_bounds = array<i64: 128, 384>}, {pipeline_mode = #tpu.pipeline_mode<synchronous>, transform_indices = @transform_2, window_bounds = array<i64: 1, 384>}, {pipeline_mode = #tpu.pipeline_mode<synchronous>, transform_indices = @transform_3, window_bounds = array<i64: 128, 128>}, {pipeline_mode = #tpu.pipeline_mode<synchronous>, transform_indices = @transform_4, window_bounds = array<i64: 1, 128>}, {pipeline_mode = #tpu.pipeline_mode<synchronous>, transform_indices = @transform_5, window_bounds = array<i64: 1, 128>}, {pipeline_mode = #tpu.pipeline_mode<synchronous>, transform_indices = @transform_6, window_bounds = array<i64: 1, 128>}, {pipeline_mode = #tpu.pipeline_mode<synchronous>, transform_indices = @transform_7, window_bounds = array<i64: 128, 512>}, {pipeline_mode = #tpu.pipeline_mode<synchronous>, transform_indices = @transform_8, window_bounds = array<i64: 1, 512>}, {pipeline_mode = #tpu.pipeline_mode<synchronous>, transform_indices = @transform_9, window_bounds = array<i64: 512, 128>}, {pipeline_mode = #tpu.pipeline_mode<synchronous>, transform_indices = @transform_10, window_bounds = array<i64: 1, 128>}, {pipeline_mode = #tpu.pipeline_mode<synchronous>, transform_indices = @transform_11, window_bounds = array<i64: 1, 128>}, {pipeline_mode = #tpu.pipeline_mode<synchronous>, transform_indices = @transform_12, window_bounds = array<i64: 1, 128>}, {pipeline_mode = #tpu.pipeline_mode<synchronous>, transform_indices = @transform_13, window_bounds = array<i64: 128, 32>}, {pipeline_mode = #tpu.pipeline_mode<synchronous>, transform_indices = @transform_14, window_bounds = array<i64: 5, 32>}, {pipeline_mode = #tpu.pipeline_mode<synchronous>, transform_indices = @transform_15, window_bounds = array<i64: 32, 128>}, {pipeline_mode = #tpu.pipeline_mode<synchronous>, transform_indices = @transform_16, window_bounds = array<i64: 1, 128>}, {transform_indices = @transform_17, window_bounds = array<i64: 1, 16, 128>}]} {
    %c0 = arith.constant 0 : index
    %c0_0 = arith.constant 0 : index
    %c0_1 = arith.constant 0 : index
    %0 = vector.load %arg1[%c0, %c0_0, %c0_1] : memref<1x16x128xf32, #tpu.memory_space<vmem>>, vector<1x16x128xf32>
    %1 = vector.shape_cast %0 : vector<1x16x128xf32> to vector<16x128xf32>
    %2 = arith.truncf %1 : vector<16x128xf32> to vector<16x128xbf16>
    %c0_2 = arith.constant 0 : index
    %c0_3 = arith.constant 0 : index
    %3 = vector.load %arg2[%c0_2, %c0_3] : memref<128x384xbf16, #tpu.memory_space<vmem>>, vector<128x384xbf16>
    %cst = arith.constant dense<0.000000e+00> : vector<16x384xf32>
    %4 = tpu.matmul %2, %3, %cst {dimension_numbers = #tpu.dot_dimension_numbers<[1], [0], [0], [1], [0, 0, 1, 1], [], []>} : vector<16x128xbf16>, vector<128x384xbf16>, vector<16x384xf32> -> vector<16x384xf32>
    %c0_4 = arith.constant 0 : index
    %c0_5 = arith.constant 0 : index
    %5 = vector.load %arg3[%c0_4, %c0_5] : memref<1x384xf32, #tpu.memory_space<vmem>>, vector<1x384xf32>
    %6 = vector.broadcast %5 : vector<1x384xf32> to vector<16x384xf32>
    %7 = arith.addf %4, %6 : vector<16x384xf32>
    %8 = arith.truncf %7 : vector<16x384xf32> to vector<16x384xbf16>
    %c0_6 = arith.constant 0 : index
    %c0_7 = arith.constant 0 : index
    %9 = vector.load %arg4[%c0_6, %c0_7] : memref<128x128xbf16, #tpu.memory_space<vmem>>, vector<128x128xbf16>
    %cst_8 = arith.constant 0.000000e+00 : f32
    %10 = vector.broadcast %cst_8 : f32 to vector<16x128xf32>
    %11 = vector.extract_strided_slice %8 {offsets = [0, 0], sizes = [16, 16], strides = [1, 1]} : vector<16x384xbf16> to vector<16x16xbf16>
    %12 = vector.extract_strided_slice %8 {offsets = [0, 128], sizes = [16, 16], strides = [1, 1]} : vector<16x384xbf16> to vector<16x16xbf16>
    %13 = vector.extract_strided_slice %8 {offsets = [0, 256], sizes = [16, 16], strides = [1, 1]} : vector<16x384xbf16> to vector<16x16xbf16>
    %cst_9 = arith.constant dense<0.000000e+00> : vector<16x16xf32>
    %14 = tpu.matmul %11, %12, %cst_9 {dimension_numbers = #tpu.dot_dimension_numbers<[1], [1], [0], [0], [0, 0, 1, 0], [], []>} : vector<16x16xbf16>, vector<16x16xbf16>, vector<16x16xf32> -> vector<16x16xf32>
    %cst_10 = arith.constant 2.500000e-01 : f32
    %15 = vector.broadcast %cst_10 : f32 to vector<16x16xf32>
    %16 = arith.mulf %14, %15 : vector<16x16xf32>
    %cst_11 = arith.constant dense<0xFF800000> : vector<16xf32>
    %17 = vector.multi_reduction <maximumf>, %16, %cst_11 [1] : vector<16x16xf32> to vector<16xf32>
    %18 = vector.shape_cast %17 : vector<16xf32> to vector<16x1xf32>
    %19 = vector.broadcast %18 : vector<16x1xf32> to vector<16x16xf32>
    %20 = arith.subf %16, %19 : vector<16x16xf32>
    %21 = math.exp %20 : vector<16x16xf32>
    %cst_12 = arith.constant dense<0.000000e+00> : vector<16xf32>
    %22 = vector.multi_reduction <add>, %21, %cst_12 [1] : vector<16x16xf32> to vector<16xf32>
    %23 = vector.shape_cast %22 : vector<16xf32> to vector<16x1xf32>
    %24 = arith.truncf %21 : vector<16x16xf32> to vector<16x16xbf16>
    %cst_13 = arith.constant dense<0.000000e+00> : vector<16x16xf32>
    %25 = tpu.matmul %24, %13, %cst_13 {dimension_numbers = #tpu.dot_dimension_numbers<[1], [0], [0], [1], [0, 0, 1, 1], [], []>} : vector<16x16xbf16>, vector<16x16xbf16>, vector<16x16xf32> -> vector<16x16xf32>
    %26 = vector.broadcast %23 : vector<16x1xf32> to vector<16x16xf32>
    %27 = arith.divf %25, %26 : vector<16x16xf32>
    %28 = arith.truncf %27 : vector<16x16xf32> to vector<16x16xbf16>
    %29 = vector.extract_strided_slice %9 {offsets = [0, 0], sizes = [16, 128], strides = [1, 1]} : vector<128x128xbf16> to vector<16x128xbf16>
    %cst_14 = arith.constant dense<0.000000e+00> : vector<16x128xf32>
    %30 = tpu.matmul %28, %29, %cst_14 {dimension_numbers = #tpu.dot_dimension_numbers<[1], [0], [0], [1], [0, 0, 1, 1], [], []>} : vector<16x16xbf16>, vector<16x128xbf16>, vector<16x128xf32> -> vector<16x128xf32>
    %31 = arith.addf %10, %30 : vector<16x128xf32>
    %32 = vector.extract_strided_slice %8 {offsets = [0, 16], sizes = [16, 16], strides = [1, 1]} : vector<16x384xbf16> to vector<16x16xbf16>
    %33 = vector.extract_strided_slice %8 {offsets = [0, 144], sizes = [16, 16], strides = [1, 1]} : vector<16x384xbf16> to vector<16x16xbf16>
    %34 = vector.extract_strided_slice %8 {offsets = [0, 272], sizes = [16, 16], strides = [1, 1]} : vector<16x384xbf16> to vector<16x16xbf16>
    %cst_15 = arith.constant dense<0.000000e+00> : vector<16x16xf32>
    %35 = tpu.matmul %32, %33, %cst_15 {dimension_numbers = #tpu.dot_dimension_numbers<[1], [1], [0], [0], [0, 0, 1, 0], [], []>} : vector<16x16xbf16>, vector<16x16xbf16>, vector<16x16xf32> -> vector<16x16xf32>
    %cst_16 = arith.constant 2.500000e-01 : f32
    %36 = vector.broadcast %cst_16 : f32 to vector<16x16xf32>
    %37 = arith.mulf %35, %36 : vector<16x16xf32>
    %cst_17 = arith.constant dense<0xFF800000> : vector<16xf32>
    %38 = vector.multi_reduction <maximumf>, %37, %cst_17 [1] : vector<16x16xf32> to vector<16xf32>
    %39 = vector.shape_cast %38 : vector<16xf32> to vector<16x1xf32>
    %40 = vector.broadcast %39 : vector<16x1xf32> to vector<16x16xf32>
    %41 = arith.subf %37, %40 : vector<16x16xf32>
    %42 = math.exp %41 : vector<16x16xf32>
    %cst_18 = arith.constant dense<0.000000e+00> : vector<16xf32>
    %43 = vector.multi_reduction <add>, %42, %cst_18 [1] : vector<16x16xf32> to vector<16xf32>
    %44 = vector.shape_cast %43 : vector<16xf32> to vector<16x1xf32>
    %45 = arith.truncf %42 : vector<16x16xf32> to vector<16x16xbf16>
    %cst_19 = arith.constant dense<0.000000e+00> : vector<16x16xf32>
    %46 = tpu.matmul %45, %34, %cst_19 {dimension_numbers = #tpu.dot_dimension_numbers<[1], [0], [0], [1], [0, 0, 1, 1], [], []>} : vector<16x16xbf16>, vector<16x16xbf16>, vector<16x16xf32> -> vector<16x16xf32>
    %47 = vector.broadcast %44 : vector<16x1xf32> to vector<16x16xf32>
    %48 = arith.divf %46, %47 : vector<16x16xf32>
    %49 = arith.truncf %48 : vector<16x16xf32> to vector<16x16xbf16>
    %50 = vector.extract_strided_slice %9 {offsets = [16, 0], sizes = [16, 128], strides = [1, 1]} : vector<128x128xbf16> to vector<16x128xbf16>
    %cst_20 = arith.constant dense<0.000000e+00> : vector<16x128xf32>
    %51 = tpu.matmul %49, %50, %cst_20 {dimension_numbers = #tpu.dot_dimension_numbers<[1], [0], [0], [1], [0, 0, 1, 1], [], []>} : vector<16x16xbf16>, vector<16x128xbf16>, vector<16x128xf32> -> vector<16x128xf32>
    %52 = arith.addf %31, %51 : vector<16x128xf32>
    %53 = vector.extract_strided_slice %8 {offsets = [0, 32], sizes = [16, 16], strides = [1, 1]} : vector<16x384xbf16> to vector<16x16xbf16>
    %54 = vector.extract_strided_slice %8 {offsets = [0, 160], sizes = [16, 16], strides = [1, 1]} : vector<16x384xbf16> to vector<16x16xbf16>
    %55 = vector.extract_strided_slice %8 {offsets = [0, 288], sizes = [16, 16], strides = [1, 1]} : vector<16x384xbf16> to vector<16x16xbf16>
    %cst_21 = arith.constant dense<0.000000e+00> : vector<16x16xf32>
    %56 = tpu.matmul %53, %54, %cst_21 {dimension_numbers = #tpu.dot_dimension_numbers<[1], [1], [0], [0], [0, 0, 1, 0], [], []>} : vector<16x16xbf16>, vector<16x16xbf16>, vector<16x16xf32> -> vector<16x16xf32>
    %cst_22 = arith.constant 2.500000e-01 : f32
    %57 = vector.broadcast %cst_22 : f32 to vector<16x16xf32>
    %58 = arith.mulf %56, %57 : vector<16x16xf32>
    %cst_23 = arith.constant dense<0xFF800000> : vector<16xf32>
    %59 = vector.multi_reduction <maximumf>, %58, %cst_23 [1] : vector<16x16xf32> to vector<16xf32>
    %60 = vector.shape_cast %59 : vector<16xf32> to vector<16x1xf32>
    %61 = vector.broadcast %60 : vector<16x1xf32> to vector<16x16xf32>
    %62 = arith.subf %58, %61 : vector<16x16xf32>
    %63 = math.exp %62 : vector<16x16xf32>
    %cst_24 = arith.constant dense<0.000000e+00> : vector<16xf32>
    %64 = vector.multi_reduction <add>, %63, %cst_24 [1] : vector<16x16xf32> to vector<16xf32>
    %65 = vector.shape_cast %64 : vector<16xf32> to vector<16x1xf32>
    %66 = arith.truncf %63 : vector<16x16xf32> to vector<16x16xbf16>
    %cst_25 = arith.constant dense<0.000000e+00> : vector<16x16xf32>
    %67 = tpu.matmul %66, %55, %cst_25 {dimension_numbers = #tpu.dot_dimension_numbers<[1], [0], [0], [1], [0, 0, 1, 1], [], []>} : vector<16x16xbf16>, vector<16x16xbf16>, vector<16x16xf32> -> vector<16x16xf32>
    %68 = vector.broadcast %65 : vector<16x1xf32> to vector<16x16xf32>
    %69 = arith.divf %67, %68 : vector<16x16xf32>
    %70 = arith.truncf %69 : vector<16x16xf32> to vector<16x16xbf16>
    %71 = vector.extract_strided_slice %9 {offsets = [32, 0], sizes = [16, 128], strides = [1, 1]} : vector<128x128xbf16> to vector<16x128xbf16>
    %cst_26 = arith.constant dense<0.000000e+00> : vector<16x128xf32>
    %72 = tpu.matmul %70, %71, %cst_26 {dimension_numbers = #tpu.dot_dimension_numbers<[1], [0], [0], [1], [0, 0, 1, 1], [], []>} : vector<16x16xbf16>, vector<16x128xbf16>, vector<16x128xf32> -> vector<16x128xf32>
    %73 = arith.addf %52, %72 : vector<16x128xf32>
    %74 = vector.extract_strided_slice %8 {offsets = [0, 48], sizes = [16, 16], strides = [1, 1]} : vector<16x384xbf16> to vector<16x16xbf16>
    %75 = vector.extract_strided_slice %8 {offsets = [0, 176], sizes = [16, 16], strides = [1, 1]} : vector<16x384xbf16> to vector<16x16xbf16>
    %76 = vector.extract_strided_slice %8 {offsets = [0, 304], sizes = [16, 16], strides = [1, 1]} : vector<16x384xbf16> to vector<16x16xbf16>
    %cst_27 = arith.constant dense<0.000000e+00> : vector<16x16xf32>
    %77 = tpu.matmul %74, %75, %cst_27 {dimension_numbers = #tpu.dot_dimension_numbers<[1], [1], [0], [0], [0, 0, 1, 0], [], []>} : vector<16x16xbf16>, vector<16x16xbf16>, vector<16x16xf32> -> vector<16x16xf32>
    %cst_28 = arith.constant 2.500000e-01 : f32
    %78 = vector.broadcast %cst_28 : f32 to vector<16x16xf32>
    %79 = arith.mulf %77, %78 : vector<16x16xf32>
    %cst_29 = arith.constant dense<0xFF800000> : vector<16xf32>
    %80 = vector.multi_reduction <maximumf>, %79, %cst_29 [1] : vector<16x16xf32> to vector<16xf32>
    %81 = vector.shape_cast %80 : vector<16xf32> to vector<16x1xf32>
    %82 = vector.broadcast %81 : vector<16x1xf32> to vector<16x16xf32>
    %83 = arith.subf %79, %82 : vector<16x16xf32>
    %84 = math.exp %83 : vector<16x16xf32>
    %cst_30 = arith.constant dense<0.000000e+00> : vector<16xf32>
    %85 = vector.multi_reduction <add>, %84, %cst_30 [1] : vector<16x16xf32> to vector<16xf32>
    %86 = vector.shape_cast %85 : vector<16xf32> to vector<16x1xf32>
    %87 = arith.truncf %84 : vector<16x16xf32> to vector<16x16xbf16>
    %cst_31 = arith.constant dense<0.000000e+00> : vector<16x16xf32>
    %88 = tpu.matmul %87, %76, %cst_31 {dimension_numbers = #tpu.dot_dimension_numbers<[1], [0], [0], [1], [0, 0, 1, 1], [], []>} : vector<16x16xbf16>, vector<16x16xbf16>, vector<16x16xf32> -> vector<16x16xf32>
    %89 = vector.broadcast %86 : vector<16x1xf32> to vector<16x16xf32>
    %90 = arith.divf %88, %89 : vector<16x16xf32>
    %91 = arith.truncf %90 : vector<16x16xf32> to vector<16x16xbf16>
    %92 = vector.extract_strided_slice %9 {offsets = [48, 0], sizes = [16, 128], strides = [1, 1]} : vector<128x128xbf16> to vector<16x128xbf16>
    %cst_32 = arith.constant dense<0.000000e+00> : vector<16x128xf32>
    %93 = tpu.matmul %91, %92, %cst_32 {dimension_numbers = #tpu.dot_dimension_numbers<[1], [0], [0], [1], [0, 0, 1, 1], [], []>} : vector<16x16xbf16>, vector<16x128xbf16>, vector<16x128xf32> -> vector<16x128xf32>
    %94 = arith.addf %73, %93 : vector<16x128xf32>
    %95 = vector.extract_strided_slice %8 {offsets = [0, 64], sizes = [16, 16], strides = [1, 1]} : vector<16x384xbf16> to vector<16x16xbf16>
    %96 = vector.extract_strided_slice %8 {offsets = [0, 192], sizes = [16, 16], strides = [1, 1]} : vector<16x384xbf16> to vector<16x16xbf16>
    %97 = vector.extract_strided_slice %8 {offsets = [0, 320], sizes = [16, 16], strides = [1, 1]} : vector<16x384xbf16> to vector<16x16xbf16>
    %cst_33 = arith.constant dense<0.000000e+00> : vector<16x16xf32>
    %98 = tpu.matmul %95, %96, %cst_33 {dimension_numbers = #tpu.dot_dimension_numbers<[1], [1], [0], [0], [0, 0, 1, 0], [], []>} : vector<16x16xbf16>, vector<16x16xbf16>, vector<16x16xf32> -> vector<16x16xf32>
    %cst_34 = arith.constant 2.500000e-01 : f32
    %99 = vector.broadcast %cst_34 : f32 to vector<16x16xf32>
    %100 = arith.mulf %98, %99 : vector<16x16xf32>
    %cst_35 = arith.constant dense<0xFF800000> : vector<16xf32>
    %101 = vector.multi_reduction <maximumf>, %100, %cst_35 [1] : vector<16x16xf32> to vector<16xf32>
    %102 = vector.shape_cast %101 : vector<16xf32> to vector<16x1xf32>
    %103 = vector.broadcast %102 : vector<16x1xf32> to vector<16x16xf32>
    %104 = arith.subf %100, %103 : vector<16x16xf32>
    %105 = math.exp %104 : vector<16x16xf32>
    %cst_36 = arith.constant dense<0.000000e+00> : vector<16xf32>
    %106 = vector.multi_reduction <add>, %105, %cst_36 [1] : vector<16x16xf32> to vector<16xf32>
    %107 = vector.shape_cast %106 : vector<16xf32> to vector<16x1xf32>
    %108 = arith.truncf %105 : vector<16x16xf32> to vector<16x16xbf16>
    %cst_37 = arith.constant dense<0.000000e+00> : vector<16x16xf32>
    %109 = tpu.matmul %108, %97, %cst_37 {dimension_numbers = #tpu.dot_dimension_numbers<[1], [0], [0], [1], [0, 0, 1, 1], [], []>} : vector<16x16xbf16>, vector<16x16xbf16>, vector<16x16xf32> -> vector<16x16xf32>
    %110 = vector.broadcast %107 : vector<16x1xf32> to vector<16x16xf32>
    %111 = arith.divf %109, %110 : vector<16x16xf32>
    %112 = arith.truncf %111 : vector<16x16xf32> to vector<16x16xbf16>
    %113 = vector.extract_strided_slice %9 {offsets = [64, 0], sizes = [16, 128], strides = [1, 1]} : vector<128x128xbf16> to vector<16x128xbf16>
    %cst_38 = arith.constant dense<0.000000e+00> : vector<16x128xf32>
    %114 = tpu.matmul %112, %113, %cst_38 {dimension_numbers = #tpu.dot_dimension_numbers<[1], [0], [0], [1], [0, 0, 1, 1], [], []>} : vector<16x16xbf16>, vector<16x128xbf16>, vector<16x128xf32> -> vector<16x128xf32>
    %115 = arith.addf %94, %114 : vector<16x128xf32>
    %116 = vector.extract_strided_slice %8 {offsets = [0, 80], sizes = [16, 16], strides = [1, 1]} : vector<16x384xbf16> to vector<16x16xbf16>
    %117 = vector.extract_strided_slice %8 {offsets = [0, 208], sizes = [16, 16], strides = [1, 1]} : vector<16x384xbf16> to vector<16x16xbf16>
    %118 = vector.extract_strided_slice %8 {offsets = [0, 336], sizes = [16, 16], strides = [1, 1]} : vector<16x384xbf16> to vector<16x16xbf16>
    %cst_39 = arith.constant dense<0.000000e+00> : vector<16x16xf32>
    %119 = tpu.matmul %116, %117, %cst_39 {dimension_numbers = #tpu.dot_dimension_numbers<[1], [1], [0], [0], [0, 0, 1, 0], [], []>} : vector<16x16xbf16>, vector<16x16xbf16>, vector<16x16xf32> -> vector<16x16xf32>
    %cst_40 = arith.constant 2.500000e-01 : f32
    %120 = vector.broadcast %cst_40 : f32 to vector<16x16xf32>
    %121 = arith.mulf %119, %120 : vector<16x16xf32>
    %cst_41 = arith.constant dense<0xFF800000> : vector<16xf32>
    %122 = vector.multi_reduction <maximumf>, %121, %cst_41 [1] : vector<16x16xf32> to vector<16xf32>
    %123 = vector.shape_cast %122 : vector<16xf32> to vector<16x1xf32>
    %124 = vector.broadcast %123 : vector<16x1xf32> to vector<16x16xf32>
    %125 = arith.subf %121, %124 : vector<16x16xf32>
    %126 = math.exp %125 : vector<16x16xf32>
    %cst_42 = arith.constant dense<0.000000e+00> : vector<16xf32>
    %127 = vector.multi_reduction <add>, %126, %cst_42 [1] : vector<16x16xf32> to vector<16xf32>
    %128 = vector.shape_cast %127 : vector<16xf32> to vector<16x1xf32>
    %129 = arith.truncf %126 : vector<16x16xf32> to vector<16x16xbf16>
    %cst_43 = arith.constant dense<0.000000e+00> : vector<16x16xf32>
    %130 = tpu.matmul %129, %118, %cst_43 {dimension_numbers = #tpu.dot_dimension_numbers<[1], [0], [0], [1], [0, 0, 1, 1], [], []>} : vector<16x16xbf16>, vector<16x16xbf16>, vector<16x16xf32> -> vector<16x16xf32>
    %131 = vector.broadcast %128 : vector<16x1xf32> to vector<16x16xf32>
    %132 = arith.divf %130, %131 : vector<16x16xf32>
    %133 = arith.truncf %132 : vector<16x16xf32> to vector<16x16xbf16>
    %134 = vector.extract_strided_slice %9 {offsets = [80, 0], sizes = [16, 128], strides = [1, 1]} : vector<128x128xbf16> to vector<16x128xbf16>
    %cst_44 = arith.constant dense<0.000000e+00> : vector<16x128xf32>
    %135 = tpu.matmul %133, %134, %cst_44 {dimension_numbers = #tpu.dot_dimension_numbers<[1], [0], [0], [1], [0, 0, 1, 1], [], []>} : vector<16x16xbf16>, vector<16x128xbf16>, vector<16x128xf32> -> vector<16x128xf32>
    %136 = arith.addf %115, %135 : vector<16x128xf32>
    %137 = vector.extract_strided_slice %8 {offsets = [0, 96], sizes = [16, 16], strides = [1, 1]} : vector<16x384xbf16> to vector<16x16xbf16>
    %138 = vector.extract_strided_slice %8 {offsets = [0, 224], sizes = [16, 16], strides = [1, 1]} : vector<16x384xbf16> to vector<16x16xbf16>
    %139 = vector.extract_strided_slice %8 {offsets = [0, 352], sizes = [16, 16], strides = [1, 1]} : vector<16x384xbf16> to vector<16x16xbf16>
    %cst_45 = arith.constant dense<0.000000e+00> : vector<16x16xf32>
    %140 = tpu.matmul %137, %138, %cst_45 {dimension_numbers = #tpu.dot_dimension_numbers<[1], [1], [0], [0], [0, 0, 1, 0], [], []>} : vector<16x16xbf16>, vector<16x16xbf16>, vector<16x16xf32> -> vector<16x16xf32>
    %cst_46 = arith.constant 2.500000e-01 : f32
    %141 = vector.broadcast %cst_46 : f32 to vector<16x16xf32>
    %142 = arith.mulf %140, %141 : vector<16x16xf32>
    %cst_47 = arith.constant dense<0xFF800000> : vector<16xf32>
    %143 = vector.multi_reduction <maximumf>, %142, %cst_47 [1] : vector<16x16xf32> to vector<16xf32>
    %144 = vector.shape_cast %143 : vector<16xf32> to vector<16x1xf32>
    %145 = vector.broadcast %144 : vector<16x1xf32> to vector<16x16xf32>
    %146 = arith.subf %142, %145 : vector<16x16xf32>
    %147 = math.exp %146 : vector<16x16xf32>
    %cst_48 = arith.constant dense<0.000000e+00> : vector<16xf32>
    %148 = vector.multi_reduction <add>, %147, %cst_48 [1] : vector<16x16xf32> to vector<16xf32>
    %149 = vector.shape_cast %148 : vector<16xf32> to vector<16x1xf32>
    %150 = arith.truncf %147 : vector<16x16xf32> to vector<16x16xbf16>
    %cst_49 = arith.constant dense<0.000000e+00> : vector<16x16xf32>
    %151 = tpu.matmul %150, %139, %cst_49 {dimension_numbers = #tpu.dot_dimension_numbers<[1], [0], [0], [1], [0, 0, 1, 1], [], []>} : vector<16x16xbf16>, vector<16x16xbf16>, vector<16x16xf32> -> vector<16x16xf32>
    %152 = vector.broadcast %149 : vector<16x1xf32> to vector<16x16xf32>
    %153 = arith.divf %151, %152 : vector<16x16xf32>
    %154 = arith.truncf %153 : vector<16x16xf32> to vector<16x16xbf16>
    %155 = vector.extract_strided_slice %9 {offsets = [96, 0], sizes = [16, 128], strides = [1, 1]} : vector<128x128xbf16> to vector<16x128xbf16>
    %cst_50 = arith.constant dense<0.000000e+00> : vector<16x128xf32>
    %156 = tpu.matmul %154, %155, %cst_50 {dimension_numbers = #tpu.dot_dimension_numbers<[1], [0], [0], [1], [0, 0, 1, 1], [], []>} : vector<16x16xbf16>, vector<16x128xbf16>, vector<16x128xf32> -> vector<16x128xf32>
    %157 = arith.addf %136, %156 : vector<16x128xf32>
    %158 = vector.extract_strided_slice %8 {offsets = [0, 112], sizes = [16, 16], strides = [1, 1]} : vector<16x384xbf16> to vector<16x16xbf16>
    %159 = vector.extract_strided_slice %8 {offsets = [0, 240], sizes = [16, 16], strides = [1, 1]} : vector<16x384xbf16> to vector<16x16xbf16>
    %160 = vector.extract_strided_slice %8 {offsets = [0, 368], sizes = [16, 16], strides = [1, 1]} : vector<16x384xbf16> to vector<16x16xbf16>
    %cst_51 = arith.constant dense<0.000000e+00> : vector<16x16xf32>
    %161 = tpu.matmul %158, %159, %cst_51 {dimension_numbers = #tpu.dot_dimension_numbers<[1], [1], [0], [0], [0, 0, 1, 0], [], []>} : vector<16x16xbf16>, vector<16x16xbf16>, vector<16x16xf32> -> vector<16x16xf32>
    %cst_52 = arith.constant 2.500000e-01 : f32
    %162 = vector.broadcast %cst_52 : f32 to vector<16x16xf32>
    %163 = arith.mulf %161, %162 : vector<16x16xf32>
    %cst_53 = arith.constant dense<0xFF800000> : vector<16xf32>
    %164 = vector.multi_reduction <maximumf>, %163, %cst_53 [1] : vector<16x16xf32> to vector<16xf32>
    %165 = vector.shape_cast %164 : vector<16xf32> to vector<16x1xf32>
    %166 = vector.broadcast %165 : vector<16x1xf32> to vector<16x16xf32>
    %167 = arith.subf %163, %166 : vector<16x16xf32>
    %168 = math.exp %167 : vector<16x16xf32>
    %cst_54 = arith.constant dense<0.000000e+00> : vector<16xf32>
    %169 = vector.multi_reduction <add>, %168, %cst_54 [1] : vector<16x16xf32> to vector<16xf32>
    %170 = vector.shape_cast %169 : vector<16xf32> to vector<16x1xf32>
    %171 = arith.truncf %168 : vector<16x16xf32> to vector<16x16xbf16>
    %cst_55 = arith.constant dense<0.000000e+00> : vector<16x16xf32>
    %172 = tpu.matmul %171, %160, %cst_55 {dimension_numbers = #tpu.dot_dimension_numbers<[1], [0], [0], [1], [0, 0, 1, 1], [], []>} : vector<16x16xbf16>, vector<16x16xbf16>, vector<16x16xf32> -> vector<16x16xf32>
    %173 = vector.broadcast %170 : vector<16x1xf32> to vector<16x16xf32>
    %174 = arith.divf %172, %173 : vector<16x16xf32>
    %175 = arith.truncf %174 : vector<16x16xf32> to vector<16x16xbf16>
    %176 = vector.extract_strided_slice %9 {offsets = [112, 0], sizes = [16, 128], strides = [1, 1]} : vector<128x128xbf16> to vector<16x128xbf16>
    %cst_56 = arith.constant dense<0.000000e+00> : vector<16x128xf32>
    %177 = tpu.matmul %175, %176, %cst_56 {dimension_numbers = #tpu.dot_dimension_numbers<[1], [0], [0], [1], [0, 0, 1, 1], [], []>} : vector<16x16xbf16>, vector<16x128xbf16>, vector<16x128xf32> -> vector<16x128xf32>
    %178 = arith.addf %157, %177 : vector<16x128xf32>
    %c0_57 = arith.constant 0 : index
    %c0_58 = arith.constant 0 : index
    %179 = vector.load %arg5[%c0_57, %c0_58] : memref<1x128xf32, #tpu.memory_space<vmem>>, vector<1x128xf32>
    %180 = vector.broadcast %179 : vector<1x128xf32> to vector<16x128xf32>
    %181 = arith.addf %178, %180 : vector<16x128xf32>
    %182 = arith.addf %1, %181 : vector<16x128xf32>
    %cst_59 = arith.constant dense<0.000000e+00> : vector<16xf32>
    %183 = vector.multi_reduction <add>, %182, %cst_59 [1] : vector<16x128xf32> to vector<16xf32>
    %184 = vector.shape_cast %183 : vector<16xf32> to vector<16x1xf32>
    %cst_60 = arith.constant 1.280000e+02 : f32
    %185 = vector.broadcast %cst_60 : f32 to vector<16x1xf32>
    %186 = arith.divf %184, %185 : vector<16x1xf32>
    %187 = vector.broadcast %186 : vector<16x1xf32> to vector<16x128xf32>
    %188 = arith.subf %182, %187 : vector<16x128xf32>
    %189 = arith.mulf %188, %188 : vector<16x128xf32>
    %cst_61 = arith.constant dense<0.000000e+00> : vector<16xf32>
    %190 = vector.multi_reduction <add>, %189, %cst_61 [1] : vector<16x128xf32> to vector<16xf32>
    %191 = vector.shape_cast %190 : vector<16xf32> to vector<16x1xf32>
    %cst_62 = arith.constant 1.280000e+02 : f32
    %192 = vector.broadcast %cst_62 : f32 to vector<16x1xf32>
    %193 = arith.divf %191, %192 : vector<16x1xf32>
    %cst_63 = arith.constant 9.99999997E-7 : f32
    %194 = vector.broadcast %cst_63 : f32 to vector<16x1xf32>
    %195 = arith.addf %193, %194 : vector<16x1xf32>
    %196 = math.rsqrt %195 : vector<16x1xf32>
    %197 = vector.broadcast %196 : vector<16x1xf32> to vector<16x128xf32>
    %198 = arith.mulf %188, %197 : vector<16x128xf32>
    %c0_64 = arith.constant 0 : index
    %c0_65 = arith.constant 0 : index
    %199 = vector.load %arg6[%c0_64, %c0_65] : memref<1x128xf32, #tpu.memory_space<vmem>>, vector<1x128xf32>
    %200 = vector.broadcast %199 : vector<1x128xf32> to vector<16x128xf32>
    %201 = arith.mulf %198, %200 : vector<16x128xf32>
    %c0_66 = arith.constant 0 : index
    %c0_67 = arith.constant 0 : index
    %202 = vector.load %arg7[%c0_66, %c0_67] : memref<1x128xf32, #tpu.memory_space<vmem>>, vector<1x128xf32>
    %203 = vector.broadcast %202 : vector<1x128xf32> to vector<16x128xf32>
    %204 = arith.addf %201, %203 : vector<16x128xf32>
    %205 = arith.truncf %204 : vector<16x128xf32> to vector<16x128xbf16>
    %c0_68 = arith.constant 0 : index
    %c0_69 = arith.constant 0 : index
    %206 = vector.load %arg8[%c0_68, %c0_69] : memref<128x512xbf16, #tpu.memory_space<vmem>>, vector<128x512xbf16>
    %cst_70 = arith.constant dense<0.000000e+00> : vector<16x512xf32>
    %207 = tpu.matmul %205, %206, %cst_70 {dimension_numbers = #tpu.dot_dimension_numbers<[1], [0], [0], [1], [0, 0, 1, 1], [], []>} : vector<16x128xbf16>, vector<128x512xbf16>, vector<16x512xf32> -> vector<16x512xf32>
    %c0_71 = arith.constant 0 : index
    %c0_72 = arith.constant 0 : index
    %208 = vector.load %arg9[%c0_71, %c0_72] : memref<1x512xf32, #tpu.memory_space<vmem>>, vector<1x512xf32>
    %209 = vector.broadcast %208 : vector<1x512xf32> to vector<16x512xf32>
    %210 = arith.addf %207, %209 : vector<16x512xf32>
    %cst_73 = arith.constant 5.000000e-01 : f32
    %211 = vector.broadcast %cst_73 : f32 to vector<16x512xf32>
    %212 = arith.mulf %211, %210 : vector<16x512xf32>
    %213 = arith.mulf %210, %210 : vector<16x512xf32>
    %214 = arith.mulf %213, %210 : vector<16x512xf32>
    %cst_74 = arith.constant 4.471500e-02 : f32
    %215 = vector.broadcast %cst_74 : f32 to vector<16x512xf32>
    %216 = arith.mulf %215, %214 : vector<16x512xf32>
    %217 = arith.addf %210, %216 : vector<16x512xf32>
    %cst_75 = arith.constant 0.797884583 : f32
    %218 = vector.broadcast %cst_75 : f32 to vector<16x512xf32>
    %219 = arith.mulf %218, %217 : vector<16x512xf32>
    %220 = math.tanh %219 : vector<16x512xf32>
    %cst_76 = arith.constant 1.000000e+00 : f32
    %221 = vector.broadcast %cst_76 : f32 to vector<16x512xf32>
    %222 = arith.addf %221, %220 : vector<16x512xf32>
    %223 = arith.mulf %212, %222 : vector<16x512xf32>
    %224 = arith.truncf %223 : vector<16x512xf32> to vector<16x512xbf16>
    %c0_77 = arith.constant 0 : index
    %c0_78 = arith.constant 0 : index
    %225 = vector.load %arg10[%c0_77, %c0_78] : memref<512x128xbf16, #tpu.memory_space<vmem>>, vector<512x128xbf16>
    %cst_79 = arith.constant dense<0.000000e+00> : vector<16x128xf32>
    %226 = tpu.matmul %224, %225, %cst_79 {dimension_numbers = #tpu.dot_dimension_numbers<[1], [0], [0], [1], [0, 0, 1, 1], [], []>} : vector<16x512xbf16>, vector<512x128xbf16>, vector<16x128xf32> -> vector<16x128xf32>
    %c0_80 = arith.constant 0 : index
    %c0_81 = arith.constant 0 : index
    %227 = vector.load %arg11[%c0_80, %c0_81] : memref<1x128xf32, #tpu.memory_space<vmem>>, vector<1x128xf32>
    %228 = vector.broadcast %227 : vector<1x128xf32> to vector<16x128xf32>
    %229 = arith.addf %226, %228 : vector<16x128xf32>
    %230 = arith.addf %204, %229 : vector<16x128xf32>
    %cst_82 = arith.constant dense<0.000000e+00> : vector<16xf32>
    %231 = vector.multi_reduction <add>, %230, %cst_82 [1] : vector<16x128xf32> to vector<16xf32>
    %232 = vector.shape_cast %231 : vector<16xf32> to vector<16x1xf32>
    %cst_83 = arith.constant 1.280000e+02 : f32
    %233 = vector.broadcast %cst_83 : f32 to vector<16x1xf32>
    %234 = arith.divf %232, %233 : vector<16x1xf32>
    %235 = vector.broadcast %234 : vector<16x1xf32> to vector<16x128xf32>
    %236 = arith.subf %230, %235 : vector<16x128xf32>
    %237 = arith.mulf %236, %236 : vector<16x128xf32>
    %cst_84 = arith.constant dense<0.000000e+00> : vector<16xf32>
    %238 = vector.multi_reduction <add>, %237, %cst_84 [1] : vector<16x128xf32> to vector<16xf32>
    %239 = vector.shape_cast %238 : vector<16xf32> to vector<16x1xf32>
    %cst_85 = arith.constant 1.280000e+02 : f32
    %240 = vector.broadcast %cst_85 : f32 to vector<16x1xf32>
    %241 = arith.divf %239, %240 : vector<16x1xf32>
    %cst_86 = arith.constant 9.99999997E-7 : f32
    %242 = vector.broadcast %cst_86 : f32 to vector<16x1xf32>
    %243 = arith.addf %241, %242 : vector<16x1xf32>
    %244 = math.rsqrt %243 : vector<16x1xf32>
    %245 = vector.broadcast %244 : vector<16x1xf32> to vector<16x128xf32>
    %246 = arith.mulf %236, %245 : vector<16x128xf32>
    %c0_87 = arith.constant 0 : index
    %c0_88 = arith.constant 0 : index
    %247 = vector.load %arg12[%c0_87, %c0_88] : memref<1x128xf32, #tpu.memory_space<vmem>>, vector<1x128xf32>
    %248 = vector.broadcast %247 : vector<1x128xf32> to vector<16x128xf32>
    %249 = arith.mulf %246, %248 : vector<16x128xf32>
    %c0_89 = arith.constant 0 : index
    %c0_90 = arith.constant 0 : index
    %250 = vector.load %arg13[%c0_89, %c0_90] : memref<1x128xf32, #tpu.memory_space<vmem>>, vector<1x128xf32>
    %251 = vector.broadcast %250 : vector<1x128xf32> to vector<16x128xf32>
    %252 = arith.addf %249, %251 : vector<16x128xf32>
    %c0_91 = arith.constant 0 : index
    %c0_92 = arith.constant 0 : index
    %253 = vector.load %arg15[%c0_91, %c0_92] : memref<5x32xf32, #tpu.memory_space<vmem>>, vector<5x32xf32>
    %cst_93 = arith.constant dense<0.000000e+00> : vector<128xf32>
    %254 = vector.multi_reduction <add>, %252, %cst_93 [0] : vector<16x128xf32> to vector<128xf32>
    %255 = vector.shape_cast %254 : vector<128xf32> to vector<1x128xf32>
    %cst_94 = arith.constant 1.600000e+01 : f32
    %256 = vector.broadcast %cst_94 : f32 to vector<1x128xf32>
    %257 = arith.divf %255, %256 : vector<1x128xf32>
    %c0_95 = arith.constant 0 : index
    %c0_96 = arith.constant 0 : index
    %258 = vector.load %arg14[%c0_95, %c0_96] : memref<128x32xf32, #tpu.memory_space<vmem>>, vector<128x32xf32>
    %cst_97 = arith.constant dense<0.000000e+00> : vector<1x32xf32>
    %259 = tpu.matmul %257, %258, %cst_97 {dimension_numbers = #tpu.dot_dimension_numbers<[1], [0], [0], [1], [0, 0, 1, 1], [], []>} : vector<1x128xf32>, vector<128x32xf32>, vector<1x32xf32> -> vector<1x32xf32>
    %260 = vector.extract_strided_slice %253 {offsets = [0, 0], sizes = [1, 32], strides = [1, 1]} : vector<5x32xf32> to vector<1x32xf32>
    %261 = arith.mulf %259, %260 : vector<1x32xf32>
    %262 = vector.extract_strided_slice %253 {offsets = [1, 0], sizes = [1, 32], strides = [1, 1]} : vector<5x32xf32> to vector<1x32xf32>
    %263 = arith.addf %261, %262 : vector<1x32xf32>
    %cst_98 = arith.constant 5.000000e-01 : f32
    %264 = vector.broadcast %cst_98 : f32 to vector<1x32xf32>
    %265 = arith.mulf %264, %263 : vector<1x32xf32>
    %266 = arith.mulf %263, %263 : vector<1x32xf32>
    %267 = arith.mulf %266, %263 : vector<1x32xf32>
    %cst_99 = arith.constant 4.471500e-02 : f32
    %268 = vector.broadcast %cst_99 : f32 to vector<1x32xf32>
    %269 = arith.mulf %268, %267 : vector<1x32xf32>
    %270 = arith.addf %263, %269 : vector<1x32xf32>
    %cst_100 = arith.constant 0.797884583 : f32
    %271 = vector.broadcast %cst_100 : f32 to vector<1x32xf32>
    %272 = arith.mulf %271, %270 : vector<1x32xf32>
    %273 = math.tanh %272 : vector<1x32xf32>
    %cst_101 = arith.constant 1.000000e+00 : f32
    %274 = vector.broadcast %cst_101 : f32 to vector<1x32xf32>
    %275 = arith.addf %274, %273 : vector<1x32xf32>
    %276 = arith.mulf %265, %275 : vector<1x32xf32>
    %277 = vector.extract_strided_slice %253 {offsets = [2, 0], sizes = [1, 32], strides = [1, 1]} : vector<5x32xf32> to vector<1x32xf32>
    %278 = arith.mulf %276, %277 : vector<1x32xf32>
    %279 = vector.extract_strided_slice %253 {offsets = [3, 0], sizes = [1, 32], strides = [1, 1]} : vector<5x32xf32> to vector<1x32xf32>
    %280 = arith.mulf %278, %279 : vector<1x32xf32>
    %281 = vector.extract_strided_slice %253 {offsets = [4, 0], sizes = [1, 32], strides = [1, 1]} : vector<5x32xf32> to vector<1x32xf32>
    %282 = arith.addf %280, %281 : vector<1x32xf32>
    %cst_102 = arith.constant 5.000000e-01 : f32
    %283 = vector.broadcast %cst_102 : f32 to vector<1x32xf32>
    %284 = arith.mulf %283, %282 : vector<1x32xf32>
    %285 = arith.mulf %282, %282 : vector<1x32xf32>
    %286 = arith.mulf %285, %282 : vector<1x32xf32>
    %cst_103 = arith.constant 4.471500e-02 : f32
    %287 = vector.broadcast %cst_103 : f32 to vector<1x32xf32>
    %288 = arith.mulf %287, %286 : vector<1x32xf32>
    %289 = arith.addf %282, %288 : vector<1x32xf32>
    %cst_104 = arith.constant 0.797884583 : f32
    %290 = vector.broadcast %cst_104 : f32 to vector<1x32xf32>
    %291 = arith.mulf %290, %289 : vector<1x32xf32>
    %292 = math.tanh %291 : vector<1x32xf32>
    %cst_105 = arith.constant 1.000000e+00 : f32
    %293 = vector.broadcast %cst_105 : f32 to vector<1x32xf32>
    %294 = arith.addf %293, %292 : vector<1x32xf32>
    %295 = arith.mulf %284, %294 : vector<1x32xf32>
    %c0_106 = arith.constant 0 : index
    %c0_107 = arith.constant 0 : index
    %296 = vector.load %arg16[%c0_106, %c0_107] : memref<32x128xf32, #tpu.memory_space<vmem>>, vector<32x128xf32>
    %cst_108 = arith.constant dense<0.000000e+00> : vector<1x128xf32>
    %297 = tpu.matmul %295, %296, %cst_108 {dimension_numbers = #tpu.dot_dimension_numbers<[1], [0], [0], [1], [0, 0, 1, 1], [], []>} : vector<1x32xf32>, vector<32x128xf32>, vector<1x128xf32> -> vector<1x128xf32>
    %c0_109 = arith.constant 0 : index
    %c0_110 = arith.constant 0 : index
    %298 = vector.load %arg17[%c0_109, %c0_110] : memref<1x128xf32, #tpu.memory_space<vmem>>, vector<1x128xf32>
    %299 = arith.addf %297, %298 : vector<1x128xf32>
    %cst_111 = arith.constant 0.000000e+00 : f32
    %300 = vector.broadcast %cst_111 : f32 to vector<1x128xf32>
    %301 = arith.subf %300, %299 : vector<1x128xf32>
    %302 = math.exp %301 : vector<1x128xf32>
    %cst_112 = arith.constant 1.000000e+00 : f32
    %303 = vector.broadcast %cst_112 : f32 to vector<1x128xf32>
    %304 = arith.addf %303, %302 : vector<1x128xf32>
    %cst_113 = arith.constant 1.000000e+00 : f32
    %305 = vector.broadcast %cst_113 : f32 to vector<1x128xf32>
    %306 = arith.divf %305, %304 : vector<1x128xf32>
    %307 = vector.broadcast %306 : vector<1x128xf32> to vector<16x128xf32>
    %308 = arith.mulf %252, %307 : vector<16x128xf32>
    %c0_114 = arith.constant 0 : index
    %c0_115 = arith.constant 0 : index
    %c0_116 = arith.constant 0 : index
    %309 = vector.load %arg18[%c0_114, %c0_115, %c0_116] : memref<1x16x128xf32, #tpu.memory_space<vmem>>, vector<1x16x128xf32>
    %310 = vector.shape_cast %309 : vector<1x16x128xf32> to vector<16x128xf32>
    %311 = vector.shape_cast %308 : vector<16x128xf32> to vector<1x16x128xf32>
    tpu.vector_store %arg18[%c0_114, %c0_115, %c0_116], %311 {strides = array<i32>} : memref<1x16x128xf32, #tpu.memory_space<vmem>>, vector<1x16x128xf32>,
    return
  }
  func.func @transform_0(%arg0: i32) -> (i32, i32, i32) {
    %c0_i32 = arith.constant 0 : i32
    %c0_i32_0 = arith.constant 0 : i32
    %c0_i32_1 = arith.constant 0 : i32
    return %arg0, %c0_i32, %c0_i32_0 : i32, i32, i32
  }
  func.func @transform_1(%arg0: i32) -> (i32, i32) {
    %c0_i32 = arith.constant 0 : i32
    %c0_i32_0 = arith.constant 0 : i32
    %c0_i32_1 = arith.constant 0 : i32
    return %c0_i32, %c0_i32_0 : i32, i32
  }
  func.func @transform_2(%arg0: i32) -> (i32, i32) {
    %c0_i32 = arith.constant 0 : i32
    %c0_i32_0 = arith.constant 0 : i32
    %c0_i32_1 = arith.constant 0 : i32
    return %c0_i32, %c0_i32_0 : i32, i32
  }
  func.func @transform_3(%arg0: i32) -> (i32, i32) {
    %c0_i32 = arith.constant 0 : i32
    %c0_i32_0 = arith.constant 0 : i32
    %c0_i32_1 = arith.constant 0 : i32
    return %c0_i32, %c0_i32_0 : i32, i32
  }
  func.func @transform_4(%arg0: i32) -> (i32, i32) {
    %c0_i32 = arith.constant 0 : i32
    %c0_i32_0 = arith.constant 0 : i32
    %c0_i32_1 = arith.constant 0 : i32
    return %c0_i32, %c0_i32_0 : i32, i32
  }
  func.func @transform_5(%arg0: i32) -> (i32, i32) {
    %c0_i32 = arith.constant 0 : i32
    %c0_i32_0 = arith.constant 0 : i32
    %c0_i32_1 = arith.constant 0 : i32
    return %c0_i32, %c0_i32_0 : i32, i32
  }
  func.func @transform_6(%arg0: i32) -> (i32, i32) {
    %c0_i32 = arith.constant 0 : i32
    %c0_i32_0 = arith.constant 0 : i32
    %c0_i32_1 = arith.constant 0 : i32
    return %c0_i32, %c0_i32_0 : i32, i32
  }
  func.func @transform_7(%arg0: i32) -> (i32, i32) {
    %c0_i32 = arith.constant 0 : i32
    %c0_i32_0 = arith.constant 0 : i32
    %c0_i32_1 = arith.constant 0 : i32
    return %c0_i32, %c0_i32_0 : i32, i32
  }
  func.func @transform_8(%arg0: i32) -> (i32, i32) {
    %c0_i32 = arith.constant 0 : i32
    %c0_i32_0 = arith.constant 0 : i32
    %c0_i32_1 = arith.constant 0 : i32
    return %c0_i32, %c0_i32_0 : i32, i32
  }
  func.func @transform_9(%arg0: i32) -> (i32, i32) {
    %c0_i32 = arith.constant 0 : i32
    %c0_i32_0 = arith.constant 0 : i32
    %c0_i32_1 = arith.constant 0 : i32
    return %c0_i32, %c0_i32_0 : i32, i32
  }
  func.func @transform_10(%arg0: i32) -> (i32, i32) {
    %c0_i32 = arith.constant 0 : i32
    %c0_i32_0 = arith.constant 0 : i32
    %c0_i32_1 = arith.constant 0 : i32
    return %c0_i32, %c0_i32_0 : i32, i32
  }
  func.func @transform_11(%arg0: i32) -> (i32, i32) {
    %c0_i32 = arith.constant 0 : i32
    %c0_i32_0 = arith.constant 0 : i32
    %c0_i32_1 = arith.constant 0 : i32
    return %c0_i32, %c0_i32_0 : i32, i32
  }
  func.func @transform_12(%arg0: i32) -> (i32, i32) {
    %c0_i32 = arith.constant 0 : i32
    %c0_i32_0 = arith.constant 0 : i32
    %c0_i32_1 = arith.constant 0 : i32
    return %c0_i32, %c0_i32_0 : i32, i32
  }
  func.func @transform_13(%arg0: i32) -> (i32, i32) {
    %c0_i32 = arith.constant 0 : i32
    %c0_i32_0 = arith.constant 0 : i32
    %c0_i32_1 = arith.constant 0 : i32
    return %c0_i32, %c0_i32_0 : i32, i32
  }
  func.func @transform_14(%arg0: i32) -> (i32, i32) {
    %c0_i32 = arith.constant 0 : i32
    %c0_i32_0 = arith.constant 0 : i32
    %c0_i32_1 = arith.constant 0 : i32
    return %c0_i32, %c0_i32_0 : i32, i32
  }
  func.func @transform_15(%arg0: i32) -> (i32, i32) {
    %c0_i32 = arith.constant 0 : i32
    %c0_i32_0 = arith.constant 0 : i32
    %c0_i32_1 = arith.constant 0 : i32
    return %c0_i32, %c0_i32_0 : i32, i32
  }
  func.func @transform_16(%arg0: i32) -> (i32, i32) {
    %c0_i32 = arith.constant 0 : i32
    %c0_i32_0 = arith.constant 0 : i32
    %c0_i32_1 = arith.constant 0 : i32
    return %c0_i32, %c0_i32_0 : i32, i32
  }
  func.func @transform_17(%arg0: i32) -> (i32, i32, i32) {
    %c0_i32 = arith.constant 0 : i32
    %c0_i32_0 = arith.constant 0 : i32
    %c0_i32_1 = arith.constant 0 : i32
    return %arg0, %c0_i32, %c0_i32_0 : i32, i32, i32
  }
}

</mosaic_0001>

<bundles_post_ra>
// kernel: svtrv2_forward.10
= control target key start
LH: loop header
LB: loop body
LE: loop exit
PB: predicated region body
PF: predicated region fallthrough
CT: control target
= control target key end

     0   :  { %s1112_s15 = smov 0   ;;  %s1114_s16 = smov 0   ;;  %s1354_s0 = inlined_call_operand.vmem [shape: bf16[256,27], index: 0, kind: input, shape index: {}]   ;;  %s1355_s1 = inlined_call_operand.vmem [shape: bf16[27,16], index: 1, kind: input, shape index: {}]   ;;  %s1356_s2 = inlined_call_operand.vmem [shape: f32[1,16], index: 2, kind: input, shape index: {}]   ;;  %s1357_s3 = inlined_call_operand.vmem [shape: f32[1,16], index: 3, kind: input, shape index: {}]   ;;  %s1358_s4 = inlined_call_operand.vmem [shape: bf16[256,16], index: 4, kind: output, shape index: {}]  }
   0x1   :  { %s1116_s17 = smov 0  }
   0x2 LB: > { %s33_s18 = sadd.s32 1, %s1080_s16  ;;  %p902_p0 = scmp.ge.s32.totalorder %s1084_s17, 1  ;;  %s1084_s17 = sphi %s1116_s17, %s14_s17   ;;  %s1080_s16 = sphi %s1114_s16, %s1360_s16   ;;  %s1076_s15 = sphi %s1112_s15, %s1359_s15  }
   0x3   : > { %p35_p1 = scmp.ge.s32.totalorder %s33_s18, 2  ;;  %p221_p2 = scmp.lt.s32.totalorder %s1084_s17, 3 }
   0x5   : > { %s1362_s18 = smov (%p35_p1, %s33_s18), 0  ;;  %p222_p3 = pnand %p902_p0, %p221_p2 }
   0x6   : > { %s903_s21 = sshll.u32 (!%p222_p3), %s1076_s15, 4 }
   0x7   : > { %225 = sbr.rel (%p222_p3) target bundleno = 287 (0x11f), region = 36  ;;  %p268_p4 = scmp.lt.s32.totalorder (!%p222_p3), %s903_s21, 31 }
   0xc   : > { %v1020_v0 = vld [vmem:[%s1355_s1 + $0x8] sm:$0x3f]   ;;  %vm397_vm0 = vcmask 1044480   ;;  %vm398_vm1 = vcmask 1045504   ;;  %v1086_v1 = vmov 65535   ;;  %v1021_v5 = vld [vmem:[%s1355_s1] sm:$0xff]  }
   0xd   : > { %v399_v2 = vsel %vm397_vm0, 4294967295, %v1086_v1  ;;  %s1364_s21 = smov (!%p268_p4, %s903_s21), 31  ;;  %vm372_vm2 = vcmask 220160   ;;  %v1155_v14 = vld [vmem:[%s1356_s2] ss:$0 sm:$0xff]  ;;  %vm755_vm3 = vcmask 125952  }
   0xe   : > { %v400_v3 = vsel %vm398_vm1, %v399_v2, 0  ;;  %s904_s24 = sshll.u32 %s1364_s21, 2  ;;  %v1160_v16 = vld [vmem:[%s1357_s3] ss:$0 sm:$0xff] }
   0xf   : > { %v402_v4 = vand.u32 %v1020_v0, %v400_v3  ;;  %s274_s27 = scalar_lea.vmem %s1354_s0, %s904_s24  ;;  %s1283_s8 = scalar_lea.vmem %s1358_s4, %s904_s24 }
  0x10   : > { %v1022_v6 = vld [vmem:[%s274_s27] sm:$0xff]   ;;  %v1024_v8 = vld [vmem:[%s274_s27 + $0x8] sm:$0xff]   ;;  %v1026_v10 = vld [vmem:[%s274_s27 + $0x10] sm:$0xff]  }
  0x11   : > { %971 = vmatprep.subr.bf16.mxu0 %v402_v4  ;;  %991 = vmatprep.subr.bf16.mxu1 %v402_v4  ;;  %v1023_v7 = vld [vmem:[%s274_s27 + $0x20] sm:$0xff]   ;;  %v1025_v9 = vld [vmem:[%s274_s27 + $0x28] sm:$0xff]   ;;  %v1027_v11 = vld [vmem:[%s274_s27 + $0x30] sm:$0xff]  }
  0x12   : > { %972 = vmatpush3.bf16.msra.mxu0 %v402_v4  ;;  %993 = vmatpush3.bf16.msra.mxu1 %v402_v4  ;;  %v1028_v12 = vld [vmem:[%s274_s27 + $0x18] sm:$0xff]  }
  0x13   : > { %973 = vmatprep.subr.bf16.mxu0 %v1021_v5  ;;  %992 = vmatprep.subr.bf16.mxu1 %v1021_v5  ;;  %v1029_v13 = vld [vmem:[%s274_s27 + $0x38] sm:$0xff]  }
  0x14   : > { %975 = vmatprep.mubr.msk.bf16.mxu0 %vm372_vm2, %v1022_v6  ;;  %983 = vmatprep.mubr.msk.bf16.mxu1 %vm372_vm2, %v1023_v7 }
  0x16   : > { %974 = vmatpush3.bf16.msra.mxu0 %v1021_v5  ;;  %994 = vmatpush3.bf16.msra.mxu1 %v1021_v5 }
  0x19   : > { %976 = vmatmul.mubr.msk.bf16.vlgmr.msra.gmra.mxu0 %vm372_vm2, %v1024_v8  ;;  %984 = vmatmul.mubr.msk.bf16.vlgmr.msra.gmra.mxu1 %vm372_vm2, %v1025_v9 }
  0x1a   : > { %979 = vmatprep.mubr.msk.bf16.mxu0 %vm372_vm2, %v1026_v10  ;;  %987 = vmatprep.mubr.msk.bf16.mxu1 %vm372_vm2, %v1027_v11 }
  0x21   : > { %980 = vmatmul.mubr.msk.bf16.gmra.mxu0 %vm372_vm2, %v1028_v12  ;;  %988 = vmatmul.mubr.msk.bf16.gmra.mxu1 %vm372_vm2, %v1029_v13 }
  0xd9   : > { %v977_v15 = vpop.f32.mrf.mxu0  ;;  %v985_v17 = vpop.f32.mrf.mxu1 }
  0xda   : > { %v510_v18 = vmul.f32 %v977_v15, %v1155_v14  ;;  %v518_v19 = vmul.f32 %v985_v17, %v1155_v14 }
  0xdb   : > { %v438_v20 = vpop.f32.mrf.mxu0  ;;  %v470_v21 = vpop.f32.mrf.mxu1 }
  0xdc   : > { %v1165_v22 = vadd.f32 %v1160_v16, %v510_v18  ;;  %v1168_v23 = vadd.f32 %v1160_v16, %v518_v19  ;;  %v508_v24 = vmul.f32 %v1155_v14, %v438_v20  ;;  %v516_v25 = vmul.f32 %v1155_v14, %v470_v21 }
  0xdd   : > { %v978_v26 = vpop.f32.mrf.mxu0  ;;  %v986_v27 = vpop.f32.mrf.mxu1 }
  0xde   : > { %v565_v28 = vmul.f32 %v1165_v22, %v1165_v22  ;;  %v573_v29 = vmul.f32 %v1168_v23, %v1168_v23  ;;  %v1177_v30 = vadd.f32 %v1160_v16, %v508_v24  ;;  %v1180_v31 = vadd.f32 %v1160_v16, %v516_v25 }
  0xdf   : > { %v511_v32 = vmul.f32 %v978_v26, %v1155_v14  ;;  %v519_v33 = vmul.f32 %v986_v27, %v1155_v14  ;;  %v441_v34 = vpop.f32.mrf.mxu0  ;;  %v473_v35 = vpop.f32.mrf.mxu1 }
  0xe0   : > { %v581_v36 = vmul.f32 %v565_v28, %v1165_v22  ;;  %v589_v37 = vmul.f32 %v573_v29, %v1168_v23  ;;  %v509_v38 = vmul.f32 %v1155_v14, %v441_v34  ;;  %v517_v39 = vmul.f32 %v1155_v14, %v473_v35 }
  0xe1   : > { %v563_v40 = vmul.f32 %v1177_v30, %v1177_v30  ;;  %v571_v41 = vmul.f32 %v1180_v31, %v1180_v31  ;;  %v1193_v44 = vadd.f32 %v1160_v16, %v511_v32  ;;  %v1196_v45 = vadd.f32 %v1160_v16, %v519_v33  ;;  %v981_v49 = vpop.f32.mrf.mxu0  ;;  %v989_v0 = vpop.f32.mrf.mxu1 }
  0xe2   : > { %v597_v42 = vmul.f32 0.044715, %v581_v36  ;;  %v605_v43 = vmul.f32 0.044715, %v589_v37  ;;  %v1201_v48 = vadd.f32 %v1160_v16, %v509_v38  ;;  %v1208_v53 = vadd.f32 %v1160_v16, %v517_v39 }
  0xe3   : > { %v579_v46 = vmul.f32 %v563_v40, %v1177_v30  ;;  %v587_v47 = vmul.f32 %v571_v41, %v1180_v31  ;;  %v566_v52 = vmul.f32 %v1193_v44, %v1193_v44  ;;  %v574_v56 = vmul.f32 %v1196_v45, %v1196_v45  ;;  %v454_v1 = vpop.f32.mrf.mxu0  ;;  %v486_v15 = vpop.f32.mrf.mxu1 }
  0xe4   : > { %v613_v50 = vadd.f32 %v597_v42, %v1165_v22  ;;  %v621_v51 = vadd.f32 %v605_v43, %v1168_v23  ;;  %v564_v63 = vmul.f32 %v1201_v48, %v1201_v48  ;;  %v572_v3 = vmul.f32 %v1208_v53, %v1208_v53 }
  0xe5   : > { %v595_v54 = vmul.f32 0.044715, %v579_v46  ;;  %v603_v55 = vmul.f32 0.044715, %v587_v47  ;;  %v582_v59 = vmul.f32 %v566_v52, %v1193_v44  ;;  %v590_v62 = vmul.f32 %v574_v56, %v1196_v45  ;;  %v982_v17 = vpop.f32.mrf.mxu0  ;;  %v990_v35 = vpop.f32.mrf.mxu1 }
  0xe6   : > { %v629_v57 = vmul.f32 0.7978846, %v613_v50  ;;  %v637_v58 = vmul.f32 0.7978846, %v621_v51  ;;  %v580_v8 = vmul.f32 %v564_v63, %v1201_v48  ;;  %v588_v9 = vmul.f32 %v572_v3, %v1208_v53 }
  0xe7   : > { %v611_v60 = vadd.f32 %v595_v54, %v1177_v30  ;;  %v619_v61 = vadd.f32 %v603_v55, %v1180_v31  ;;  %v598_v2 = vmul.f32 0.044715, %v582_v59  ;;  %v606_v6 = vmul.f32 0.044715, %v590_v62  ;;  %v457_v36 = vpop.f32.mrf.mxu0 }
  0xe8   : > { %1030 = vtanh.f32 %v629_v57  ;;  %v514_v10 = vmul.f32 %v981_v49, %v1155_v14  ;;  %v522_v12 = vmul.f32 %v989_v0, %v1155_v14  ;;  %v512_v13 = vmul.f32 %v1155_v14, %v454_v1 }
  0xe9   : > { %1032 = vtanh.f32 %v637_v58  ;;  %v627_v4 = vmul.f32 0.7978846, %v611_v60  ;;  %v635_v5 = vmul.f32 0.7978846, %v619_v61  ;;  %v614_v7 = vadd.f32 %v598_v2, %v1193_v44  ;;  %v489_v60 = vpop.f32.mrf.mxu1 }
  0xea   : > { %v622_v11 = vadd.f32 %v606_v6, %v1196_v45  ;;  %v596_v19 = vmul.f32 0.044715, %v580_v8  ;;  %v604_v20 = vmul.f32 0.044715, %v588_v9  ;;  %v1228_v24 = vadd.f32 %v1160_v16, %v514_v10 }
  0xeb   : > { %1034 = vtanh.f32 %v627_v4  ;;  %v630_v18 = vmul.f32 0.7978846, %v614_v7  ;;  %v1231_v25 = vadd.f32 %v1160_v16, %v522_v12  ;;  %v1234_v26 = vadd.f32 %v1160_v16, %v512_v13 }
  0xec   : > { %1036 = vtanh.f32 %v635_v5  ;;  %v638_v21 = vmul.f32 0.7978846, %v622_v11  ;;  %v612_v27 = vadd.f32 %v596_v19, %v1201_v48  ;;  %v620_v28 = vadd.f32 %v604_v20, %v1208_v53 }
  0xed   : > { %1038 = vtanh.f32 %v630_v18  ;;  %v520_v29 = vmul.f32 %v1155_v14, %v486_v15  ;;  %v549_v32 = vmul.f32 0.5, %v1165_v22  ;;  %v557_v33 = vmul.f32 0.5, %v1168_v23 }
  0xee   : > { %1040 = vtanh.f32 %v638_v21  ;;  %v569_v34 = vmul.f32 %v1228_v24, %v1228_v24  ;;  %v547_v37 = vmul.f32 0.5, %v1177_v30  ;;  %v628_v38 = vmul.f32 0.7978846, %v612_v27 }
  0xef   : > { %v636_v39 = vmul.f32 0.7978846, %v620_v28  ;;  %v577_v40 = vmul.f32 %v1231_v25, %v1231_v25  ;;  %v567_v22 = vmul.f32 %v1234_v26, %v1234_v26  ;;  %v1250_v23 = vadd.f32 %v1160_v16, %v520_v29 }
  0xf0   : > { %v585_v41 = vmul.f32 %v569_v34, %v1228_v24  ;;  %v515_v42 = vmul.f32 %v982_v17, %v1155_v14  ;;  %1042 = vtanh.f32 %v628_v38  ;;  %v523_v30 = vmul.f32 %v990_v35, %v1155_v14 }
  0xf1   : > { %v593_v43 = vmul.f32 %v577_v40, %v1231_v25  ;;  %v513_v46 = vmul.f32 %v1155_v14, %v457_v36  ;;  %v555_v47 = vmul.f32 0.5, %v1180_v31  ;;  %1044 = vtanh.f32 %v636_v39 }
  0xf2   : > { %v601_v49 = vmul.f32 0.044715, %v585_v41  ;;  %v583_v50 = vmul.f32 %v567_v22, %v1234_v26  ;;  %v550_v51 = vmul.f32 0.5, %v1193_v44  ;;  %v575_v54 = vmul.f32 %v1250_v23, %v1250_v23 }
  0xf3   : > { %v609_v52 = vmul.f32 0.044715, %v593_v43  ;;  %v1262_v55 = vadd.f32 %v1160_v16, %v515_v42  ;;  %v558_v57 = vmul.f32 0.5, %v1196_v45  ;;  %v1267_v31 = vadd.f32 %v1160_v16, %v523_v30 }
  0xf4   : > { %v617_v58 = vadd.f32 %v601_v49, %v1228_v24  ;;  %v599_v59 = vmul.f32 0.044715, %v583_v50  ;;  %v591_v63 = vmul.f32 %v575_v54, %v1250_v23  ;;  %v1272_v0 = vadd.f32 %v1160_v16, %v513_v46 }
  0xf5   : > { %v1031_v56 = vpop.eup %1030  ;;  %v625_v62 = vadd.f32 %v609_v52, %v1231_v25  ;;  %v570_v3 = vmul.f32 %v1262_v55, %v1262_v55  ;;  %v521_v8 = vmul.f32 %v1155_v14, %v489_v60  ;;  %v548_v35 = vmul.f32 0.5, %v1201_v48 }
  0xf6   : > { %v1033_v61 = vpop.eup %1032  ;;  %v661_v44 = vadd.f32 1.0, %v1031_v56  ;;  %v633_v2 = vmul.f32 0.7978846, %v617_v58  ;;  %v615_v45 = vadd.f32 %v599_v59, %v1234_v26  ;;  %v607_v7 = vmul.f32 0.044715, %v591_v63 }
  0xf7   : > { %v669_v1 = vadd.f32 1.0, %v1033_v61  ;;  %v641_v6 = vmul.f32 0.7978846, %v625_v62  ;;  %v586_v20 = vmul.f32 %v570_v3, %v1262_v55  ;;  %v568_v42 = vmul.f32 %v1272_v0, %v1272_v0 }
  0xf8   : > { %v1035_v4 = vpop.eup %1034  ;;  %v677_v5 = vmul.f32 %v661_v44, %v549_v32  ;;  %1046 = vtanh.f32 %v633_v2  ;;  %v631_v12 = vmul.f32 0.7978846, %v615_v45  ;;  %v623_v17 = vadd.f32 %v607_v7, %v1250_v23 }
  0xf9   : > { %v1037_v9 = vpop.eup %1036  ;;  %v685_v10 = vmul.f32 %v669_v1, %v557_v33  ;;  %v659_v11 = vadd.f32 1.0, %v1035_v4  ;;  %1048 = vtanh.f32 %v641_v6  ;;  %v578_v32 = vmul.f32 %v1267_v31, %v1267_v31 }
  0xfa   : > { %v947_v13 = vpack.c.bf16 %v677_v5, %v677_v5  ;;  %v667_v15 = vadd.f32 1.0, %v1037_v9  ;;  %v1039_v18 = vpop.eup %1038  ;;  %1050 = vtanh.f32 %v631_v12  ;;  %v639_v29 = vmul.f32 0.7978846, %v623_v17 }
  0xfb   : > { %v955_v14 = vpack.c.bf16 %v685_v10, %v685_v10  ;;  %v675_v19 = vmul.f32 %v659_v11, %v547_v37  ;;  %v1041_v21 = vpop.eup %1040  ;;  %v662_v28 = vadd.f32 1.0, %v1039_v18  ;;  %v602_v36 = vmul.f32 0.044715, %v586_v20 }
  0xfc   : > { %758 = vst.msk [vmem:[%s1283_s8 + $0x8] sm:$0xf] %vm755_vm3, %v947_v13  ;;  %v683_v27 = vmul.f32 %v667_v15, %v555_v47  ;;  %v670_v34 = vadd.f32 1.0, %v1041_v21  ;;  %1052 = vtanh.f32 %v639_v29  ;;  %v594_v39 = vmul.f32 %v578_v32, %v1267_v31 }
  0xfd   : > { %766 = vst.msk [vmem:[%s1283_s8 + $0x28] sm:$0xf] %vm755_vm3, %v955_v14  ;;  %v945_v33 = vpack.c.bf16 %v675_v19, %v675_v19  ;;  %v678_v38 = vmul.f32 %v662_v28, %v550_v51  ;;  %v1043_v40 = vpop.eup %1042  ;;  %v618_v22 = vadd.f32 %v602_v36, %v1262_v55  ;;  %v1301_v43 = vadd.f32 %v1160_v16, %v521_v8 }
  0xfe   : > { %v953_v37 = vpack.c.bf16 %v683_v27, %v683_v27  ;;  %v686_v41 = vmul.f32 %v670_v34, %v558_v57  ;;  %v1045_v48 = vpop.eup %1044  ;;  %v660_v46 = vadd.f32 1.0, %v1043_v40  ;;  %v556_v47 = vmul.f32 0.5, %v1208_v53 }
  0xff   : > { %756 = vst.msk [vmem:[%s1283_s8] sm:$0xf] %vm755_vm3, %v945_v33  ;;  %v948_v30 = vpack.c.bf16 %v678_v38, %v678_v38  ;;  %v610_v49 = vmul.f32 0.044715, %v594_v39  ;;  %v668_v51 = vadd.f32 1.0, %v1045_v48  ;;  %v584_v54 = vmul.f32 %v568_v42, %v1272_v0 }
 0x100   : > { %764 = vst.msk [vmem:[%s1283_s8 + $0x20] sm:$0xf] %vm755_vm3, %v953_v37  ;;  %v956_v50 = vpack.c.bf16 %v686_v41, %v686_v41  ;;  %v634_v52 = vmul.f32 0.7978846, %v618_v22  ;;  %v676_v56 = vmul.f32 %v660_v46, %v548_v35  ;;  %v576_v57 = vmul.f32 %v1301_v43, %v1301_v43 }
 0x101   : > { %759 = vst.msk [vmem:[%s1283_s8 + $0xc] sm:$0xf] %vm755_vm3, %v948_v30  ;;  %v626_v16 = vadd.f32 %v610_v49, %v1267_v31  ;;  %v684_v58 = vmul.f32 %v668_v51, %v556_v47  ;;  %v600_v53 = vmul.f32 0.044715, %v584_v54  ;;  %v553_v45 = vmul.f32 0.5, %v1228_v24 }
 0x102   : > { %767 = vst.msk [vmem:[%s1283_s8 + $0x2c] sm:$0xf] %vm755_vm3, %v956_v50  ;;  %1054 = vtanh.f32 %v634_v52  ;;  %v946_v59 = vpack.c.bf16 %v676_v56, %v676_v56  ;;  %v592_v61 = vmul.f32 %v576_v57, %v1301_v43  ;;  %v561_v6 = vmul.f32 0.5, %v1231_v25 }
 0x103   : > { %v642_v60 = vmul.f32 0.7978846, %v626_v16  ;;  %v954_v44 = vpack.c.bf16 %v684_v58, %v684_v58  ;;  %v616_v62 = vadd.f32 %v600_v53, %v1272_v0  ;;  %v551_v10 = vmul.f32 0.5, %v1234_v26 }
 0x104   : > { %757 = vst.msk [vmem:[%s1283_s8 + $0x4] sm:$0xf] %vm755_vm3, %v946_v59  ;;  %v608_v1 = vmul.f32 0.044715, %v592_v61  ;;  %v559_v25 = vmul.f32 0.5, %v1250_v23  ;;  %v554_v27 = vmul.f32 0.5, %v1262_v55 }
 0x105   : > { %v1047_v63 = vpop.eup %1046  ;;  %1056 = vtanh.f32 %v642_v60  ;;  %765 = vst.msk [vmem:[%s1283_s8 + $0x24] sm:$0xf] %vm755_vm3, %v954_v44  ;;  %v632_v4 = vmul.f32 0.7978846, %v616_v62  ;;  %v562_v32 = vmul.f32 0.5, %v1267_v31  ;;  %v552_v37 = vmul.f32 0.5, %v1272_v0 }
 0x106   : > { %v1049_v2 = vpop.eup %1048  ;;  %v665_v3 = vadd.f32 1.0, %v1047_v63  ;;  %v624_v8 = vadd.f32 %v608_v1, %v1301_v43  ;;  %v560_v41 = vmul.f32 0.5, %v1301_v43 }
 0x107   : > { %v1051_v5 = vpop.eup %1050  ;;  %v673_v7 = vadd.f32 1.0, %v1049_v2  ;;  %1058 = vtanh.f32 %v632_v4 }
 0x108   : > { %v681_v9 = vmul.f32 %v665_v3, %v553_v45  ;;  %v663_v11 = vadd.f32 1.0, %v1051_v5  ;;  %v640_v13 = vmul.f32 0.7978846, %v624_v8 }
 0x109   : > { %v689_v12 = vmul.f32 %v673_v7, %v561_v6  ;;  %v1053_v15 = vpop.eup %1052 }
 0x10a   : > { %v951_v24 = vpack.c.bf16 %v681_v9, %v681_v9  ;;  %v679_v17 = vmul.f32 %v663_v11, %v551_v10  ;;  %v671_v14 = vadd.f32 1.0, %v1053_v15  ;;  %1060 = vtanh.f32 %v640_v13 }
 0x10b   : > { %v959_v18 = vpack.c.bf16 %v689_v12, %v689_v12 }
 0x10c   : > { %762 = vst.msk [vmem:[%s1283_s8 + $0x18] sm:$0xf] %vm755_vm3, %v951_v24  ;;  %v949_v19 = vpack.c.bf16 %v679_v17, %v679_v17  ;;  %v687_v26 = vmul.f32 %v671_v14, %v559_v25 }
 0x10d   : > { %770 = vst.msk [vmem:[%s1283_s8 + $0x38] sm:$0xf] %vm755_vm3, %v959_v18 }
 0x10e   : > { %760 = vst.msk [vmem:[%s1283_s8 + $0x10] sm:$0xf] %vm755_vm3, %v949_v19  ;;  %v957_v21 = vpack.c.bf16 %v687_v26, %v687_v26 }
 0x10f   : > { %v1055_v20 = vpop.eup %1054 }
 0x110   : > { %v666_v28 = vadd.f32 1.0, %v1055_v20  ;;  %768 = vst.msk [vmem:[%s1283_s8 + $0x30] sm:$0xf] %vm755_vm3, %v957_v21 }
 0x112   : > { %v1057_v23 = vpop.eup %1056  ;;  %v682_v29 = vmul.f32 %v666_v28, %v554_v27 }
 0x113   : > { %v674_v33 = vadd.f32 1.0, %v1057_v23 }
 0x114   : > { %v952_v34 = vpack.c.bf16 %v682_v29, %v682_v29  ;;  %v1059_v35 = vpop.eup %1058 }
 0x115   : > { %v690_v36 = vmul.f32 %v674_v33, %v562_v32  ;;  %v664_v38 = vadd.f32 1.0, %v1059_v35 }
 0x116   : > { %763 = vst.msk [vmem:[%s1283_s8 + $0x1c] sm:$0xf] %vm755_vm3, %v952_v34 }
 0x117   : > { %v960_v55 = vpack.c.bf16 %v690_v36, %v690_v36  ;;  %v1061_v39 = vpop.eup %1060  ;;  %v680_v40 = vmul.f32 %v664_v38, %v552_v37 }
 0x118   : > { %v672_v22 = vadd.f32 1.0, %v1061_v39 }
 0x119   : > { %771 = vst.msk [vmem:[%s1283_s8 + $0x3c] sm:$0xf] %vm755_vm3, %v960_v55  ;;  %v950_v31 = vpack.c.bf16 %v680_v40, %v680_v40 }
 0x11a   : > { %v688_v42 = vmul.f32 %v672_v22, %v560_v41 }
 0x11b   : > { %761 = vst.msk [vmem:[%s1283_s8 + $0x14] sm:$0xf] %vm755_vm3, %v950_v31 }
 0x11c   : > { %v958_v48 = vpack.c.bf16 %v688_v42, %v688_v42 }
 0x11e   : > { %769 = vst.msk [vmem:[%s1283_s8 + $0x34] sm:$0xf] %vm755_vm3, %v958_v48 }
 0x11f PF: > { %s14_s17 = sadd.s32 1, %s1084_s17   ;;  %s1359_s15 = smov %s1080_s16 }
 0x120   : > { %p11_p5 = scmp.ge.s32.totalorder %s14_s17, 4   ;;  %s1360_s16 = smov %s1362_s18 }
 0x122   :  { %13 = sbr.rel (!%p11_p5) target bundleno = 2 (0x2), region = 75 }

// kernel: svtrv2_forward.11
= control target key start
LH: loop header
LB: loop body
LE: loop exit
PB: predicated region body
PF: predicated region fallthrough
CT: control target
= control target key end

     0   :  { %v406_v0 = vmov 0   ;;  %vm134_vm0 = vcmask 130048   ;;  %vm314_vm1 = vcmask 261120   ;;  %s567_s1 = inlined_call_operand.vmem [shape: bf16[144,32], index: 1, kind: input, shape index: {}]   ;;  %s568_s0 = inlined_call_operand.vmem [shape: bf16[64,144], index: 0, kind: input, shape index: {}]   ;;  %s569_s2 = inlined_call_operand.vmem [shape: f32[1,32], index: 2, kind: input, shape index: {}]   ;;  %s570_s3 = inlined_call_operand.vmem [shape: f32[1,32], index: 3, kind: input, shape index: {}]   ;;  %s571_s4 = inlined_call_operand.vmem [shape: f32[64,32], index: 4, kind: output, shape index: {}]  }
   0x1   :  { %147 = vmatprep.subr.bf16.mxu0 %v406_v0  ;;  %350 = vmatprep.subr.bf16.mxu1 %v406_v0  ;;  %v369_v1 = vld [vmem:[%s567_s1 + $0x38] sm:$0xff]   ;;  %v370_v2 = vld [vmem:[%s567_s1 + $0x30] sm:$0xff]   ;;  %v371_v3 = vld [vmem:[%s567_s1 + $0x28] sm:$0xff]  }
   0x2   :  { %148 = vmatpush1.bf16.msra.mxu0 %v369_v1  ;;  %359 = vmatpush1.bf16.msra.mxu1 %v369_v1  ;;  %v372_v4 = vld [vmem:[%s567_s1 + $0x20] sm:$0xff]   ;;  %v373_v7 = vld [vmem:[%s567_s1 + $0x18] sm:$0xff]   ;;  %v374_v8 = vld [vmem:[%s567_s1 + $0x10] sm:$0xff]  }
   0x3   :  { %149 = vmatprep.subr.bf16.mxu0 %v406_v0  ;;  %351 = vmatprep.subr.bf16.mxu1 %v406_v0  ;;  %v380_v5 = vld [vmem:[%s568_s0 + $0x4] ss:$8 sps:$4 sm:$0xff]   ;;  %v378_v12 = vld [vmem:[%s568_s0] ss:$8 sps:$4 sm:$0xff]   ;;  %v384_v14 = vld [vmem:[%s568_s0 + $0x14] ss:$8 sps:$4 sm:$0xff]  }
   0x4   :  { %v383_v6 = vld [vmem:[%s568_s0 + $0x24] ss:$8 sps:$4 sm:$0xff]   ;;  %344 = vmatprep.mubr.msk.bf16.mxu0 %vm134_vm0, %v380_v5  ;;  %v381_v13 = vld [vmem:[%s568_s0 + $0x20] ss:$8 sps:$4 sm:$0xff]   ;;  %v386_v15 = vld [vmem:[%s568_s0 + $0x34] ss:$8 sps:$4 sm:$0xff]  }
   0x5   :  { %346 = vmatprep.mubr.msk.bf16.mxu1 %vm134_vm0, %v383_v6  ;;  %v375_v9 = vld [vmem:[%s567_s1 + $0x8] sm:$0xff]   ;;  %v376_v10 = vld [vmem:[%s567_s1] sm:$0xff]   ;;  %v388_v16 = vld [vmem:[%s568_s0 + $0x10] ss:$8 sps:$4 sm:$0xff]  }
   0x6   :  { %150 = vmatpush1.bf16.msra.mxu0 %v370_v2  ;;  %360 = vmatpush1.bf16.msra.mxu1 %v370_v2  ;;  %v377_v11 = vld [vmem:[%s567_s1 + $0x40] sm:$0xff]   ;;  %v389_v17 = vld [vmem:[%s568_s0 + $0x30] ss:$8 sps:$4 sm:$0xff]  }
   0x7   :  { %151 = vmatprep.subr.bf16.mxu0 %v406_v0  ;;  %352 = vmatprep.subr.bf16.mxu1 %v406_v0  ;;  %v348_v18 = vld [vmem:[%s569_s2] ss:$0 sm:$0xff] }
   0x8   :  { %v349_v20 = vld [vmem:[%s570_s3] ss:$0 sm:$0xff] }
   0xa   :  { %152 = vmatpush1.bf16.msra.mxu0 %v371_v3  ;;  %361 = vmatpush1.bf16.msra.mxu1 %v371_v3 }
   0xb   :  { %153 = vmatprep.subr.bf16.mxu0 %v406_v0  ;;  %353 = vmatprep.subr.bf16.mxu1 %v406_v0 }
   0xe   :  { %154 = vmatpush1.bf16.msra.mxu0 %v372_v4  ;;  %362 = vmatpush1.bf16.msra.mxu1 %v372_v4 }
   0xf   :  { %155 = vmatprep.subr.bf16.mxu0 %v406_v0  ;;  %354 = vmatprep.subr.bf16.mxu1 %v406_v0 }
  0x12   :  { %156 = vmatpush1.bf16.msra.mxu0 %v373_v7  ;;  %363 = vmatpush1.bf16.msra.mxu1 %v373_v7 }
  0x13   :  { %157 = vmatprep.subr.bf16.mxu0 %v406_v0  ;;  %355 = vmatprep.subr.bf16.mxu1 %v406_v0 }
  0x16   :  { %158 = vmatpush1.bf16.msra.mxu0 %v374_v8  ;;  %364 = vmatpush1.bf16.msra.mxu1 %v374_v8 }
  0x17   :  { %159 = vmatprep.subr.bf16.mxu0 %v406_v0  ;;  %356 = vmatprep.subr.bf16.mxu1 %v406_v0 }
  0x1a   :  { %160 = vmatpush1.bf16.msra.mxu0 %v375_v9  ;;  %365 = vmatpush1.bf16.msra.mxu1 %v375_v9 }
  0x1b   :  { %161 = vmatprep.subr.bf16.mxu0 %v406_v0  ;;  %357 = vmatprep.subr.bf16.mxu1 %v406_v0 }
  0x1e   :  { %162 = vmatpush1.bf16.msra.mxu0 %v376_v10  ;;  %366 = vmatpush1.bf16.msra.mxu1 %v376_v10 }
  0x1f   :  { %177 = vmatprep.subr.bf16.mxu0 %v406_v0  ;;  %358 = vmatprep.subr.bf16.mxu1 %v406_v0 }
  0x22   :  { %178 = vmatpush2.bf16.msra.mxu0 %v377_v11  ;;  %367 = vmatpush2.bf16.msra.mxu1 %v377_v11 }
  0x25   :  { %180 = vmatmul.mubr.bf16.vlgmr.msra.gmra.mxu0 %v378_v12  ;;  %196 = vmatmul.mubr.bf16.vlgmr.msra.gmra.mxu1 %v381_v13 }
  0x26   :  { %345 = vmatprep.mubr.msk.bf16.mxu0 %vm134_vm0, %v384_v14  ;;  %347 = vmatprep.mubr.msk.bf16.mxu1 %vm134_vm0, %v386_v15 }
  0x2d   :  { %188 = vmatmul.mubr.bf16.gmra.mxu0 %v388_v16  ;;  %204 = vmatmul.mubr.bf16.gmra.mxu1 %v389_v17 }
  0xe5   :  { %v181_v19 = vpop.f32.mrf.mxu0  ;;  %v197_v21 = vpop.f32.mrf.mxu1 }
  0xe6   :  { %v219_v22 = vmul.f32 %v348_v18, %v181_v19  ;;  %v223_v23 = vmul.f32 %v348_v18, %v197_v21 }
  0xe7   :  { %v183_v24 = vpop.f32.mrf.mxu0  ;;  %v199_v25 = vpop.f32.mrf.mxu1 }
  0xe8   :  { %v493_v26 = vadd.f32 %v349_v20, %v219_v22  ;;  %v495_v27 = vadd.f32 %v349_v20, %v223_v23 }
  0xe9   :  { %v184_v28 = vpop.f32.mrf.mxu0  ;;  %v200_v29 = vpop.f32.mrf.mxu1 }
  0xea   :  { %v250_v30 = vmul.f32 %v493_v26, %v493_v26  ;;  %v254_v31 = vmul.f32 %v495_v27, %v495_v27  ;;  %v220_v32 = vmul.f32 %v348_v18, %v184_v28  ;;  %v224_v33 = vmul.f32 %v348_v18, %v200_v29 }
  0xeb   :  { %v186_v34 = vpop.f32.mrf.mxu0  ;;  %v202_v35 = vpop.f32.mrf.mxu1 }
  0xec   :  { %v258_v36 = vmul.f32 %v250_v30, %v493_v26  ;;  %v262_v37 = vmul.f32 %v254_v31, %v495_v27  ;;  %v503_v38 = vadd.f32 %v349_v20, %v220_v32  ;;  %v505_v39 = vadd.f32 %v349_v20, %v224_v33 }
  0xed   :  { %v189_v40 = vpop.f32.mrf.mxu0  ;;  %v205_v41 = vpop.f32.mrf.mxu1  ;;  %v242_v32 = vmul.f32 0.5, %v493_v26  ;;  %v246_v34 = vmul.f32 0.5, %v495_v27 }
  0xee   :  { %v266_v42 = vmul.f32 0.044715, %v258_v36  ;;  %v270_v43 = vmul.f32 0.044715, %v262_v37  ;;  %v221_v44 = vmul.f32 %v348_v18, %v189_v40  ;;  %v225_v45 = vmul.f32 %v348_v18, %v205_v41 }
  0xef   :  { %v251_v46 = vmul.f32 %v503_v38, %v503_v38  ;;  %v255_v47 = vmul.f32 %v505_v39, %v505_v39  ;;  %v191_v48 = vpop.f32.mrf.mxu0  ;;  %v207_v49 = vpop.f32.mrf.mxu1 }
  0xf0   :  { %v274_v50 = vadd.f32 %v266_v42, %v493_v26  ;;  %v278_v51 = vadd.f32 %v270_v43, %v495_v27  ;;  %v513_v52 = vadd.f32 %v349_v20, %v221_v44  ;;  %v515_v53 = vadd.f32 %v349_v20, %v225_v45 }
  0xf1   :  { %v259_v54 = vmul.f32 %v251_v46, %v503_v38  ;;  %v263_v55 = vmul.f32 %v255_v47, %v505_v39  ;;  %v192_v56 = vpop.f32.mrf.mxu0  ;;  %v208_v57 = vpop.f32.mrf.mxu1  ;;  %v243_v26 = vmul.f32 0.5, %v503_v38  ;;  %v247_v27 = vmul.f32 0.5, %v505_v39 }
  0xf2   :  { %v282_v58 = vmul.f32 0.7978846, %v274_v50  ;;  %v286_v59 = vmul.f32 0.7978846, %v278_v51  ;;  %v252_v60 = vmul.f32 %v513_v52, %v513_v52  ;;  %v256_v63 = vmul.f32 %v515_v53, %v515_v53 }
  0xf3   :  { %v267_v61 = vmul.f32 0.044715, %v259_v54  ;;  %v271_v62 = vmul.f32 0.044715, %v263_v55  ;;  %v194_v0 = vpop.f32.mrf.mxu0  ;;  %v210_v1 = vpop.f32.mrf.mxu1  ;;  %v222_v3 = vmul.f32 %v348_v18, %v192_v56  ;;  %v226_v4 = vmul.f32 %v348_v18, %v208_v57 }
  0xf4   :  { %390 = vtanh.f32 %v282_v58  ;;  %v260_v2 = vmul.f32 %v252_v60, %v513_v52  ;;  %v264_v7 = vmul.f32 %v256_v63, %v515_v53  ;;  %v244_v48 = vmul.f32 0.5, %v513_v52 }
  0xf5   :  { %392 = vtanh.f32 %v286_v59  ;;  %v275_v5 = vadd.f32 %v267_v61, %v503_v38  ;;  %v279_v6 = vadd.f32 %v271_v62, %v505_v39  ;;  %v237_v9 = vadd.f32 %v349_v20, %v222_v3 }
  0xf6   :  { %v268_v8 = vmul.f32 0.044715, %v260_v2  ;;  %v241_v10 = vadd.f32 %v349_v20, %v226_v4  ;;  %v272_v13 = vmul.f32 0.044715, %v264_v7  ;;  %v248_v50 = vmul.f32 0.5, %v515_v53 }
  0xf7   :  { %v283_v11 = vmul.f32 0.7978846, %v275_v5  ;;  %v287_v12 = vmul.f32 0.7978846, %v279_v6  ;;  %v253_v15 = vmul.f32 %v237_v9, %v237_v9  ;;  %v245_v54 = vmul.f32 0.5, %v237_v9 }
  0xf8   :  { %v276_v14 = vadd.f32 %v268_v8, %v513_v52  ;;  %v280_v16 = vadd.f32 %v272_v13, %v515_v53  ;;  %v257_v17 = vmul.f32 %v241_v10, %v241_v10  ;;  %v249_v56 = vmul.f32 0.5, %v241_v10 }
  0xf9   :  { %394 = vtanh.f32 %v283_v11  ;;  %v261_v19 = vmul.f32 %v253_v15, %v237_v9 }
  0xfa   :  { %396 = vtanh.f32 %v287_v12  ;;  %v284_v18 = vmul.f32 0.7978846, %v276_v14  ;;  %v288_v21 = vmul.f32 0.7978846, %v280_v16  ;;  %v265_v22 = vmul.f32 %v257_v17, %v241_v10 }
  0xfb   :  { %v269_v23 = vmul.f32 0.044715, %v261_v19 }
  0xfc   :  { %398 = vtanh.f32 %v284_v18  ;;  %v273_v24 = vmul.f32 0.044715, %v265_v22 }
  0xfd   :  { %400 = vtanh.f32 %v288_v21  ;;  %v277_v20 = vadd.f32 %v269_v23, %v237_v9 }
  0xfe   :  { %v281_v25 = vadd.f32 %v273_v24, %v241_v10 }
  0xff   :  { %v285_v28 = vmul.f32 0.7978846, %v277_v20 }
 0x100   :  { %v289_v30 = vmul.f32 0.7978846, %v281_v25 }
 0x101   :  { %v391_v29 = vpop.eup %390  ;;  %402 = vtanh.f32 %v285_v28 }
 0x102   :  { %v393_v31 = vpop.eup %392  ;;  %v298_v33 = vadd.f32 1.0, %v391_v29  ;;  %404 = vtanh.f32 %v289_v30 }
 0x103   :  { %v302_v35 = vadd.f32 1.0, %v393_v31 }
 0x104   :  { %v306_v36 = vmul.f32 %v298_v33, %v242_v32 }
 0x105   :  { %v310_v37 = vmul.f32 %v302_v35, %v246_v34 }
 0x106   :  { %v395_v40 = vpop.eup %394  ;;  %315 = vst.msk [vmem:[%s571_s4] sm:$0xff] %vm314_vm1, %v306_v36 }
 0x107   :  { %v397_v41 = vpop.eup %396  ;;  %319 = vst.msk [vmem:[%s571_s4 + $0x20] sm:$0xff] %vm314_vm1, %v310_v37  ;;  %v299_v42 = vadd.f32 1.0, %v395_v40 }
 0x108   :  { %v303_v43 = vadd.f32 1.0, %v397_v41 }
 0x109   :  { %v399_v44 = vpop.eup %398  ;;  %v307_v45 = vmul.f32 %v299_v42, %v243_v26 }
 0x10a   :  { %v401_v46 = vpop.eup %400  ;;  %v311_v47 = vmul.f32 %v303_v43, %v247_v27  ;;  %v300_v49 = vadd.f32 1.0, %v399_v44 }
 0x10b   :  { %316 = vst.msk [vmem:[%s571_s4 + $0x8] sm:$0xff] %vm314_vm1, %v307_v45  ;;  %v304_v51 = vadd.f32 1.0, %v401_v46 }
 0x10c   :  { %320 = vst.msk [vmem:[%s571_s4 + $0x28] sm:$0xff] %vm314_vm1, %v311_v47  ;;  %v308_v38 = vmul.f32 %v300_v49, %v244_v48 }
 0x10d   :  { %v312_v39 = vmul.f32 %v304_v51, %v248_v50 }
 0x10e   :  { %317 = vst.msk [vmem:[%s571_s4 + $0x10] sm:$0xff] %vm314_vm1, %v308_v38  ;;  %v403_v52 = vpop.eup %402 }
 0x10f   :  { %321 = vst.msk [vmem:[%s571_s4 + $0x30] sm:$0xff] %vm314_vm1, %v312_v39  ;;  %v405_v53 = vpop.eup %404  ;;  %v301_v55 = vadd.f32 1.0, %v403_v52 }
 0x110   :  { %v305_v57 = vadd.f32 1.0, %v405_v53 }
 0x111   :  { %v309_v58 = vmul.f32 %v301_v55, %v245_v54 }
 0x112   :  { %v313_v59 = vmul.f32 %v305_v57, %v249_v56 }
 0x113   :  { %318 = vst.msk [vmem:[%s571_s4 + $0x18] sm:$0xff] %vm314_vm1, %v309_v58 }
 0x114   :  { %322 = vst.msk [vmem:[%s571_s4 + $0x38] sm:$0xff] %vm314_vm1, %v313_v59 }

// kernel: svtrv2_forward.12
= control target key start
LH: loop header
LB: loop body
LE: loop exit
PB: predicated region body
PF: predicated region fallthrough
CT: control target
= control target key end

     0   :  { %s2247_s27 = smov 0   ;;  %s2536_s0 = inlined_call_operand.vmem [shape: f32[2,32,32], index: 0, kind: input, shape index: {}]   ;;  %s2537_s1 = inlined_call_operand.vmem [shape: f32[32,32], index: 1, kind: input, shape index: {}]   ;;  %s2538_s2 = inlined_call_operand.vmem [shape: bf16[32,96], index: 2, kind: input, shape index: {}]   ;;  %s2539_s3 = inlined_call_operand.vmem [shape: f32[1,96], index: 3, kind: input, shape index: {}]   ;;  %s2540_s4 = inlined_call_operand.vmem [shape: bf16[32,32], index: 4, kind: input, shape index: {}]   ;;  %s2541_s5 = inlined_call_operand.vmem [shape: f32[1,32], index: 5, kind: input, shape index: {}]   ;;  %s2542_s6 = inlined_call_operand.vmem [shape: f32[1,32], index: 6, kind: input, shape index: {}]   ;;  %s2543_s7 = inlined_call_operand.vmem [shape: f32[1,32], index: 7, kind: input, shape index: {}]   ;;  %s2544_s8 = inlined_call_operand.vmem [shape: bf16[32,128], index: 8, kind: input, shape index: {}]   ;;  %s2545_s9 = inlined_call_operand.vmem [shape: f32[1,128], index: 9, kind: input, shape index: {}]   ;;  %s2546_s10 = inlined_call_operand.vmem [shape: bf16[128,32], index: 10, kind: input, shape index: {}]   ;;  %s2547_s11 = inlined_call_operand.vmem [shape: f32[1,32], index: 11, kind: input, shape index: {}]   ;;  %s2548_s12 = inlined_call_operand.vmem [shape: f32[1,32], index: 12, kind: input, shape index: {}]   ;;  %s2549_s13 = inlined_call_operand.vmem [shape: f32[1,32], index: 13, kind: input, shape index: {}]   ;;  %s2550_s14 = inlined_call_operand.vmem [shape: f32[32,8], index: 14, kind: input, shape index: {}]   ;;  %s2551_s15 = inlined_call_operand.vmem [shape: f32[5,8], index: 15, kind: input, shape index: {}]   ;;  %s2552_s16 = inlined_call_operand.vmem [shape: f32[8,32], index: 16, kind: input, shape index: {}]   ;;  %s2553_s17 = inlined_call_operand.vmem [shape: f32[1,32], index: 17, kind: input, shape index: {}]   ;;  %s2554_s18 = inlined_call_operand.vmem [shape: f32[2,32,32], index: 18, kind: output, shape index: {}]  }
   0x1   :  { %2557 = sst [smem:[#allocation2_spill]] %s2536_s0 }
   0x2   :  { %2558 = sst [smem:[#allocation3_spill]] %s2537_s1 }
   0x3   :  { %2559 = sst [smem:[#allocation4_spill]] %s2538_s2 }
   0x4 LB: > { %s1844_s28 = sadd.s32 4294967295, %s2143_s27   ;;  %p1848_p0 = scmp.ge.s32.totalorder %s2143_s27, 1  ;;  %s2143_s27 = sphi %s2247_s27, %s28_s27  }
   0x5   : > { %p512_p1 = scmp.lt.s32.totalorder %s2143_s27, 3 }
   0x7   : > { %p513_p2 = pnand %p1848_p0, %p512_p1 }
   0x8   : > { %s2560_s0 = sld [smem:[#allocation4_spill]] (!%p513_p2)  ;;  %p566_p3 = scmp.lt.s32.totalorder (!%p513_p2), %s1844_s28, 1 }
   0x9   : > { %516 = sbr.rel (%p513_p2) target bundleno = 3083 (0xc0b), region = 92  ;;  %s2561_s2 = sld [smem:[#allocation2_spill]] (!%p513_p2) }
   0xa   : > { %s2145_s26 = smov (!%p513_p2), 64   ;;  %s2146_s29 = smov (!%p513_p2), 96  }
   0xb   : > { %s2562_s1 = sld [smem:[#allocation3_spill]] (!%p513_p2)  ;;  %s2149_s30 = smov (!%p513_p2), 48  }
   0xe   : > { %v2059_v0 = vld [vmem:[%s2560_s0 + $0x8] sm:$0xff]   ;;  %v2060_v1 = vld [vmem:[%s2560_s0] sm:$0xff]   ;;  %s2564_s28 = smov (!%p566_p3, %s1844_s28), 1  ;;  %vm606_vm0 = vcmask 261120   ;;  %vm674_vm1 = vcmask 130048   ;;  %vm2151_vm2 = vmmov 0  }
   0xf   : > { %1944 = vmatprep.subr.bf16.mxu1 %v2059_v0  ;;  %s1895_s20 = sshll.u32 %s2564_s28, 5  ;;  %v1853_v9 = vld [vmem:[%s2539_s3] ss:$0 sm:$0xff]  ;;  %vm1697_vm3 = vcmask 64512  }
  0x10   : > { %1945 = vmatpush3.bf16.msra.mxu1 %v2059_v0  ;;  %s570_s23 = scalar_lea.vmem %s2561_s2, %s1895_s20 }
  0x11   : > { %1946 = vmatprep.subr.bf16.mxu1 %v2060_v1  ;;  %v2269_v2 = vld [vmem:[%s570_s23] sm:$0xff]  ;;  %v2271_v3 = vld [vmem:[%s570_s23 + $0x8] sm:$0xff]  ;;  %v2273_v4 = vld [vmem:[%s570_s23 + $0x10] sm:$0xff] }
  0x12   : > { %v581_v5 = vpack.c.bf16 %v2271_v3, %v2269_v2  ;;  %v2277_v6 = vld [vmem:[%s570_s23 + $0x18] sm:$0xff]  ;;  %v2305_v26 = vld [vmem:[%s2562_s1 + $0x10] sm:$0xff]  ;;  %v2310_v29 = vld [vmem:[%s2562_s1] sm:$0xff]  ;;  %s575_s23 = scalar_lea.vmem %s2554_s18, %s1895_s20 }
  0x13   : > { %v582_v7 = vpack.c.bf16 %v2277_v6, %v2273_v4  ;;  %v2316_v33 = vld [vmem:[%s2562_s1 + $0x18] sm:$0xff]  ;;  %v2325_v41 = vld [vmem:[%s2562_s1 + $0x8] sm:$0xff] }
  0x14   : > { %1947 = vmatpush3.bf16.msra.mxu1 %v2060_v1  ;;  %1948 = vmatprep.mubr.msk.bf16.mxu1 %vm606_vm0, %v581_v5 }
  0x17   : > { %1949 = vmatmul.mubr.msk.bf16.vlgmr.msra.gmra.mxu1 %vm606_vm0, %v582_v7 }
  0xd7   : > { %v1950_v8 = vpop.f32.mrf.mxu1 }
  0xd8   : > { %v656_v12 = vadd.f32 %v1950_v8, %v1853_v9 }
  0xd9   : > { %v647_v10 = vpop.f32.mrf.mxu1 }
  0xda   : > { %v648_v15 = vadd.f32 %v1853_v9, %v647_v10 }
  0xdb   : > { %v1951_v11 = vpop.f32.mrf.mxu1 }
  0xdc   : > { %v659_v13 = vadd.f32 %v1951_v11, %v1853_v9 }
  0xdd   : > { %v650_v14 = vpop.f32.mrf.mxu1 }
  0xde   : > { %v2286_v16 = vpack.c.bf16 %v659_v13, %v656_v12  ;;  %v651_v17 = vadd.f32 %v1853_v9, %v650_v14 }
  0xe0   : > { %v2288_v18 = vpack.c.bf16 %v651_v17, %v648_v15  ;;  %788 = vrot.lane.b32.xlu1 %v2286_v16, %s2145_s26  ;;  %672 = vrot.lane.b32.xlu0 %v2286_v16, %s2146_s29 }
  0xe2   : > { %1956 = vmatprep.mubr.msk.bf16.mxu1 %vm674_vm1, %v2288_v18 }
  0xe4   : > { %786 = vrot.lane.b32.xlu1 %v2288_v18, %s2145_s26  ;;  %670 = vrot.lane.b32.xlu0 %v2288_v18, %s2146_s29  ;;  %s2147_s26 = smov 112   ;;  %s2148_s29 = smov 80  }
 0x152   : > { %v789_v19 = vpop.permute.xlu1 %788  ;;  %v673_v20 = vpop.permute.xlu0 %672 }
 0x153   : > { %v685_v21 = vsel %vm674_vm1, %v673_v20, 0  ;;  %2040 = vmatprep.subr.msk.bf16.mxu1 %vm674_vm1, %v673_v20  ;;  %1960 = vmatprep.subr.bf16.mxu0 %v789_v19 }
 0x154   : > { %1953 = vmatpush3.bf16.xpose.msra.mxu1 %v685_v21  ;;  %1961 = vmatpush3.bf16.msra.mxu0 %v789_v19 }
 0x156   : > { %v787_v22 = vpop.permute.xlu1 %786  ;;  %v671_v23 = vpop.permute.xlu0 %670 }
 0x157   : > { %2041 = vmatprep.subr.msk.bf16.mxu1 %vm674_vm1, %v671_v23  ;;  %1962 = vmatprep.subr.bf16.mxu0 %v787_v22  ;;  %v682_v24 = vsel %vm674_vm1, %v671_v23, 0 }
 0x158   : > { %1963 = vmatpush3.bf16.msra.mxu0 %v787_v22 }
 0x15c   : > { %1955 = vmatpush3.bf16.xpose.msra.mxu1 %v682_v24 }
 0x163   : > { %1957 = vmatmul.mubr.msk.bf16.vlgmr.msra.gmra.mxu1 %vm674_vm1, %v2286_v16 }
 0x223   : > { %v1958_v25 = vpop.f32.mrf.mxu1 }
 0x224   : > { %v738_v27 = vmul.f32 0.25, %v1958_v25 }
 0x225   : > { %v721_v28 = vpop.f32.mrf.mxu1 }
 0x226   : > { %v736_v30 = vmul.f32 0.25, %v721_v28  ;;  %v746_v31 = vadd.f32 %v2305_v26, %v738_v27 }
 0x227   : > { %v1959_v32 = vpop.f32.mrf.mxu1 }
 0x228   : > { %v739_v34 = vmul.f32 0.25, %v1959_v32  ;;  %v754_v35 = vsel %vm606_vm0, %v746_v31, -inf  ;;  %v744_v36 = vadd.f32 %v2310_v29, %v736_v30 }
 0x229   : > { %755 = vmax.xlane.f32.xlu0 %v754_v35  ;;  %v724_v37 = vpop.f32.mrf.mxu1  ;;  %v2061_v35 = vld [vmem:[%s2540_s4] sm:$0xff]  }
 0x22a   : > { %v737_v38 = vmul.f32 0.25, %v724_v37  ;;  %v748_v39 = vsel %vm606_vm0, %v744_v36, -inf  ;;  %v747_v40 = vadd.f32 %v2316_v33, %v739_v34 }
 0x22b   : > { %749 = vmax.xlane.f32.xlu1 %v748_v39 }
 0x22c   : > { %v757_v42 = vsel %vm606_vm0, %v747_v40, -inf  ;;  %v745_v43 = vadd.f32 %v2325_v41, %v737_v38 }
 0x22e   : > { %v751_v44 = vsel %vm606_vm0, %v745_v43, -inf }
 0x22f   : > { %758 = vmax.xlane.f32.xlu1 %v757_v42 }
 0x233   : > { %752 = vmax.xlane.f32.xlu1 %v751_v44 }
 0x23f   : > { %857 = vrot.lane.b32.xlu0 %v2288_v18, %s2147_s26 }
 0x244   : > { %863 = vrot.lane.b32.xlu1 %v2286_v16, %s2148_s29 }
 0x248   : > { %861 = vrot.lane.b32.xlu1 %v2288_v18, %s2148_s29 }
 0x24c   : > { %859 = vrot.lane.b32.xlu1 %v2286_v16, %s2147_s26 }
 0x2b2   : > { %v756_v46 = vpop.xlane.xlu0 %755 }
 0x2b3   : > { %v762_v50 = vsub.f32 %v746_v31, %v756_v46 }
 0x2b4   : > { %v750_v45 = vpop.xlane.xlu1 %749 }
 0x2b5   : > { %v760_v47 = vsub.f32 %v744_v36, %v750_v45  ;;  %v768_v55 = vmul.f32 1.442695, %v762_v50 }
 0x2b6   : > { %v858_v0 = vpop.permute.xlu0 %857 }
 0x2b7   : > { %v764_v51 = vmul.f32 1.442695, %v760_v47 }
 0x2b8   : > { %v759_v48 = vpop.xlane.xlu1 %758 }
 0x2b9   : > { %v763_v49 = vsub.f32 %v747_v40, %v759_v48  ;;  %2073 = vpow2.f32 %v764_v51 }
 0x2bb   : > { %v770_v52 = vmul.f32 1.442695, %v763_v49 }
 0x2bc   : > { %v753_v53 = vpop.xlane.xlu1 %752 }
 0x2bd   : > { %v761_v54 = vsub.f32 %v745_v43, %v753_v53  ;;  %2075 = vpow2.f32 %v770_v52 }
 0x2bf   : > { %v766_v56 = vmul.f32 1.442695, %v761_v54 }
 0x2c0   : > { %v864_v57 = vpop.permute.xlu1 %863 }
 0x2c1   : > { %2077 = vpow2.f32 %v766_v56  ;;  %2042 = vmatprep.subr.msk.bf16.mxu0 %vm674_vm1, %v864_v57  ;;  %v875_v1 = vsel %vm674_vm1, %v864_v57, 0 }
 0x2c2   : > { %2079 = vpow2.f32 %v768_v55 }
 0x2c4   : > { %v862_v5 = vpop.permute.xlu1 %861 }
 0x2c5   : > { %v872_v7 = vsel %vm674_vm1, %v862_v5, 0 }
 0x2c6   : > { %v2074_v58 = vpop.eup %2073 }
 0x2c7   : > { %v772_v32 = vsel %vm606_vm0, %v2074_v58, 0.0 }
 0x2c8   : > { %v860_v8 = vpop.permute.xlu1 %859 }
 0x2ca   : > { %v2076_v59 = vpop.eup %2075 }
 0x2ce   : > { %v2078_v60 = vpop.eup %2077 }
 0x2cf   : > { %v2080_v61 = vpop.eup %2079  ;;  %v784_v62 = vpack.c.bf16 %v2078_v60, %v2074_v58 }
 0x2d0   : > { %v785_v63 = vpack.c.bf16 %v2076_v59, %v2080_v61  ;;  %v778_v34 = vsel %vm606_vm0, %v2080_v61, 0.0 }
 0x2d1   : > { %1964 = vmatprep.mubr.msk.bf16.mxu0 %vm606_vm0, %v784_v62 }
 0x2d2   : > { %1965 = vmatmul.mubr.msk.bf16.vlgmr.msra.gmra.mxu0 %vm606_vm0, %v785_v63 }
 0x2d3   : > { %1969 = vmatpush3.bf16.xpose.msra.mxu0 %v875_v1  ;;  %1972 = vmatprep.mubr.msk.bf16.mxu0 %vm674_vm1, %v858_v0 }
 0x2d4   : > { %2043 = vmatprep.subr.msk.bf16.mxu0 %vm674_vm1, %v862_v5 }
 0x2db   : > { %1971 = vmatpush3.bf16.xpose.msra.mxu0 %v872_v7 }
 0x2dc   : > { %1990 = vmatprep.subr.bf16.mxu0 %v2061_v35 }
 0x2e2   : > { %1973 = vmatmul.mubr.msk.bf16.vlgmr.msra.gmra.mxu0 %vm674_vm1, %v860_v8 }
 0x2e3   : > { %1991 = vmatpush3.bf16.msra.mxu0 %v2061_v35 }
 0x392   : > { %v2342_v9 = vpop.f32.mrf.mxu0 }
 0x394   : > { %v2344_v10 = vpop.f32.mrf.mxu0 }
 0x396   : > { %v2346_v11 = vpop.f32.mrf.mxu0 }
 0x398   : > { %v2348_v12 = vpop.f32.mrf.mxu0 }
 0x3a2   : > { %v1974_v13 = vpop.f32.mrf.mxu0 }
 0x3a3   : > { %v928_v14 = vmul.f32 0.25, %v1974_v13 }
 0x3a4   : > { %v911_v15 = vpop.f32.mrf.mxu0 }
 0x3a5   : > { %v926_v17 = vmul.f32 0.25, %v911_v15  ;;  %v932_v19 = vadd.f32 %v928_v14, %v2305_v26 }
 0x3a6   : > { %v1975_v20 = vpop.f32.mrf.mxu0 }
 0x3a7   : > { %v929_v21 = vmul.f32 0.25, %v1975_v20  ;;  %v940_v22 = vsel %vm606_vm0, %v932_v19, -inf  ;;  %v930_v23 = vadd.f32 %v926_v17, %v2310_v29  ;;  %v775_v29 = vsel %vm606_vm0, %v2078_v60, 0.0  ;;  %v2062_v17 = vld [vmem:[%s2540_s4 + $0x8] sm:$0xff]  }
 0x3a8   : > { %941 = vmax.xlane.f32.xlu1 %v940_v22  ;;  %v914_v24 = vpop.f32.mrf.mxu0 }
 0x3a9   : > { %v927_v25 = vmul.f32 0.25, %v914_v24  ;;  %v934_v27 = vsel %vm606_vm0, %v930_v23, -inf  ;;  %v933_v30 = vadd.f32 %v929_v21, %v2316_v33  ;;  %v781_v33 = vsel %vm606_vm0, %v2076_v59, 0.0 }
 0x3ab   : > { %v931_v28 = vadd.f32 %v927_v25, %v2325_v41  ;;  %v943_v26 = vsel %vm606_vm0, %v933_v30, -inf }
 0x3ac   : > { %935 = vmax.xlane.f32.xlu1 %v934_v27 }
 0x3ad   : > { %v937_v31 = vsel %vm606_vm0, %v931_v28, -inf }
 0x3ae   : > { %938 = vmax.xlane.f32.xlu0 %v937_v31 }
 0x3b0   : > { %944 = vmax.xlane.f32.xlu1 %v943_v26 }
 0x3c1   : > { %974 = vrot.lane.b32.xlu1 %v2286_v16, %s2149_s30 }
 0x3c4   : > { %972 = vrot.lane.b32.xlu0 %v2288_v18, %s2149_s30 }
 0x3e3   : > { %776 = vadd.xlane.f32.xlu0 %v775_v29 }
 0x3e5   : > { %773 = vadd.xlane.f32.xlu1 %v772_v32 }
 0x3e7   : > { %782 = vadd.xlane.f32.xlu0 %v781_v33 }
 0x3e9   : > { %779 = vadd.xlane.f32.xlu1 %v778_v34 }
 0x431   : > { %v942_v16 = vpop.xlane.xlu1 %941 }
 0x432   : > { %v948_v18 = vsub.f32 %v932_v19, %v942_v16 }
 0x434   : > { %v954_v38 = vmul.f32 1.442695, %v948_v18 }
 0x435   : > { %v936_v36 = vpop.xlane.xlu1 %935 }
 0x436   : > { %v946_v37 = vsub.f32 %v930_v23, %v936_v36  ;;  %v1872_v36 = vld [vmem:[%s2541_s5] ss:$0 sm:$0xff] }
 0x437   : > { %v939_v39 = vpop.xlane.xlu0 %938 }
 0x438   : > { %v950_v40 = vmul.f32 1.442695, %v946_v37  ;;  %v947_v41 = vsub.f32 %v931_v28, %v939_v39 }
 0x439   : > { %v945_v42 = vpop.xlane.xlu1 %944 }
 0x43a   : > { %2081 = vpow2.f32 %v950_v40  ;;  %v952_v43 = vmul.f32 1.442695, %v947_v41  ;;  %v949_v44 = vsub.f32 %v933_v30, %v945_v42 }
 0x43b   : > { %2083 = vpow2.f32 %v954_v38  ;;  %v973_v47 = vpop.permute.xlu0 %972 }
 0x43c   : > { %2085 = vpow2.f32 %v952_v43  ;;  %v956_v45 = vmul.f32 1.442695, %v949_v44 }
 0x43d   : > { %v975_v46 = vpop.permute.xlu1 %974 }
 0x43e   : > { %2087 = vpow2.f32 %v956_v45  ;;  %1976 = vmatprep.subr.bf16.mxu1 %v975_v46 }
 0x43f   : > { %1977 = vmatpush3.bf16.msra.mxu1 %v975_v46 }
 0x440   : > { %1978 = vmatprep.subr.bf16.mxu1 %v973_v47 }
 0x443   : > { %1979 = vmatpush3.bf16.msra.mxu1 %v973_v47 }
 0x444   : > { %1984 = vmatprep.subr.bf16.mxu1 %v2062_v17 }
 0x447   : > { %v2082_v48 = vpop.eup %2081 }
 0x448   : > { %v2084_v49 = vpop.eup %2083  ;;  %v958_v50 = vsel %vm606_vm0, %v2082_v48, 0.0 }
 0x449   : > { %v2086_v51 = vpop.eup %2085  ;;  %959 = vadd.xlane.f32.xlu1 %v958_v50  ;;  %v964_v55 = vsel %vm606_vm0, %v2084_v49, 0.0 }
 0x44a   : > { %v961_v52 = vsel %vm606_vm0, %v2086_v51, 0.0  ;;  %v970_v53 = vpack.c.bf16 %v2086_v51, %v2082_v48 }
 0x44b   : > { %v2088_v54 = vpop.eup %2087  ;;  %962 = vadd.xlane.f32.xlu0 %v961_v52 }
 0x44c   : > { %1980 = vmatprep.mubr.msk.bf16.mxu1 %vm606_vm0, %v970_v53  ;;  %v971_v56 = vpack.c.bf16 %v2088_v54, %v2084_v49  ;;  %v967_v57 = vsel %vm606_vm0, %v2088_v54, 0.0 }
 0x44d   : > { %965 = vadd.xlane.f32.xlu1 %v964_v55 }
 0x44e   : > { %1981 = vmatmul.mubr.msk.bf16.vlgmr.msra.gmra.mxu1 %vm606_vm0, %v971_v56 }
 0x44f   : > { %968 = vadd.xlane.f32.xlu0 %v967_v57  ;;  %1985 = vmatpush3.bf16.msra.mxu1 %v2062_v17  ;;  %v2063_v17 = vld [vmem:[%s2544_s8 + $0x8] sm:$0xff]  }
 0x450   : > { %1996 = vmatprep.subr.bf16.mxu1 %v2063_v17 }
 0x46c   : > { %v777_v58 = vpop.xlane.xlu0 %776 }
 0x46d   : > { %2089 = vrcp.f32 %v777_v58 }
 0x46e   : > { %v774_v59 = vpop.xlane.xlu1 %773 }
 0x46f   : > { %2091 = vrcp.f32 %v774_v59 }
 0x470   : > { %v783_v60 = vpop.xlane.xlu0 %782 }
 0x471   : > { %2093 = vrcp.f32 %v783_v60 }
 0x472   : > { %v780_v61 = vpop.xlane.xlu1 %779 }
 0x473   : > { %2095 = vrcp.f32 %v780_v61 }
 0x47a   : > { %v2090_v62 = vpop.eup %2089 }
 0x47b   : > { %v850_v1 = vmul.f32 %v2090_v62, %v2348_v12 }
 0x47c   : > { %v2092_v63 = vpop.eup %2091 }
 0x47d   : > { %v848_v0 = vmul.f32 %v2092_v63, %v2344_v10 }
 0x47e   : > { %v2094_v5 = vpop.eup %2093 }
 0x47f   : > { %v855_v7 = vpack.c.bf16 %v850_v1, %v848_v0  ;;  %v854_v14 = vmul.f32 %v2094_v5, %v2346_v11 }
 0x480   : > { %v2096_v8 = vpop.eup %2095 }
 0x481   : > { %1992 = vmatprep.mubr.msk.bf16.mxu0 %vm674_vm1, %v855_v7  ;;  %v852_v13 = vmul.f32 %v2096_v8, %v2342_v9 }
 0x483   : > { %v856_v15 = vpack.c.bf16 %v854_v14, %v852_v13 }
 0x485   : > { %1993 = vmatmul.mubr.msk.bf16.vlgmr.msra.gmra.mxu0 %vm674_vm1, %v856_v15 }
 0x4d2   : > { %v960_v12 = vpop.xlane.xlu1 %959 }
 0x4d3   : > { %2097 = vrcp.f32 %v960_v12 }
 0x4d4   : > { %v963_v10 = vpop.xlane.xlu0 %962 }
 0x4d6   : > { %v966_v20 = vpop.xlane.xlu1 %965 }
 0x4d8   : > { %v969_v19 = vpop.xlane.xlu0 %968 }
 0x4d9   : > { %2099 = vrcp.f32 %v969_v19 }
 0x4da   : > { %2101 = vrcp.f32 %v963_v10  ;;  %v2064_v10 = vld [vmem:[%s2544_s8] sm:$0xff]  }
 0x4db   : > { %2103 = vrcp.f32 %v966_v20 }
 0x4e0   : > { %v2098_v11 = vpop.eup %2097 }
 0x4e6   : > { %v2100_v23 = vpop.eup %2099 }
 0x4e7   : > { %v2102_v24 = vpop.eup %2101 }
 0x4e8   : > { %v2104_v28 = vpop.eup %2103 }
 0x50e   : > { %v1982_v9 = vpop.f32.mrf.mxu1 }
 0x50f   : > { %v1038_v26 = vmul.f32 %v2104_v28, %v1982_v9 }
 0x510   : > { %v1018_v21 = vpop.f32.mrf.mxu1 }
 0x511   : > { %v1034_v30 = vmul.f32 %v2098_v11, %v1018_v21 }
 0x512   : > { %v1983_v22 = vpop.f32.mrf.mxu1 }
 0x513   : > { %v1040_v25 = vmul.f32 %v2100_v23, %v1983_v22 }
 0x514   : > { %v1021_v27 = vpop.f32.mrf.mxu1 }
 0x515   : > { %v1036_v31 = vmul.f32 %v2102_v24, %v1021_v27  ;;  %v1042_v32 = vpack.c.bf16 %v1040_v25, %v1038_v26  ;;  %v1873_v26 = vld [vmem:[%s2542_s6] ss:$0 sm:$0xff] }
 0x517   : > { %v1041_v29 = vpack.c.bf16 %v1036_v31, %v1034_v30 }
 0x519   : > { %1986 = vmatprep.mubr.msk.bf16.mxu1 %vm674_vm1, %v1041_v29 }
 0x51a   : > { %1987 = vmatmul.mubr.msk.bf16.vlgmr.msra.gmra.mxu1 %vm674_vm1, %v1042_v32 }
 0x51b   : > { %1997 = vmatpush3.bf16.msra.mxu1 %v2063_v17 }
 0x51c   : > { %1998 = vmatprep.subr.bf16.mxu1 %v2064_v10 }
 0x51f   : > { %1999 = vmatpush3.bf16.msra.mxu1 %v2064_v10 }
 0x545   : > { %v1994_v33 = vpop.f32.mrf.mxu0 }
 0x547   : > { %v1150_v34 = vpop.f32.mrf.mxu0 }
 0x549   : > { %v1995_v18 = vpop.f32.mrf.mxu0 }
 0x54b   : > { %v1153_v43 = vpop.f32.mrf.mxu0 }
 0x5da   : > { %v1988_v35 = vpop.f32.mrf.mxu1 }
 0x5db   : > { %v1159_v16 = vadd.f32 %v1994_v33, %v1988_v35 }
 0x5dc   : > { %v1089_v37 = vpop.f32.mrf.mxu1 }
 0x5dd   : > { %v1151_v38 = vadd.f32 %v1150_v34, %v1089_v37  ;;  %v1174_v40 = vadd.f32 %v1872_v36, %v1159_v16  ;;  %v1874_v16 = vld [vmem:[%s2543_s7] ss:$0 sm:$0xff] }
 0x5de   : > { %v1989_v39 = vpop.f32.mrf.mxu1 }
 0x5df   : > { %v1172_v41 = vadd.f32 %v1872_v36, %v1151_v38  ;;  %v1162_v42 = vadd.f32 %v1995_v18, %v1989_v39  ;;  %v1178_v50 = vadd.f32 %v1174_v40, %v2273_v4 }
 0x5e0   : > { %v1092_v44 = vpop.f32.mrf.mxu1 }
 0x5e1   : > { %v1154_v45 = vadd.f32 %v1153_v43, %v1092_v44  ;;  %v1176_v46 = vadd.f32 %v1172_v41, %v2269_v2  ;;  %v1175_v47 = vadd.f32 %v1872_v36, %v1162_v42  ;;  %v1186_v52 = vsel %vm606_vm0, %v1178_v50, 0.0 }
 0x5e3   : > { %v1173_v48 = vadd.f32 %v1872_v36, %v1154_v45  ;;  %v1180_v49 = vsel %vm606_vm0, %v1176_v46, 0.0  ;;  %v1179_v54 = vadd.f32 %v1175_v47, %v2277_v6  ;;  %v2066_v47 = vld [vmem:[%s2546_s10 + $0x30] sm:$0xff]  }
 0x5e4   : > { %1181 = vadd.xlane.f32.xlu1 %v1180_v49  ;;  %v2068_v49 = vld [vmem:[%s2546_s10 + $0x20] sm:$0xff]  }
 0x5e5   : > { %v1177_v51 = vadd.f32 %v1173_v48, %v2271_v3  ;;  %v1189_v55 = vsel %vm606_vm0, %v1179_v54, 0.0  ;;  %v2067_v48 = vld [vmem:[%s2546_s10 + $0x28] sm:$0xff]  }
 0x5e7   : > { %v1183_v53 = vsel %vm606_vm0, %v1177_v51, 0.0 }
 0x5e8   : > { %1187 = vadd.xlane.f32.xlu1 %v1186_v52  ;;  %1184 = vadd.xlane.f32.xlu0 %v1183_v53  ;;  %v2071_v52 = vld [vmem:[%s2546_s10 + $0x8] sm:$0xff]   ;;  %v2072_v53 = vld [vmem:[%s2546_s10] sm:$0xff]  }
 0x5ec   : > { %1190 = vadd.xlane.f32.xlu0 %v1189_v55 }
 0x66d   : > { %v1182_v2 = vpop.xlane.xlu1 %1181 }
 0x66e   : > { %v1193_v56 = vmul.f32 0.03125, %v1182_v2 }
 0x670   : > { %v1197_v57 = vsub.f32 %v1176_v46, %v1193_v56  ;;  %v2065_v46 = vld [vmem:[%s2546_s10 + $0x38] sm:$0xff]  }
 0x671   : > { %v1188_v58 = vpop.xlane.xlu1 %1187  ;;  %v1185_v59 = vpop.xlane.xlu0 %1184  ;;  %2004 = vmatprep.subr.bf16.mxu0 %v2065_v46 }
 0x672   : > { %v1195_v4 = vmul.f32 0.03125, %v1188_v58  ;;  %v1194_v60 = vmul.f32 0.03125, %v1185_v59  ;;  %v1201_v61 = vmul.f32 %v1197_v57, %v1197_v57  ;;  %2005 = vmatpush3.bf16.msra.mxu0 %v2065_v46 }
 0x673   : > { %2006 = vmatprep.subr.bf16.mxu0 %v2066_v47 }
 0x674   : > { %v1199_v3 = vsub.f32 %v1178_v50, %v1195_v4  ;;  %v1198_v62 = vsub.f32 %v1177_v51, %v1194_v60  ;;  %v1205_v63 = vsel %vm606_vm0, %v1201_v61, 0.0  ;;  %v2069_v50 = vld [vmem:[%s2546_s10 + $0x18] sm:$0xff]   ;;  %v2070_v51 = vld [vmem:[%s2546_s10 + $0x10] sm:$0xff]  }
 0x675   : > { %1206 = vadd.xlane.f32.xlu1 %v1205_v63  ;;  %v1191_v0 = vpop.xlane.xlu0 %1190 }
 0x676   : > { %v1196_v6 = vmul.f32 0.03125, %v1191_v0  ;;  %v1203_v1 = vmul.f32 %v1199_v3, %v1199_v3  ;;  %v1202_v5 = vmul.f32 %v1198_v62, %v1198_v62  ;;  %2007 = vmatpush3.bf16.msra.mxu0 %v2066_v47 }
 0x677   : > { %2008 = vmatprep.subr.bf16.mxu0 %v2067_v48 }
 0x678   : > { %v1200_v7 = vsub.f32 %v1179_v54, %v1196_v6  ;;  %v1211_v8 = vsel %vm606_vm0, %v1203_v1, 0.0  ;;  %v1208_v13 = vsel %vm606_vm0, %v1202_v5, 0.0  ;;  %v1875_v54 = vld [vmem:[%s2545_s9] ss:$0 sm:$0xff] }
 0x679   : > { %1212 = vadd.xlane.f32.xlu1 %v1211_v8  ;;  %1209 = vadd.xlane.f32.xlu0 %v1208_v13 }
 0x67a   : > { %v1204_v14 = vmul.f32 %v1200_v7, %v1200_v7  ;;  %2009 = vmatpush3.bf16.msra.mxu0 %v2067_v48 }
 0x67b   : > { %2010 = vmatprep.subr.bf16.mxu0 %v2068_v49 }
 0x67c   : > { %v1214_v15 = vsel %vm606_vm0, %v1204_v14, 0.0 }
 0x67d   : > { %1215 = vadd.xlane.f32.xlu0 %v1214_v15 }
 0x67e   : > { %2011 = vmatpush3.bf16.msra.mxu0 %v2068_v49 }
 0x67f   : > { %2012 = vmatprep.subr.bf16.mxu0 %v2069_v50 }
 0x682   : > { %2013 = vmatpush3.bf16.msra.mxu0 %v2069_v50 }
 0x683   : > { %2014 = vmatprep.subr.bf16.mxu0 %v2070_v51 }
 0x686   : > { %2015 = vmatpush3.bf16.msra.mxu0 %v2070_v51 }
 0x687   : > { %2016 = vmatprep.subr.bf16.mxu0 %v2071_v52 }
 0x68a   : > { %2017 = vmatpush3.bf16.msra.mxu0 %v2071_v52 }
 0x68b   : > { %2018 = vmatprep.subr.bf16.mxu0 %v2072_v53 }
 0x68e   : > { %2019 = vmatpush3.bf16.msra.mxu0 %v2072_v53 }
 0x6fe   : > { %v1207_v12 = vpop.xlane.xlu1 %1206 }
 0x6ff   : > { %v1217_v19 = vmul.f32 0.03125, %v1207_v12 }
 0x701   : > { %v1221_v20 = vadd.f32 1e-06, %v1217_v19 }
 0x702   : > { %v1213_v9 = vpop.xlane.xlu1 %1212  ;;  %v1210_v21 = vpop.xlane.xlu0 %1209 }
 0x703   : > { %2105 = vrsqrt.f32 %v1221_v20  ;;  %v1219_v11 = vmul.f32 0.03125, %v1213_v9  ;;  %v1218_v22 = vmul.f32 0.03125, %v1210_v21 }
 0x705   : > { %v1223_v23 = vadd.f32 1e-06, %v1219_v11  ;;  %v1222_v24 = vadd.f32 1e-06, %v1218_v22 }
 0x706   : > { %v1216_v25 = vpop.xlane.xlu0 %1215 }
 0x707   : > { %2107 = vrsqrt.f32 %v1223_v23  ;;  %v1220_v27 = vmul.f32 0.03125, %v1216_v25 }
 0x708   : > { %2109 = vrsqrt.f32 %v1222_v24 }
 0x709   : > { %v1224_v28 = vadd.f32 1e-06, %v1220_v27 }
 0x70b   : > { %2111 = vrsqrt.f32 %v1224_v28 }
 0x710   : > { %v2106_v30 = vpop.eup %2105 }
 0x711   : > { %v1229_v31 = vmul.f32 %v2106_v30, %v1197_v57 }
 0x713   : > { %v1240_v35 = vmul.f32 %v1873_v26, %v1229_v31 }
 0x714   : > { %v2108_v29 = vpop.eup %2107 }
 0x715   : > { %v2110_v32 = vpop.eup %2109  ;;  %v1231_v33 = vmul.f32 %v2108_v29, %v1199_v3  ;;  %v2411_v39 = vadd.f32 %v1874_v16, %v1240_v35 }
 0x716   : > { %v1230_v34 = vmul.f32 %v2110_v32, %v1198_v62 }
 0x717   : > { %v1242_v38 = vmul.f32 %v1873_v26, %v1231_v33 }
 0x718   : > { %v2112_v18 = vpop.eup %2111  ;;  %v1241_v36 = vmul.f32 %v1873_v26, %v1230_v34 }
 0x719   : > { %v1232_v37 = vmul.f32 %v2112_v18, %v1200_v7  ;;  %v2417_v43 = vadd.f32 %v1874_v16, %v1242_v38  ;;  %v1880_v38 = vld [vmem:[%s2547_s11] ss:$0 sm:$0xff] }
 0x71a   : > { %v2413_v40 = vadd.f32 %v1874_v16, %v1241_v36 }
 0x71b   : > { %v1243_v41 = vmul.f32 %v1873_v26, %v1232_v37 }
 0x71c   : > { %v1255_v42 = vpack.c.bf16 %v2413_v40, %v2411_v39 }
 0x71d   : > { %v2419_v44 = vadd.f32 %v1874_v16, %v1243_v41 }
 0x71e   : > { %2000 = vmatprep.mubr.msk.bf16.mxu1 %vm606_vm0, %v1255_v42 }
 0x71f   : > { %v1256_v45 = vpack.c.bf16 %v2419_v44, %v2417_v43 }
 0x721   : > { %2001 = vmatmul.mubr.msk.bf16.vlgmr.msra.gmra.mxu1 %vm606_vm0, %v1256_v45 }
 0x7e1   : > { %v2002_v55 = vpop.f32.mrf.mxu1 }
 0x7e2   : > { %v1329_v2 = vadd.f32 %v2002_v55, %v1875_v54 }
 0x7e3   : > { %v1320_v56 = vpop.f32.mrf.mxu1 }
 0x7e4   : > { %v1341_v57 = vmul.f32 %v1329_v2, %v1329_v2  ;;  %v1321_v58 = vadd.f32 %v1875_v54, %v1320_v56  ;;  %v1337_v32 = vmul.f32 0.5, %v1329_v2 }
 0x7e5   : > { %v2003_v59 = vpop.f32.mrf.mxu1 }
 0x7e6   : > { %v1345_v4 = vmul.f32 %v1341_v57, %v1329_v2  ;;  %v1339_v60 = vmul.f32 %v1321_v58, %v1321_v58  ;;  %v1332_v61 = vadd.f32 %v2003_v59, %v1875_v54  ;;  %v1335_v31 = vmul.f32 0.5, %v1321_v58 }
 0x7e7   : > { %v1323_v3 = vpop.f32.mrf.mxu1 }
 0x7e8   : > { %v1349_v62 = vmul.f32 0.044715, %v1345_v4  ;;  %v1343_v63 = vmul.f32 %v1339_v60, %v1321_v58  ;;  %v1342_v0 = vmul.f32 %v1332_v61, %v1332_v61  ;;  %v1324_v6 = vadd.f32 %v1875_v54, %v1323_v3 }
 0x7e9   : > { %v1338_v28 = vmul.f32 0.5, %v1332_v61 }
 0x7ea   : > { %v1353_v1 = vadd.f32 %v1349_v62, %v1329_v2  ;;  %v1347_v5 = vmul.f32 0.044715, %v1343_v63  ;;  %v1346_v7 = vmul.f32 %v1342_v0, %v1332_v61  ;;  %v1340_v8 = vmul.f32 %v1324_v6, %v1324_v6 }
 0x7eb   : > { %v1336_v26 = vmul.f32 0.5, %v1324_v6 }
 0x7ec   : > { %v1357_v13 = vmul.f32 0.7978846, %v1353_v1  ;;  %v1351_v14 = vadd.f32 %v1347_v5, %v1321_v58  ;;  %v1350_v15 = vmul.f32 0.044715, %v1346_v7  ;;  %v1344_v17 = vmul.f32 %v1340_v8, %v1324_v6 }
 0x7ee   : > { %v1355_v10 = vmul.f32 0.7978846, %v1351_v14  ;;  %v1354_v12 = vadd.f32 %v1350_v15, %v1332_v61  ;;  %v1348_v19 = vmul.f32 0.044715, %v1344_v17  ;;  %2113 = vtanh.f32 %v1357_v13  ;;  %v1589_v14 = vld [vmem:[%s2550_s14 + $0x18] sm:$0xff]  ;;  %v1588_v17 = vld [vmem:[%s2550_s14 + $0x10] sm:$0xff] }
 0x7ef   : > { %v2150_v15 = vmov 0.0  }
 0x7f0   : > { %v1358_v20 = vmul.f32 0.7978846, %v1354_v12  ;;  %2115 = vtanh.f32 %v1355_v10  ;;  %v1352_v9 = vadd.f32 %v1348_v19, %v1324_v6  ;;  %2024 = vmatprep.subr.mxu1 %v2150_v15  ;;  %2032 = vmatprep.mubr.msk.f32.mxu1 %vm2151_vm2, %v2150_v15  ;;  %v1587_v10 = vld [vmem:[%s2550_s14 + $0x8] sm:$0xff]  ;;  %v1586_v12 = vld [vmem:[%s2550_s14] sm:$0xff] }
 0x7f1   : > { %2025 = vmatpush3.msra.mxu1 %v1589_v14 }
 0x7f2   : > { %2117 = vtanh.f32 %v1358_v20  ;;  %v1356_v21 = vmul.f32 0.7978846, %v1352_v9  ;;  %2026 = vmatprep.subr.mxu1 %v2150_v15 }
 0x7f3   : > { %2027 = vmatpush3.msra.mxu1 %v1588_v17 }
 0x7f4   : > { %2119 = vtanh.f32 %v1356_v21  ;;  %2028 = vmatprep.subr.mxu1 %v2150_v15 }
 0x7f5   : > { %2029 = vmatpush3.msra.mxu1 %v1587_v10 }
 0x7f6   : > { %2030 = vmatprep.subr.mxu1 %v2150_v15 }
 0x7f7   : > { %2031 = vmatpush3.msra.mxu1 %v1586_v12 }
 0x7f8   : > { %2035 = vmatprep.subr.mxu1 %v2150_v15 }
 0x7fb   : > { %v2114_v11 = vpop.eup %2113 }
 0x7fc   : > { %v1365_v30 = vadd.f32 1.0, %v2114_v11 }
 0x7fd   : > { %v2116_v22 = vpop.eup %2115 }
 0x7fe   : > { %v1363_v25 = vadd.f32 1.0, %v2116_v22  ;;  %v1369_v16 = vmul.f32 %v1365_v30, %v1337_v32 }
 0x7ff   : > { %v2118_v23 = vpop.eup %2117 }
 0x800   : > { %v1366_v24 = vadd.f32 1.0, %v2118_v23  ;;  %v1367_v34 = vmul.f32 %v1363_v25, %v1335_v31 }
 0x801   : > { %v2120_v27 = vpop.eup %2119 }
 0x802   : > { %v1364_v29 = vadd.f32 1.0, %v2120_v27  ;;  %v1370_v33 = vmul.f32 %v1366_v24, %v1338_v28 }
 0x804   : > { %v1368_v35 = vmul.f32 %v1364_v29, %v1336_v26  ;;  %v1372_v36 = vpack.c.bf16 %v1370_v33, %v1369_v16  ;;  %v1889_v26 = vld [vmem:[%s2548_s12] ss:$0 sm:$0xff] }
 0x806   : > { %v1371_v18 = vpack.c.bf16 %v1368_v35, %v1367_v34  ;;  %v1890_v34 = vld [vmem:[%s2549_s13] ss:$0 sm:$0xff] }
 0x808   : > { %2020 = vmatprep.mubr.bf16.mxu0 %v1371_v18 }
 0x809   : > { %2021 = vmatmul.mubr.bf16.vlgmr.msra.gmra.mxu0 %v1372_v36 }
 0x8c9   : > { %v2022_v37 = vpop.f32.mrf.mxu0 }
 0x8ca   : > { %v1487_v42 = vadd.f32 %v2022_v37, %v1880_v38 }
 0x8cb   : > { %v1478_v41 = vpop.f32.mrf.mxu0 }
 0x8cc   : > { %v1479_v45 = vadd.f32 %v1880_v38, %v1478_v41  ;;  %v1495_v52 = vadd.f32 %v1487_v42, %v2417_v43 }
 0x8cd   : > { %v2023_v46 = vpop.f32.mrf.mxu0 }
 0x8ce   : > { %v1493_v47 = vadd.f32 %v1479_v45, %v2411_v39  ;;  %v1490_v49 = vadd.f32 %v2023_v46, %v1880_v38  ;;  %v1503_v55 = vsel %vm606_vm0, %v1495_v52, 0.0 }
 0x8cf   : > { %v1481_v48 = vpop.f32.mrf.mxu0 }
 0x8d0   : > { %v1482_v50 = vadd.f32 %v1880_v38, %v1481_v48  ;;  %v1497_v51 = vsel %vm606_vm0, %v1493_v47, 0.0  ;;  %v1496_v2 = vadd.f32 %v1490_v49, %v2419_v44 }
 0x8d1   : > { %1498 = vadd.xlane.f32.xlu1 %v1497_v51 }
 0x8d2   : > { %v1494_v53 = vadd.f32 %v1482_v50, %v2413_v40  ;;  %v1506_v39 = vsel %vm606_vm0, %v1496_v2, 0.0 }
 0x8d4   : > { %v1500_v54 = vsel %vm606_vm0, %v1494_v53, 0.0 }
 0x8d5   : > { %1501 = vadd.xlane.f32.xlu0 %v1500_v54  ;;  %1504 = vadd.xlane.f32.xlu1 %v1503_v55 }
 0x8d9   : > { %1507 = vadd.xlane.f32.xlu0 %v1506_v39 }
 0x95a   : > { %v1499_v56 = vpop.xlane.xlu1 %1498 }
 0x95b   : > { %v1509_v57 = vmul.f32 0.03125, %v1499_v56 }
 0x95d   : > { %v1513_v58 = vsub.f32 %v1493_v47, %v1509_v57 }
 0x95e   : > { %v1502_v59 = vpop.xlane.xlu0 %1501  ;;  %v1505_v4 = vpop.xlane.xlu1 %1504 }
 0x95f   : > { %v1510_v43 = vmul.f32 0.03125, %v1502_v59  ;;  %v1511_v60 = vmul.f32 0.03125, %v1505_v4  ;;  %v1517_v61 = vmul.f32 %v1513_v58, %v1513_v58 }
 0x961   : > { %v1514_v40 = vsub.f32 %v1494_v53, %v1510_v43  ;;  %v1515_v3 = vsub.f32 %v1495_v52, %v1511_v60  ;;  %v1521_v62 = vsel %vm606_vm0, %v1517_v61, 0.0  ;;  %v1695_v43 = vld [vmem:[%s2552_s16] sm:$0xff] }
 0x962   : > { %v1508_v63 = vpop.xlane.xlu0 %1507  ;;  %1522 = vadd.xlane.f32.xlu1 %v1521_v62  ;;  %v1571_v60 = vld [vmem:[%s2551_s15] sm:$0x1f] }
 0x963   : > { %v1512_v44 = vmul.f32 0.03125, %v1508_v63  ;;  %v1518_v0 = vmul.f32 %v1514_v40, %v1514_v40  ;;  %v1519_v6 = vmul.f32 %v1515_v3, %v1515_v3  ;;  %v1665_v61 = vrot.slane %v1571_v60, 1 }
 0x964   : > { %v1677_v14 = vrot.slane %v1571_v60, 2  ;;  %v1680_v17 = vrot.slane %v1571_v60, 3  ;;  %v1683_v12 = vrot.slane %v1571_v60, 4 }
 0x965   : > { %v1516_v1 = vsub.f32 %v1496_v2, %v1512_v44  ;;  %v1524_v5 = vsel %vm606_vm0, %v1518_v0, 0.0  ;;  %v1527_v7 = vsel %vm606_vm0, %v1519_v6, 0.0 }
 0x966   : > { %1525 = vadd.xlane.f32.xlu0 %v1524_v5  ;;  %1528 = vadd.xlane.f32.xlu1 %v1527_v7 }
 0x967   : > { %v1520_v8 = vmul.f32 %v1516_v1, %v1516_v1 }
 0x969   : > { %v1530_v13 = vsel %vm606_vm0, %v1520_v8, 0.0 }
 0x96a   : > { %1531 = vadd.xlane.f32.xlu0 %v1530_v13 }
 0x9eb   : > { %v1523_v19 = vpop.xlane.xlu1 %1522 }
 0x9ec   : > { %v1533_v20 = vmul.f32 0.03125, %v1523_v19 }
 0x9ee   : > { %v1537_v9 = vadd.f32 1e-06, %v1533_v20 }
 0x9ef   : > { %v1526_v21 = vpop.xlane.xlu0 %1525  ;;  %v1529_v11 = vpop.xlane.xlu1 %1528 }
 0x9f0   : > { %2121 = vrsqrt.f32 %v1537_v9  ;;  %v1534_v22 = vmul.f32 0.03125, %v1526_v21  ;;  %v1535_v23 = vmul.f32 0.03125, %v1529_v11 }
 0x9f2   : > { %v1538_v24 = vadd.f32 1e-06, %v1534_v22  ;;  %v1539_v25 = vadd.f32 1e-06, %v1535_v23 }
 0x9f3   : > { %v1532_v27 = vpop.xlane.xlu0 %1531 }
 0x9f4   : > { %2123 = vrsqrt.f32 %v1538_v24  ;;  %v1536_v28 = vmul.f32 0.03125, %v1532_v27 }
 0x9f5   : > { %2125 = vrsqrt.f32 %v1539_v25 }
 0x9f6   : > { %v1540_v30 = vadd.f32 1e-06, %v1536_v28 }
 0x9f8   : > { %2127 = vrsqrt.f32 %v1540_v30  ;;  %v1696_v30 = vld [vmem:[%s2553_s17] sm:$0x1] }
 0x9fd   : > { %v2122_v31 = vpop.eup %2121 }
 0x9fe   : > { %v1545_v29 = vmul.f32 %v2122_v31, %v1513_v58 }
 0xa00   : > { %v1556_v32 = vmul.f32 %v1889_v26, %v1545_v29 }
 0xa01   : > { %v2124_v33 = vpop.eup %2123 }
 0xa02   : > { %v2126_v35 = vpop.eup %2125  ;;  %v1546_v16 = vmul.f32 %v2124_v33, %v1514_v40  ;;  %v2492_v36 = vadd.f32 %v1890_v34, %v1556_v32 }
 0xa03   : > { %v1547_v18 = vmul.f32 %v2126_v35, %v1515_v3 }
 0xa04   : > { %v1557_v37 = vmul.f32 %v1889_v26, %v1546_v16  ;;  %v1572_v47 = vsel %vm606_vm0, %v2492_v36, 0.0  ;;  %v1777_v16 = vlaneseq }
 0xa05   : > { %v2128_v38 = vpop.eup %2127  ;;  %v1558_v41 = vmul.f32 %v1889_v26, %v1547_v18 }
 0xa06   : > { %v2494_v42 = vadd.f32 %v1890_v34, %v1557_v37  ;;  %v1548_v45 = vmul.f32 %v2128_v38, %v1516_v1  ;;  %v1778_v18 = vshrl.u32 %v1777_v16, 7 }
 0xa07   : > { %v2496_v46 = vadd.f32 %v1890_v34, %v1558_v41 }
 0xa08   : > { %v1573_v48 = vsel %vm606_vm0, %v2494_v42, 0.0  ;;  %v1559_v49 = vmul.f32 %v1889_v26, %v1548_v45  ;;  %v1779_v37 = vsub.s32 0, %v1778_v18 }
 0xa09   : > { %v1574_v50 = vadd.f32 %v1573_v48, %v1572_v47  ;;  %v1575_v51 = vsel %vm606_vm0, %v2496_v46, 0.0 }
 0xa0a   : > { %v2504_v52 = vadd.f32 %v1890_v34, %v1559_v49 }
 0xa0b   : > { %v1576_v53 = vadd.f32 %v1575_v51, %v1574_v50 }
 0xa0c   : > { %v1577_v54 = vsel %vm606_vm0, %v2504_v52, 0.0 }
 0xa0d   : > { %v1578_v55 = vadd.f32 %v1577_v54, %v1576_v53 }
 0xa0f   : > { %v1579_v2 = vrot.slane %v1578_v55, 4 }
 0xa11   : > { %v1580_v39 = vadd.f32 %v1579_v2, %v1578_v55 }
 0xa13   : > { %v1581_v56 = vrot.slane %v1580_v39, 2 }
 0xa15   : > { %v1582_v57 = vadd.f32 %v1581_v56, %v1580_v39 }
 0xa17   : > { %v1583_v58 = vrot.slane %v1582_v57, 1 }
 0xa19   : > { %v1584_v59 = vadd.f32 %v1583_v58, %v1582_v57 }
 0xa1b   : > { %v1585_v4 = vmul.f32 0.03125, %v1584_v59 }
 0xa1d   : > { %2033 = vmatmul.mubr.msk.f32.vlgmr.msra.gmra.mxu1 %vm606_vm0, %v1585_v4 }
 0xa1e   : > { %2037 = vmatprep.mubr.msk.f32.mxu1 %vm2151_vm2, %v2150_v15  ;;  %2036 = vmatpush3.msra.mxu1 %v1695_v43 }
 0xadd   : > { %v1659_v40 = vpop.f32.mrf.mxu1 }
 0xade   : > { %v1663_v3 = vmul.f32 %v1659_v40, %v1571_v60 }
 0xadf   : > { %v2034_v62 = vpop.f32.mrf.mxu1 }
 0xae0   : > { %v1667_v63 = vadd.f32 %v1665_v61, %v1663_v3 }
 0xae2   : > { %v1669_v44 = vmul.f32 %v1667_v63, %v1667_v63  ;;  %v1668_v8 = vmul.f32 0.5, %v1667_v63 }
 0xae4   : > { %v1670_v0 = vmul.f32 %v1669_v44, %v1667_v63 }
 0xae6   : > { %v1671_v6 = vmul.f32 0.044715, %v1670_v0 }
 0xae8   : > { %v1672_v1 = vadd.f32 %v1671_v6, %v1667_v63 }
 0xaea   : > { %v1673_v5 = vmul.f32 0.7978846, %v1672_v1 }
 0xaec   : > { %2129 = vtanh.f32 %v1673_v5 }
 0xaf9   : > { %v2130_v7 = vpop.eup %2129 }
 0xafa   : > { %v1675_v13 = vadd.f32 1.0, %v2130_v7 }
 0xafc   : > { %v1676_v15 = vmul.f32 %v1675_v13, %v1668_v8 }
 0xafe   : > { %v1679_v10 = vmul.f32 %v1677_v14, %v1676_v15 }
 0xb00   : > { %v1682_v19 = vmul.f32 %v1680_v17, %v1679_v10 }
 0xb02   : > { %v1685_v20 = vadd.f32 %v1683_v12, %v1682_v19 }
 0xb04   : > { %v1687_v9 = vmul.f32 %v1685_v20, %v1685_v20  ;;  %v1686_v25 = vmul.f32 0.5, %v1685_v20 }
 0xb06   : > { %v1688_v21 = vmul.f32 %v1687_v9, %v1685_v20 }
 0xb08   : > { %v1689_v11 = vmul.f32 0.044715, %v1688_v21 }
 0xb0a   : > { %v1690_v22 = vadd.f32 %v1689_v11, %v1685_v20 }
 0xb0c   : > { %v1691_v23 = vmul.f32 0.7978846, %v1690_v22 }
 0xb0e   : > { %2131 = vtanh.f32 %v1691_v23 }
 0xb1b   : > { %v2132_v24 = vpop.eup %2131 }
 0xb1c   : > { %v1693_v27 = vadd.f32 1.0, %v2132_v24 }
 0xb1e   : > { %v1694_v28 = vmul.f32 %v1693_v27, %v1686_v25 }
 0xb20   : > { %2038 = vmatmul.mubr.msk.f32.vlgmr.msra.gmra.mxu1 %vm1697_vm3, %v1694_v28 }
 0xbe0   : > { %v1767_v31 = vpop.f32.mrf.mxu1 }
 0xbe1   : > { %v1768_v26 = vadd.f32 %v1767_v31, %v1696_v30 }
 0xbe2   : > { %v2039_v29 = vpop.f32.mrf.mxu1 }
 0xbe3   : > { %v1771_v32 = vsub.f32 0.0, %v1768_v26 }
 0xbe5   : > { %v1772_v33 = vmul.f32 1.442695, %v1771_v32 }
 0xbe7   : > { %2133 = vpow2.f32 %v1772_v33 }
 0xbf4   : > { %v2134_v34 = vpop.eup %2133 }
 0xbf5   : > { %v1774_v35 = vadd.f32 1.0, %v2134_v34 }
 0xbf7   : > { %2135 = vrcp.f32 %v1774_v35 }
 0xc04   : > { %v2136_v38 = vpop.eup %2135 }
 0xc05   : > { %v1780_v41 = vrot.slane %v2136_v38, %v1779_v37 }
 0xc07   : > { %v1781_v45 = vmul.f32 %v1780_v41, %v2492_v36  ;;  %v1782_v47 = vmul.f32 %v1780_v41, %v2494_v42  ;;  %v1783_v48 = vmul.f32 %v1780_v41, %v2496_v46  ;;  %v1784_v49 = vmul.f32 %v1780_v41, %v2504_v52 }
 0xc09   : > { %1785 = vst.msk [vmem:[%s575_s23] sm:$0xff] %vm606_vm0, %v1781_v45  ;;  %1786 = vst.msk [vmem:[%s575_s23 + $0x8] sm:$0xff] %vm606_vm0, %v1782_v47 }
 0xc0a   : > { %1787 = vst.msk [vmem:[%s575_s23 + $0x10] sm:$0xff] %vm606_vm0, %v1783_v48  ;;  %1788 = vst.msk [vmem:[%s575_s23 + $0x18] sm:$0xff] %vm606_vm0, %v1784_v49 }
 0xc0b PF: > { %s28_s27 = sadd.s32 1, %s2143_s27  }
 0xc0c   : > { %p25_p4 = scmp.ge.s32.totalorder %s28_s27, 4  }
 0xc0e   :  { %27 = sbr.rel (!%p25_p4) target bundleno = 4 (0x4), region = 122 }

// kernel: svtrv2_forward.13
= control target key start
LH: loop header
LB: loop body
LE: loop exit
PB: predicated region body
PF: predicated region fallthrough
CT: control target
= control target key end

     0   :  { %vm242_vm0 = vcmask 261120   ;;  %vm385_vm1 = vcmask 523264   ;;  %s690_s1 = inlined_call_operand.vmem [shape: bf16[288,64], index: 1, kind: input, shape index: {}]   ;;  %s691_s0 = inlined_call_operand.vmem [shape: bf16[64,288], index: 0, kind: input, shape index: {}]   ;;  %s692_s2 = inlined_call_operand.vmem [shape: f32[1,64], index: 2, kind: input, shape index: {}]   ;;  %s693_s3 = inlined_call_operand.vmem [shape: f32[64,64], index: 3, kind: output, shape index: {}]  }
   0x1   :  { %v507_v0 = vld [vmem:[%s690_s1 + $0x78] sm:$0xff]   ;;  %v509_v2 = vld [vmem:[%s690_s1 + $0x70] sm:$0xff]   ;;  %v511_v4 = vld [vmem:[%s690_s1 + $0x68] sm:$0xff]  }
   0x2   :  { %v508_v1 = vld [vmem:[%s690_s1 + $0x38] sm:$0xff]   ;;  %433 = vmatprep.subr.bf16.mxu0 %v507_v0  ;;  %491 = vmatprep.subr.bf16.mxu1 %v507_v0  ;;  %v510_v3 = vld [vmem:[%s690_s1 + $0x30] sm:$0xff]   ;;  %v512_v5 = vld [vmem:[%s690_s1 + $0x28] sm:$0xff]  }
   0x3   :  { %434 = vmatpush3.bf16.msra.mxu0 %v508_v1  ;;  %499 = vmatpush3.bf16.msra.mxu1 %v508_v1  ;;  %v513_v6 = vld [vmem:[%s690_s1 + $0x60] sm:$0xff]   ;;  %v515_v8 = vld [vmem:[%s690_s1 + $0x58] sm:$0xff]   ;;  %v517_v10 = vld [vmem:[%s690_s1 + $0x50] sm:$0xff]  }
   0x4   :  { %435 = vmatprep.subr.bf16.mxu0 %v509_v2  ;;  %492 = vmatprep.subr.bf16.mxu1 %v509_v2  ;;  %v514_v7 = vld [vmem:[%s690_s1 + $0x20] sm:$0xff]   ;;  %v516_v9 = vld [vmem:[%s690_s1 + $0x18] sm:$0xff]   ;;  %v518_v13 = vld [vmem:[%s690_s1 + $0x10] sm:$0xff]  }
   0x5   :  { %v525_v11 = vld [vmem:[%s691_s0 + $0x4] ss:$12 sps:$4 sm:$0xff]   ;;  %v528_v12 = vld [vmem:[%s691_s0 + $0x4c] ss:$12 sps:$4 sm:$0xff]   ;;  %v526_v20 = vld [vmem:[%s691_s0 + $0x48] ss:$12 sps:$4 sm:$0xff]  }
   0x6   :  { %v519_v14 = vld [vmem:[%s690_s1 + $0x48] sm:$0xff]   ;;  %287 = vmatprep.mubr.bf16.mxu0 %v525_v11  ;;  %311 = vmatprep.mubr.bf16.mxu1 %v528_v12  ;;  %v521_v16 = vld [vmem:[%s690_s1 + $0x40] sm:$0xff]   ;;  %v539_v28 = vld [vmem:[%s691_s0 + $0x30] ss:$12 sps:$4 sm:$0xff]  }
   0x7   :  { %436 = vmatpush3.bf16.msra.mxu0 %v510_v3  ;;  %500 = vmatpush3.bf16.msra.mxu1 %v510_v3  ;;  %v520_v15 = vld [vmem:[%s690_s1 + $0x8] sm:$0xff]   ;;  %v522_v17 = vld [vmem:[%s690_s1] sm:$0xff]   ;;  %v540_v29 = vld [vmem:[%s691_s0 + $0x50] ss:$12 sps:$4 sm:$0xff]  }
   0x8   :  { %437 = vmatprep.subr.bf16.mxu0 %v511_v4  ;;  %493 = vmatprep.subr.bf16.mxu1 %v511_v4  ;;  %v529_v18 = vld [vmem:[%s690_s1 + $0x88] sm:$0xff]   ;;  %v530_v22 = vld [vmem:[%s690_s1 + $0x80] sm:$0xff]  }
   0x9   :  { %v523_v19 = vld [vmem:[%s691_s0] ss:$12 sps:$4 sm:$0xff]   ;;  %v531_v21 = vld [vmem:[%s691_s0 + $0x1c] ss:$12 sps:$4 sm:$0xff]   ;;  %v534_v24 = vld [vmem:[%s691_s0 + $0x18] ss:$12 sps:$4 sm:$0xff]  }
   0xa   :  { %v533_v23 = vld [vmem:[%s691_s0 + $0x8] ss:$12 sps:$4 sm:$0xff]   ;;  %v535_v25 = vld [vmem:[%s691_s0 + $0x20] ss:$12 sps:$4 sm:$0xff]   ;;  %v538_v27 = vld [vmem:[%s691_s0 + $0x38] ss:$12 sps:$4 sm:$0xff]  }
   0xb   :  { %438 = vmatpush3.bf16.msra.mxu0 %v512_v5  ;;  %501 = vmatpush3.bf16.msra.mxu1 %v512_v5  ;;  %v536_v26 = vld [vmem:[%s691_s0 + $0x34] ss:$12 sps:$4 sm:$0xff]  }
   0xc   :  { %439 = vmatprep.subr.bf16.mxu0 %v513_v6  ;;  %494 = vmatprep.subr.bf16.mxu1 %v513_v6  ;;  %v398_v39 = vld [vmem:[%s692_s2] ss:$0 sm:$0xff] }
   0xf   :  { %440 = vmatpush3.bf16.msra.mxu0 %v514_v7  ;;  %502 = vmatpush3.bf16.msra.mxu1 %v514_v7 }
  0x10   :  { %441 = vmatprep.subr.bf16.mxu0 %v515_v8  ;;  %495 = vmatprep.subr.bf16.mxu1 %v515_v8 }
  0x13   :  { %442 = vmatpush3.bf16.msra.mxu0 %v516_v9  ;;  %503 = vmatpush3.bf16.msra.mxu1 %v516_v9 }
  0x14   :  { %443 = vmatprep.subr.bf16.mxu0 %v517_v10  ;;  %496 = vmatprep.subr.bf16.mxu1 %v517_v10 }
  0x17   :  { %444 = vmatpush3.bf16.msra.mxu0 %v518_v13  ;;  %504 = vmatpush3.bf16.msra.mxu1 %v518_v13 }
  0x18   :  { %445 = vmatprep.subr.bf16.mxu0 %v519_v14  ;;  %497 = vmatprep.subr.bf16.mxu1 %v519_v14 }
  0x1b   :  { %446 = vmatpush3.bf16.msra.mxu0 %v520_v15  ;;  %505 = vmatpush3.bf16.msra.mxu1 %v520_v15 }
  0x1c   :  { %447 = vmatprep.subr.bf16.mxu0 %v521_v16  ;;  %498 = vmatprep.subr.bf16.mxu1 %v521_v16 }
  0x1f   :  { %448 = vmatpush3.bf16.msra.mxu0 %v522_v17  ;;  %506 = vmatpush3.bf16.msra.mxu1 %v522_v17 }
  0x20   :  { %479 = vmatprep.subr.bf16.mxu1 %v529_v18 }
  0x22   :  { %288 = vmatmul.mubr.bf16.vlgmr.msra.gmra.mxu0 %v523_v19  ;;  %312 = vmatmul.mubr.bf16.vlgmr.msra.gmra.mxu1 %v526_v20 }
  0x23   :  { %480 = vmatpush3.bf16.msra.mxu1 %v529_v18  ;;  %295 = vmatprep.mubr.bf16.mxu0 %v531_v21 }
  0x24   :  { %481 = vmatprep.subr.bf16.mxu1 %v530_v22  ;;  %483 = vmatprep.mubr.msk.bf16.mxu1 %vm242_vm0, %v533_v23 }
  0x27   :  { %482 = vmatpush3.bf16.msra.mxu1 %v530_v22 }
  0x2a   :  { %296 = vmatmul.mubr.bf16.gmra.mxu0 %v534_v24  ;;  %484 = vmatmul.mubr.msk.bf16.vlgmr.msra.gmra.mxu1 %vm242_vm0, %v535_v25 }
  0x2b   :  { %303 = vmatprep.mubr.bf16.mxu0 %v536_v26  ;;  %487 = vmatprep.mubr.msk.bf16.mxu1 %vm242_vm0, %v538_v27 }
  0x32   :  { %304 = vmatmul.mubr.bf16.gmra.mxu0 %v539_v28  ;;  %488 = vmatmul.mubr.msk.bf16.gmra.mxu1 %vm242_vm0, %v540_v29 }
  0xe2   :  { %v449_v30 = vpop.f32.mrf.mxu0  ;;  %v467_v31 = vpop.f32.mrf.mxu1 }
  0xe4   :  { %v450_v32 = vpop.f32.mrf.mxu0  ;;  %v468_v33 = vpop.f32.mrf.mxu1 }
  0xe5   :  { %v451_v36 = vadd.f32 %v450_v32, %v449_v30  ;;  %v469_v44 = vadd.f32 %v468_v33, %v467_v31 }
  0xe6   :  { %v452_v34 = vpop.f32.mrf.mxu0  ;;  %v470_v35 = vpop.f32.mrf.mxu1 }
  0xe7   :  { %v290_v43 = vadd.f32 %v451_v36, %v398_v39  ;;  %v314_v55 = vadd.f32 %v469_v44, %v398_v39 }
  0xe8   :  { %v453_v37 = vpop.f32.mrf.mxu0  ;;  %v471_v38 = vpop.f32.mrf.mxu1 }
  0xe9   :  { %v454_v42 = vadd.f32 %v453_v37, %v452_v34  ;;  %v472_v56 = vadd.f32 %v471_v38, %v470_v35 }
  0xea   :  { %v455_v40 = vpop.f32.mrf.mxu0  ;;  %v485_v41 = vpop.f32.mrf.mxu1 }
  0xeb   :  { %v293_v52 = vadd.f32 %v454_v42, %v398_v39  ;;  %v317_v4 = vadd.f32 %v472_v56, %v398_v39 }
  0xec   :  { %v456_v45 = vpop.f32.mrf.mxu0  ;;  %v354_v46 = vpop.f32.mrf.mxu1 }
  0xed   :  { %v457_v47 = vadd.f32 %v456_v45, %v455_v40  ;;  %v355_v48 = vadd.f32 %v354_v46, %v290_v43 }
  0xee   :  { %v458_v49 = vpop.f32.mrf.mxu0  ;;  %v486_v50 = vpop.f32.mrf.mxu1 }
  0xef   :  { %v298_v51 = vadd.f32 %v457_v47, %v398_v39  ;;  %386 = vst.msk [vmem:[%s693_s3] sm:$0xff] %vm385_vm1, %v355_v48 }
  0xf0   :  { %v459_v53 = vpop.f32.mrf.mxu0  ;;  %v357_v54 = vpop.f32.mrf.mxu1 }
  0xf1   :  { %v363_v57 = vadd.f32 %v485_v41, %v298_v51  ;;  %v460_v58 = vadd.f32 %v459_v53, %v458_v49  ;;  %v358_v59 = vadd.f32 %v357_v54, %v293_v52 }
  0xf2   :  { %v461_v60 = vpop.f32.mrf.mxu0  ;;  %v489_v61 = vpop.f32.mrf.mxu1 }
  0xf3   :  { %388 = vst.msk [vmem:[%s693_s3 + $0x10] sm:$0xff] %vm385_vm1, %v363_v57  ;;  %v301_v62 = vadd.f32 %v460_v58, %v398_v39  ;;  %387 = vst.msk [vmem:[%s693_s3 + $0x8] sm:$0xff] %vm385_vm1, %v358_v59  ;;  %v379_v63 = vadd.f32 %v489_v61, %v314_v55 }
  0xf4   :  { %v462_v0 = vpop.f32.mrf.mxu0  ;;  %v370_v1 = vpop.f32.mrf.mxu1 }
  0xf5   :  { %v366_v2 = vadd.f32 %v486_v50, %v301_v62  ;;  %392 = vst.msk [vmem:[%s693_s3 + $0x30] sm:$0xff] %vm385_vm1, %v379_v63  ;;  %v463_v3 = vadd.f32 %v462_v0, %v461_v60 }
  0xf6   :  { %v464_v5 = vpop.f32.mrf.mxu0  ;;  %v490_v6 = vpop.f32.mrf.mxu1 }
  0xf7   :  { %389 = vst.msk [vmem:[%s693_s3 + $0x18] sm:$0xff] %vm385_vm1, %v366_v2  ;;  %v306_v7 = vadd.f32 %v463_v3, %v398_v39  ;;  %v382_v8 = vadd.f32 %v490_v6, %v317_v4 }
  0xf8   :  { %v465_v9 = vpop.f32.mrf.mxu0  ;;  %v373_v13 = vpop.f32.mrf.mxu1 }
  0xf9   :  { %v371_v10 = vadd.f32 %v370_v1, %v306_v7  ;;  %393 = vst.msk [vmem:[%s693_s3 + $0x38] sm:$0xff] %vm385_vm1, %v382_v8  ;;  %v466_v11 = vadd.f32 %v465_v9, %v464_v5 }
  0xfb   :  { %390 = vst.msk [vmem:[%s693_s3 + $0x20] sm:$0xff] %vm385_vm1, %v371_v10  ;;  %v309_v12 = vadd.f32 %v466_v11, %v398_v39 }
  0xfd   :  { %v374_v14 = vadd.f32 %v373_v13, %v309_v12 }
  0xff   :  { %391 = vst.msk [vmem:[%s693_s3 + $0x28] sm:$0xff] %vm385_vm1, %v374_v14 }

// kernel: svtrv2_forward.14
= control target key start
LH: loop header
LB: loop body
LE: loop exit
PB: predicated region body
PF: predicated region fallthrough
CT: control target
= control target key end

     0   :  { %vm22_vm0 = vcmask 523264   ;;  %s326_s0 = inlined_call_operand.vmem [shape: f32[64,64], index: 0, kind: input, shape index: {}]   ;;  %s327_s1 = inlined_call_operand.vmem [shape: f32[1,64], index: 1, kind: input, shape index: {}]   ;;  %s328_s2 = inlined_call_operand.vmem [shape: f32[1,64], index: 2, kind: input, shape index: {}]   ;;  %s329_s3 = inlined_call_operand.vmem [shape: f32[64,64], index: 3, kind: output, shape index: {}]  }
   0x1   :  { %v14_v0 = vld [vmem:[%s326_s0] sm:$0xff]  ;;  %v16_v1 = vld [vmem:[%s326_s0 + $0x10] sm:$0xff]  ;;  %v15_v2 = vld [vmem:[%s326_s0 + $0x8] sm:$0xff] }
   0x2   :  { %v23_v3 = vsel %vm22_vm0, %v14_v0, 0.0  ;;  %v29_v4 = vsel %vm22_vm0, %v16_v1, 0.0  ;;  %v17_v5 = vld [vmem:[%s326_s0 + $0x18] sm:$0xff]  ;;  %v26_v6 = vsel %vm22_vm0, %v15_v2, 0.0  ;;  %v18_v8 = vld [vmem:[%s326_s0 + $0x20] sm:$0xff]  ;;  %v19_v9 = vld [vmem:[%s326_s0 + $0x28] sm:$0xff] }
   0x3   :  { %24 = vadd.xlane.f32.xlu0 %v23_v3  ;;  %30 = vadd.xlane.f32.xlu1 %v29_v4  ;;  %v32_v7 = vsel %vm22_vm0, %v17_v5, 0.0  ;;  %v35_v10 = vsel %vm22_vm0, %v18_v8, 0.0  ;;  %v38_v11 = vsel %vm22_vm0, %v19_v9, 0.0  ;;  %v20_v12 = vld [vmem:[%s326_s0 + $0x30] sm:$0xff]  ;;  %v21_v13 = vld [vmem:[%s326_s0 + $0x38] sm:$0xff] }
   0x4   :  { %v41_v14 = vsel %vm22_vm0, %v20_v12, 0.0  ;;  %v44_v15 = vsel %vm22_vm0, %v21_v13, 0.0 }
   0x7   :  { %27 = vadd.xlane.f32.xlu0 %v26_v6  ;;  %33 = vadd.xlane.f32.xlu1 %v32_v7 }
   0xb   :  { %36 = vadd.xlane.f32.xlu0 %v35_v10  ;;  %39 = vadd.xlane.f32.xlu1 %v38_v11 }
   0xf   :  { %42 = vadd.xlane.f32.xlu0 %v41_v14  ;;  %45 = vadd.xlane.f32.xlu1 %v44_v15 }
  0x8c   :  { %v25_v16 = vpop.xlane.xlu0 %24  ;;  %v31_v17 = vpop.xlane.xlu1 %30 }
  0x8d   :  { %v48_v18 = vmul.f32 0.015625, %v25_v16  ;;  %v50_v19 = vmul.f32 0.015625, %v31_v17  ;;  %v170_v16 = vld [vmem:[%s327_s1] ss:$0 sm:$0xff] }
  0x8f   :  { %v240_v20 = vsub.f32 %v14_v0, %v48_v18  ;;  %v242_v21 = vsub.f32 %v16_v1, %v50_v19  ;;  %v171_v19 = vld [vmem:[%s328_s2] ss:$0 sm:$0xff] }
  0x90   :  { %v28_v22 = vpop.xlane.xlu0 %27  ;;  %v34_v23 = vpop.xlane.xlu1 %33 }
  0x91   :  { %v49_v24 = vmul.f32 0.015625, %v28_v22  ;;  %v51_v25 = vmul.f32 0.015625, %v34_v23  ;;  %v64_v26 = vmul.f32 %v240_v20, %v240_v20  ;;  %v66_v27 = vmul.f32 %v242_v21, %v242_v21 }
  0x93   :  { %v248_v28 = vsub.f32 %v15_v2, %v49_v24  ;;  %v250_v29 = vsub.f32 %v17_v5, %v51_v25  ;;  %v72_v30 = vsel %vm22_vm0, %v64_v26, 0.0  ;;  %v78_v33 = vsel %vm22_vm0, %v66_v27, 0.0 }
  0x94   :  { %73 = vadd.xlane.f32.xlu0 %v72_v30  ;;  %v37_v31 = vpop.xlane.xlu0 %36  ;;  %v40_v32 = vpop.xlane.xlu1 %39 }
  0x95   :  { %v52_v34 = vmul.f32 0.015625, %v37_v31  ;;  %v53_v35 = vmul.f32 0.015625, %v40_v32  ;;  %v65_v36 = vmul.f32 %v248_v28, %v248_v28  ;;  %v67_v37 = vmul.f32 %v250_v29, %v250_v29 }
  0x97   :  { %v258_v38 = vsub.f32 %v18_v8, %v52_v34  ;;  %v260_v39 = vsub.f32 %v19_v9, %v53_v35  ;;  %v75_v40 = vsel %vm22_vm0, %v65_v36, 0.0  ;;  %v81_v43 = vsel %vm22_vm0, %v67_v37, 0.0 }
  0x98   :  { %79 = vadd.xlane.f32.xlu0 %v78_v33  ;;  %76 = vadd.xlane.f32.xlu1 %v75_v40  ;;  %v43_v41 = vpop.xlane.xlu0 %42  ;;  %v46_v42 = vpop.xlane.xlu1 %45 }
  0x99   :  { %v54_v44 = vmul.f32 0.015625, %v43_v41  ;;  %v55_v45 = vmul.f32 0.015625, %v46_v42  ;;  %v68_v46 = vmul.f32 %v258_v38, %v258_v38  ;;  %v69_v47 = vmul.f32 %v260_v39, %v260_v39 }
  0x9b   :  { %v268_v48 = vsub.f32 %v20_v12, %v54_v44  ;;  %v270_v49 = vsub.f32 %v21_v13, %v55_v45  ;;  %v84_v50 = vsel %vm22_vm0, %v68_v46, 0.0  ;;  %v87_v51 = vsel %vm22_vm0, %v69_v47, 0.0 }
  0x9c   :  { %82 = vadd.xlane.f32.xlu1 %v81_v43  ;;  %85 = vadd.xlane.f32.xlu0 %v84_v50 }
  0x9d   :  { %v70_v52 = vmul.f32 %v268_v48, %v268_v48  ;;  %v71_v53 = vmul.f32 %v270_v49, %v270_v49 }
  0x9f   :  { %v90_v54 = vsel %vm22_vm0, %v70_v52, 0.0  ;;  %v93_v55 = vsel %vm22_vm0, %v71_v53, 0.0 }
  0xa0   :  { %88 = vadd.xlane.f32.xlu1 %v87_v51  ;;  %91 = vadd.xlane.f32.xlu0 %v90_v54 }
  0xa4   :  { %94 = vadd.xlane.f32.xlu1 %v93_v55 }
 0x11d   :  { %v74_v56 = vpop.xlane.xlu0 %73 }
 0x11e   :  { %v96_v57 = vmul.f32 0.015625, %v74_v56 }
 0x120   :  { %v104_v58 = vadd.f32 1e-06, %v96_v57 }
 0x121   :  { %v77_v59 = vpop.xlane.xlu1 %76  ;;  %v80_v60 = vpop.xlane.xlu0 %79 }
 0x122   :  { %172 = vrsqrt.f32 %v104_v58  ;;  %v97_v61 = vmul.f32 0.015625, %v77_v59  ;;  %v98_v62 = vmul.f32 0.015625, %v80_v60 }
 0x124   :  { %v105_v63 = vadd.f32 1e-06, %v97_v61  ;;  %v106_v0 = vadd.f32 1e-06, %v98_v62 }
 0x125   :  { %v83_v1 = vpop.xlane.xlu1 %82  ;;  %v86_v2 = vpop.xlane.xlu0 %85 }
 0x126   :  { %174 = vrsqrt.f32 %v105_v63  ;;  %v99_v3 = vmul.f32 0.015625, %v83_v1  ;;  %v100_v4 = vmul.f32 0.015625, %v86_v2 }
 0x127   :  { %176 = vrsqrt.f32 %v106_v0 }
 0x128   :  { %v107_v5 = vadd.f32 1e-06, %v99_v3  ;;  %v108_v6 = vadd.f32 1e-06, %v100_v4 }
 0x129   :  { %v89_v7 = vpop.xlane.xlu1 %88  ;;  %v92_v8 = vpop.xlane.xlu0 %91 }
 0x12a   :  { %178 = vrsqrt.f32 %v107_v5  ;;  %v101_v9 = vmul.f32 0.015625, %v89_v7  ;;  %v102_v10 = vmul.f32 0.015625, %v92_v8 }
 0x12b   :  { %180 = vrsqrt.f32 %v108_v6 }
 0x12c   :  { %v109_v11 = vadd.f32 1e-06, %v101_v9  ;;  %v110_v12 = vadd.f32 1e-06, %v102_v10 }
 0x12d   :  { %v95_v13 = vpop.xlane.xlu1 %94 }
 0x12e   :  { %182 = vrsqrt.f32 %v109_v11  ;;  %v103_v14 = vmul.f32 0.015625, %v95_v13 }
 0x12f   :  { %v173_v15 = vpop.eup %172  ;;  %184 = vrsqrt.f32 %v110_v12 }
 0x130   :  { %v120_v17 = vmul.f32 %v173_v15, %v240_v20  ;;  %v111_v18 = vadd.f32 1e-06, %v103_v14 }
 0x132   :  { %v135_v22 = vmul.f32 %v170_v16, %v120_v17  ;;  %186 = vrsqrt.f32 %v111_v18 }
 0x133   :  { %v175_v23 = vpop.eup %174 }
 0x134   :  { %v177_v24 = vpop.eup %176  ;;  %v150_v25 = vadd.f32 %v171_v19, %v135_v22  ;;  %v121_v26 = vmul.f32 %v175_v23, %v248_v28 }
 0x135   :  { %v122_v27 = vmul.f32 %v177_v24, %v242_v21 }
 0x136   :  { %158 = vst.msk [vmem:[%s329_s3] sm:$0xff] %vm22_vm0, %v150_v25  ;;  %v136_v20 = vmul.f32 %v170_v16, %v121_v26 }
 0x137   :  { %v179_v30 = vpop.eup %178  ;;  %v137_v31 = vmul.f32 %v170_v16, %v122_v27 }
 0x138   :  { %v181_v32 = vpop.eup %180  ;;  %v151_v33 = vadd.f32 %v171_v19, %v136_v20  ;;  %v123_v34 = vmul.f32 %v179_v30, %v250_v29 }
 0x139   :  { %v152_v35 = vadd.f32 %v171_v19, %v137_v31  ;;  %v124_v36 = vmul.f32 %v181_v32, %v258_v38 }
 0x13a   :  { %159 = vst.msk [vmem:[%s329_s3 + $0x8] sm:$0xff] %vm22_vm0, %v151_v33  ;;  %v138_v21 = vmul.f32 %v170_v16, %v123_v34 }
 0x13b   :  { %v183_v28 = vpop.eup %182  ;;  %160 = vst.msk [vmem:[%s329_s3 + $0x10] sm:$0xff] %vm22_vm0, %v152_v35  ;;  %v139_v37 = vmul.f32 %v170_v16, %v124_v36 }
 0x13c   :  { %v185_v40 = vpop.eup %184  ;;  %v153_v41 = vadd.f32 %v171_v19, %v138_v21  ;;  %v125_v29 = vmul.f32 %v183_v28, %v260_v39 }
 0x13d   :  { %v154_v42 = vadd.f32 %v171_v19, %v139_v37  ;;  %v126_v38 = vmul.f32 %v185_v40, %v268_v48 }
 0x13e   :  { %161 = vst.msk [vmem:[%s329_s3 + $0x18] sm:$0xff] %vm22_vm0, %v153_v41  ;;  %v140_v43 = vmul.f32 %v170_v16, %v125_v29 }
 0x13f   :  { %v187_v44 = vpop.eup %186  ;;  %162 = vst.msk [vmem:[%s329_s3 + $0x20] sm:$0xff] %vm22_vm0, %v154_v42  ;;  %v141_v45 = vmul.f32 %v170_v16, %v126_v38 }
 0x140   :  { %v155_v46 = vadd.f32 %v171_v19, %v140_v43  ;;  %v127_v47 = vmul.f32 %v187_v44, %v270_v49 }
 0x141   :  { %v156_v39 = vadd.f32 %v171_v19, %v141_v45 }
 0x142   :  { %163 = vst.msk [vmem:[%s329_s3 + $0x28] sm:$0xff] %vm22_vm0, %v155_v46  ;;  %v142_v48 = vmul.f32 %v170_v16, %v127_v47 }
 0x143   :  { %164 = vst.msk [vmem:[%s329_s3 + $0x30] sm:$0xff] %vm22_vm0, %v156_v39 }
 0x144   :  { %v157_v50 = vadd.f32 %v171_v19, %v142_v48 }
 0x146   :  { %165 = vst.msk [vmem:[%s329_s3 + $0x38] sm:$0xff] %vm22_vm0, %v157_v50 }

// kernel: svtrv2_forward.15
= control target key start
LH: loop header
LB: loop body
LE: loop exit
PB: predicated region body
PF: predicated region fallthrough
CT: control target
= control target key end

     0   :  { %s3110_s27 = smov 0   ;;  %s3622_s0 = inlined_call_operand.vmem [shape: f32[2,32,64], index: 0, kind: input, shape index: {}]   ;;  %s3623_s1 = inlined_call_operand.vmem [shape: f32[32,32], index: 1, kind: input, shape index: {}]   ;;  %s3624_s2 = inlined_call_operand.vmem [shape: bf16[64,192], index: 2, kind: input, shape index: {}]   ;;  %s3625_s3 = inlined_call_operand.vmem [shape: f32[1,192], index: 3, kind: input, shape index: {}]   ;;  %s3626_s4 = inlined_call_operand.vmem [shape: bf16[64,64], index: 4, kind: input, shape index: {}]   ;;  %s3627_s5 = inlined_call_operand.vmem [shape: f32[1,64], index: 5, kind: input, shape index: {}]   ;;  %s3628_s6 = inlined_call_operand.vmem [shape: f32[1,64], index: 6, kind: input, shape index: {}]   ;;  %s3629_s7 = inlined_call_operand.vmem [shape: f32[1,64], index: 7, kind: input, shape index: {}]   ;;  %s3630_s8 = inlined_call_operand.vmem [shape: bf16[64,256], index: 8, kind: input, shape index: {}]   ;;  %s3631_s9 = inlined_call_operand.vmem [shape: f32[1,256], index: 9, kind: input, shape index: {}]   ;;  %s3632_s10 = inlined_call_operand.vmem [shape: bf16[256,64], index: 10, kind: input, shape index: {}]   ;;  %s3633_s11 = inlined_call_operand.vmem [shape: f32[1,64], index: 11, kind: input, shape index: {}]   ;;  %s3634_s12 = inlined_call_operand.vmem [shape: f32[1,64], index: 12, kind: input, shape index: {}]   ;;  %s3635_s13 = inlined_call_operand.vmem [shape: f32[1,64], index: 13, kind: input, shape index: {}]   ;;  %s3636_s14 = inlined_call_operand.vmem [shape: f32[64,16], index: 14, kind: input, shape index: {}]   ;;  %s3637_s15 = inlined_call_operand.vmem [shape: f32[5,16], index: 15, kind: input, shape index: {}]   ;;  %s3638_s16 = inlined_call_operand.vmem [shape: f32[16,64], index: 16, kind: input, shape index: {}]   ;;  %s3639_s17 = inlined_call_operand.vmem [shape: f32[1,64], index: 17, kind: input, shape index: {}]   ;;  %s3640_s18 = inlined_call_operand.vmem [shape: f32[2,32,64], index: 18, kind: output, shape index: {}]  }
   0x1   :  { %3643 = sst [smem:[#allocation2_spill]] %s3622_s0 }
   0x2   :  { %3644 = sst [smem:[#allocation3_spill]] %s3623_s1 }
   0x3   :  { %3645 = sst [smem:[#allocation4_spill]] %s3624_s2 }
   0x4 LB: > { %s2538_s28 = sadd.s32 4294967295, %s3003_s27   ;;  %p2542_p0 = scmp.ge.s32.totalorder %s3003_s27, 1  ;;  %s3003_s27 = sphi %s3110_s27, %s28_s27  }
   0x5   : > { %p512_p1 = scmp.lt.s32.totalorder %s3003_s27, 3 }
   0x7   : > { %p513_p2 = pnand %p2542_p0, %p512_p1 }
   0x8   : > { %s3646_s0 = sld [smem:[#allocation4_spill]] (!%p513_p2)  ;;  %p566_p3 = scmp.lt.s32.totalorder (!%p513_p2), %s2538_s28, 1 }
   0x9   : > { %516 = sbr.rel (%p513_p2) target bundleno = 3526 (0xdc6), region = 92  ;;  %s3647_s1 = sld [smem:[#allocation2_spill]] (!%p513_p2) }
   0xa   : > { %s3006_s29 = smov (!%p513_p2), 48   ;;  %s3007_s30 = smov (!%p513_p2), 64  }
   0xb   : > { %s3008_s19 = smov (!%p513_p2), 112   ;;  %s3648_s22 = sld [smem:[#allocation3_spill]] (!%p513_p2) }
   0xc   : > { %s3009_s21 = smov (!%p513_p2), 32   ;;  %s3010_s2 = smov (!%p513_p2), 96  }
   0xd   : > { %s3011_s23 = smov (!%p513_p2), 16   ;;  %s3012_s24 = smov (!%p513_p2), 80  }
   0xe   : > { %v2847_v0 = vld [vmem:[%s3646_s0 + $0x34] ss:$8 sps:$4 sm:$0xff]   ;;  %v2849_v1 = vld [vmem:[%s3646_s0 + $0x30] ss:$8 sps:$4 sm:$0xff]   ;;  %v3005_v2 = vmov 0   ;;  %s3650_s28 = smov (!%p566_p3, %s2538_s28), 1  ;;  %v593_v15 = vlaneseq }
   0xf   : > { %682 = vmatprep.mubr.bf16.mxu0 %v3005_v2  ;;  %658 = vmatprep.subr.bf16.mxu0 %v2847_v0  ;;  %v2850_v3 = vld [vmem:[%s3646_s0 + $0x24] ss:$8 sps:$4 sm:$0xff]   ;;  %v2852_v4 = vld [vmem:[%s3646_s0 + $0x20] ss:$8 sps:$4 sm:$0xff]   ;;  %v2853_v5 = vld [vmem:[%s3646_s0 + $0x14] ss:$8 sps:$4 sm:$0xff]  }
  0x10   : > { %659 = vmatpush1.bf16.msra.mxu0 %v2849_v1  ;;  %s2621_s25 = sshll.u32 %s3650_s28, 5  ;;  %v2855_v6 = vld [vmem:[%s3646_s0 + $0x10] ss:$8 sps:$4 sm:$0xff]   ;;  %v2856_v7 = vld [vmem:[%s3646_s0 + $0x4] ss:$8 sps:$4 sm:$0xff]   ;;  %vm643_vm0 = vcmask 523264  }
  0x11   : > { %660 = vmatprep.subr.bf16.mxu0 %v2850_v3  ;;  %s3145_s20 = scalar_lea.vmem %s3647_s1, %s2621_s25  ;;  %v2858_v8 = vld [vmem:[%s3646_s0] ss:$8 sps:$4 sm:$0xff]   ;;  %v3166_v16 = vshrl.u32 %v593_v15, 7  ;;  %vm721_vm1 = vcmask 130048   ;;  %v3215_v54 = vld [vmem:[%s3648_s22 + $0x10] sm:$0xff]  ;;  %vm795_vm2 = vcmask 261120   ;;  %s575_s1 = scalar_lea.vmem %s3640_s18, %s2621_s25 }
  0x12   : > { %v577_v9 = vld [vmem:[%s3145_s20] sm:$0xff]  ;;  %v578_v10 = vld [vmem:[%s3145_s20 + $0x8] sm:$0xff]  ;;  %v3156_v12 = vld [vmem:[%s3145_s20 + $0x10] sm:$0xff]  ;;  %vm3014_vm3 = vmmov 0  }
  0x13   : > { %v581_v11 = vpack.c.bf16 %v578_v10, %v577_v9  ;;  %v3159_v13 = vld [vmem:[%s3145_s20 + $0x18] sm:$0xff]  ;;  %v3169_v17 = vsub.s32 0, %v3166_v16  ;;  %v591_v18 = vld [vmem:[%s3625_s3] sm:$0x3]  ;;  %v599_v19 = vsub.s32 1, %v3166_v16  ;;  %v3236_v10 = vld [vmem:[%s3648_s22 + $0x8] sm:$0xff] }
  0x14   : > { %661 = vmatpush1.bf16.msra.mxu0 %v2852_v4  ;;  %v582_v14 = vpack.c.bf16 %v3159_v13, %v3156_v12  ;;  %v3222_v63 = vld [vmem:[%s3648_s22] sm:$0xff]  ;;  %v3231_v9 = vld [vmem:[%s3648_s22 + $0x18] sm:$0xff] }
  0x15   : > { %662 = vmatprep.subr.bf16.mxu0 %v2853_v5  ;;  %v596_v21 = vrot.slane %v591_v18, %v3169_v17  ;;  %v600_v23 = vrot.slane %v591_v18, %v599_v19 }
  0x18   : > { %663 = vmatpush1.bf16.msra.mxu0 %v2855_v6 }
  0x19   : > { %664 = vmatprep.subr.bf16.mxu0 %v2856_v7 }
  0x1c   : > { %665 = vmatpush1.bf16.msra.mxu0 %v2858_v8 }
  0x1f   : > { %2555 = vmatmul.mubr.msk.bf16.vlgmr.msra.gmra.mxu0 %vm643_vm0, %v581_v11 }
  0x20   : > { %692 = vmatprep.mubr.bf16.mxu0 %v3005_v2 }
  0x27   : > { %2556 = vmatmul.mubr.msk.bf16.gmra.mxu0 %vm643_vm0, %v582_v14 }
  0xdf   : > { %v684_v20 = vpop.f32.mrf.mxu0 }
  0xe0   : > { %v685_v25 = vadd.f32 %v684_v20, %v596_v21 }
  0xe1   : > { %v686_v22 = vpop.f32.mrf.mxu0 }
  0xe2   : > { %v687_v28 = vadd.f32 %v686_v22, %v600_v23 }
  0xe3   : > { %v688_v24 = vpop.f32.mrf.mxu0 }
  0xe4   : > { %v689_v26 = vadd.f32 %v688_v24, %v596_v21 }
  0xe5   : > { %v690_v27 = vpop.f32.mrf.mxu0 }
  0xe6   : > { %v3178_v29 = vpack.c.bf16 %v689_v26, %v685_v25  ;;  %v691_v30 = vadd.f32 %v690_v27, %v600_v23 }
  0xe7   : > { %v694_v31 = vpop.f32.mrf.mxu0 }
  0xe8   : > { %v3180_v32 = vpack.c.bf16 %v691_v30, %v687_v28  ;;  %2711 = vmatprep.mubr.msk.bf16.mxu1 %vm721_vm1, %v3178_v29  ;;  %v695_v35 = vadd.f32 %v694_v31, %v596_v21 }
  0xe9   : > { %v696_v33 = vpop.f32.mrf.mxu0 }
  0xea   : > { %v697_v46 = vadd.f32 %v696_v33, %v600_v23 }
  0xeb   : > { %v698_v34 = vpop.f32.mrf.mxu0 }
  0xec   : > { %v699_v36 = vadd.f32 %v698_v34, %v596_v21 }
  0xed   : > { %v700_v42 = vpop.f32.mrf.mxu0 }
  0xee   : > { %v3184_v37 = vpack.c.bf16 %v699_v36, %v695_v35  ;;  %v701_v45 = vadd.f32 %v700_v42, %v600_v23 }
  0xf0   : > { %905 = vrot.lane.b32.xlu1 %v3184_v37, %s3006_s29  ;;  %719 = vrot.lane.b32.xlu0 %v3184_v37, %s3007_s30  ;;  %v3200_v48 = vpack.c.bf16 %v701_v45, %v697_v46 }
  0xf4   : > { %903 = vrot.lane.b32.xlu1 %v3178_v29, %s3006_s29  ;;  %717 = vrot.lane.b32.xlu0 %v3178_v29, %s3007_s30 }
  0xf8   : > { %901 = vrot.lane.b32.xlu1 %v3184_v37, %s3008_s19  ;;  %899 = vrot.lane.b32.xlu0 %v3178_v29, %s3008_s19 }
 0x162   : > { %v906_v38 = vpop.permute.xlu1 %905  ;;  %v720_v39 = vpop.permute.xlu0 %719 }
 0x163   : > { %v917_v40 = vsel %vm721_vm1, %v906_v38, 0  ;;  %2821 = vmatprep.subr.msk.bf16.mxu1 %vm721_vm1, %v720_v39  ;;  %2823 = vmatprep.subr.msk.bf16.mxu0 %vm721_vm1, %v906_v38  ;;  %v732_v41 = vsel %vm721_vm1, %v720_v39, 0 }
 0x164   : > { %2708 = vmatpush3.bf16.xpose.msra.mxu1 %v732_v41  ;;  %2724 = vmatpush3.bf16.xpose.msra.mxu0 %v917_v40 }
 0x166   : > { %v904_v43 = vpop.permute.xlu1 %903  ;;  %v718_v44 = vpop.permute.xlu0 %717 }
 0x167   : > { %2822 = vmatprep.subr.msk.bf16.mxu1 %vm721_vm1, %v718_v44  ;;  %2824 = vmatprep.subr.msk.bf16.mxu0 %vm721_vm1, %v904_v43  ;;  %v914_v49 = vsel %vm721_vm1, %v904_v43, 0  ;;  %v729_v50 = vsel %vm721_vm1, %v718_v44, 0 }
 0x16a   : > { %v900_v47 = vpop.permute.xlu0 %899  ;;  %v902_v51 = vpop.permute.xlu1 %901 }
 0x16b   : > { %2727 = vmatprep.mubr.msk.bf16.mxu0 %vm721_vm1, %v900_v47 }
 0x16c   : > { %2710 = vmatpush3.bf16.xpose.msra.mxu1 %v729_v50  ;;  %2726 = vmatpush3.bf16.xpose.msra.mxu0 %v914_v49 }
 0x16d   : > { %2715 = vmatprep.subr.bf16.mxu1 %v3200_v48 }
 0x173   : > { %2712 = vmatmul.mubr.msk.bf16.vlgmr.msra.gmra.mxu1 %vm721_vm1, %v3184_v37  ;;  %2728 = vmatmul.mubr.msk.bf16.vlgmr.msra.gmra.mxu0 %vm721_vm1, %v902_v51 }
 0x174   : > { %2716 = vmatpush3.bf16.msra.mxu1 %v3200_v48 }
 0x175   : > { %2717 = vmatprep.subr.bf16.mxu1 %v3180_v32 }
 0x178   : > { %2718 = vmatpush3.bf16.msra.mxu1 %v3180_v32 }
 0x233   : > { %v2713_v52 = vpop.f32.mrf.mxu1  ;;  %v2729_v53 = vpop.f32.mrf.mxu0 }
 0x234   : > { %v785_v55 = vmul.f32 0.25, %v2713_v52  ;;  %v970_v56 = vmul.f32 0.25, %v2729_v53 }
 0x235   : > { %v768_v57 = vpop.f32.mrf.mxu1  ;;  %v953_v58 = vpop.f32.mrf.mxu0 }
 0x236   : > { %v783_v59 = vmul.f32 0.25, %v768_v57  ;;  %v968_v60 = vmul.f32 0.25, %v953_v58  ;;  %v974_v61 = vadd.f32 %v970_v56, %v3215_v54  ;;  %v793_v62 = vadd.f32 %v3215_v54, %v785_v55 }
 0x237   : > { %v2714_v0 = vpop.f32.mrf.mxu1  ;;  %v2730_v3 = vpop.f32.mrf.mxu0 }
 0x238   : > { %v786_v1 = vmul.f32 0.25, %v2714_v0  ;;  %v982_v4 = vsel %vm795_vm2, %v974_v61, -inf  ;;  %v802_v5 = vsel %vm795_vm2, %v793_v62, -inf  ;;  %v972_v7 = vadd.f32 %v968_v60, %v3222_v63 }
 0x239   : > { %983 = vmax.xlane.f32.xlu1 %v982_v4  ;;  %803 = vmax.xlane.f32.xlu0 %v802_v5  ;;  %v771_v6 = vpop.f32.mrf.mxu1  ;;  %v791_v8 = vadd.f32 %v3222_v63, %v783_v59  ;;  %v971_v14 = vmul.f32 0.25, %v2730_v3  ;;  %v956_v22 = vpop.f32.mrf.mxu0 }
 0x23a   : > { %v784_v11 = vmul.f32 0.25, %v771_v6  ;;  %v976_v15 = vsel %vm795_vm2, %v972_v7, -inf  ;;  %v794_v20 = vadd.f32 %v3231_v9, %v786_v1  ;;  %v969_v23 = vmul.f32 0.25, %v956_v22 }
 0x23b   : > { %v796_v18 = vsel %vm795_vm2, %v791_v8, -inf  ;;  %v975_v26 = vadd.f32 %v971_v14, %v3231_v9 }
 0x23c   : > { %v792_v21 = vadd.f32 %v3236_v10, %v784_v11  ;;  %v805_v24 = vsel %vm795_vm2, %v794_v20, -inf  ;;  %v973_v28 = vadd.f32 %v969_v23, %v3236_v10 }
 0x23d   : > { %977 = vmax.xlane.f32.xlu1 %v976_v15  ;;  %797 = vmax.xlane.f32.xlu0 %v796_v18  ;;  %v985_v27 = vsel %vm795_vm2, %v975_v26, -inf  ;;  %v2859_v15 = vld [vmem:[%s3626_s4 + $0x8] sm:$0xff]  }
 0x23e   : > { %v799_v25 = vsel %vm795_vm2, %v792_v21, -inf  ;;  %v979_v30 = vsel %vm795_vm2, %v973_v28, -inf  ;;  %2739 = vmatprep.subr.bf16.mxu0 %v2859_v15 }
 0x23f   : > { %2740 = vmatpush3.bf16.msra.mxu0 %v2859_v15 }
 0x241   : > { %806 = vmax.xlane.f32.xlu0 %v805_v24  ;;  %800 = vmax.xlane.f32.xlu1 %v799_v25 }
 0x245   : > { %986 = vmax.xlane.f32.xlu0 %v985_v27  ;;  %v2860_v27 = vld [vmem:[%s3626_s4] sm:$0xff]  }
 0x249   : > { %980 = vmax.xlane.f32.xlu0 %v979_v30 }
 0x252   : > { %1018 = vrot.lane.b32.xlu1 %v3200_v48, %s3008_s19 }
 0x25f   : > { %1016 = vrot.lane.b32.xlu0 %v3180_v32, %s3008_s19 }
 0x2c2   : > { %v984_v31 = vpop.xlane.xlu1 %983  ;;  %v804_v33 = vpop.xlane.xlu0 %803 }
 0x2c3   : > { %v990_v34 = vsub.f32 %v974_v61, %v984_v31  ;;  %v810_v36 = vsub.f32 %v793_v62, %v804_v33 }
 0x2c5   : > { %v996_v35 = vmul.f32 1.442695, %v990_v34  ;;  %v816_v42 = vmul.f32 1.442695, %v810_v36 }
 0x2c6   : > { %v978_v38 = vpop.xlane.xlu1 %977  ;;  %v798_v39 = vpop.xlane.xlu0 %797 }
 0x2c7   : > { %2891 = vpow2.f32 %v996_v35  ;;  %v988_v40 = vsub.f32 %v972_v7, %v978_v38  ;;  %v808_v41 = vsub.f32 %v791_v8, %v798_v39 }
 0x2c9   : > { %v992_v43 = vmul.f32 1.442695, %v988_v40  ;;  %v812_v44 = vmul.f32 1.442695, %v808_v41 }
 0x2ca   : > { %v807_v45 = vpop.xlane.xlu0 %806  ;;  %v801_v46 = vpop.xlane.xlu1 %800 }
 0x2cb   : > { %2893 = vpow2.f32 %v992_v43  ;;  %v811_v47 = vsub.f32 %v794_v20, %v807_v45  ;;  %v809_v49 = vsub.f32 %v792_v21, %v801_v46 }
 0x2cc   : > { %2895 = vpow2.f32 %v816_v42 }
 0x2cd   : > { %v818_v50 = vmul.f32 1.442695, %v811_v47  ;;  %v814_v51 = vmul.f32 1.442695, %v809_v49  ;;  %2897 = vpow2.f32 %v812_v44 }
 0x2ce   : > { %v987_v52 = vpop.xlane.xlu0 %986  ;;  %v1019_v53 = vpop.permute.xlu1 %1018 }
 0x2cf   : > { %2899 = vpow2.f32 %v818_v50  ;;  %v991_v55 = vsub.f32 %v975_v26, %v987_v52  ;;  %2731 = vmatprep.subr.bf16.mxu1 %v1019_v53 }
 0x2d0   : > { %2901 = vpow2.f32 %v814_v51 }
 0x2d1   : > { %v998_v56 = vmul.f32 1.442695, %v991_v55 }
 0x2d2   : > { %v981_v57 = vpop.xlane.xlu0 %980 }
 0x2d3   : > { %v989_v58 = vsub.f32 %v973_v28, %v981_v57  ;;  %2903 = vpow2.f32 %v998_v56 }
 0x2d4   : > { %v2892_v59 = vpop.eup %2891 }
 0x2d5   : > { %v994_v60 = vmul.f32 1.442695, %v989_v58  ;;  %v1006_v61 = vsel %vm795_vm2, %v2892_v59, 0.0 }
 0x2d6   : > { %1007 = vadd.xlane.f32.xlu1 %v1006_v61  ;;  %v1017_v8 = vpop.permute.xlu0 %1016 }
 0x2d7   : > { %2905 = vpow2.f32 %v994_v60 }
 0x2d8   : > { %v2894_v62 = vpop.eup %2893 }
 0x2d9   : > { %v1000_v0 = vsel %vm795_vm2, %v2894_v62, 0.0  ;;  %v2896_v1 = vpop.eup %2895 }
 0x2da   : > { %1001 = vadd.xlane.f32.xlu1 %v1000_v0  ;;  %v2898_v3 = vpop.eup %2897  ;;  %v826_v25 = vsel %vm795_vm2, %v2896_v1, 0.0 }
 0x2db   : > { %v820_v24 = vsel %vm795_vm2, %v2898_v3, 0.0 }
 0x2dc   : > { %v2900_v4 = vpop.eup %2899 }
 0x2dd   : > { %v2902_v5 = vpop.eup %2901  ;;  %v833_v6 = vpack.c.bf16 %v2900_v4, %v2896_v1  ;;  %v829_v26 = vsel %vm795_vm2, %v2900_v4, 0.0 }
 0x2de   : > { %v832_v7 = vpack.c.bf16 %v2902_v5, %v2898_v3  ;;  %v823_v23 = vsel %vm795_vm2, %v2902_v5, 0.0 }
 0x2e0   : > { %2719 = vmatprep.mubr.msk.bf16.mxu1 %vm795_vm2, %v832_v7  ;;  %v2904_v11 = vpop.eup %2903 }
 0x2e1   : > { %2720 = vmatmul.mubr.msk.bf16.vlgmr.msra.gmra.mxu1 %vm795_vm2, %v833_v6  ;;  %v1013_v21 = vpack.c.bf16 %v2904_v11, %v2892_v59  ;;  %v1009_v22 = vsel %vm795_vm2, %v2904_v11, 0.0 }
 0x2e2   : > { %2732 = vmatpush3.bf16.msra.mxu1 %v1019_v53 }
 0x2e3   : > { %2733 = vmatprep.subr.bf16.mxu1 %v1017_v8 }
 0x2e4   : > { %v2906_v14 = vpop.eup %2905 }
 0x2e5   : > { %v1003_v18 = vsel %vm795_vm2, %v2906_v14, 0.0  ;;  %v1012_v20 = vpack.c.bf16 %v2906_v14, %v2894_v62 }
 0x2e6   : > { %2734 = vmatpush3.bf16.msra.mxu1 %v1017_v8  ;;  %1004 = vadd.xlane.f32.xlu0 %v1003_v18 }
 0x2e7   : > { %2735 = vmatprep.mubr.msk.bf16.mxu1 %vm795_vm2, %v1012_v20  ;;  %2745 = vmatprep.subr.bf16.mxu1 %v2860_v27 }
 0x2e9   : > { %2736 = vmatmul.mubr.msk.bf16.vlgmr.msra.gmra.mxu1 %vm795_vm2, %v1013_v21 }
 0x2ea   : > { %1010 = vadd.xlane.f32.xlu0 %v1009_v22  ;;  %2746 = vmatpush3.bf16.msra.mxu1 %v2860_v27 }
 0x2eb   : > { %1215 = vrot.lane.b32.xlu1 %v3184_v37, %s3009_s21 }
 0x2ef   : > { %1209 = vrot.lane.b32.xlu1 %v3178_v29, %s3010_s2 }
 0x2f3   : > { %1211 = vrot.lane.b32.xlu1 %v3184_v37, %s3010_s2 }
 0x2f7   : > { %1464 = vrot.lane.b32.xlu1 %v3178_v29, %s3011_s23 }
 0x2fb   : > { %1462 = vrot.lane.b32.xlu1 %v3184_v37, %s3012_s24 }
 0x300   : > { %1213 = vrot.lane.b32.xlu0 %v3178_v29, %s3009_s21 }
 0x304   : > { %1466 = vrot.lane.b32.xlu0 %v3184_v37, %s3011_s23 }
 0x308   : > { %1460 = vrot.lane.b32.xlu0 %v3178_v29, %s3012_s24 }
 0x31f   : > { %824 = vadd.xlane.f32.xlu1 %v823_v23 }
 0x327   : > { %821 = vadd.xlane.f32.xlu0 %v820_v24 }
 0x32b   : > { %827 = vadd.xlane.f32.xlu0 %v826_v25 }
 0x32f   : > { %830 = vadd.xlane.f32.xlu0 %v829_v26 }
 0x35f   : > { %v1008_v37 = vpop.xlane.xlu1 %1007 }
 0x363   : > { %v1002_v29 = vpop.xlane.xlu1 %1001 }
 0x364   : > { %2907 = vrcp.f32 %v1002_v29 }
 0x367   : > { %v1216_v28 = vpop.permute.xlu1 %1215 }
 0x368   : > { %2825 = vmatprep.subr.msk.bf16.mxu0 %vm721_vm1, %v1216_v28  ;;  %v1227_v1 = vsel %vm721_vm1, %v1216_v28, 0 }
 0x36b   : > { %v1210_v31 = vpop.permute.xlu1 %1209 }
 0x36f   : > { %v1005_v30 = vpop.xlane.xlu0 %1004  ;;  %v1212_v34 = vpop.permute.xlu1 %1211 }
 0x371   : > { %v2908_v49 = vpop.eup %2907 }
 0x373   : > { %v1011_v33 = vpop.xlane.xlu0 %1010  ;;  %v1465_v38 = vpop.permute.xlu1 %1464 }
 0x374   : > { %2909 = vrcp.f32 %v1011_v33  ;;  %v1475_v23 = vsel %vm721_vm1, %v1465_v38, 0 }
 0x375   : > { %2911 = vrcp.f32 %v1005_v30 }
 0x376   : > { %2913 = vrcp.f32 %v1008_v37 }
 0x377   : > { %v1214_v35 = vpop.permute.xlu0 %1213  ;;  %v1463_v43 = vpop.permute.xlu1 %1462 }
 0x378   : > { %v1224_v5 = vsel %vm721_vm1, %v1214_v35, 0 }
 0x37b   : > { %v1467_v41 = vpop.permute.xlu0 %1466 }
 0x37c   : > { %v1478_v15 = vsel %vm721_vm1, %v1467_v41, 0 }
 0x37f   : > { %v1461_v46 = vpop.permute.xlu0 %1460 }
 0x381   : > { %v2910_v51 = vpop.eup %2909 }
 0x382   : > { %v2912_v52 = vpop.eup %2911 }
 0x383   : > { %v2914_v56 = vpop.eup %2913 }
 0x3a1   : > { %v2721_v36 = vpop.f32.mrf.mxu1 }
 0x3a3   : > { %v874_v39 = vpop.f32.mrf.mxu1 }
 0x3a5   : > { %v2722_v40 = vpop.f32.mrf.mxu1 }
 0x3a7   : > { %v877_v42 = vpop.f32.mrf.mxu1 }
 0x3a8   : > { %v825_v47 = vpop.xlane.xlu1 %824 }
 0x3a9   : > { %v2737_v44 = vpop.f32.mrf.mxu1  ;;  %2915 = vrcp.f32 %v825_v47 }
 0x3aa   : > { %v1082_v60 = vmul.f32 %v2914_v56, %v2737_v44 }
 0x3ab   : > { %v1062_v45 = vpop.f32.mrf.mxu1 }
 0x3ac   : > { %v1078_v57 = vmul.f32 %v2908_v49, %v1062_v45 }
 0x3ad   : > { %v2738_v50 = vpop.f32.mrf.mxu1 }
 0x3ae   : > { %v1084_v53 = vmul.f32 %v2910_v51, %v2738_v50 }
 0x3af   : > { %v1065_v55 = vpop.f32.mrf.mxu1 }
 0x3b0   : > { %v1080_v58 = vmul.f32 %v2912_v52, %v1065_v55  ;;  %v822_v59 = vpop.xlane.xlu0 %821  ;;  %v1086_v62 = vpack.c.bf16 %v1084_v53, %v1082_v60 }
 0x3b1   : > { %2917 = vrcp.f32 %v822_v59 }
 0x3b2   : > { %v1085_v61 = vpack.c.bf16 %v1080_v58, %v1078_v57 }
 0x3b4   : > { %2741 = vmatprep.mubr.msk.bf16.mxu0 %vm721_vm1, %v1085_v61  ;;  %v828_v0 = vpop.xlane.xlu0 %827 }
 0x3b5   : > { %2742 = vmatmul.mubr.msk.bf16.vlgmr.msra.gmra.mxu0 %vm721_vm1, %v1086_v62  ;;  %2919 = vrcp.f32 %v828_v0 }
 0x3b6   : > { %2752 = vmatpush3.bf16.xpose.msra.mxu0 %v1227_v1  ;;  %2755 = vmatprep.mubr.msk.bf16.mxu0 %vm721_vm1, %v1210_v31  ;;  %v2916_v4 = vpop.eup %2915 }
 0x3b7   : > { %2826 = vmatprep.subr.msk.bf16.mxu0 %vm721_vm1, %v1214_v35  ;;  %v892_v8 = vmul.f32 %v2916_v4, %v877_v42 }
 0x3b8   : > { %v831_v3 = vpop.xlane.xlu0 %830 }
 0x3b9   : > { %2921 = vrcp.f32 %v831_v3 }
 0x3be   : > { %v2918_v6 = vpop.eup %2917  ;;  %2754 = vmatpush3.bf16.xpose.msra.mxu0 %v1224_v5 }
 0x3bf   : > { %2827 = vmatprep.subr.msk.bf16.mxu0 %vm721_vm1, %v1467_v41  ;;  %v890_v7 = vmul.f32 %v2918_v6, %v874_v39 }
 0x3c1   : > { %v897_v11 = vpack.c.bf16 %v892_v8, %v890_v7 }
 0x3c2   : > { %v2920_v14 = vpop.eup %2919 }
 0x3c3   : > { %2747 = vmatprep.mubr.msk.bf16.mxu1 %vm721_vm1, %v897_v11  ;;  %v894_v20 = vmul.f32 %v2920_v14, %v2721_v36 }
 0x3c5   : > { %2756 = vmatmul.mubr.msk.bf16.vlgmr.msra.gmra.mxu0 %vm721_vm1, %v1212_v34 }
 0x3c6   : > { %v2922_v18 = vpop.eup %2921  ;;  %2774 = vmatpush3.bf16.xpose.msra.mxu0 %v1478_v15  ;;  %2777 = vmatprep.mubr.msk.bf16.mxu0 %vm721_vm1, %v1461_v46 }
 0x3c7   : > { %2828 = vmatprep.subr.msk.bf16.mxu0 %vm721_vm1, %v1465_v38  ;;  %v896_v21 = vmul.f32 %v2922_v18, %v2722_v40 }
 0x3c9   : > { %v898_v22 = vpack.c.bf16 %v896_v21, %v894_v20 }
 0x3cb   : > { %2748 = vmatmul.mubr.msk.bf16.vlgmr.msra.gmra.mxu1 %vm721_vm1, %v898_v22 }
 0x3ce   : > { %2776 = vmatpush3.bf16.xpose.msra.mxu0 %v1475_v23 }
 0x3d5   : > { %2778 = vmatmul.mubr.msk.bf16.vlgmr.msra.gmra.mxu0 %vm721_vm1, %v1463_v43 }
 0x3d6   : > { %1901 = vmatprep.mubr.bf16.mxu0 %v3005_v2 }
 0x475   : > { %v2743_v24 = vpop.f32.mrf.mxu0 }
 0x477   : > { %v1133_v25 = vpop.f32.mrf.mxu0 }
 0x479   : > { %v2744_v26 = vpop.f32.mrf.mxu0 }
 0x47b   : > { %v3299_v27 = vpop.f32.mrf.mxu0 }
 0x485   : > { %v2757_v37 = vpop.f32.mrf.mxu0 }
 0x486   : > { %v1280_v29 = vmul.f32 0.25, %v2757_v37 }
 0x487   : > { %v1263_v28 = vpop.f32.mrf.mxu0 }
 0x488   : > { %v1278_v30 = vmul.f32 0.25, %v1263_v28  ;;  %v1284_v31 = vadd.f32 %v1280_v29, %v3215_v54 }
 0x489   : > { %v2758_v33 = vpop.f32.mrf.mxu0 }
 0x48a   : > { %v1281_v34 = vmul.f32 0.25, %v2758_v33  ;;  %v1292_v35 = vsel %vm795_vm2, %v1284_v31, -inf  ;;  %v1282_v36 = vadd.f32 %v1278_v30, %v3222_v63 }
 0x48b   : > { %1293 = vmax.xlane.f32.xlu1 %v1292_v35  ;;  %v1266_v38 = vpop.f32.mrf.mxu0  ;;  %v2749_v39 = vpop.f32.mrf.mxu1 }
 0x48c   : > { %v1279_v40 = vmul.f32 0.25, %v1266_v38  ;;  %v3304_v41 = vadd.f32 %v2749_v39, %v2743_v24  ;;  %v1285_v42 = vadd.f32 %v1281_v34, %v3231_v9  ;;  %v1286_v44 = vsel %vm795_vm2, %v1282_v36, -inf }
 0x48d   : > { %v1194_v43 = vpop.f32.mrf.mxu1 }
 0x48e   : > { %v1295_v45 = vsel %vm795_vm2, %v1285_v42, -inf  ;;  %v3309_v46 = vadd.f32 %v1194_v43, %v1133_v25  ;;  %v1283_v47 = vadd.f32 %v1279_v40, %v3236_v10 }
 0x48f   : > { %1287 = vmax.xlane.f32.xlu1 %v1286_v44  ;;  %1296 = vmax.xlane.f32.xlu0 %v1295_v45  ;;  %v2750_v49 = vpop.f32.mrf.mxu1 }
 0x490   : > { %v3312_v50 = vadd.f32 %v2750_v49, %v2744_v26  ;;  %v1289_v51 = vsel %vm795_vm2, %v1283_v47, -inf }
 0x493   : > { %1290 = vmax.xlane.f32.xlu0 %v1289_v51 }
 0x495   : > { %v2779_v52 = vpop.f32.mrf.mxu0 }
 0x496   : > { %v1531_v56 = vmul.f32 0.25, %v2779_v52 }
 0x497   : > { %v1514_v53 = vpop.f32.mrf.mxu0 }
 0x498   : > { %v1529_v58 = vmul.f32 0.25, %v1514_v53  ;;  %v3320_v60 = vadd.f32 %v1531_v56, %v3215_v54 }
 0x499   : > { %v2780_v55 = vpop.f32.mrf.mxu0 }
 0x49a   : > { %v1543_v61 = vsel %vm795_vm2, %v3320_v60, -inf  ;;  %v1533_v62 = vadd.f32 %v1529_v58, %v3222_v63  ;;  %v1532_v26 = vmul.f32 0.25, %v2780_v55 }
 0x49b   : > { %v1517_v57 = vpop.f32.mrf.mxu0 }
 0x49c   : > { %v1530_v59 = vmul.f32 0.25, %v1517_v57  ;;  %v1537_v1 = vsel %vm795_vm2, %v1533_v62, -inf  ;;  %v1536_v33 = vadd.f32 %v1532_v26, %v3231_v9 }
 0x49e   : > { %v1534_v0 = vadd.f32 %v1530_v59, %v3236_v10  ;;  %v1546_v35 = vsel %vm795_vm2, %v1536_v33, -inf }
 0x4a0   : > { %1326 = vrot.lane.b32.xlu1 %v3200_v48, %s3010_s2  ;;  %v1540_v3 = vsel %vm795_vm2, %v1534_v0, -inf }
 0x4a9   : > { %1324 = vrot.lane.b32.xlu0 %v3180_v32, %s3010_s2 }
 0x4c4   : > { %1544 = vmax.xlane.f32.xlu1 %v1543_v61 }
 0x4c8   : > { %1538 = vmax.xlane.f32.xlu1 %v1537_v1  ;;  %1541 = vmax.xlane.f32.xlu0 %v1540_v3 }
 0x514   : > { %v1294_v4 = vpop.xlane.xlu1 %1293 }
 0x515   : > { %v1300_v5 = vsub.f32 %v1284_v31, %v1294_v4  ;;  %v1197_v4 = vpop.f32.mrf.mxu1 }
 0x517   : > { %v1306_v6 = vmul.f32 1.442695, %v1300_v5 }
 0x518   : > { %v1297_v7 = vpop.xlane.xlu0 %1296  ;;  %v1288_v54 = vpop.xlane.xlu1 %1287 }
 0x519   : > { %2923 = vpow2.f32 %v1306_v6  ;;  %v1301_v8 = vsub.f32 %v1285_v42, %v1297_v7  ;;  %v1298_v11 = vsub.f32 %v1282_v36, %v1288_v54  ;;  %v2861_v36 = vld [vmem:[%s3626_s4 + $0x10] sm:$0xff]  }
 0x51b   : > { %v1308_v14 = vmul.f32 1.442695, %v1301_v8  ;;  %v1302_v15 = vmul.f32 1.442695, %v1298_v11 }
 0x51c   : > { %v1291_v63 = vpop.xlane.xlu0 %1290  ;;  %v1327_v18 = vpop.permute.xlu1 %1326 }
 0x51d   : > { %2925 = vpow2.f32 %v1308_v14  ;;  %v1299_v10 = vsub.f32 %v1283_v47, %v1291_v63  ;;  %2759 = vmatprep.subr.bf16.mxu1 %v1327_v18 }
 0x51e   : > { %2927 = vpow2.f32 %v1302_v15  ;;  %2760 = vmatpush3.bf16.msra.mxu1 %v1327_v18 }
 0x51f   : > { %v1304_v20 = vmul.f32 1.442695, %v1299_v10 }
 0x520   : > { %v1325_v21 = vpop.permute.xlu0 %1324 }
 0x521   : > { %2929 = vpow2.f32 %v1304_v20  ;;  %2761 = vmatprep.subr.bf16.mxu1 %v1325_v21 }
 0x522   : > { %2762 = vmatpush3.bf16.msra.mxu1 %v1325_v21 }
 0x523   : > { %2767 = vmatprep.subr.bf16.mxu1 %v2861_v36 }
 0x526   : > { %v2924_v22 = vpop.eup %2923 }
 0x527   : > { %v1316_v23 = vsel %vm795_vm2, %v2924_v22, 0.0 }
 0x528   : > { %1317 = vadd.xlane.f32.xlu1 %v1316_v23 }
 0x52a   : > { %v2926_v24 = vpop.eup %2925 }
 0x52b   : > { %v2928_v25 = vpop.eup %2927  ;;  %v1319_v37 = vsel %vm795_vm2, %v2926_v24, 0.0  ;;  %v1323_v34 = vpack.c.bf16 %v2926_v24, %v2924_v22 }
 0x52c   : > { %1320 = vadd.xlane.f32.xlu0 %v1319_v37  ;;  %v1310_v29 = vsel %vm795_vm2, %v2928_v25, 0.0 }
 0x52d   : > { %1311 = vadd.xlane.f32.xlu1 %v1310_v29 }
 0x52e   : > { %v2930_v28 = vpop.eup %2929 }
 0x52f   : > { %v1313_v30 = vsel %vm795_vm2, %v2930_v28, 0.0  ;;  %v1322_v31 = vpack.c.bf16 %v2930_v28, %v2928_v25  ;;  %v2862_v25 = vld [vmem:[%s3626_s4 + $0x18] sm:$0xff]  }
 0x530   : > { %1314 = vadd.xlane.f32.xlu0 %v1313_v30 }
 0x531   : > { %2763 = vmatprep.mubr.msk.bf16.mxu1 %vm795_vm2, %v1322_v31 }
 0x532   : > { %2764 = vmatmul.mubr.msk.bf16.vlgmr.msra.gmra.mxu1 %vm795_vm2, %v1323_v34 }
 0x533   : > { %2768 = vmatpush3.bf16.msra.mxu1 %v2861_v36  ;;  %v1198_v36 = vadd.f32 %v1197_v4, %v3299_v27 }
 0x534   : > { %1547 = vmax.xlane.f32.xlu0 %v1546_v35 }
 0x53e   : > { %1577 = vrot.lane.b32.xlu1 %v3200_v48, %s3012_s24 }
 0x54a   : > { %1575 = vrot.lane.b32.xlu0 %v3180_v32, %s3012_s24 }
 0x54d   : > { %v1545_v9 = vpop.xlane.xlu1 %1544 }
 0x54e   : > { %v1551_v38 = vsub.f32 %v3320_v60, %v1545_v9 }
 0x550   : > { %v1557_v47 = vmul.f32 1.442695, %v1551_v38 }
 0x551   : > { %v1542_v39 = vpop.xlane.xlu0 %1541  ;;  %v1539_v40 = vpop.xlane.xlu1 %1538 }
 0x552   : > { %v1550_v42 = vsub.f32 %v1534_v0, %v1542_v39  ;;  %v1549_v43 = vsub.f32 %v1533_v62, %v1539_v40 }
 0x554   : > { %v1555_v44 = vmul.f32 1.442695, %v1550_v42  ;;  %v1553_v45 = vmul.f32 1.442695, %v1549_v43 }
 0x556   : > { %2931 = vpow2.f32 %v1555_v44 }
 0x557   : > { %2933 = vpow2.f32 %v1553_v45 }
 0x558   : > { %2935 = vpow2.f32 %v1557_v47 }
 0x563   : > { %v2932_v49 = vpop.eup %2931 }
 0x564   : > { %v2934_v51 = vpop.eup %2933  ;;  %v1564_v32 = vsel %vm795_vm2, %v2932_v49, 0.0 }
 0x565   : > { %v1561_v48 = vsel %vm795_vm2, %v2934_v51, 0.0  ;;  %v1573_v52 = vpack.c.bf16 %v2932_v49, %v2934_v51  ;;  %v2936_v53 = vpop.eup %2935 }
 0x566   : > { %1562 = vadd.xlane.f32.xlu1 %v1561_v48  ;;  %v1567_v55 = vsel %vm795_vm2, %v2936_v53, 0.0 }
 0x569   : > { %1565 = vadd.xlane.f32.xlu0 %v1564_v32 }
 0x56a   : > { %1568 = vadd.xlane.f32.xlu1 %v1567_v55  ;;  %v2585_v55 = vld [vmem:[%s3627_s5] ss:$0 sm:$0xff] }
 0x5b1   : > { %v1318_v56 = vpop.xlane.xlu1 %1317 }
 0x5b5   : > { %v1321_v57 = vpop.xlane.xlu0 %1320 }
 0x5b6   : > { %v1312_v58 = vpop.xlane.xlu1 %1311 }
 0x5b9   : > { %v1315_v59 = vpop.xlane.xlu0 %1314 }
 0x5ba   : > { %v1578_v60 = vpop.permute.xlu1 %1577 }
 0x5bb   : > { %2781 = vmatprep.subr.bf16.mxu1 %v1578_v60 }
 0x5bd   : > { %v1548_v61 = vpop.xlane.xlu0 %1547 }
 0x5be   : > { %v1552_v62 = vsub.f32 %v1536_v33, %v1548_v61 }
 0x5c0   : > { %v1559_v0 = vmul.f32 1.442695, %v1552_v62 }
 0x5c1   : > { %v1576_v23 = vpop.permute.xlu0 %1575 }
 0x5c2   : > { %2937 = vpow2.f32 %v1559_v0 }
 0x5c3   : > { %2939 = vrcp.f32 %v1321_v57 }
 0x5c4   : > { %2941 = vrcp.f32 %v1312_v58 }
 0x5c5   : > { %2943 = vrcp.f32 %v1315_v59 }
 0x5c6   : > { %2945 = vrcp.f32 %v1318_v56 }
 0x5cf   : > { %v2938_v1 = vpop.eup %2937 }
 0x5d0   : > { %v1570_v3 = vsel %vm795_vm2, %v2938_v1, 0.0  ;;  %v2940_v7 = vpop.eup %2939  ;;  %v1574_v24 = vpack.c.bf16 %v2938_v1, %v2936_v53  ;;  %v2995_v1 = vld [vmem:[%s3145_s20] sm:$0xff] }
 0x5d1   : > { %1571 = vadd.xlane.f32.xlu0 %v1570_v3  ;;  %v2942_v8 = vpop.eup %2941 }
 0x5d2   : > { %v2944_v11 = vpop.eup %2943 }
 0x5d3   : > { %v2946_v63 = vpop.eup %2945 }
 0x5ef   : > { %v1563_v26 = vpop.xlane.xlu1 %1562 }
 0x5f0   : > { %2947 = vrcp.f32 %v1563_v26 }
 0x5f2   : > { %v2765_v5 = vpop.f32.mrf.mxu1  ;;  %v1566_v37 = vpop.xlane.xlu0 %1565 }
 0x5f3   : > { %v1390_v20 = vmul.f32 %v2946_v63, %v2765_v5  ;;  %v1569_v28 = vpop.xlane.xlu1 %1568 }
 0x5f4   : > { %v1370_v6 = vpop.f32.mrf.mxu1 }
 0x5f5   : > { %v1386_v18 = vmul.f32 %v2942_v8, %v1370_v6 }
 0x5f6   : > { %v2766_v54 = vpop.f32.mrf.mxu1 }
 0x5f7   : > { %v1392_v14 = vmul.f32 %v2940_v7, %v2766_v54  ;;  %v2996_v54 = vld [vmem:[%s3145_s20 + $0x8] sm:$0xff] }
 0x5f8   : > { %v1373_v15 = vpop.f32.mrf.mxu1 }
 0x5f9   : > { %v1388_v10 = vmul.f32 %v2944_v11, %v1373_v15  ;;  %v1394_v22 = vpack.c.bf16 %v1392_v14, %v1390_v20 }
 0x5fb   : > { %v1393_v21 = vpack.c.bf16 %v1388_v10, %v1386_v18 }
 0x5fd   : > { %2769 = vmatprep.mubr.msk.bf16.mxu1 %vm721_vm1, %v1393_v21  ;;  %v2948_v43 = vpop.eup %2947 }
 0x5fe   : > { %2770 = vmatmul.mubr.msk.bf16.vlgmr.msra.gmra.mxu1 %vm721_vm1, %v1394_v22 }
 0x5ff   : > { %2782 = vmatpush3.bf16.msra.mxu1 %v1578_v60  ;;  %2785 = vmatprep.mubr.msk.bf16.mxu1 %vm795_vm2, %v1573_v52 }
 0x600   : > { %2783 = vmatprep.subr.bf16.mxu1 %v1576_v23 }
 0x603   : > { %2784 = vmatpush3.bf16.msra.mxu1 %v1576_v23 }
 0x604   : > { %2789 = vmatprep.subr.bf16.mxu1 %v2862_v25 }
 0x606   : > { %2786 = vmatmul.mubr.msk.bf16.vlgmr.msra.gmra.mxu1 %vm795_vm2, %v1574_v24 }
 0x607   : > { %2790 = vmatpush3.bf16.msra.mxu1 %v2862_v25 }
 0x65a   : > { %v1572_v29 = vpop.xlane.xlu0 %1571 }
 0x65b   : > { %2949 = vrcp.f32 %v1572_v29 }
 0x65c   : > { %2951 = vrcp.f32 %v1566_v37 }
 0x65d   : > { %2953 = vrcp.f32 %v1569_v28 }
 0x668   : > { %v2950_v45 = vpop.eup %2949 }
 0x669   : > { %v2952_v47 = vpop.eup %2951 }
 0x6be   : > { %v2771_v30 = vpop.f32.mrf.mxu1 }
 0x6bf   : > { %v1458_v31 = vadd.f32 %v2771_v30, %v3304_v41  ;;  %v2954_v41 = vpop.eup %2953 }
 0x6c0   : > { %v1441_v33 = vpop.f32.mrf.mxu1 }
 0x6c1   : > { %v1456_v34 = vadd.f32 %v1441_v33, %v3309_v46 }
 0x6c2   : > { %v2772_v35 = vpop.f32.mrf.mxu1 }
 0x6c3   : > { %v1459_v9 = vadd.f32 %v2772_v35, %v3312_v50 }
 0x6c4   : > { %v1444_v38 = vpop.f32.mrf.mxu1 }
 0x6c5   : > { %v1457_v39 = vadd.f32 %v1444_v38, %v1198_v36  ;;  %v2863_v38 = vld [vmem:[%s3630_s8 + $0x30] ss:$8 sps:$4 sm:$0xff]  }
 0x6c6   : > { %v2787_v40 = vpop.f32.mrf.mxu1 }
 0x6c7   : > { %v1641_v53 = vmul.f32 %v2954_v41, %v2787_v40  ;;  %v2866_v40 = vld [vmem:[%s3630_s8 + $0x20] ss:$8 sps:$4 sm:$0xff]  }
 0x6c8   : > { %v1621_v42 = vpop.f32.mrf.mxu1 }
 0x6c9   : > { %v1637_v48 = vmul.f32 %v2948_v43, %v1621_v42  ;;  %v2871_v42 = vld [vmem:[%s3630_s8 + $0x14] ss:$8 sps:$4 sm:$0xff]   ;;  %v2869_v43 = vld [vmem:[%s3630_s8 + $0x10] ss:$8 sps:$4 sm:$0xff]  }
 0x6ca   : > { %v2788_v44 = vpop.f32.mrf.mxu1 }
 0x6cb   : > { %v1643_v49 = vmul.f32 %v2950_v45, %v2788_v44  ;;  %v2874_v44 = vld [vmem:[%s3630_s8 + $0x4] ss:$8 sps:$4 sm:$0xff]   ;;  %v2872_v45 = vld [vmem:[%s3630_s8] ss:$8 sps:$4 sm:$0xff]  }
 0x6cc   : > { %v1624_v51 = vpop.f32.mrf.mxu1 }
 0x6cd   : > { %v1639_v52 = vmul.f32 %v2952_v47, %v1624_v51  ;;  %v1645_v32 = vpack.c.bf16 %v1643_v49, %v1641_v53 }
 0x6cf   : > { %v1644_v46 = vpack.c.bf16 %v1639_v52, %v1637_v48 }
 0x6d1   : > { %2791 = vmatprep.mubr.msk.bf16.mxu1 %vm721_vm1, %v1644_v46 }
 0x6d2   : > { %2792 = vmatmul.mubr.msk.bf16.vlgmr.msra.gmra.mxu1 %vm721_vm1, %v1645_v32 }
 0x792   : > { %v2793_v27 = vpop.f32.mrf.mxu1 }
 0x793   : > { %v1709_v50 = vadd.f32 %v2793_v27, %v1458_v31 }
 0x794   : > { %v1692_v56 = vpop.f32.mrf.mxu1 }
 0x795   : > { %v1707_v57 = vadd.f32 %v1692_v56, %v1456_v34  ;;  %v1720_v59 = vadd.f32 %v2585_v55, %v1709_v50 }
 0x796   : > { %v2794_v58 = vpop.f32.mrf.mxu1 }
 0x797   : > { %v1718_v60 = vadd.f32 %v2585_v55, %v1707_v57  ;;  %v1710_v61 = vadd.f32 %v2794_v58, %v1459_v9  ;;  %v1724_v7 = vadd.f32 %v1720_v59, %v3156_v12  ;;  %v2865_v9 = vld [vmem:[%s3630_s8 + $0x34] ss:$8 sps:$4 sm:$0xff]   ;;  %v2586_v58 = vld [vmem:[%s3628_s6] ss:$0 sm:$0xff] }
 0x798   : > { %v1695_v62 = vpop.f32.mrf.mxu1  ;;  %1877 = vmatprep.subr.bf16.mxu0 %v2865_v9 }
 0x799   : > { %v1708_v0 = vadd.f32 %v1695_v62, %v1457_v39  ;;  %v1722_v3 = vadd.f32 %v2995_v1, %v1718_v60  ;;  %v1721_v4 = vadd.f32 %v2585_v55, %v1710_v61  ;;  %v1732_v11 = vsel %vm643_vm0, %v1724_v7, 0.0  ;;  %1878 = vmatpush1.bf16.msra.mxu0 %v2863_v38  ;;  %v2868_v39 = vld [vmem:[%s3630_s8 + $0x24] ss:$8 sps:$4 sm:$0xff]  }
 0x79a   : > { %1879 = vmatprep.subr.bf16.mxu0 %v2868_v39 }
 0x79b   : > { %v1719_v5 = vadd.f32 %v2585_v55, %v1708_v0  ;;  %v1726_v6 = vsel %vm643_vm0, %v1722_v3, 0.0  ;;  %v1725_v15 = vadd.f32 %v1721_v4, %v3159_v13  ;;  %v2587_v0 = vld [vmem:[%s3629_s7] ss:$0 sm:$0xff] }
 0x79c   : > { %1727 = vadd.xlane.f32.xlu1 %v1726_v6 }
 0x79d   : > { %v1723_v8 = vadd.f32 %v2996_v54, %v1719_v5  ;;  %v1735_v63 = vsel %vm643_vm0, %v1725_v15, 0.0  ;;  %1880 = vmatpush1.bf16.msra.mxu0 %v2866_v40 }
 0x79e   : > { %1881 = vmatprep.subr.bf16.mxu0 %v2871_v42 }
 0x79f   : > { %v1729_v14 = vsel %vm643_vm0, %v1723_v8, 0.0 }
 0x7a0   : > { %1733 = vadd.xlane.f32.xlu1 %v1732_v11  ;;  %1730 = vadd.xlane.f32.xlu0 %v1729_v14 }
 0x7a1   : > { %1882 = vmatpush1.bf16.msra.mxu0 %v2869_v43 }
 0x7a2   : > { %1883 = vmatprep.subr.bf16.mxu0 %v2874_v44 }
 0x7a4   : > { %1736 = vadd.xlane.f32.xlu0 %v1735_v63 }
 0x7a5   : > { %1884 = vmatpush1.bf16.msra.mxu0 %v2872_v45 }
 0x825   : > { %v1728_v18 = vpop.xlane.xlu1 %1727 }
 0x826   : > { %v1739_v10 = vmul.f32 0.015625, %v1728_v18  ;;  %v2875_v18 = vld [vmem:[%s3632_s10 + $0x78] sm:$0xff]  }
 0x827   : > { %2667 = vmatprep.subr.bf16.mxu1 %v2875_v18 }
 0x828   : > { %v1743_v20 = vsub.f32 %v1722_v3, %v1739_v10  ;;  %v2876_v10 = vld [vmem:[%s3632_s10 + $0x38] sm:$0xff]  }
 0x829   : > { %v1734_v21 = vpop.xlane.xlu1 %1733  ;;  %v1731_v22 = vpop.xlane.xlu0 %1730  ;;  %2668 = vmatpush3.bf16.msra.mxu1 %v2876_v10 }
 0x82a   : > { %v1741_v12 = vmul.f32 0.015625, %v1734_v21  ;;  %v1740_v23 = vmul.f32 0.015625, %v1731_v22  ;;  %v1747_v24 = vmul.f32 %v1743_v20, %v1743_v20  ;;  %v2879_v21 = vld [vmem:[%s3632_s10 + $0x68] sm:$0xff]  }
 0x82b   : > { %v2880_v22 = vld [vmem:[%s3632_s10 + $0x28] sm:$0xff]  }
 0x82c   : > { %v1745_v25 = vsub.f32 %v1724_v7, %v1741_v12  ;;  %v1744_v26 = vsub.f32 %v1723_v8, %v1740_v23  ;;  %v1751_v37 = vsel %vm643_vm0, %v1747_v24, 0.0  ;;  %v2881_v12 = vld [vmem:[%s3632_s10 + $0x60] sm:$0xff]   ;;  %v2883_v24 = vld [vmem:[%s3632_s10 + $0x58] sm:$0xff]  }
 0x82d   : > { %1752 = vadd.xlane.f32.xlu1 %v1751_v37  ;;  %v1737_v29 = vpop.xlane.xlu0 %1736  ;;  %v2882_v23 = vld [vmem:[%s3632_s10 + $0x20] sm:$0xff]   ;;  %v2886_v37 = vld [vmem:[%s3632_s10 + $0x10] sm:$0xff]  }
 0x82e   : > { %v1742_v13 = vmul.f32 0.015625, %v1737_v29  ;;  %v1749_v28 = vmul.f32 %v1745_v25, %v1745_v25  ;;  %v1748_v30 = vmul.f32 %v1744_v26, %v1744_v26  ;;  %v2887_v29 = vld [vmem:[%s3632_s10 + $0x48] sm:$0xff]  }
 0x830   : > { %v1746_v31 = vsub.f32 %v1725_v15, %v1742_v13  ;;  %v1757_v33 = vsel %vm643_vm0, %v1749_v28, 0.0  ;;  %v1754_v34 = vsel %vm643_vm0, %v1748_v30, 0.0  ;;  %v2888_v13 = vld [vmem:[%s3632_s10 + $0x8] sm:$0xff]   ;;  %v2889_v28 = vld [vmem:[%s3632_s10 + $0x40] sm:$0xff]  }
 0x831   : > { %1758 = vadd.xlane.f32.xlu1 %v1757_v33  ;;  %1755 = vadd.xlane.f32.xlu0 %v1754_v34  ;;  %v2890_v30 = vld [vmem:[%s3632_s10] sm:$0xff]  }
 0x832   : > { %v1750_v35 = vmul.f32 %v1746_v31, %v1746_v31 }
 0x834   : > { %v1760_v36 = vsel %vm643_vm0, %v1750_v35, 0.0 }
 0x835   : > { %1761 = vadd.xlane.f32.xlu0 %v1760_v36 }
 0x8b6   : > { %v1753_v47 = vpop.xlane.xlu1 %1752 }
 0x8b7   : > { %v1763_v49 = vmul.f32 0.015625, %v1753_v47 }
 0x8b9   : > { %v1767_v51 = vadd.f32 1e-06, %v1763_v49 }
 0x8ba   : > { %v1759_v41 = vpop.xlane.xlu1 %1758  ;;  %v1756_v48 = vpop.xlane.xlu0 %1755 }
 0x8bb   : > { %2955 = vrsqrt.f32 %v1767_v51  ;;  %v1765_v52 = vmul.f32 0.015625, %v1759_v41  ;;  %v1764_v53 = vmul.f32 0.015625, %v1756_v48 }
 0x8bd   : > { %v1768_v46 = vadd.f32 1e-06, %v1764_v53  ;;  %v1769_v32 = vadd.f32 1e-06, %v1765_v52 }
 0x8be   : > { %v1762_v27 = vpop.xlane.xlu0 %1761 }
 0x8bf   : > { %v1766_v50 = vmul.f32 0.015625, %v1762_v27  ;;  %2957 = vrsqrt.f32 %v1768_v46 }
 0x8c0   : > { %2959 = vrsqrt.f32 %v1769_v32 }
 0x8c1   : > { %v1770_v55 = vadd.f32 1e-06, %v1766_v50 }
 0x8c3   : > { %2961 = vrsqrt.f32 %v1770_v55 }
 0x8c8   : > { %v2956_v56 = vpop.eup %2955 }
 0x8c9   : > { %v1775_v57 = vmul.f32 %v2956_v56, %v1743_v20  ;;  %v2878_v20 = vld [vmem:[%s3632_s10 + $0x30] sm:$0xff]  }
 0x8cb   : > { %v1786_v61 = vmul.f32 %v2586_v58, %v1775_v57 }
 0x8cc   : > { %v2958_v59 = vpop.eup %2957 }
 0x8cd   : > { %v1776_v60 = vmul.f32 %v2958_v59, %v1744_v26  ;;  %v2960_v62 = vpop.eup %2959  ;;  %v3406_v5 = vadd.f32 %v2587_v0, %v1786_v61  ;;  %v2885_v26 = vld [vmem:[%s3632_s10 + $0x50] sm:$0xff]  }
 0x8ce   : > { %v1777_v7 = vmul.f32 %v2960_v62, %v1745_v25  ;;  %v2884_v25 = vld [vmem:[%s3632_s10 + $0x18] sm:$0xff]  }
 0x8cf   : > { %v1787_v3 = vmul.f32 %v2586_v58, %v1776_v60 }
 0x8d0   : > { %v2962_v1 = vpop.eup %2961  ;;  %v1788_v11 = vmul.f32 %v2586_v58, %v1777_v7 }
 0x8d1   : > { %v1778_v4 = vmul.f32 %v2962_v1, %v1746_v31  ;;  %v3408_v6 = vadd.f32 %v2587_v0, %v1787_v3  ;;  %v1811_v31 = vld [vmem:[%s3631_s9] sm:$0x3] }
 0x8d2   : > { %v3416_v15 = vadd.f32 %v2587_v0, %v1788_v11  ;;  %v1816_v33 = vrot.slane %v1811_v31, %v3169_v17  ;;  %v1820_v34 = vrot.slane %v1811_v31, %v599_v19 }
 0x8d3   : > { %v1801_v54 = vpack.c.bf16 %v3408_v6, %v3406_v5  ;;  %v1789_v8 = vmul.f32 %v2586_v58, %v1778_v4 }
 0x8d5   : > { %2596 = vmatmul.mubr.msk.bf16.vlgmr.msra.gmra.mxu0 %vm643_vm0, %v1801_v54  ;;  %v3414_v14 = vadd.f32 %v2587_v0, %v1789_v8 }
 0x8d6   : > { %1911 = vmatprep.mubr.bf16.mxu0 %v3005_v2  ;;  %v2877_v2 = vld [vmem:[%s3632_s10 + $0x70] sm:$0xff]  }
 0x8d7   : > { %v1802_v63 = vpack.c.bf16 %v3414_v14, %v3416_v15  ;;  %2669 = vmatprep.subr.bf16.mxu1 %v2877_v2 }
 0x8d8   : > { %2670 = vmatpush3.bf16.msra.mxu1 %v2878_v20 }
 0x8d9   : > { %2671 = vmatprep.subr.bf16.mxu1 %v2879_v21 }
 0x8dc   : > { %2672 = vmatpush3.bf16.msra.mxu1 %v2880_v22 }
 0x8dd   : > { %2597 = vmatmul.mubr.msk.bf16.gmra.mxu0 %vm643_vm0, %v1802_v63  ;;  %2673 = vmatprep.subr.bf16.mxu1 %v2881_v12 }
 0x8e0   : > { %2674 = vmatpush3.bf16.msra.mxu1 %v2882_v23 }
 0x8e1   : > { %2675 = vmatprep.subr.bf16.mxu1 %v2883_v24 }
 0x8e4   : > { %2676 = vmatpush3.bf16.msra.mxu1 %v2884_v25 }
 0x8e5   : > { %2677 = vmatprep.subr.bf16.mxu1 %v2885_v26 }
 0x8e8   : > { %2678 = vmatpush3.bf16.msra.mxu1 %v2886_v37 }
 0x8e9   : > { %2679 = vmatprep.subr.bf16.mxu1 %v2887_v29 }
 0x8ec   : > { %2680 = vmatpush3.bf16.msra.mxu1 %v2888_v13 }
 0x8ed   : > { %2681 = vmatprep.subr.bf16.mxu1 %v2889_v28 }
 0x8f0   : > { %2682 = vmatpush3.bf16.msra.mxu1 %v2890_v30 }
 0x995   : > { %v1903_v35 = vpop.f32.mrf.mxu0 }
 0x996   : > { %v3475_v36 = vadd.f32 %v1903_v35, %v1816_v33 }
 0x997   : > { %v1905_v9 = vpop.f32.mrf.mxu0 }
 0x998   : > { %v1930_v38 = vmul.f32 %v3475_v36, %v3475_v36  ;;  %v3479_v39 = vadd.f32 %v1905_v9, %v1820_v34 }
 0x999   : > { %v1907_v40 = vpop.f32.mrf.mxu0 }
 0x99a   : > { %v1938_v42 = vmul.f32 %v1930_v38, %v3475_v36  ;;  %v1931_v43 = vmul.f32 %v3479_v39, %v3479_v39  ;;  %v1908_v44 = vadd.f32 %v1907_v40, %v1816_v33 }
 0x99b   : > { %v1909_v45 = vpop.f32.mrf.mxu0 }
 0x99c   : > { %v1946_v47 = vmul.f32 0.044715, %v1938_v42  ;;  %v1939_v16 = vmul.f32 %v1931_v43, %v3479_v39  ;;  %v1932_v19 = vmul.f32 %v1908_v44, %v1908_v44  ;;  %v1910_v49 = vadd.f32 %v1909_v45, %v1820_v34 }
 0x99d   : > { %v1913_v51 = vpop.f32.mrf.mxu0  ;;  %v1924_v40 = vmul.f32 0.5, %v1908_v44  ;;  %v1923_v43 = vmul.f32 0.5, %v3479_v39 }
 0x99e   : > { %v1954_v41 = vadd.f32 %v1946_v47, %v3475_v36  ;;  %v1947_v48 = vmul.f32 0.044715, %v1939_v16  ;;  %v1940_v52 = vmul.f32 %v1932_v19, %v1908_v44  ;;  %v3486_v53 = vadd.f32 %v1913_v51, %v1816_v33 }
 0x99f   : > { %v1933_v46 = vmul.f32 %v1910_v49, %v1910_v49  ;;  %v1915_v32 = vpop.f32.mrf.mxu0  ;;  %v1925_v45 = vmul.f32 0.5, %v1910_v49  ;;  %v1922_v16 = vmul.f32 0.5, %v3475_v36 }
 0x9a0   : > { %v1962_v27 = vmul.f32 0.7978846, %v1954_v41  ;;  %v1955_v50 = vadd.f32 %v1947_v48, %v3479_v39  ;;  %v1948_v55 = vmul.f32 0.044715, %v1940_v52  ;;  %v1934_v56 = vmul.f32 %v3486_v53, %v3486_v53 }
 0x9a1   : > { %v1941_v57 = vmul.f32 %v1933_v46, %v1910_v49  ;;  %v1916_v58 = vadd.f32 %v1915_v32, %v1820_v34  ;;  %v1917_v59 = vpop.f32.mrf.mxu0 }
 0x9a2   : > { %v1963_v60 = vmul.f32 0.7978846, %v1955_v50  ;;  %v1956_v61 = vadd.f32 %v1948_v55, %v1908_v44  ;;  %v1942_v62 = vmul.f32 %v1934_v56, %v3486_v53  ;;  %v1918_v3 = vadd.f32 %v1917_v59, %v1816_v33 }
 0x9a3   : > { %v1949_v0 = vmul.f32 0.044715, %v1941_v57  ;;  %v1935_v1 = vmul.f32 %v1916_v58, %v1916_v58  ;;  %v1919_v4 = vpop.f32.mrf.mxu0  ;;  %2963 = vtanh.f32 %v1962_v27  ;;  %v1927_v44 = vmul.f32 0.5, %v1916_v58 }
 0x9a4   : > { %v1964_v7 = vmul.f32 0.7978846, %v1956_v61  ;;  %v1950_v54 = vmul.f32 0.044715, %v1942_v62  ;;  %v1920_v8 = vadd.f32 %v1919_v4, %v1820_v34  ;;  %2965 = vtanh.f32 %v1963_v60 }
 0x9a5   : > { %v1957_v11 = vadd.f32 %v1949_v0, %v1910_v49  ;;  %v1943_v63 = vmul.f32 %v1935_v1, %v1916_v58  ;;  %v1936_v18 = vmul.f32 %v1918_v3, %v1918_v3  ;;  %v1928_v59 = vmul.f32 0.5, %v1918_v3 }
 0x9a6   : > { %2967 = vtanh.f32 %v1964_v7  ;;  %v1958_v10 = vadd.f32 %v1950_v54, %v3486_v53  ;;  %v1937_v2 = vmul.f32 %v1920_v8, %v1920_v8  ;;  %v1929_v39 = vmul.f32 0.5, %v1920_v8 }
 0x9a7   : > { %v1965_v20 = vmul.f32 0.7978846, %v1957_v11  ;;  %v1951_v21 = vmul.f32 0.044715, %v1943_v63  ;;  %v1944_v22 = vmul.f32 %v1936_v18, %v1918_v3  ;;  %v1926_v62 = vmul.f32 0.5, %v3486_v53 }
 0x9a8   : > { %v1945_v12 = vmul.f32 %v1937_v2, %v1920_v8  ;;  %v1966_v25 = vmul.f32 0.7978846, %v1958_v10 }
 0x9a9   : > { %2969 = vtanh.f32 %v1965_v20  ;;  %v1959_v23 = vadd.f32 %v1951_v21, %v1916_v58  ;;  %v1952_v24 = vmul.f32 0.044715, %v1944_v22  ;;  %v2598_v58 = vld [vmem:[%s3633_s11] ss:$0 sm:$0xff] }
 0x9aa   : > { %v1953_v26 = vmul.f32 0.044715, %v1945_v12 }
 0x9ab   : > { %v1967_v37 = vmul.f32 0.7978846, %v1959_v23  ;;  %v1960_v29 = vadd.f32 %v1952_v24, %v1918_v3 }
 0x9ac   : > { %v1961_v13 = vadd.f32 %v1953_v26, %v1920_v8 }
 0x9ad   : > { %2971 = vtanh.f32 %v1967_v37  ;;  %v1968_v28 = vmul.f32 0.7978846, %v1960_v29 }
 0x9ae   : > { %2973 = vtanh.f32 %v1966_v25  ;;  %v1969_v30 = vmul.f32 0.7978846, %v1961_v13 }
 0x9af   : > { %2975 = vtanh.f32 %v1968_v28 }
 0x9b0   : > { %2977 = vtanh.f32 %v1969_v30  ;;  %v2964_v31 = vpop.eup %2963 }
 0x9b1   : > { %v2966_v33 = vpop.eup %2965  ;;  %v1978_v42 = vadd.f32 1.0, %v2964_v31 }
 0x9b2   : > { %v1979_v9 = vadd.f32 1.0, %v2966_v33 }
 0x9b3   : > { %v2968_v34 = vpop.eup %2967  ;;  %v1986_v52 = vmul.f32 %v1978_v42, %v1922_v16 }
 0x9b4   : > { %v1980_v35 = vadd.f32 1.0, %v2968_v34  ;;  %v1987_v51 = vmul.f32 %v1979_v9, %v1923_v43 }
 0x9b6   : > { %v2970_v38 = vpop.eup %2969  ;;  %v1988_v19 = vmul.f32 %v1980_v35, %v1924_v40 }
 0x9b7   : > { %v1981_v47 = vadd.f32 1.0, %v2970_v38 }
 0x9b8   : > { %v1994_v50 = vpack.c.bf16 %v1988_v19, %v1986_v52 }
 0x9b9   : > { %v1989_v41 = vmul.f32 %v1981_v47, %v1925_v45 }
 0x9ba   : > { %v2972_v48 = vpop.eup %2971 }
 0x9bb   : > { %v2974_v46 = vpop.eup %2973  ;;  %v1995_v32 = vpack.c.bf16 %v1989_v41, %v1987_v51  ;;  %v1983_v55 = vadd.f32 1.0, %v2972_v48 }
 0x9bc   : > { %v2976_v27 = vpop.eup %2975  ;;  %v1982_v60 = vadd.f32 1.0, %v2974_v46 }
 0x9bd   : > { %v2978_v56 = vpop.eup %2977  ;;  %2165 = vmatprep.mubr.bf16.mxu1 %v1995_v32  ;;  %v1984_v57 = vadd.f32 1.0, %v2976_v27  ;;  %v1991_v36 = vmul.f32 %v1983_v55, %v1927_v44  ;;  %v3013_v32 = vmov 0.0   ;;  %v2283_v27 = vld [vmem:[%s3636_s14 + $0x38] sm:$0xff]  ;;  %v2281_v55 = vld [vmem:[%s3636_s14 + $0x28] sm:$0xff] }
 0x9be   : > { %2166 = vmatmul.mubr.bf16.vlgmr.msra.gmra.mxu1 %v1994_v50  ;;  %v1985_v49 = vadd.f32 1.0, %v2978_v56  ;;  %v1990_v4 = vmul.f32 %v1982_v60, %v1926_v62  ;;  %2795 = vmatprep.subr.mxu0 %v3013_v32  ;;  %v2282_v50 = vld [vmem:[%s3636_s14 + $0x30] sm:$0xff]  ;;  %v2280_v56 = vld [vmem:[%s3636_s14 + $0x20] sm:$0xff]  ;;  %v2279_v44 = vld [vmem:[%s3636_s14 + $0x18] sm:$0xff] }
 0x9bf   : > { %v1992_v0 = vmul.f32 %v1984_v57, %v1928_v59  ;;  %2796 = vmatpush3.msra.mxu0 %v2283_v27  ;;  %2811 = vmatprep.mubr.msk.f32.mxu0 %vm3014_vm3, %v3013_v32  ;;  %v2278_v57 = vld [vmem:[%s3636_s14 + $0x10] sm:$0xff] }
 0x9c0   : > { %v1993_v61 = vmul.f32 %v1985_v49, %v1929_v39  ;;  %2797 = vmatprep.subr.mxu0 %v3013_v32  ;;  %v2277_v39 = vld [vmem:[%s3636_s14 + $0x8] sm:$0xff]  ;;  %v2276_v49 = vld [vmem:[%s3636_s14] sm:$0xff] }
 0x9c1   : > { %v1996_v7 = vpack.c.bf16 %v1992_v0, %v1990_v4  ;;  %2798 = vmatpush3.msra.mxu0 %v2282_v50 }
 0x9c2   : > { %v1997_v1 = vpack.c.bf16 %v1993_v61, %v1991_v36  ;;  %2799 = vmatprep.subr.mxu0 %v3013_v32 }
 0x9c3   : > { %2800 = vmatpush3.msra.mxu0 %v2281_v55 }
 0x9c4   : > { %2173 = vmatprep.mubr.bf16.mxu1 %v1997_v1  ;;  %2801 = vmatprep.subr.mxu0 %v3013_v32 }
 0x9c5   : > { %2802 = vmatpush3.msra.mxu0 %v2280_v56 }
 0x9c6   : > { %2174 = vmatmul.mubr.bf16.gmra.mxu1 %v1996_v7  ;;  %2803 = vmatprep.subr.mxu0 %v3013_v32 }
 0x9c7   : > { %2804 = vmatpush3.msra.mxu0 %v2279_v44 }
 0x9c8   : > { %2805 = vmatprep.subr.mxu0 %v3013_v32 }
 0x9c9   : > { %2806 = vmatpush3.msra.mxu0 %v2278_v57 }
 0x9ca   : > { %2807 = vmatprep.subr.mxu0 %v3013_v32 }
 0x9cb   : > { %2808 = vmatpush3.msra.mxu0 %v2277_v39 }
 0x9cc   : > { %2809 = vmatprep.subr.mxu0 %v3013_v32 }
 0x9cd   : > { %2810 = vmatpush3.msra.mxu0 %v2276_v49 }
 0x9ce   : > { %2814 = vmatprep.subr.mxu0 %v3013_v32 }
 0xa7e   : > { %v2683_v54 = vpop.f32.mrf.mxu1 }
 0xa80   : > { %v2684_v11 = vpop.f32.mrf.mxu1 }
 0xa81   : > { %v2685_v8 = vadd.f32 %v2684_v11, %v2683_v54 }
 0xa82   : > { %v2686_v63 = vpop.f32.mrf.mxu1 }
 0xa83   : > { %v2168_v3 = vadd.f32 %v2685_v8, %v2598_v58 }
 0xa84   : > { %v2687_v18 = vpop.f32.mrf.mxu1 }
 0xa85   : > { %v2688_v10 = vadd.f32 %v2687_v18, %v2686_v63  ;;  %v2182_v2 = vadd.f32 %v2168_v3, %v3406_v5  ;;  %v2615_v18 = vld [vmem:[%s3634_s12] ss:$0 sm:$0xff] }
 0xa86   : > { %v2689_v53 = vpop.f32.mrf.mxu1 }
 0xa87   : > { %v2171_v20 = vadd.f32 %v2688_v10, %v2598_v58  ;;  %v2186_v21 = vsel %vm643_vm0, %v2182_v2, 0.0 }
 0xa88   : > { %2187 = vadd.xlane.f32.xlu1 %v2186_v21  ;;  %v2690_v22 = vpop.f32.mrf.mxu1  ;;  %v2616_v21 = vld [vmem:[%s3635_s13] ss:$0 sm:$0xff] }
 0xa89   : > { %v2691_v12 = vadd.f32 %v2690_v22, %v2689_v53  ;;  %v2183_v23 = vadd.f32 %v2171_v20, %v3408_v6 }
 0xa8a   : > { %v2692_v24 = vpop.f32.mrf.mxu1 }
 0xa8b   : > { %v2176_v25 = vadd.f32 %v2691_v12, %v2598_v58  ;;  %v2189_v26 = vsel %vm643_vm0, %v2183_v23, 0.0 }
 0xa8c   : > { %2190 = vadd.xlane.f32.xlu0 %v2189_v26  ;;  %v2693_v37 = vpop.f32.mrf.mxu1 }
 0xa8d   : > { %v2694_v29 = vadd.f32 %v2693_v37, %v2692_v24  ;;  %v2184_v13 = vadd.f32 %v2176_v25, %v3416_v15 }
 0xa8f   : > { %v2179_v28 = vadd.f32 %v2694_v29, %v2598_v58  ;;  %v2192_v5 = vsel %vm643_vm0, %v2184_v13, 0.0 }
 0xa90   : > { %2193 = vadd.xlane.f32.xlu1 %v2192_v5 }
 0xa91   : > { %v2185_v30 = vadd.f32 %v2179_v28, %v3414_v14 }
 0xa93   : > { %v2195_v31 = vsel %vm643_vm0, %v2185_v30, 0.0 }
 0xa94   : > { %2196 = vadd.xlane.f32.xlu0 %v2195_v31 }
 0xb11   : > { %v2188_v33 = vpop.xlane.xlu1 %2187 }
 0xb12   : > { %v2198_v6 = vmul.f32 0.015625, %v2188_v33 }
 0xb14   : > { %v3507_v34 = vsub.f32 %v2182_v2, %v2198_v6 }
 0xb15   : > { %v2191_v35 = vpop.xlane.xlu0 %2190 }
 0xb16   : > { %v2199_v9 = vmul.f32 0.015625, %v2191_v35  ;;  %v2206_v38 = vmul.f32 %v3507_v34, %v3507_v34 }
 0xb18   : > { %v3511_v40 = vsub.f32 %v2183_v23, %v2199_v9  ;;  %v2210_v15 = vsel %vm643_vm0, %v2206_v38, 0.0 }
 0xb19   : > { %2211 = vadd.xlane.f32.xlu1 %v2210_v15  ;;  %v2194_v42 = vpop.xlane.xlu1 %2193 }
 0xb1a   : > { %v2200_v43 = vmul.f32 0.015625, %v2194_v42  ;;  %v2207_v14 = vmul.f32 %v3511_v40, %v3511_v40 }
 0xb1c   : > { %v3516_v45 = vsub.f32 %v2184_v13, %v2200_v43  ;;  %v2213_v47 = vsel %vm643_vm0, %v2207_v14, 0.0  ;;  %v2390_v14 = vld [vmem:[%s3638_s16 + $0x8] sm:$0xff] }
 0xb1d   : > { %2214 = vadd.xlane.f32.xlu0 %v2213_v47  ;;  %v2197_v16 = vpop.xlane.xlu0 %2196  ;;  %v2260_v47 = vld [vmem:[%s3637_s15] sm:$0x1f] }
 0xb1e   : > { %v2201_v19 = vmul.f32 0.015625, %v2197_v16  ;;  %v2208_v51 = vmul.f32 %v3516_v45, %v3516_v45  ;;  %v2359_v16 = vrot.slane %v2260_v47, 1  ;;  %v2374_v49 = vrot.slane %v2260_v47, 3 }
 0xb20   : > { %v3521_v41 = vsub.f32 %v2185_v30, %v2201_v19  ;;  %v2216_v48 = vsel %vm643_vm0, %v2208_v51, 0.0 }
 0xb21   : > { %2217 = vadd.xlane.f32.xlu1 %v2216_v48 }
 0xb22   : > { %v2209_v52 = vmul.f32 %v3521_v41, %v3521_v41 }
 0xb24   : > { %v2219_v46 = vsel %vm643_vm0, %v2209_v52, 0.0 }
 0xb25   : > { %2220 = vadd.xlane.f32.xlu0 %v2219_v46 }
 0xba2   : > { %v2212_v59 = vpop.xlane.xlu1 %2211 }
 0xba3   : > { %v2222_v60 = vmul.f32 0.015625, %v2212_v59 }
 0xba5   : > { %v2226_v36 = vadd.f32 1e-06, %v2222_v60  ;;  %v2377_v60 = vrot.slane %v2260_v47, 4 }
 0xba6   : > { %v2215_v61 = vpop.xlane.xlu0 %2214 }
 0xba7   : > { %2979 = vrsqrt.f32 %v2226_v36  ;;  %v2223_v62 = vmul.f32 0.015625, %v2215_v61 }
 0xba9   : > { %v2227_v0 = vadd.f32 1e-06, %v2223_v62 }
 0xbaa   : > { %v2218_v1 = vpop.xlane.xlu1 %2217 }
 0xbab   : > { %2981 = vrsqrt.f32 %v2227_v0  ;;  %v2224_v4 = vmul.f32 0.015625, %v2218_v1 }
 0xbad   : > { %v2228_v7 = vadd.f32 1e-06, %v2224_v4 }
 0xbae   : > { %v2221_v54 = vpop.xlane.xlu0 %2220 }
 0xbaf   : > { %2983 = vrsqrt.f32 %v2228_v7  ;;  %v2225_v58 = vmul.f32 0.015625, %v2221_v54 }
 0xbb1   : > { %v2229_v11 = vadd.f32 1e-06, %v2225_v58 }
 0xbb3   : > { %2985 = vrsqrt.f32 %v2229_v11 }
 0xbb4   : > { %v2980_v8 = vpop.eup %2979 }
 0xbb5   : > { %v2234_v63 = vmul.f32 %v2980_v8, %v3507_v34 }
 0xbb7   : > { %v2245_v2 = vmul.f32 %v2615_v18, %v2234_v63  ;;  %v2391_v63 = vld [vmem:[%s3639_s17] sm:$0x1] }
 0xbb8   : > { %v2982_v3 = vpop.eup %2981 }
 0xbb9   : > { %v2235_v10 = vmul.f32 %v2982_v3, %v3511_v40  ;;  %v3573_v23 = vadd.f32 %v2616_v21, %v2245_v2 }
 0xbbb   : > { %v2246_v53 = vmul.f32 %v2615_v18, %v2235_v10  ;;  %v2261_v13 = vsel %vm643_vm0, %v3573_v23, 0.0 }
 0xbbc   : > { %v2984_v20 = vpop.eup %2983 }
 0xbbd   : > { %v3570_v22 = vadd.f32 %v2616_v21, %v2246_v53  ;;  %v2236_v12 = vmul.f32 %v2984_v20, %v3516_v45  ;;  %v2389_v45 = vld [vmem:[%s3638_s16] sm:$0xff] }
 0xbbf   : > { %v2247_v24 = vmul.f32 %v2615_v18, %v2236_v12  ;;  %v2262_v26 = vsel %vm643_vm0, %v3570_v22, 0.0 }
 0xbc0   : > { %v2986_v25 = vpop.eup %2985  ;;  %v2263_v30 = vadd.f32 %v2262_v26, %v2261_v13 }
 0xbc1   : > { %v3577_v37 = vadd.f32 %v2616_v21, %v2247_v24  ;;  %v2237_v29 = vmul.f32 %v2986_v25, %v3521_v41 }
 0xbc3   : > { %v2264_v28 = vsel %vm643_vm0, %v3577_v37, 0.0  ;;  %v2248_v5 = vmul.f32 %v2615_v18, %v2237_v29 }
 0xbc4   : > { %v2265_v33 = vadd.f32 %v2264_v28, %v2263_v30 }
 0xbc5   : > { %v3584_v31 = vadd.f32 %v2616_v21, %v2248_v5 }
 0xbc7   : > { %v2266_v6 = vsel %vm643_vm0, %v3584_v31, 0.0 }
 0xbc8   : > { %v2267_v34 = vadd.f32 %v2266_v6, %v2265_v33 }
 0xbca   : > { %v2268_v35 = vrot.slane %v2267_v34, 4 }
 0xbcc   : > { %v2269_v9 = vadd.f32 %v2268_v35, %v2267_v34 }
 0xbce   : > { %v2270_v38 = vrot.slane %v2269_v9, 2 }
 0xbd0   : > { %v2271_v40 = vadd.f32 %v2270_v38, %v2269_v9 }
 0xbd2   : > { %v2272_v15 = vrot.slane %v2271_v40, 1 }
 0xbd4   : > { %v2273_v42 = vadd.f32 %v2272_v15, %v2271_v40 }
 0xbd6   : > { %v2275_v43 = vmul.f32 0.03125, %v2273_v42 }
 0xbd8   : > { %2812 = vmatmul.mubr.msk.f32.vlgmr.msra.gmra.mxu0 %vm643_vm0, %v2275_v43 }
 0xbd9   : > { %2818 = vmatprep.mubr.msk.f32.mxu0 %vm3014_vm3, %v3013_v32  ;;  %2815 = vmatpush3.msra.mxu0 %v2390_v14 }
 0xbda   : > { %2816 = vmatprep.subr.mxu0 %v3013_v32  ;;  %v2371_v32 = vrot.slane %v2260_v47, 2 }
 0xbdb   : > { %2817 = vmatpush3.msra.mxu0 %v2389_v45 }
 0xc98   : > { %v2353_v19 = vpop.f32.mrf.mxu0 }
 0xc99   : > { %v2357_v51 = vmul.f32 %v2353_v19, %v2260_v47 }
 0xc9a   : > { %v2813_v41 = vpop.f32.mrf.mxu0 }
 0xc9b   : > { %v2361_v48 = vadd.f32 %v2359_v16, %v2357_v51 }
 0xc9d   : > { %v2363_v52 = vmul.f32 %v2361_v48, %v2361_v48  ;;  %v2362_v44 = vmul.f32 0.5, %v2361_v48 }
 0xc9f   : > { %v2364_v46 = vmul.f32 %v2363_v52, %v2361_v48 }
 0xca1   : > { %v2365_v27 = vmul.f32 0.044715, %v2364_v46 }
 0xca3   : > { %v2366_v50 = vadd.f32 %v2365_v27, %v2361_v48 }
 0xca5   : > { %v2367_v55 = vmul.f32 0.7978846, %v2366_v50 }
 0xca7   : > { %2987 = vtanh.f32 %v2367_v55 }
 0xcb4   : > { %v2988_v56 = vpop.eup %2987 }
 0xcb5   : > { %v2369_v57 = vadd.f32 1.0, %v2988_v56 }
 0xcb7   : > { %v2370_v39 = vmul.f32 %v2369_v57, %v2362_v44 }
 0xcb9   : > { %v2373_v59 = vmul.f32 %v2371_v32, %v2370_v39 }
 0xcbb   : > { %v2376_v36 = vmul.f32 %v2374_v49, %v2373_v59 }
 0xcbd   : > { %v2379_v61 = vadd.f32 %v2377_v60, %v2376_v36 }
 0xcbf   : > { %v2381_v62 = vmul.f32 %v2379_v61, %v2379_v61  ;;  %v2380_v58 = vmul.f32 0.5, %v2379_v61 }
 0xcc1   : > { %v2382_v0 = vmul.f32 %v2381_v62, %v2379_v61 }
 0xcc3   : > { %v2383_v1 = vmul.f32 0.044715, %v2382_v0 }
 0xcc5   : > { %v2384_v4 = vadd.f32 %v2383_v1, %v2379_v61 }
 0xcc7   : > { %v2385_v7 = vmul.f32 0.7978846, %v2384_v4 }
 0xcc9   : > { %2989 = vtanh.f32 %v2385_v7 }
 0xcd6   : > { %v2990_v54 = vpop.eup %2989 }
 0xcd7   : > { %v2387_v11 = vadd.f32 1.0, %v2990_v54 }
 0xcd9   : > { %v2388_v8 = vmul.f32 %v2387_v11, %v2380_v58 }
 0xcdb   : > { %2819 = vmatmul.mubr.msk.f32.vlgmr.msra.gmra.mxu0 %vm721_vm1, %v2388_v8 }
 0xd9b   : > { %v2461_v3 = vpop.f32.mrf.mxu0 }
 0xd9c   : > { %v2462_v18 = vadd.f32 %v2461_v3, %v2391_v63 }
 0xd9d   : > { %v2820_v10 = vpop.f32.mrf.mxu0 }
 0xd9e   : > { %v2465_v2 = vsub.f32 0.0, %v2462_v18 }
 0xda0   : > { %v2466_v53 = vmul.f32 1.442695, %v2465_v2 }
 0xda2   : > { %2991 = vpow2.f32 %v2466_v53 }
 0xdaf   : > { %v2992_v20 = vpop.eup %2991 }
 0xdb0   : > { %v2468_v21 = vadd.f32 1.0, %v2992_v20 }
 0xdb2   : > { %2993 = vrcp.f32 %v2468_v21 }
 0xdbf   : > { %v2994_v12 = vpop.eup %2993 }
 0xdc0   : > { %v2474_v24 = vrot.slane %v2994_v12, %v3169_v17 }
 0xdc2   : > { %v2475_v25 = vmul.f32 %v2474_v24, %v3573_v23  ;;  %v2476_v26 = vmul.f32 %v2474_v24, %v3570_v22  ;;  %v2477_v29 = vmul.f32 %v2474_v24, %v3577_v37  ;;  %v2478_v13 = vmul.f32 %v2474_v24, %v3584_v31 }
 0xdc4   : > { %2479 = vst.msk [vmem:[%s575_s1] sm:$0xff] %vm643_vm0, %v2475_v25  ;;  %2480 = vst.msk [vmem:[%s575_s1 + $0x8] sm:$0xff] %vm643_vm0, %v2476_v26 }
 0xdc5   : > { %2481 = vst.msk [vmem:[%s575_s1 + $0x10] sm:$0xff] %vm643_vm0, %v2477_v29  ;;  %2482 = vst.msk [vmem:[%s575_s1 + $0x18] sm:$0xff] %vm643_vm0, %v2478_v13 }
 0xdc6 PF: > { %s28_s27 = sadd.s32 1, %s3003_s27  }
 0xdc7   : > { %p25_p4 = scmp.ge.s32.totalorder %s28_s27, 4  }
 0xdc9   :  { %27 = sbr.rel (!%p25_p4) target bundleno = 4 (0x4), region = 122 }

// kernel: svtrv2_forward.17
= control target key start
LH: loop header
LB: loop body
LE: loop exit
PB: predicated region body
PF: predicated region fallthrough
CT: control target
= control target key end

     0   :  { %s1105_s12 = smov 0   ;;  %s1107_s13 = smov 0   ;;  %s1231_s0 = inlined_call_operand.vmem [shape: bf16[32,1024], index: 0, kind: input, shape index: {}]   ;;  %s1232_s1 = inlined_call_operand.vmem [shape: bf16[1024,128], index: 1, kind: input, shape index: {}]   ;;  %s1233_s2 = inlined_call_operand.vmem [shape: f32[1,128], index: 2, kind: input, shape index: {}]   ;;  %s1234_s3 = inlined_call_operand.vmem [shape: f32[32,128], index: 3, kind: output, shape index: {}]  }
   0x1   :  { %s1109_s14 = smov 0   ;;  %s1111_s15 = smov 0  }
   0x2   :  { %s1113_s16 = smov 0  }
   0x3 LB: > { %s25_s17 = sadd.s32 1, %s1078_s15  ;;  %p48_p1 = scmp.ne.s32.totalorder %s1070_s13, %s1066_s12  ;;  %s1082_s16 = sphi %s1113_s16, %s13_s16   ;;  %s1078_s15 = sphi %s1111_s15, %s1238_s15   ;;  %s1074_s14 = sphi %s1109_s14, %s1237_s14   ;;  %s1070_s13 = sphi %s1107_s13, %s1236_s13   ;;  %s1066_s12 = sphi %s1105_s12, %s1235_s12  }
   0x4   : > { %p26_p0 = scmp.ge.s32.totalorder %s25_s17, 2  ;;  %p49_p2 = scmp.eq.s32.totalorder %s1082_s16, 0 }
   0x5   : > { %s41_s19 = sadd.s32 1, %s1070_s13  ;;  %p847_p5 = scmp.ge.s32.totalorder %s1082_s16, 2 }
   0x6   : > { %s1240_s17 = smov (%p26_p0, %s25_s17), 0  ;;  %p50_p3 = por %p49_p2, %p48_p1 }
   0x7   : > { %s37_s18 = ssub.s32 %s1078_s15, %s1240_s17  ;;  %162 = sbr.rel (%p847_p5) target bundleno = 20 (0x14), region = 20 }
   0x8   : > { %p39_p4 = scmp.eq.s32.totalorder %s37_s18, 0 }
   0xa   : > { %s1140_s20 = scalar_select %p39_p4, %s1070_s13, %s41_s19  }
   0xc   : > { %165 = sbr.rel (!%p50_p3) target bundleno = 20 (0x14), region = 24  ;;  %s167_s21 = sand.u32 (%p50_p3), 1, %s1070_s13  }
   0xd   : > { %s902_s22 = sshll.u32 (%p50_p3), %s1078_s15, 4  ;;  %s848_s23 = sshll.u32 (%p50_p3), %s167_s21, 6 }
   0xe   : > { %s175_s26 = scalar_lea.vmem (%p50_p3), %s1231_s0, %s902_s22  ;;  %s169_s27 = scalar_lea.vmem (%p50_p3), [#allocation3], %s848_s23 }
   0xf   : > { %v188_v0 = vld [vmem:[%s175_s26] sm:$0xff] (%p50_p3)  ;;  %v190_v1 = vld [vmem:[%s175_s26 + $0x8] sm:$0xff] (%p50_p3) }
  0x10   : > { %v192_v2 = vld [vmem:[%s175_s26 + $0x20] sm:$0xff] (%p50_p3)  ;;  %189 = vst [vmem:[%s169_s27] sm:$0xff] (%p50_p3), %v188_v0  ;;  %191 = vst [vmem:[%s169_s27 + $0x8] sm:$0xff] (%p50_p3), %v190_v1  ;;  %v194_v3 = vld [vmem:[%s175_s26 + $0x28] sm:$0xff] (%p50_p3) }
  0x11   : > { %193 = vst [vmem:[%s169_s27 + $0x10] sm:$0xff] %v192_v2  ;;  %v196_v4 = vld [vmem:[%s175_s26 + $0x40] sm:$0xff]  ;;  %v198_v5 = vld [vmem:[%s175_s26 + $0x48] sm:$0xff]  ;;  %195 = vst [vmem:[%s169_s27 + $0x18] sm:$0xff] %v194_v3 }
  0x12   : > { %197 = vst [vmem:[%s169_s27 + $0x20] sm:$0xff] %v196_v4  ;;  %199 = vst [vmem:[%s169_s27 + $0x28] sm:$0xff] %v198_v5  ;;  %v200_v6 = vld [vmem:[%s175_s26 + $0x60] sm:$0xff]  ;;  %v202_v7 = vld [vmem:[%s175_s26 + $0x68] sm:$0xff] }
  0x13   : > { %201 = vst [vmem:[%s169_s27 + $0x30] sm:$0xff] %v200_v6  ;;  %203 = vst [vmem:[%s169_s27 + $0x38] sm:$0xff] %v202_v7 }
  0x14 PF: > { %p851_p6 = scmp.ge.s32.totalorder %s1082_s16, 1  ;;  %p220_p7 = scmp.lt.s32.totalorder %s1082_s16, 3 }
  0x16   : > { %p221_p8 = pnand %p851_p6, %p220_p7 }
  0x17   : > { %s227_s28 = sand.u32 (!%p221_p8), 1, %s1066_s12   ;;  %s853_s29 = sshll.u32 (!%p221_p8), %s1074_s14, 6 }
  0x18   : > { %224 = sbr.rel (%p221_p8) target bundleno = 296 (0x128), region = 51  ;;  %s852_s30 = sshll.u32 (!%p221_p8), %s227_s28, 6 }
  0x19   : > { %p267_p9 = scmp.lt.s32.totalorder (!%p221_p8), %s853_s29, 127  ;;  %s1157_s8 = scalar_lea.vmem (!%p221_p8), [#allocation3], %s852_s30 }
  0x1a   : > { %p855_p10 = scmp.ne.s32.totalorder (!%p221_p8), %s1074_s14, 0 }
  0x1d   : > { %s1242_s29 = smov (!%p267_p9, %s853_s29), 127  ;;  %291 = sbr.rel (%p855_p10) target bundleno = 37 (0x25), region = 59 }
  0x1e   : > { %s854_s4 = sshll.u32 %s1242_s29, 2 }
  0x1f   : > { %s1155_s7 = scalar_lea.vmem %s1232_s1, %s854_s4 }
  0x22   : > { %v1084_v8 = vmov 0.0  }
  0x23   : > { %292 = vst [vmem:[#allocation2 + $0x10] sm:$0xff] %v1084_v8  ;;  %293 = vst [vmem:[#allocation2] sm:$0xff] %v1084_v8 }
  0x24   : > { %294 = vst [vmem:[#allocation2 + $0x18] sm:$0xff] %v1084_v8  ;;  %295 = vst [vmem:[#allocation2 + $0x8] sm:$0xff] %v1084_v8 }
  0x25 PF: > { %v1000_v9 = vld [vmem:[%s1155_s7 + $0x78] sm:$0xff]   ;;  %v1004_v13 = vld [vmem:[%s1155_s7 + $0x70] sm:$0xff]   ;;  %v1008_v17 = vld [vmem:[%s1155_s7 + $0x68] sm:$0xff]   ;;  %p896_p11 = scmp.ne.s32.totalorder %s1074_s14, 1 }
  0x26   : > { %v1001_v10 = vld [vmem:[%s1155_s7 + $0xf8] sm:$0xff]   ;;  %903 = vmatprep.subr.bf16.mxu0 %v1000_v9  ;;  %v1005_v14 = vld [vmem:[%s1155_s7 + $0xf0] sm:$0xff]   ;;  %v1009_v18 = vld [vmem:[%s1155_s7 + $0xe8] sm:$0xff]  }
  0x27   : > { %v1002_v11 = vld [vmem:[%s1155_s7 + $0x38] sm:$0xff]   ;;  %931 = vmatprep.subr.bf16.mxu1 %v1001_v10  ;;  %v1006_v15 = vld [vmem:[%s1155_s7 + $0x30] sm:$0xff]   ;;  %v1010_v19 = vld [vmem:[%s1155_s7 + $0x28] sm:$0xff]  }
  0x28   : > { %v1003_v12 = vld [vmem:[%s1155_s7 + $0xb8] sm:$0xff]   ;;  %904 = vmatpush3.bf16.msra.mxu0 %v1002_v11  ;;  %v1007_v16 = vld [vmem:[%s1155_s7 + $0xb0] sm:$0xff]   ;;  %v1011_v20 = vld [vmem:[%s1155_s7 + $0xa8] sm:$0xff]  }
  0x29   : > { %932 = vmatpush3.bf16.msra.mxu1 %v1003_v12  ;;  %905 = vmatprep.subr.bf16.mxu0 %v1004_v13  ;;  %v1012_v21 = vld [vmem:[%s1155_s7 + $0x60] sm:$0xff]   ;;  %v1016_v25 = vld [vmem:[%s1155_s7 + $0x58] sm:$0xff]   ;;  %v1020_v29 = vld [vmem:[%s1155_s7 + $0x50] sm:$0xff]  }
  0x2a   : > { %933 = vmatprep.subr.bf16.mxu1 %v1005_v14  ;;  %v1013_v22 = vld [vmem:[%s1155_s7 + $0xe0] sm:$0xff]   ;;  %v1017_v26 = vld [vmem:[%s1155_s7 + $0xd8] sm:$0xff]   ;;  %v1021_v30 = vld [vmem:[%s1155_s7 + $0xd0] sm:$0xff]  }
  0x2b   : > { %v1014_v23 = vld [vmem:[%s1155_s7 + $0x20] sm:$0xff]   ;;  %v1018_v27 = vld [vmem:[%s1155_s7 + $0x18] sm:$0xff]   ;;  %v1022_v31 = vld [vmem:[%s1155_s7 + $0x10] sm:$0xff]  }
  0x2c   : > { %906 = vmatpush3.bf16.msra.mxu0 %v1006_v15  ;;  %v1015_v24 = vld [vmem:[%s1155_s7 + $0xa0] sm:$0xff]   ;;  %v1019_v28 = vld [vmem:[%s1155_s7 + $0x98] sm:$0xff]   ;;  %v1023_v32 = vld [vmem:[%s1155_s7 + $0x90] sm:$0xff]  }
  0x2d   : > { %934 = vmatpush3.bf16.msra.mxu1 %v1007_v16  ;;  %907 = vmatprep.subr.bf16.mxu0 %v1008_v17  ;;  %v1024_v33 = vld [vmem:[%s1155_s7 + $0x48] sm:$0xff]   ;;  %v1028_v37 = vld [vmem:[%s1155_s7 + $0x40] sm:$0xff]   ;;  %v296_v56 = vld [vmem:[#allocation2 + $0x10] sm:$0xff] }
  0x2e   : > { %935 = vmatprep.subr.bf16.mxu1 %v1009_v18  ;;  %v1025_v34 = vld [vmem:[%s1155_s7 + $0xc8] sm:$0xff]   ;;  %v1029_v38 = vld [vmem:[%s1155_s7 + $0xc0] sm:$0xff]   ;;  %v298_v10 = vld [vmem:[#allocation2 + $0x18] sm:$0xff] }
  0x2f   : > { %v1026_v35 = vld [vmem:[%s1155_s7 + $0x8] sm:$0xff]   ;;  %v1030_v39 = vld [vmem:[%s1155_s7] sm:$0xff]  }
  0x30   : > { %908 = vmatpush3.bf16.msra.mxu0 %v1010_v19  ;;  %v1027_v36 = vld [vmem:[%s1155_s7 + $0x88] sm:$0xff]   ;;  %v1031_v40 = vld [vmem:[%s1155_s7 + $0x80] sm:$0xff]  }
  0x31   : > { %936 = vmatpush3.bf16.msra.mxu1 %v1011_v20  ;;  %909 = vmatprep.subr.bf16.mxu0 %v1012_v21  ;;  %v1032_v41 = vld [vmem:[%s1157_s8] ss:$16 sps:$4 sm:$0xff]   ;;  %v1034_v42 = vld [vmem:[%s1157_s8 + $0x4] ss:$16 sps:$4 sm:$0xff]   ;;  %v1035_v43 = vld [vmem:[%s1157_s8 + $0x8] ss:$16 sps:$4 sm:$0xff]  }
  0x32   : > { %937 = vmatprep.subr.bf16.mxu1 %v1013_v22  ;;  %v1037_v44 = vld [vmem:[%s1157_s8 + $0xc] ss:$16 sps:$4 sm:$0xff]   ;;  %636 = vmatprep.mubr.bf16.mxu0 %v1034_v42  ;;  %v1038_v45 = vld [vmem:[%s1157_s8 + $0x24] ss:$16 sps:$4 sm:$0xff]   ;;  %v1042_v47 = vld [vmem:[%s1157_s8 + $0x20] ss:$16 sps:$4 sm:$0xff]  }
  0x33   : > { %685 = vmatprep.mubr.bf16.mxu1 %v1037_v44  ;;  %v1040_v46 = vld [vmem:[%s1157_s8 + $0x2c] ss:$16 sps:$4 sm:$0xff]   ;;  %v1043_v48 = vld [vmem:[%s1157_s8 + $0x28] ss:$16 sps:$4 sm:$0xff]   ;;  %v297_v1 = vld [vmem:[#allocation2] sm:$0xff] }
  0x34   : > { %910 = vmatpush3.bf16.msra.mxu0 %v1014_v23  ;;  %v299_v18 = vld [vmem:[#allocation2 + $0x8] sm:$0xff] }
  0x35   : > { %938 = vmatpush3.bf16.msra.mxu1 %v1015_v24  ;;  %911 = vmatprep.subr.bf16.mxu0 %v1016_v25 }
  0x36   : > { %939 = vmatprep.subr.bf16.mxu1 %v1017_v26 }
  0x38   : > { %912 = vmatpush3.bf16.msra.mxu0 %v1018_v27 }
  0x39   : > { %940 = vmatpush3.bf16.msra.mxu1 %v1019_v28  ;;  %913 = vmatprep.subr.bf16.mxu0 %v1020_v29 }
  0x3a   : > { %941 = vmatprep.subr.bf16.mxu1 %v1021_v30 }
  0x3c   : > { %914 = vmatpush3.bf16.msra.mxu0 %v1022_v31 }
  0x3d   : > { %942 = vmatpush3.bf16.msra.mxu1 %v1023_v32  ;;  %915 = vmatprep.subr.bf16.mxu0 %v1024_v33 }
  0x3e   : > { %943 = vmatprep.subr.bf16.mxu1 %v1025_v34 }
  0x40   : > { %916 = vmatpush3.bf16.msra.mxu0 %v1026_v35 }
  0x41   : > { %944 = vmatpush3.bf16.msra.mxu1 %v1027_v36  ;;  %917 = vmatprep.subr.bf16.mxu0 %v1028_v37 }
  0x42   : > { %945 = vmatprep.subr.bf16.mxu1 %v1029_v38 }
  0x44   : > { %918 = vmatpush3.bf16.msra.mxu0 %v1030_v39 }
  0x45   : > { %946 = vmatpush3.bf16.msra.mxu1 %v1031_v40 }
  0x47   : > { %637 = vmatmul.mubr.bf16.vlgmr.msra.gmra.mxu0 %v1032_v41 }
  0x48   : > { %686 = vmatmul.mubr.bf16.vlgmr.msra.gmra.mxu1 %v1035_v43  ;;  %644 = vmatprep.mubr.bf16.mxu0 %v1038_v45 }
  0x49   : > { %693 = vmatprep.mubr.bf16.mxu1 %v1040_v46 }
  0x4f   : > { %645 = vmatmul.mubr.bf16.gmra.mxu0 %v1042_v47 }
  0x50   : > { %694 = vmatmul.mubr.bf16.gmra.mxu1 %v1043_v48 }
 0x107   : > { %v919_v49 = vpop.f32.mrf.mxu0 }
 0x108   : > { %v947_v50 = vpop.f32.mrf.mxu1 }
 0x109   : > { %v920_v51 = vpop.f32.mrf.mxu0 }
 0x10a   : > { %v921_v52 = vadd.f32 %v920_v51, %v919_v49  ;;  %v948_v53 = vpop.f32.mrf.mxu1 }
 0x10b   : > { %v949_v54 = vadd.f32 %v948_v53, %v947_v50  ;;  %v922_v55 = vpop.f32.mrf.mxu0 }
 0x10c   : > { %v950_v57 = vpop.f32.mrf.mxu1 }
 0x10d   : > { %v688_v58 = vadd.f32 %v949_v54, %v921_v52  ;;  %v923_v59 = vpop.f32.mrf.mxu0 }
 0x10e   : > { %v924_v60 = vadd.f32 %v923_v59, %v922_v55  ;;  %v951_v61 = vpop.f32.mrf.mxu1 }
 0x10f   : > { %v702_v62 = vadd.f32 %v688_v58, %v296_v56  ;;  %v952_v63 = vadd.f32 %v951_v61, %v950_v57  ;;  %v925_v0 = vpop.f32.mrf.mxu0 }
 0x110   : > { %v953_v2 = vpop.f32.mrf.mxu1 }
 0x111   : > { %706 = vst [vmem:[#allocation2 + $0x10] sm:$0xff] %v702_v62  ;;  %v691_v3 = vadd.f32 %v952_v63, %v924_v60  ;;  %v926_v4 = vpop.f32.mrf.mxu0 }
 0x112   : > { %v927_v5 = vadd.f32 %v926_v4, %v925_v0  ;;  %v954_v6 = vpop.f32.mrf.mxu1 }
 0x113   : > { %v703_v7 = vadd.f32 %v691_v3, %v297_v1  ;;  %v955_v8 = vadd.f32 %v954_v6, %v953_v2  ;;  %v928_v9 = vpop.f32.mrf.mxu0 }
 0x114   : > { %v956_v11 = vpop.f32.mrf.mxu1 }
 0x115   : > { %707 = vst [vmem:[#allocation2] sm:$0xff] %v703_v7  ;;  %v696_v12 = vadd.f32 %v955_v8, %v927_v5  ;;  %v929_v13 = vpop.f32.mrf.mxu0 }
 0x116   : > { %v930_v14 = vadd.f32 %v929_v13, %v928_v9  ;;  %v957_v15 = vpop.f32.mrf.mxu1 }
 0x117   : > { %v704_v16 = vadd.f32 %v696_v12, %v298_v10  ;;  %v958_v17 = vadd.f32 %v957_v15, %v956_v11 }
 0x119   : > { %708 = vst [vmem:[#allocation2 + $0x18] sm:$0xff] %v704_v16  ;;  %v699_v19 = vadd.f32 %v958_v17, %v930_v14  ;;  %713 = sbr.rel (%p896_p11) target bundleno = 296 (0x128), region = 63 }
 0x11b   : > { %v705_v20 = vadd.f32 %v699_v19, %v299_v18 }
 0x11d   : > { %709 = vst [vmem:[#allocation2 + $0x8] sm:$0xff] %v705_v20 }
 0x11e   : > { %v714_v21 = vld [vmem:[#allocation2 + $0x10] sm:$0xff]  ;;  %v897_v22 = vld [vmem:[%s1233_s2] ss:$0 sm:$0xff] }
 0x11f   : > { %v715_v23 = vld [vmem:[#allocation2] sm:$0xff]  ;;  %v725_v24 = vadd.f32 %v897_v22, %v714_v21 }
 0x120   : > { %v726_v25 = vadd.f32 %v897_v22, %v715_v23  ;;  %v716_v26 = vld [vmem:[#allocation2 + $0x18] sm:$0xff] }
 0x121   : > { %v727_v28 = vadd.f32 %v897_v22, %v716_v26  ;;  %729 = vst [vmem:[%s1234_s3] sm:$0xff] %v725_v24 }
 0x122   : > { %730 = vst [vmem:[%s1234_s3 + $0x8] sm:$0xff] %v726_v25 }
 0x123   : > { %731 = vst [vmem:[%s1234_s3 + $0x10] sm:$0xff] %v727_v28 }
 0x124   : > { %v717_v27 = vld [vmem:[#allocation2 + $0x8] sm:$0xff] }
 0x125   : > { %v728_v29 = vadd.f32 %v897_v22, %v717_v27 }
 0x127   : > { %732 = vst [vmem:[%s1234_s3 + $0x18] sm:$0xff] %v728_v29 }
 0x128 PF: > { %s13_s16 = sadd.s32 1, %s1082_s16   ;;  %s1235_s12 = smov %s1070_s13 }
 0x129   : > { %p10_p12 = scmp.ge.s32.totalorder %s13_s16, 4   ;;  %s1236_s13 = smov %s1140_s20 }
 0x12a   : > { %s1237_s14 = smov %s1078_s15  ;;  %s1238_s15 = smov %s1240_s17 }
 0x12b   :  { %12 = sbr.rel (!%p10_p12) target bundleno = 3 (0x3), region = 104 }

// kernel: svtrv2_forward.18
= control target key start
LH: loop header
LB: loop body
LE: loop exit
PB: predicated region body
PF: predicated region fallthrough
CT: control target
= control target key end

     0   :  { %s153_s0 = inlined_call_operand.vmem [shape: f32[32,128], index: 0, kind: input, shape index: {}]   ;;  %s154_s1 = inlined_call_operand.vmem [shape: f32[1,128], index: 1, kind: input, shape index: {}]   ;;  %s155_s2 = inlined_call_operand.vmem [shape: f32[1,128], index: 2, kind: input, shape index: {}]   ;;  %s156_s3 = inlined_call_operand.vmem [shape: f32[32,128], index: 3, kind: output, shape index: {}]  }
   0x1   :  { %v14_v0 = vld [vmem:[%s153_s0] sm:$0xff]  ;;  %v16_v1 = vld [vmem:[%s153_s0 + $0x10] sm:$0xff]  ;;  %v15_v2 = vld [vmem:[%s153_s0 + $0x8] sm:$0xff] }
   0x2   :  { %18 = vadd.xlane.f32.xlu0 %v14_v0  ;;  %22 = vadd.xlane.f32.xlu1 %v16_v1  ;;  %v17_v3 = vld [vmem:[%s153_s0 + $0x18] sm:$0xff]  ;;  %v93_v33 = vld [vmem:[%s154_s1] ss:$0 sm:$0xff] }
   0x3   :  { %v94_v35 = vld [vmem:[%s155_s2] ss:$0 sm:$0xff] }
   0x6   :  { %20 = vadd.xlane.f32.xlu0 %v15_v2  ;;  %24 = vadd.xlane.f32.xlu1 %v17_v3 }
  0x8b   :  { %v19_v4 = vpop.xlane.xlu0 %18  ;;  %v23_v5 = vpop.xlane.xlu1 %22 }
  0x8c   :  { %v27_v6 = vmul.f32 0.0078125, %v19_v4  ;;  %v29_v7 = vmul.f32 0.0078125, %v23_v5 }
  0x8e   :  { %v31_v8 = vsub.f32 %v14_v0, %v27_v6  ;;  %v33_v9 = vsub.f32 %v16_v1, %v29_v7 }
  0x8f   :  { %v21_v10 = vpop.xlane.xlu0 %20  ;;  %v25_v11 = vpop.xlane.xlu1 %24 }
  0x90   :  { %v28_v12 = vmul.f32 0.0078125, %v21_v10  ;;  %v35_v13 = vmul.f32 %v31_v8, %v31_v8  ;;  %v30_v14 = vmul.f32 0.0078125, %v25_v11  ;;  %v37_v17 = vmul.f32 %v33_v9, %v33_v9 }
  0x92   :  { %v32_v15 = vsub.f32 %v15_v2, %v28_v12  ;;  %39 = vadd.xlane.f32.xlu0 %v35_v13  ;;  %v34_v16 = vsub.f32 %v17_v3, %v30_v14 }
  0x94   :  { %v36_v18 = vmul.f32 %v32_v15, %v32_v15  ;;  %v38_v19 = vmul.f32 %v34_v16, %v34_v16 }
  0x96   :  { %43 = vadd.xlane.f32.xlu0 %v37_v17  ;;  %41 = vadd.xlane.f32.xlu1 %v36_v18 }
  0x9a   :  { %45 = vadd.xlane.f32.xlu1 %v38_v19 }
 0x11b   :  { %v40_v20 = vpop.xlane.xlu0 %39 }
 0x11c   :  { %v47_v21 = vmul.f32 0.0078125, %v40_v20 }
 0x11e   :  { %v51_v22 = vadd.f32 1e-06, %v47_v21 }
 0x11f   :  { %v42_v23 = vpop.xlane.xlu1 %41  ;;  %v44_v24 = vpop.xlane.xlu0 %43 }
 0x120   :  { %95 = vrsqrt.f32 %v51_v22  ;;  %v48_v25 = vmul.f32 0.0078125, %v42_v23  ;;  %v49_v26 = vmul.f32 0.0078125, %v44_v24 }
 0x122   :  { %v52_v27 = vadd.f32 1e-06, %v48_v25  ;;  %v53_v28 = vadd.f32 1e-06, %v49_v26 }
 0x123   :  { %v46_v29 = vpop.xlane.xlu1 %45 }
 0x124   :  { %97 = vrsqrt.f32 %v52_v27  ;;  %v50_v30 = vmul.f32 0.0078125, %v46_v29 }
 0x125   :  { %99 = vrsqrt.f32 %v53_v28 }
 0x126   :  { %v54_v31 = vadd.f32 1e-06, %v50_v30 }
 0x128   :  { %101 = vrsqrt.f32 %v54_v31 }
 0x12d   :  { %v96_v32 = vpop.eup %95 }
 0x12e   :  { %v59_v34 = vmul.f32 %v96_v32, %v31_v8 }
 0x130   :  { %v70_v36 = vmul.f32 %v93_v33, %v59_v34 }
 0x131   :  { %v98_v37 = vpop.eup %97 }
 0x132   :  { %v100_v38 = vpop.eup %99  ;;  %v81_v39 = vadd.f32 %v94_v35, %v70_v36  ;;  %v60_v40 = vmul.f32 %v98_v37, %v32_v15 }
 0x133   :  { %v61_v41 = vmul.f32 %v100_v38, %v33_v9 }
 0x134   :  { %85 = vst [vmem:[%s156_s3] sm:$0xff] %v81_v39  ;;  %v71_v42 = vmul.f32 %v93_v33, %v60_v40 }
 0x135   :  { %v102_v43 = vpop.eup %101  ;;  %v72_v44 = vmul.f32 %v93_v33, %v61_v41 }
 0x136   :  { %v82_v45 = vadd.f32 %v94_v35, %v71_v42  ;;  %v62_v46 = vmul.f32 %v102_v43, %v34_v16 }
 0x137   :  { %v83_v47 = vadd.f32 %v94_v35, %v72_v44 }
 0x138   :  { %86 = vst [vmem:[%s156_s3 + $0x8] sm:$0xff] %v82_v45  ;;  %v73_v48 = vmul.f32 %v93_v33, %v62_v46 }
 0x139   :  { %87 = vst [vmem:[%s156_s3 + $0x10] sm:$0xff] %v83_v47 }
 0x13a   :  { %v84_v49 = vadd.f32 %v94_v35, %v73_v48 }
 0x13c   :  { %88 = vst [vmem:[%s156_s3 + $0x18] sm:$0xff] %v84_v49 }

// kernel: svtrv2_forward.19
= control target key start
LH: loop header
LB: loop body
LE: loop exit
PB: predicated region body
PF: predicated region fallthrough
CT: control target
= control target key end

     0   :  { %s5068_s0 = inlined_call_operand.vmem [shape: f32[2,16,128], index: 0, kind: input, shape index: {}]   ;;  %s5069_s1 = inlined_call_operand.vmem [shape: bf16[128,384], index: 1, kind: input, shape index: {}]   ;;  %s5070_s2 = inlined_call_operand.vmem [shape: f32[1,384], index: 2, kind: input, shape index: {}]   ;;  %s5071_s3 = inlined_call_operand.vmem [shape: bf16[128,128], index: 3, kind: input, shape index: {}]   ;;  %s5072_s4 = inlined_call_operand.vmem [shape: f32[1,128], index: 4, kind: input, shape index: {}]   ;;  %s5073_s5 = inlined_call_operand.vmem [shape: f32[1,128], index: 5, kind: input, shape index: {}]   ;;  %s5074_s6 = inlined_call_operand.vmem [shape: f32[1,128], index: 6, kind: input, shape index: {}]   ;;  %s5075_s7 = inlined_call_operand.vmem [shape: bf16[128,512], index: 7, kind: input, shape index: {}]   ;;  %s5076_s8 = inlined_call_operand.vmem [shape: f32[1,512], index: 8, kind: input, shape index: {}]   ;;  %s5077_s9 = inlined_call_operand.vmem [shape: bf16[512,128], index: 9, kind: input, shape index: {}]   ;;  %s5078_s10 = inlined_call_operand.vmem [shape: f32[1,128], index: 10, kind: input, shape index: {}]   ;;  %s5079_s11 = inlined_call_operand.vmem [shape: f32[1,128], index: 11, kind: input, shape index: {}]   ;;  %s5080_s12 = inlined_call_operand.vmem [shape: f32[1,128], index: 12, kind: input, shape index: {}]   ;;  %s5081_s13 = inlined_call_operand.vmem [shape: f32[128,32], index: 13, kind: input, shape index: {}]   ;;  %s5082_s14 = inlined_call_operand.vmem [shape: f32[5,32], index: 14, kind: input, shape index: {}]   ;;  %s5083_s15 = inlined_call_operand.vmem [shape: f32[32,128], index: 15, kind: input, shape index: {}]   ;;  %s5084_s16 = inlined_call_operand.vmem [shape: f32[1,128], index: 16, kind: input, shape index: {}]   ;;  %s5085_s17 = inlined_call_operand.hbm [shape: f32[2,16,128], index: 17, kind: output, shape index: {}]  }
   0x1   :  { %5093 = sst [smem:[#allocation11_spill]] %s5068_s0 }
   0x2   :  { %5094 = sst [smem:[#allocation12_spill]] %s5069_s1 }
   0x3   :  { %5095 = sst [smem:[#allocation13_spill]] %s5070_s2 }
   0x4   :  { %22 = vsyncpa [#allocation3], 0 }
   0x5   :  { %24 = vsyncpa [#allocation3 + $0x1], 0  ;;  %s4253_s24 = smov 0   ;;  %s4255_s25 = smov 0  }
   0x6   :  { %s4257_s26 = smov 0   ;;  %s4259_s27 = smov 0  }
   0x7 LB: > { %5096 = sst [smem:[#allocation5_spill]] %s4136_s24  ;;  %s4274_s28 = sadd.s32 4294967295, %s4148_s27   ;;  %s4148_s27 = sphi %s4259_s27, %s5110_s27   ;;  %s4144_s26 = sphi %s4257_s26, %s5112_s26   ;;  %s4140_s25 = sphi %s4255_s25, %s5114_s25   ;;  %s4136_s24 = sphi %s4253_s24, %s5113_s24  }
   0x8   : > { %5097 = sst [smem:[#allocation6_spill]] %s4144_s26  ;;  %s3345_s29 = sadd.s32 4294967294, %s4148_s27  }
   0x9   : > { %5098 = sst [smem:[#allocation7_spill]] %s4148_s27  ;;  %s4278_s0 = sadd.s32 1, %s4148_s27  }
   0xa   : > { %5099 = sst [smem:[#allocation8_spill]] %s4278_s0  ;;  %s399_s30 = sadd.s32 1, %s4144_s26 }
   0xb   : > { %s396_s18 = ssub.s32 %s4148_s27, %s4278_s0  ;;  %p409_p0 = scmp.ne.s32.totalorder %s4144_s26, %s4140_s25 }
   0xc   : > { %p397_p1 = scmp.eq.s32.totalorder %s396_s18, 0  ;;  %p410_p2 = scmp.eq.s32.totalorder %s4274_s28, 1 }
   0xd   : > { %p415_p3 = scmp.ne.s32.totalorder %s4140_s25, %s4136_s24  ;;  %p416_p4 = scmp.eq.s32.totalorder %s3345_s29, 1 }
   0xe   : > { %s4289_s19 = scalar_select %p397_p1, %s4144_s26, %s399_s30  }
   0xf   : > { %p4291_p5 = por %p410_p2, %p409_p0  ;;  %p4295_p6 = por %p416_p4, %p415_p3 }
  0x10   : > { %5100 = sst [smem:[#allocation9_spill]] %s4289_s19  ;;  %p3348_p7 = scmp.ge.s32.totalorder %s4148_s27, 1 }
  0x11   : > { %s5102_s20 = scalar_select %p4295_p6, 1, 0 }
  0x12   : > { %p490_p8 = scmp.lt.s32.totalorder %s4148_s27, 3 }
  0x13   : > { %5103 = sst [smem:[#allocation10_spill]] %s5102_s20 }
  0x14   : > { %p491_p9 = pnand %p3348_p7, %p490_p8 }
  0x15   : > { %s5104_s23 = sld [smem:[#allocation12_spill]] (!%p491_p9)  ;;  %p542_p10 = scmp.lt.s32.totalorder (!%p491_p9), %s4274_s28, 1 }
  0x16   : > { %494 = sbr.rel (%p491_p9) target bundleno = 5122 (0x1402), region = 88  ;;  %s5105_s0 = sld [smem:[#allocation11_spill]] (!%p491_p9) }
  0x17   : > { %s5106_s2 = sld [smem:[#allocation13_spill]] (!%p491_p9)  ;;  %s4153_s21 = smov (!%p491_p9), 112  }
  0x18   : > { %s4154_s22 = smov (!%p491_p9), 96   ;;  %s4155_s30 = smov (!%p491_p9), 80  }
  0x19   : > { %s4156_s24 = smov (!%p491_p9), 64   ;;  %s4159_s18 = smov (!%p491_p9), 16  }
  0x1a   : > { %s3485_s29 = sshll.u32 (!%p491_p9), %s4274_s28, 8 }
  0x1b   : > { %v3870_v0 = vld [vmem:[%s5104_s23 + $0xac] ss:$12 sps:$4 sm:$0xff]   ;;  %v3872_v1 = vld [vmem:[%s5104_s23 + $0xa8] ss:$12 sps:$4 sm:$0xff]   ;;  %v4150_v2 = vmov 0   ;;  %v4151_v4 = vmov 0.0   ;;  %v585_v29 = vlaneseq }
  0x1c   : > { %760 = vmatprep.mubr.bf16.mxu0 %v4150_v2  ;;  %728 = vmatprep.subr.bf16.mxu0 %v3870_v0  ;;  %v3873_v3 = vld [vmem:[%s5104_s23 + $0x94] ss:$12 sps:$4 sm:$0xff]   ;;  %v3875_v5 = vld [vmem:[%s5104_s23 + $0x90] ss:$12 sps:$4 sm:$0xff]   ;;  %v3878_v7 = vld [vmem:[%s5104_s23 + $0x78] ss:$12 sps:$4 sm:$0xff]  }
  0x1d   : > { %3609 = vmatprep.subr.bf16.mxu1 %v4151_v4  ;;  %729 = vmatpush1.bf16.msra.mxu0 %v3872_v1  ;;  %v3876_v6 = vld [vmem:[%s5104_s23 + $0x7c] ss:$12 sps:$4 sm:$0xff]   ;;  %v3879_v8 = vld [vmem:[%s5104_s23 + $0x64] ss:$12 sps:$4 sm:$0xff]   ;;  %s543_s20 = scalar_select %p542_p10, %s4274_s28, 1  ;;  %vm4152_vm0 = vmmov 0  }
  0x1e   : > { %730 = vmatprep.subr.bf16.mxu0 %v3873_v3  ;;  %v3881_v9 = vld [vmem:[%s5104_s23 + $0x60] ss:$12 sps:$4 sm:$0xff]   ;;  %v3894_v11 = vld [vmem:[%s5104_s23 + $0xb0] ss:$12 sps:$4 sm:$0xff]   ;;  %v3895_v12 = vld [vmem:[%s5104_s23 + $0x98] ss:$12 sps:$4 sm:$0xff]   ;;  %3625 = vmatprep.mubr.msk.bf16.mxu1 %vm4152_vm0, %v4151_v4 }
  0x1f   : > { %v3882_v10 = vld [vmem:[%s5104_s23 + $0x4c] ss:$12 sps:$4 sm:$0xff]   ;;  %s3484_s26 = sshll.u32 %s543_s20, 4  ;;  %3610 = vmatpush3.bf16.msra.mxu1 %v3894_v11  ;;  %v3884_v13 = vld [vmem:[%s5104_s23 + $0x48] ss:$12 sps:$4 sm:$0xff]   ;;  %v4399_v30 = vshrl.u32 %v585_v29, 7 }
  0x20   : > { %3611 = vmatprep.subr.bf16.mxu1 %v4151_v4  ;;  %v3885_v14 = vld [vmem:[%s5104_s23 + $0x34] ss:$12 sps:$4 sm:$0xff]   ;;  %v3887_v16 = vld [vmem:[%s5104_s23 + $0x30] ss:$12 sps:$4 sm:$0xff]   ;;  %v3890_v19 = vld [vmem:[%s5104_s23 + $0x18] ss:$12 sps:$4 sm:$0xff]   ;;  %s4367_s19 = scalar_lea.vmem %s5105_s0, %s3484_s26 }
  0x21   : > { %731 = vmatpush1.bf16.msra.mxu0 %v3875_v5  ;;  %v3896_v15 = vld [vmem:[%s5104_s23 + $0x80] ss:$12 sps:$4 sm:$0xff]   ;;  %v3888_v17 = vld [vmem:[%s5104_s23 + $0x1c] ss:$12 sps:$4 sm:$0xff]   ;;  %v3891_v20 = vld [vmem:[%s5104_s23 + $0x4] ss:$12 sps:$4 sm:$0xff]  }
  0x22   : > { %732 = vmatprep.subr.bf16.mxu0 %v3876_v6  ;;  %v3897_v18 = vld [vmem:[%s5104_s23 + $0x68] ss:$12 sps:$4 sm:$0xff]   ;;  %v3898_v21 = vld [vmem:[%s5104_s23 + $0x50] ss:$12 sps:$4 sm:$0xff]   ;;  %v3893_v22 = vld [vmem:[%s5104_s23] ss:$12 sps:$4 sm:$0xff]  }
  0x23   : > { %3612 = vmatpush3.bf16.msra.mxu1 %v3895_v12  ;;  %v548_v23 = vld [vmem:[%s4367_s19] sm:$0xff]  ;;  %v549_v24 = vld [vmem:[%s4367_s19 + $0x8] sm:$0xff]  ;;  %v591_v31 = vsub.s32 1, %v4399_v30  ;;  %v4406_v35 = vsub.s32 0, %v4399_v30  ;;  %vm831_vm1 = vcmask 130048   ;;  %v595_v47 = vsub.s32 2, %v4399_v30 }
  0x24   : > { %3613 = vmatprep.subr.bf16.mxu1 %v4151_v4  ;;  %v550_v25 = vpack.c.bf16 %v549_v24, %v548_v23  ;;  %v3899_v26 = vld [vmem:[%s5104_s23 + $0x38] ss:$12 sps:$4 sm:$0xff]   ;;  %v3900_v27 = vld [vmem:[%s5104_s23 + $0x20] ss:$12 sps:$4 sm:$0xff]   ;;  %v3901_v28 = vld [vmem:[%s5104_s23 + $0x8] ss:$12 sps:$4 sm:$0xff]  }
  0x25   : > { %733 = vmatpush1.bf16.msra.mxu0 %v3878_v7  ;;  %v583_v33 = vld [vmem:[%s5106_s2] sm:$0x7]  ;;  %s4157_s26 = smov 48   ;;  %s4158_s20 = smov 32   ;;  %vm3181_vm2 = vcmask 261120  }
  0x26   : > { %734 = vmatprep.subr.bf16.mxu0 %v3879_v8  ;;  %v592_v36 = vrot.slane %v583_v33, %v591_v31  ;;  %v588_v39 = vrot.slane %v583_v33, %v4406_v35  ;;  %v596_v48 = vrot.slane %v583_v33, %v595_v47 }
  0x27   : > { %3614 = vmatpush3.bf16.msra.mxu1 %v3896_v15 }
  0x28   : > { %3615 = vmatprep.subr.bf16.mxu1 %v4151_v4 }
  0x29   : > { %735 = vmatpush1.bf16.msra.mxu0 %v3881_v9 }
  0x2a   : > { %736 = vmatprep.subr.bf16.mxu0 %v3882_v10 }
  0x2b   : > { %3616 = vmatpush3.bf16.msra.mxu1 %v3897_v18 }
  0x2c   : > { %3617 = vmatprep.subr.bf16.mxu1 %v4151_v4 }
  0x2d   : > { %737 = vmatpush1.bf16.msra.mxu0 %v3884_v13 }
  0x2e   : > { %738 = vmatprep.subr.bf16.mxu0 %v3885_v14 }
  0x2f   : > { %3618 = vmatpush3.bf16.msra.mxu1 %v3898_v21 }
  0x30   : > { %3619 = vmatprep.subr.bf16.mxu1 %v4151_v4 }
  0x31   : > { %739 = vmatpush1.bf16.msra.mxu0 %v3887_v16 }
  0x32   : > { %740 = vmatprep.subr.bf16.mxu0 %v3888_v17 }
  0x33   : > { %3620 = vmatpush3.bf16.msra.mxu1 %v3899_v26 }
  0x34   : > { %3621 = vmatprep.subr.bf16.mxu1 %v4151_v4 }
  0x35   : > { %741 = vmatpush1.bf16.msra.mxu0 %v3890_v19 }
  0x36   : > { %742 = vmatprep.subr.bf16.mxu0 %v3891_v20 }
  0x37   : > { %3622 = vmatpush3.bf16.msra.mxu1 %v3900_v27 }
  0x38   : > { %3623 = vmatprep.subr.bf16.mxu1 %v4151_v4 }
  0x39   : > { %743 = vmatpush1.bf16.msra.mxu0 %v3893_v22 }
  0x3a   : > { %3641 = vmatprep.subr.bf16.mxu0 %v4151_v4 }
  0x3b   : > { %3624 = vmatpush3.bf16.msra.mxu1 %v3901_v28 }
  0x3c   : > { %761 = vmatmul.mubr.bf16.vlgmr.msra.gmra.mxu0 %v550_v25  ;;  %3629 = vmatprep.subr.bf16.mxu1 %v4151_v4 }
  0x3d   : > { %3643 = vmatprep.mubr.msk.bf16.mxu0 %vm4152_vm0, %v4151_v4 }
  0x3e   : > { %3626 = vmatmul.mubr.bf16.vlgmr.msra.gmra.mxu1 %v550_v25 }
  0x3f   : > { %3631 = vmatprep.mubr.msk.bf16.mxu1 %vm4152_vm0, %v4151_v4 }
  0xfc   : > { %v762_v32 = vpop.f32.mrf.mxu0 }
  0xfd   : > { %v763_v44 = vadd.f32 %v762_v32, %v588_v39 }
  0xfe   : > { %v764_v34 = vpop.f32.mrf.mxu0  ;;  %v805_v49 = vpop.f32.mrf.mxu1 }
  0xff   : > { %v765_v40 = vadd.f32 %v764_v34, %v592_v36  ;;  %v806_v51 = vadd.f32 %v805_v49, %v596_v48 }
 0x100   : > { %v766_v37 = vpop.f32.mrf.mxu0  ;;  %v3627_v50 = vpop.f32.mrf.mxu1 }
 0x101   : > { %v767_v42 = vadd.f32 %v766_v37, %v588_v39  ;;  %v3902_v39 = vld [vmem:[%s5071_s3 + $0x8] sm:$0xff]  }
 0x102   : > { %v768_v38 = vpop.f32.mrf.mxu0  ;;  %v808_v52 = vpop.f32.mrf.mxu1 }
 0x103   : > { %v769_v41 = vadd.f32 %v768_v38, %v592_v36  ;;  %v4417_v46 = vpack.c.bf16 %v767_v42, %v763_v44  ;;  %v809_v53 = vadd.f32 %v808_v52, %v596_v48 }
 0x104   : > { %v3628_v54 = vpop.f32.mrf.mxu1 }
 0x105   : > { %v4411_v43 = vpack.c.bf16 %v769_v41, %v765_v40  ;;  %v4429_v55 = vpack.c.bf16 %v809_v53, %v806_v51  ;;  %v3903_v40 = vld [vmem:[%s5071_s3] sm:$0xff]  }
 0x107   : > { %953 = vrot.lane.b32.xlu0 %v4411_v43, %s4153_s21  ;;  %v836_v45 = vsel %vm831_vm1, %v4411_v43, 0 }
 0x108   : > { %3630 = vmatpush3.bf16.xpose.msra.mxu1 %v836_v45 }
 0x109   : > { %3635 = vmatprep.subr.bf16.mxu1 %v4151_v4 }
 0x10b   : > { %950 = vrot.lane.b32.xlu0 %v4417_v46, %s4153_s21 }
 0x10f   : > { %3632 = vmatmul.mubr.msk.bf16.vlgmr.msra.gmra.mxu1 %vm831_vm1, %v4417_v46 }
 0x110   : > { %3637 = vmatprep.mubr.msk.bf16.mxu1 %vm4152_vm0, %v4151_v4  ;;  %3636 = vmatpush3.bf16.msra.mxu1 %v4429_v55 }
 0x111   : > { %3647 = vmatprep.subr.bf16.mxu1 %v4151_v4 }
 0x179   : > { %v954_v56 = vpop.permute.xlu0 %953 }
 0x17a   : > { %v959_v57 = vsel %vm831_vm1, %v954_v56, 0 }
 0x17b   : > { %3642 = vmatpush3.bf16.xpose.msra.mxu0 %v959_v57 }
 0x17c   : > { %3653 = vmatprep.subr.bf16.mxu0 %v4151_v4 }
 0x17d   : > { %v951_v58 = vpop.permute.xlu0 %950 }
 0x182   : > { %3644 = vmatmul.mubr.msk.bf16.vlgmr.msra.gmra.mxu0 %vm831_vm1, %v951_v58 }
 0x183   : > { %3655 = vmatprep.mubr.msk.bf16.mxu0 %vm4152_vm0, %v4151_v4  ;;  %3654 = vmatpush3.bf16.msra.mxu0 %v3902_v39 }
 0x184   : > { %3665 = vmatprep.subr.bf16.mxu0 %v4151_v4 }
 0x1cf   : > { %v872_v59 = vpop.f32.mrf.mxu1 }
 0x1d0   : > { %v879_v60 = vmul.f32 0.25, %v872_v59 }
 0x1d1   : > { %v3633_v61 = vpop.f32.mrf.mxu1 }
 0x1d2   : > { %v881_v62 = vsel %vm831_vm1, %v879_v60, -inf }
 0x1d3   : > { %882 = vmax.xlane.f32.xlu1 %v881_v62  ;;  %v875_v63 = vpop.f32.mrf.mxu1 }
 0x1d4   : > { %v880_v0 = vmul.f32 0.25, %v875_v63 }
 0x1d5   : > { %v3634_v1 = vpop.f32.mrf.mxu1 }
 0x1d6   : > { %v884_v3 = vsel %vm831_vm1, %v880_v0, -inf }
 0x1d7   : > { %885 = vmax.xlane.f32.xlu1 %v884_v3 }
 0x242   : > { %v995_v5 = vpop.f32.mrf.mxu0 }
 0x243   : > { %v1002_v6 = vmul.f32 0.25, %v995_v5 }
 0x244   : > { %v3645_v7 = vpop.f32.mrf.mxu0 }
 0x245   : > { %v1004_v8 = vsel %vm831_vm1, %v1002_v6, -inf }
 0x246   : > { %1005 = vmax.xlane.f32.xlu0 %v1004_v8  ;;  %v998_v9 = vpop.f32.mrf.mxu0 }
 0x247   : > { %v1003_v10 = vmul.f32 0.25, %v998_v9 }
 0x248   : > { %v3646_v11 = vpop.f32.mrf.mxu0 }
 0x249   : > { %v1007_v12 = vsel %vm831_vm1, %v1003_v10, -inf }
 0x24a   : > { %1008 = vmax.xlane.f32.xlu1 %v1007_v12 }
 0x25b   : > { %1024 = vrot.lane.b32.xlu1 %v4429_v55, %s4153_s21 }
 0x25c   : > { %v883_v13 = vpop.xlane.xlu1 %882 }
 0x25d   : > { %v887_v14 = vsub.f32 %v879_v60, %v883_v13 }
 0x25f   : > { %v889_v15 = vmul.f32 1.442695, %v887_v14 }
 0x260   : > { %v886_v16 = vpop.xlane.xlu1 %885 }
 0x261   : > { %v888_v17 = vsub.f32 %v880_v0, %v886_v16  ;;  %3990 = vpow2.f32 %v889_v15 }
 0x263   : > { %v891_v18 = vmul.f32 1.442695, %v888_v17 }
 0x265   : > { %3992 = vpow2.f32 %v891_v18 }
 0x26e   : > { %v3991_v19 = vpop.eup %3990 }
 0x26f   : > { %v893_v34 = vsel %vm831_vm1, %v3991_v19, 0.0 }
 0x272   : > { %v3993_v20 = vpop.eup %3992 }
 0x273   : > { %v899_v21 = vpack.c.bf16 %v3993_v20, %v3991_v19  ;;  %v896_v38 = vsel %vm831_vm1, %v3993_v20, 0.0 }
 0x275   : > { %3638 = vmatmul.mubr.msk.bf16.vlgmr.msra.gmra.mxu1 %vm831_vm1, %v899_v21 }
 0x276   : > { %3649 = vmatprep.mubr.msk.bf16.mxu1 %vm4152_vm0, %v4151_v4 }
 0x2cf   : > { %v1006_v22 = vpop.xlane.xlu0 %1005 }
 0x2d0   : > { %v1010_v23 = vsub.f32 %v1002_v6, %v1006_v22 }
 0x2d2   : > { %v1012_v24 = vmul.f32 1.442695, %v1010_v23 }
 0x2d3   : > { %v1009_v25 = vpop.xlane.xlu1 %1008 }
 0x2d4   : > { %3994 = vpow2.f32 %v1012_v24  ;;  %v1011_v26 = vsub.f32 %v1003_v10, %v1009_v25 }
 0x2d6   : > { %v1014_v27 = vmul.f32 1.442695, %v1011_v26 }
 0x2d7   : > { %v1025_v28 = vpop.permute.xlu1 %1024 }
 0x2d8   : > { %3996 = vpow2.f32 %v1014_v27  ;;  %3648 = vmatpush3.bf16.msra.mxu1 %v1025_v28 }
 0x2d9   : > { %3659 = vmatprep.subr.bf16.mxu1 %v4151_v4 }
 0x2e1   : > { %v3995_v29 = vpop.eup %3994 }
 0x2e2   : > { %v1016_v32 = vsel %vm831_vm1, %v3995_v29, 0.0 }
 0x2e3   : > { %1017 = vadd.xlane.f32.xlu1 %v1016_v32 }
 0x2e5   : > { %v3997_v33 = vpop.eup %3996 }
 0x2e6   : > { %v1019_v36 = vsel %vm831_vm1, %v3997_v33, 0.0  ;;  %v1022_v37 = vpack.c.bf16 %v3997_v33, %v3995_v29 }
 0x2e7   : > { %894 = vadd.xlane.f32.xlu1 %v893_v34  ;;  %1020 = vadd.xlane.f32.xlu0 %v1019_v36 }
 0x2e8   : > { %3650 = vmatmul.mubr.msk.bf16.vlgmr.msra.gmra.mxu1 %vm831_vm1, %v1022_v37 }
 0x2e9   : > { %3661 = vmatprep.mubr.msk.bf16.mxu1 %vm4152_vm0, %v4151_v4  ;;  %3660 = vmatpush3.bf16.msra.mxu1 %v3903_v40 }
 0x2ea   : > { %3671 = vmatprep.subr.bf16.mxu1 %v4151_v4 }
 0x2f8   : > { %1248 = vrot.lane.b32.xlu1 %v4429_v55, %s4154_s22 }
 0x2fd   : > { %1178 = vrot.lane.b32.xlu0 %v4411_v43, %s4154_s22 }
 0x301   : > { %1176 = vrot.lane.b32.xlu0 %v4417_v46, %s4154_s22  ;;  %s4160_s22 = smov [#allocation2]  }
 0x320   : > { %897 = vadd.xlane.f32.xlu0 %v896_v38 }
 0x335   : > { %v937_v41 = vpop.f32.mrf.mxu1 }
 0x337   : > { %v3639_v42 = vpop.f32.mrf.mxu1 }
 0x339   : > { %v940_v44 = vpop.f32.mrf.mxu1 }
 0x33b   : > { %v3640_v45 = vpop.f32.mrf.mxu1 }
 0x33c   : > { %v3904_v45 = vld [vmem:[%s5071_s3 + $0x10] sm:$0xff]  }
 0x36c   : > { %v1018_v49 = vpop.xlane.xlu1 %1017 }
 0x36d   : > { %3998 = vrcp.f32 %v1018_v49 }
 0x370   : > { %v1021_v48 = vpop.xlane.xlu0 %1020  ;;  %v895_v51 = vpop.xlane.xlu1 %894 }
 0x371   : > { %4000 = vrcp.f32 %v1021_v48 }
 0x372   : > { %4002 = vrcp.f32 %v895_v51 }
 0x374   : > { %v1179_v50 = vpop.permute.xlu0 %1178  ;;  %v1249_v8 = vpop.permute.xlu1 %1248 }
 0x375   : > { %v1184_v0 = vsel %vm831_vm1, %v1179_v50, 0 }
 0x378   : > { %v1177_v52 = vpop.permute.xlu0 %1176 }
 0x37a   : > { %v3999_v57 = vpop.eup %3998 }
 0x37e   : > { %v4001_v58 = vpop.eup %4000 }
 0x37f   : > { %v4003_v1 = vpop.eup %4002 }
 0x380   : > { %v945_v5 = vmul.f32 %v4003_v1, %v937_v41 }
 0x3a8   : > { %v1064_v53 = vpop.f32.mrf.mxu1 }
 0x3a9   : > { %v898_v54 = vpop.xlane.xlu0 %897  ;;  %v1072_v60 = vmul.f32 %v3999_v57, %v1064_v53 }
 0x3aa   : > { %4004 = vrcp.f32 %v898_v54  ;;  %v3651_v56 = vpop.f32.mrf.mxu1 }
 0x3ac   : > { %v1067_v59 = vpop.f32.mrf.mxu1 }
 0x3ad   : > { %v1074_v61 = vmul.f32 %v4001_v58, %v1067_v59 }
 0x3ae   : > { %v3652_v62 = vpop.f32.mrf.mxu1 }
 0x3af   : > { %v1075_v63 = vpack.c.bf16 %v1074_v61, %v1072_v60 }
 0x3b1   : > { %3656 = vmatmul.mubr.msk.bf16.vlgmr.msra.gmra.mxu0 %vm831_vm1, %v1075_v63 }
 0x3b2   : > { %3666 = vmatpush3.bf16.xpose.msra.mxu0 %v1184_v0  ;;  %3667 = vmatprep.mubr.msk.bf16.mxu0 %vm4152_vm0, %v4151_v4 }
 0x3b3   : > { %3677 = vmatprep.subr.bf16.mxu0 %v4151_v4 }
 0x3b7   : > { %v4005_v3 = vpop.eup %4004 }
 0x3b8   : > { %v947_v6 = vmul.f32 %v4005_v3, %v940_v44 }
 0x3b9   : > { %3668 = vmatmul.mubr.msk.bf16.vlgmr.msra.gmra.mxu0 %vm831_vm1, %v1177_v52 }
 0x3ba   : > { %v948_v7 = vpack.c.bf16 %v947_v6, %v945_v5  ;;  %3679 = vmatprep.mubr.msk.bf16.mxu0 %vm4152_vm0, %v4151_v4  ;;  %3678 = vmatpush3.bf16.msra.mxu0 %v3904_v45 }
 0x3bb   : > { %3689 = vmatprep.subr.bf16.mxu0 %v4151_v4 }
 0x3bc   : > { %3662 = vmatmul.mubr.msk.bf16.vlgmr.msra.gmra.mxu1 %vm831_vm1, %v948_v7 }
 0x3bd   : > { %3672 = vmatpush3.bf16.msra.mxu1 %v1249_v8  ;;  %3673 = vmatprep.mubr.msk.bf16.mxu1 %vm4152_vm0, %v4151_v4 }
 0x3be   : > { %3683 = vmatprep.subr.bf16.mxu1 %v4151_v4 }
 0x471   : > { %v1119_v9 = vpop.f32.mrf.mxu0 }
 0x473   : > { %v3657_v10 = vpop.f32.mrf.mxu0 }
 0x475   : > { %v1122_v11 = vpop.f32.mrf.mxu0 }
 0x477   : > { %v3658_v12 = vpop.f32.mrf.mxu0 }
 0x479   : > { %v1220_v13 = vpop.f32.mrf.mxu0 }
 0x47a   : > { %v1227_v14 = vmul.f32 0.25, %v1220_v13 }
 0x47b   : > { %v3669_v15 = vpop.f32.mrf.mxu0 }
 0x47c   : > { %v1169_v16 = vpop.f32.mrf.mxu1  ;;  %v1229_v17 = vsel %vm831_vm1, %v1227_v14, -inf }
 0x47d   : > { %v4479_v18 = vadd.f32 %v1169_v16, %v1119_v9  ;;  %1230 = vmax.xlane.f32.xlu1 %v1229_v17  ;;  %v1223_v19 = vpop.f32.mrf.mxu0 }
 0x47e   : > { %v1228_v20 = vmul.f32 0.25, %v1223_v19  ;;  %v3663_v21 = vpop.f32.mrf.mxu1 }
 0x47f   : > { %v3670_v22 = vpop.f32.mrf.mxu0 }
 0x480   : > { %v1172_v23 = vpop.f32.mrf.mxu1  ;;  %v1232_v24 = vsel %vm831_vm1, %v1228_v20, -inf }
 0x481   : > { %v4482_v25 = vadd.f32 %v1172_v23, %v1122_v11  ;;  %1233 = vmax.xlane.f32.xlu1 %v1232_v24 }
 0x482   : > { %v3664_v26 = vpop.f32.mrf.mxu1 }
 0x492   : > { %1354 = vrot.lane.b32.xlu1 %v4411_v43, %s4155_s30 }
 0x496   : > { %1352 = vrot.lane.b32.xlu1 %v4417_v46, %s4155_s30 }
 0x506   : > { %v1231_v27 = vpop.xlane.xlu1 %1230 }
 0x507   : > { %v1235_v28 = vsub.f32 %v1227_v14, %v1231_v27 }
 0x509   : > { %v1237_v29 = vmul.f32 1.442695, %v1235_v28 }
 0x50a   : > { %v1234_v32 = vpop.xlane.xlu1 %1233 }
 0x50b   : > { %4006 = vpow2.f32 %v1237_v29  ;;  %v1236_v33 = vsub.f32 %v1228_v20, %v1234_v32  ;;  %v3905_v29 = vld [vmem:[%s5071_s3 + $0x18] sm:$0xff]  }
 0x50d   : > { %v1239_v34 = vmul.f32 1.442695, %v1236_v33 }
 0x50e   : > { %v1355_v39 = vpop.permute.xlu1 %1354 }
 0x50f   : > { %4008 = vpow2.f32 %v1239_v34  ;;  %v1360_v42 = vsel %vm831_vm1, %v1355_v39, 0 }
 0x512   : > { %v1353_v44 = vpop.permute.xlu1 %1352 }
 0x518   : > { %v4007_v36 = vpop.eup %4006 }
 0x519   : > { %v1241_v37 = vsel %vm831_vm1, %v4007_v36, 0.0 }
 0x51a   : > { %1242 = vadd.xlane.f32.xlu0 %v1241_v37 }
 0x51c   : > { %v4009_v38 = vpop.eup %4008 }
 0x51d   : > { %v1244_v40 = vsel %vm831_vm1, %v4009_v38, 0.0  ;;  %v1247_v41 = vpack.c.bf16 %v4009_v38, %v4007_v36 }
 0x51e   : > { %1245 = vadd.xlane.f32.xlu1 %v1244_v40 }
 0x51f   : > { %3674 = vmatmul.mubr.msk.bf16.vlgmr.msra.gmra.mxu1 %vm831_vm1, %v1247_v41 }
 0x520   : > { %3684 = vmatpush3.bf16.xpose.msra.mxu1 %v1360_v42  ;;  %3685 = vmatprep.mubr.msk.bf16.mxu1 %vm4152_vm0, %v4151_v4 }
 0x521   : > { %3695 = vmatprep.subr.bf16.mxu1 %v4151_v4 }
 0x527   : > { %3686 = vmatmul.mubr.msk.bf16.vlgmr.msra.gmra.mxu1 %vm831_vm1, %v1353_v44 }
 0x528   : > { %3697 = vmatprep.mubr.msk.bf16.mxu1 %vm4152_vm0, %v4151_v4  ;;  %3696 = vmatpush3.bf16.msra.mxu1 %v3905_v29 }
 0x529   : > { %3707 = vmatprep.subr.bf16.mxu1 %v4151_v4 }
 0x5a3   : > { %v1243_v48 = vpop.xlane.xlu0 %1242 }
 0x5a4   : > { %4010 = vrcp.f32 %v1243_v48 }
 0x5a7   : > { %v1246_v49 = vpop.xlane.xlu1 %1245 }
 0x5a8   : > { %4012 = vrcp.f32 %v1246_v49 }
 0x5b1   : > { %v4011_v52 = vpop.eup %4010 }
 0x5b5   : > { %v4013_v53 = vpop.eup %4012 }
 0x5df   : > { %v1288_v50 = vpop.f32.mrf.mxu1 }
 0x5e0   : > { %v1296_v56 = vmul.f32 %v4011_v52, %v1288_v50 }
 0x5e1   : > { %v3675_v51 = vpop.f32.mrf.mxu1 }
 0x5e3   : > { %v1291_v54 = vpop.f32.mrf.mxu1 }
 0x5e4   : > { %v1298_v57 = vmul.f32 %v4013_v53, %v1291_v54 }
 0x5e5   : > { %v3676_v58 = vpop.f32.mrf.mxu1 }
 0x5e6   : > { %v1299_v59 = vpack.c.bf16 %v1298_v57, %v1296_v56 }
 0x5e7   : > { %v1396_v60 = vpop.f32.mrf.mxu1 }
 0x5e8   : > { %v1403_v61 = vmul.f32 0.25, %v1396_v60  ;;  %3680 = vmatmul.mubr.msk.bf16.vlgmr.msra.gmra.mxu0 %vm831_vm1, %v1299_v59 }
 0x5e9   : > { %v3687_v62 = vpop.f32.mrf.mxu1  ;;  %3691 = vmatprep.mubr.msk.bf16.mxu0 %vm4152_vm0, %v4151_v4 }
 0x5ea   : > { %v1405_v63 = vsel %vm831_vm1, %v1403_v61, -inf }
 0x5eb   : > { %1406 = vmax.xlane.f32.xlu0 %v1405_v63  ;;  %v1399_v0 = vpop.f32.mrf.mxu1 }
 0x5ec   : > { %v1404_v1 = vmul.f32 0.25, %v1399_v0 }
 0x5ed   : > { %v3688_v3 = vpop.f32.mrf.mxu1 }
 0x5ee   : > { %v1408_v5 = vsel %vm831_vm1, %v1404_v1, -inf }
 0x5ef   : > { %1409 = vmax.xlane.f32.xlu0 %v1408_v5 }
 0x605   : > { %1424 = vrot.lane.b32.xlu0 %v4429_v55, %s4155_s30 }
 0x609   : > { %1530 = vrot.lane.b32.xlu0 %v4411_v43, %s4156_s24 }
 0x60d   : > { %1528 = vrot.lane.b32.xlu0 %v4417_v46, %s4156_s24 }
 0x674   : > { %v1407_v6 = vpop.xlane.xlu0 %1406 }
 0x675   : > { %v1411_v7 = vsub.f32 %v1403_v61, %v1407_v6 }
 0x677   : > { %v1413_v8 = vmul.f32 1.442695, %v1411_v7 }
 0x678   : > { %v1410_v9 = vpop.xlane.xlu0 %1409 }
 0x679   : > { %4014 = vpow2.f32 %v1413_v8  ;;  %v1412_v10 = vsub.f32 %v1404_v1, %v1410_v9 }
 0x67b   : > { %v1415_v11 = vmul.f32 1.442695, %v1412_v10 }
 0x67c   : > { %v1425_v12 = vpop.permute.xlu0 %1424 }
 0x67d   : > { %4016 = vpow2.f32 %v1415_v11  ;;  %3690 = vmatpush3.bf16.msra.mxu0 %v1425_v12 }
 0x67e   : > { %3701 = vmatprep.subr.bf16.mxu0 %v4151_v4 }
 0x680   : > { %v1531_v16 = vpop.permute.xlu0 %1530 }
 0x681   : > { %v1536_v20 = vsel %vm831_vm1, %v1531_v16, 0 }
 0x684   : > { %v1529_v21 = vpop.permute.xlu0 %1528 }
 0x686   : > { %v4015_v13 = vpop.eup %4014 }
 0x687   : > { %v1417_v14 = vsel %vm831_vm1, %v4015_v13, 0.0 }
 0x688   : > { %1418 = vadd.xlane.f32.xlu1 %v1417_v14 }
 0x68a   : > { %v4017_v15 = vpop.eup %4016 }
 0x68b   : > { %v1420_v17 = vsel %vm831_vm1, %v4017_v15, 0.0  ;;  %v1423_v19 = vpack.c.bf16 %v4017_v15, %v4015_v13  ;;  %v3906_v13 = vld [vmem:[%s5071_s3 + $0x20] sm:$0xff]  }
 0x68c   : > { %1421 = vadd.xlane.f32.xlu0 %v1420_v17 }
 0x68d   : > { %3692 = vmatmul.mubr.msk.bf16.vlgmr.msra.gmra.mxu0 %vm831_vm1, %v1423_v19 }
 0x68e   : > { %3702 = vmatpush3.bf16.xpose.msra.mxu0 %v1536_v20  ;;  %3703 = vmatprep.mubr.msk.bf16.mxu0 %vm4152_vm0, %v4151_v4 }
 0x68f   : > { %3713 = vmatprep.subr.bf16.mxu0 %v4151_v4 }
 0x695   : > { %3704 = vmatmul.mubr.msk.bf16.vlgmr.msra.gmra.mxu0 %vm831_vm1, %v1529_v21 }
 0x696   : > { %3715 = vmatprep.mubr.msk.bf16.mxu0 %vm4152_vm0, %v4151_v4  ;;  %3714 = vmatpush3.bf16.msra.mxu0 %v3906_v13 }
 0x697   : > { %3725 = vmatprep.subr.bf16.mxu0 %v4151_v4 }
 0x699   : > { %1600 = vrot.lane.b32.xlu1 %v4429_v55, %s4156_s24  ;;  %s5022_s24 = scalar_lea.hbm %s5085_s17, %s3485_s29 }
 0x6a8   : > { %v1343_v22 = vpop.f32.mrf.mxu0 }
 0x6a9   : > { %v4524_v23 = vadd.f32 %v1343_v22, %v4479_v18 }
 0x6aa   : > { %v3681_v24 = vpop.f32.mrf.mxu0 }
 0x6ac   : > { %v1346_v26 = vpop.f32.mrf.mxu0 }
 0x6ad   : > { %v4527_v27 = vadd.f32 %v1346_v26, %v4482_v25 }
 0x6ae   : > { %v3682_v28 = vpop.f32.mrf.mxu0 }
 0x711   : > { %v1419_v32 = vpop.xlane.xlu1 %1418 }
 0x712   : > { %4018 = vrcp.f32 %v1419_v32 }
 0x715   : > { %v1422_v33 = vpop.xlane.xlu0 %1421  ;;  %v1601_v44 = vpop.permute.xlu1 %1600 }
 0x716   : > { %4020 = vrcp.f32 %v1422_v33 }
 0x71f   : > { %v4019_v36 = vpop.eup %4018 }
 0x723   : > { %v4021_v37 = vpop.eup %4020 }
 0x74d   : > { %v1464_v34 = vpop.f32.mrf.mxu0 }
 0x74e   : > { %v1472_v39 = vmul.f32 %v4019_v36, %v1464_v34 }
 0x74f   : > { %v3693_v18 = vpop.f32.mrf.mxu0 }
 0x751   : > { %v1467_v38 = vpop.f32.mrf.mxu0 }
 0x752   : > { %v1474_v25 = vmul.f32 %v4021_v37, %v1467_v38 }
 0x753   : > { %v3694_v40 = vpop.f32.mrf.mxu0 }
 0x754   : > { %v1475_v41 = vpack.c.bf16 %v1474_v25, %v1472_v39 }
 0x755   : > { %v1572_v42 = vpop.f32.mrf.mxu0 }
 0x756   : > { %v1579_v45 = vmul.f32 0.25, %v1572_v42  ;;  %3698 = vmatmul.mubr.msk.bf16.vlgmr.msra.gmra.mxu1 %vm831_vm1, %v1475_v41 }
 0x757   : > { %3708 = vmatpush3.bf16.msra.mxu1 %v1601_v44  ;;  %v3705_v48 = vpop.f32.mrf.mxu0  ;;  %3709 = vmatprep.mubr.msk.bf16.mxu1 %vm4152_vm0, %v4151_v4 }
 0x758   : > { %v1581_v49 = vsel %vm831_vm1, %v1579_v45, -inf  ;;  %3719 = vmatprep.subr.bf16.mxu1 %v4151_v4 }
 0x759   : > { %1582 = vmax.xlane.f32.xlu1 %v1581_v49  ;;  %v1575_v50 = vpop.f32.mrf.mxu0 }
 0x75a   : > { %v1580_v51 = vmul.f32 0.25, %v1575_v50 }
 0x75b   : > { %v3706_v52 = vpop.f32.mrf.mxu0 }
 0x75c   : > { %v1584_v53 = vsel %vm831_vm1, %v1580_v51, -inf }
 0x75d   : > { %1585 = vmax.xlane.f32.xlu1 %v1584_v53 }
 0x76e   : > { %1706 = vrot.lane.b32.xlu1 %v4411_v43, %s4157_s26 }
 0x772   : > { %1704 = vrot.lane.b32.xlu1 %v4417_v46, %s4157_s26 }
 0x7e2   : > { %v1583_v54 = vpop.xlane.xlu1 %1582 }
 0x7e3   : > { %v1587_v56 = vsub.f32 %v1579_v45, %v1583_v54 }
 0x7e5   : > { %v1589_v57 = vmul.f32 1.442695, %v1587_v56 }
 0x7e6   : > { %v1586_v58 = vpop.xlane.xlu1 %1585 }
 0x7e7   : > { %4022 = vpow2.f32 %v1589_v57  ;;  %v1588_v59 = vsub.f32 %v1580_v51, %v1586_v58 }
 0x7e9   : > { %v1591_v60 = vmul.f32 1.442695, %v1588_v59 }
 0x7ea   : > { %v1707_v0 = vpop.permute.xlu1 %1706 }
 0x7eb   : > { %4024 = vpow2.f32 %v1591_v60  ;;  %v1712_v5 = vsel %vm831_vm1, %v1707_v0, 0 }
 0x7ee   : > { %v1705_v6 = vpop.permute.xlu1 %1704 }
 0x7f4   : > { %v4023_v61 = vpop.eup %4022 }
 0x7f5   : > { %v1593_v62 = vsel %vm831_vm1, %v4023_v61, 0.0 }
 0x7f6   : > { %1594 = vadd.xlane.f32.xlu0 %v1593_v62 }
 0x7f8   : > { %v4025_v63 = vpop.eup %4024 }
 0x7f9   : > { %v1596_v1 = vsel %vm831_vm1, %v4025_v63, 0.0  ;;  %v1599_v3 = vpack.c.bf16 %v4025_v63, %v4023_v61  ;;  %v3907_v61 = vld [vmem:[%s5071_s3 + $0x28] sm:$0xff]  }
 0x7fa   : > { %1597 = vadd.xlane.f32.xlu1 %v1596_v1 }
 0x7fb   : > { %3710 = vmatmul.mubr.msk.bf16.vlgmr.msra.gmra.mxu1 %vm831_vm1, %v1599_v3 }
 0x7fc   : > { %3720 = vmatpush3.bf16.xpose.msra.mxu1 %v1712_v5  ;;  %3721 = vmatprep.mubr.msk.bf16.mxu1 %vm4152_vm0, %v4151_v4 }
 0x7fd   : > { %3731 = vmatprep.subr.bf16.mxu1 %v4151_v4 }
 0x803   : > { %3722 = vmatmul.mubr.msk.bf16.vlgmr.msra.gmra.mxu1 %vm831_vm1, %v1705_v6 }
 0x804   : > { %3733 = vmatprep.mubr.msk.bf16.mxu1 %vm4152_vm0, %v4151_v4  ;;  %3732 = vmatpush3.bf16.msra.mxu1 %v3907_v61 }
 0x805   : > { %3743 = vmatprep.subr.bf16.mxu1 %v4151_v4 }
 0x816   : > { %v1519_v7 = vpop.f32.mrf.mxu1 }
 0x817   : > { %v4554_v8 = vadd.f32 %v1519_v7, %v4524_v23 }
 0x818   : > { %v3699_v9 = vpop.f32.mrf.mxu1 }
 0x81a   : > { %v1522_v10 = vpop.f32.mrf.mxu1 }
 0x81b   : > { %v4557_v11 = vadd.f32 %v1522_v10, %v4527_v27 }
 0x81c   : > { %v3700_v12 = vpop.f32.mrf.mxu1 }
 0x87f   : > { %v1595_v14 = vpop.xlane.xlu0 %1594 }
 0x880   : > { %4026 = vrcp.f32 %v1595_v14 }
 0x883   : > { %v1598_v15 = vpop.xlane.xlu1 %1597 }
 0x884   : > { %4028 = vrcp.f32 %v1598_v15 }
 0x88d   : > { %v4027_v19 = vpop.eup %4026 }
 0x891   : > { %v4029_v20 = vpop.eup %4028 }
 0x8bb   : > { %v1640_v16 = vpop.f32.mrf.mxu1 }
 0x8bc   : > { %v1648_v22 = vmul.f32 %v4027_v19, %v1640_v16 }
 0x8bd   : > { %v3711_v17 = vpop.f32.mrf.mxu1 }
 0x8bf   : > { %v1643_v21 = vpop.f32.mrf.mxu1 }
 0x8c0   : > { %v1650_v23 = vmul.f32 %v4029_v20, %v1643_v21 }
 0x8c1   : > { %v3712_v24 = vpop.f32.mrf.mxu1 }
 0x8c2   : > { %v1651_v26 = vpack.c.bf16 %v1650_v23, %v1648_v22 }
 0x8c3   : > { %v1748_v27 = vpop.f32.mrf.mxu1 }
 0x8c4   : > { %v1755_v28 = vmul.f32 0.25, %v1748_v27  ;;  %3716 = vmatmul.mubr.msk.bf16.vlgmr.msra.gmra.mxu0 %vm831_vm1, %v1651_v26 }
 0x8c5   : > { %v3723_v29 = vpop.f32.mrf.mxu1  ;;  %3727 = vmatprep.mubr.msk.bf16.mxu0 %vm4152_vm0, %v4151_v4 }
 0x8c6   : > { %v1757_v32 = vsel %vm831_vm1, %v1755_v28, -inf }
 0x8c7   : > { %1758 = vmax.xlane.f32.xlu0 %v1757_v32  ;;  %v1751_v33 = vpop.f32.mrf.mxu1 }
 0x8c8   : > { %v1756_v34 = vmul.f32 0.25, %v1751_v33 }
 0x8c9   : > { %v3724_v18 = vpop.f32.mrf.mxu1 }
 0x8ca   : > { %v1760_v36 = vsel %vm831_vm1, %v1756_v34, -inf }
 0x8cb   : > { %1761 = vmax.xlane.f32.xlu0 %v1760_v36 }
 0x8e1   : > { %1776 = vrot.lane.b32.xlu0 %v4429_v55, %s4157_s26  ;;  %s4092_s26 = sshll.u32 %s4160_s22, 4  ;;  %s4093_s26 = int_to_ptr.vmem [resolvable:$false] %s4092_s26 }
 0x8e5   : > { %1882 = vrot.lane.b32.xlu0 %v4411_v43, %s4158_s20 }
 0x8e9   : > { %1880 = vrot.lane.b32.xlu0 %v4417_v46, %s4158_s20 }
 0x950   : > { %v1759_v37 = vpop.xlane.xlu0 %1758 }
 0x951   : > { %v1763_v38 = vsub.f32 %v1755_v28, %v1759_v37 }
 0x953   : > { %v1765_v39 = vmul.f32 1.442695, %v1763_v38 }
 0x954   : > { %v1762_v25 = vpop.xlane.xlu0 %1761 }
 0x955   : > { %4030 = vpow2.f32 %v1765_v39  ;;  %v1764_v40 = vsub.f32 %v1756_v34, %v1762_v25 }
 0x957   : > { %v1767_v41 = vmul.f32 1.442695, %v1764_v40 }
 0x958   : > { %v1777_v42 = vpop.permute.xlu0 %1776 }
 0x959   : > { %4032 = vpow2.f32 %v1767_v41  ;;  %3726 = vmatpush3.bf16.msra.mxu0 %v1777_v42  ;;  %v3908_v41 = vld [vmem:[%s5071_s3 + $0x30] sm:$0xff]  }
 0x95a   : > { %3737 = vmatprep.subr.bf16.mxu0 %v4151_v4 }
 0x95c   : > { %v1883_v49 = vpop.permute.xlu0 %1882 }
 0x95d   : > { %v1888_v52 = vsel %vm831_vm1, %v1883_v49, 0 }
 0x960   : > { %v1881_v53 = vpop.permute.xlu0 %1880 }
 0x962   : > { %v4031_v44 = vpop.eup %4030 }
 0x963   : > { %v1769_v45 = vsel %vm831_vm1, %v4031_v44, 0.0 }
 0x964   : > { %1770 = vadd.xlane.f32.xlu1 %v1769_v45 }
 0x966   : > { %v4033_v48 = vpop.eup %4032 }
 0x967   : > { %v1772_v50 = vsel %vm831_vm1, %v4033_v48, 0.0  ;;  %v1775_v51 = vpack.c.bf16 %v4033_v48, %v4031_v44 }
 0x968   : > { %1773 = vadd.xlane.f32.xlu0 %v1772_v50 }
 0x969   : > { %3728 = vmatmul.mubr.msk.bf16.vlgmr.msra.gmra.mxu0 %vm831_vm1, %v1775_v51 }
 0x96a   : > { %3738 = vmatpush3.bf16.xpose.msra.mxu0 %v1888_v52  ;;  %3739 = vmatprep.mubr.msk.bf16.mxu0 %vm4152_vm0, %v4151_v4 }
 0x96b   : > { %3749 = vmatprep.subr.bf16.mxu0 %v4151_v4 }
 0x971   : > { %3740 = vmatmul.mubr.msk.bf16.vlgmr.msra.gmra.mxu0 %vm831_vm1, %v1881_v53 }
 0x972   : > { %3751 = vmatprep.mubr.msk.bf16.mxu0 %vm4152_vm0, %v4151_v4  ;;  %3750 = vmatpush3.bf16.msra.mxu0 %v3908_v41 }
 0x973   : > { %3761 = vmatprep.subr.bf16.mxu0 %v4151_v4 }
 0x975   : > { %1952 = vrot.lane.b32.xlu1 %v4429_v55, %s4158_s20 }
 0x984   : > { %v1695_v54 = vpop.f32.mrf.mxu0 }
 0x985   : > { %v4585_v56 = vadd.f32 %v1695_v54, %v4554_v8 }
 0x986   : > { %v3717_v57 = vpop.f32.mrf.mxu0 }
 0x988   : > { %v1698_v58 = vpop.f32.mrf.mxu0 }
 0x989   : > { %v4588_v59 = vadd.f32 %v1698_v58, %v4557_v11 }
 0x98a   : > { %v3718_v60 = vpop.f32.mrf.mxu0 }
 0x9ed   : > { %v1771_v62 = vpop.xlane.xlu1 %1770 }
 0x9ee   : > { %4034 = vrcp.f32 %v1771_v62 }
 0x9f1   : > { %v1774_v63 = vpop.xlane.xlu0 %1773  ;;  %v1953_v12 = vpop.permute.xlu1 %1952 }
 0x9f2   : > { %4036 = vrcp.f32 %v1774_v63 }
 0x9fb   : > { %v4035_v3 = vpop.eup %4034 }
 0x9ff   : > { %v4037_v5 = vpop.eup %4036 }
 0xa29   : > { %v1816_v0 = vpop.f32.mrf.mxu0 }
 0xa2a   : > { %v1824_v7 = vmul.f32 %v4035_v3, %v1816_v0 }
 0xa2b   : > { %v3729_v1 = vpop.f32.mrf.mxu0 }
 0xa2d   : > { %v1819_v6 = vpop.f32.mrf.mxu0 }
 0xa2e   : > { %v1826_v8 = vmul.f32 %v4037_v5, %v1819_v6 }
 0xa2f   : > { %v3730_v9 = vpop.f32.mrf.mxu0 }
 0xa30   : > { %v1827_v10 = vpack.c.bf16 %v1826_v8, %v1824_v7 }
 0xa31   : > { %v1924_v11 = vpop.f32.mrf.mxu0 }
 0xa32   : > { %v1931_v13 = vmul.f32 0.25, %v1924_v11  ;;  %3734 = vmatmul.mubr.msk.bf16.vlgmr.msra.gmra.mxu1 %vm831_vm1, %v1827_v10 }
 0xa33   : > { %3744 = vmatpush3.bf16.msra.mxu1 %v1953_v12  ;;  %v3741_v14 = vpop.f32.mrf.mxu0  ;;  %3745 = vmatprep.mubr.msk.bf16.mxu1 %vm4152_vm0, %v4151_v4 }
 0xa34   : > { %v1933_v15 = vsel %vm831_vm1, %v1931_v13, -inf  ;;  %3755 = vmatprep.subr.bf16.mxu1 %v4151_v4 }
 0xa35   : > { %1934 = vmax.xlane.f32.xlu1 %v1933_v15  ;;  %v1927_v16 = vpop.f32.mrf.mxu0 }
 0xa36   : > { %v1932_v17 = vmul.f32 0.25, %v1927_v16 }
 0xa37   : > { %v3742_v19 = vpop.f32.mrf.mxu0 }
 0xa38   : > { %v1936_v20 = vsel %vm831_vm1, %v1932_v17, -inf }
 0xa39   : > { %1937 = vmax.xlane.f32.xlu1 %v1936_v20 }
 0xa4a   : > { %2058 = vrot.lane.b32.xlu1 %v4411_v43, %s4159_s18 }
 0xa4e   : > { %2056 = vrot.lane.b32.xlu1 %v4417_v46, %s4159_s18 }
 0xabe   : > { %v1935_v21 = vpop.xlane.xlu1 %1934 }
 0xabf   : > { %v1939_v22 = vsub.f32 %v1931_v13, %v1935_v21  ;;  %v3909_v21 = vld [vmem:[%s5071_s3 + $0x38] sm:$0xff]  }
 0xac1   : > { %v1941_v23 = vmul.f32 1.442695, %v1939_v22 }
 0xac2   : > { %v1938_v24 = vpop.xlane.xlu1 %1937 }
 0xac3   : > { %4038 = vpow2.f32 %v1941_v23  ;;  %v1940_v26 = vsub.f32 %v1932_v17, %v1938_v24 }
 0xac5   : > { %v1943_v27 = vmul.f32 1.442695, %v1940_v26 }
 0xac6   : > { %v2059_v33 = vpop.permute.xlu1 %2058 }
 0xac7   : > { %4040 = vpow2.f32 %v1943_v27  ;;  %v2064_v46 = vsel %vm831_vm1, %v2059_v33, 0 }
 0xaca   : > { %v2057_v18 = vpop.permute.xlu1 %2056 }
 0xad0   : > { %v4039_v28 = vpop.eup %4038 }
 0xad1   : > { %v1945_v29 = vsel %vm831_vm1, %v4039_v28, 0.0 }
 0xad2   : > { %1946 = vadd.xlane.f32.xlu0 %v1945_v29 }
 0xad4   : > { %v4041_v32 = vpop.eup %4040 }
 0xad5   : > { %v1948_v34 = vsel %vm831_vm1, %v4041_v32, 0.0  ;;  %v1951_v43 = vpack.c.bf16 %v4041_v32, %v4039_v28 }
 0xad6   : > { %1949 = vadd.xlane.f32.xlu1 %v1948_v34 }
 0xad7   : > { %3746 = vmatmul.mubr.msk.bf16.vlgmr.msra.gmra.mxu1 %vm831_vm1, %v1951_v43 }
 0xad8   : > { %3756 = vmatpush3.bf16.xpose.msra.mxu1 %v2064_v46  ;;  %3757 = vmatprep.mubr.msk.bf16.mxu1 %vm4152_vm0, %v4151_v4 }
 0xad9   : > { %3767 = vmatprep.subr.bf16.mxu1 %v4151_v4 }
 0xadf   : > { %3758 = vmatmul.mubr.msk.bf16.vlgmr.msra.gmra.mxu1 %vm831_vm1, %v2057_v18  ;;  %v3408_v18 = vld [vmem:[%s5072_s4] ss:$0 sm:$0xff] }
 0xae0   : > { %3769 = vmatprep.mubr.msk.bf16.mxu1 %vm4152_vm0, %v4151_v4  ;;  %3768 = vmatpush3.bf16.msra.mxu1 %v3909_v21  ;;  %v3946_v21 = vld [vmem:[%s5075_s7 + $0x20] ss:$16 sps:$4 sm:$0xff]  }
 0xaf2   : > { %v1871_v36 = vpop.f32.mrf.mxu1 }
 0xaf3   : > { %v1878_v37 = vadd.f32 %v1871_v36, %v4585_v56 }
 0xaf4   : > { %v3735_v38 = vpop.f32.mrf.mxu1 }
 0xaf6   : > { %v1874_v39 = vpop.f32.mrf.mxu1 }
 0xaf7   : > { %v1879_v25 = vadd.f32 %v1874_v39, %v4588_v59 }
 0xaf8   : > { %v3736_v40 = vpop.f32.mrf.mxu1 }
 0xaf9   : > { %v4086_v40 = vld [vmem:[%s4367_s19] sm:$0xff] }
 0xb5b   : > { %v1947_v42 = vpop.xlane.xlu0 %1946 }
 0xb5c   : > { %4042 = vrcp.f32 %v1947_v42 }
 0xb5f   : > { %v1950_v44 = vpop.xlane.xlu1 %1949 }
 0xb60   : > { %4044 = vrcp.f32 %v1950_v44 }
 0xb69   : > { %v4043_v49 = vpop.eup %4042 }
 0xb6d   : > { %v4045_v50 = vpop.eup %4044 }
 0xb97   : > { %v1992_v45 = vpop.f32.mrf.mxu1 }
 0xb98   : > { %v2000_v52 = vmul.f32 %v4043_v49, %v1992_v45  ;;  %v4087_v45 = vld [vmem:[%s4367_s19 + $0x8] sm:$0xff]  ;;  %v3912_v49 = vld [vmem:[%s5075_s7 + $0xe4] ss:$16 sps:$4 sm:$0xff]   ;;  %s539_s19 = sand.u32 1, %s4140_s25  }
 0xb99   : > { %v3747_v48 = vpop.f32.mrf.mxu1  ;;  %s3349_s27 = sshll.u32 %s539_s19, 4  ;;  %s5028_s28 = scalar_lea.sflag [#allocation3], %s539_s19 }
 0xb9a   : > { %s541_s20 = scalar_lea.vmem [#allocation2], %s3349_s27  ;;  %s4094_s27 = scalar_lea.vmem %s4093_s26, 512 }
 0xb9b   : > { %v1995_v51 = vpop.f32.mrf.mxu1  ;;  %s3283_s30 = sshll.u32 %s541_s20, 4  ;;  %s5024_s30 = int_to_ptr.vmem [resolvable:$true] %s3283_s30 }
 0xb9c   : > { %v2002_v53 = vmul.f32 %v4045_v50, %v1995_v51  ;;  %v3913_v50 = vld [vmem:[%s5075_s7 + $0xe8] ss:$16 sps:$4 sm:$0xff]   ;;  %v3915_v51 = vld [vmem:[%s5075_s7 + $0xec] ss:$16 sps:$4 sm:$0xff]   ;;  %s4088_s21 = scalar_lea.vmem %s5024_s30, 256  ;;  %p4095_p0 = scmp.lt.s32.totalorder %s5024_s30, %s4093_s26 }
 0xb9d   : > { %v3748_v54 = vpop.f32.mrf.mxu1  ;;  %2542 = vmatprep.subr.bf16.mxu1 %v3915_v51  ;;  %v3963_v51 = vld [vmem:[%s5077_s9 + $0xf0] sm:$0xff]   ;;  %p4089_p11 = scmp.ne.s32.totalorder %s5024_s30, %s4088_s21  ;;  %p4096_p1 = scmp.lt.s32.totalorder %s4094_s27, %s4088_s21 }
 0xb9e   : > { %v2003_v56 = vpack.c.bf16 %v2002_v53, %v2000_v52 }
 0xb9f   : > { %v2100_v57 = vpop.f32.mrf.mxu1  ;;  %p4090_p12 = pnand %p4089_p11, %p4291_p5  ;;  %p4097_p2 = por %p4096_p1, %p4095_p0 }
 0xba0   : > { %v2107_v58 = vmul.f32 0.25, %v2100_v57  ;;  %3752 = vmatmul.mubr.msk.bf16.vlgmr.msra.gmra.mxu0 %vm831_vm1, %v2003_v56 }
 0xba1   : > { %v3759_v59 = vpop.f32.mrf.mxu1  ;;  %3763 = vmatprep.mubr.msk.bf16.mxu0 %vm4152_vm0, %v4151_v4  ;;  %p4091_p13 = pneg %p4090_p12 }
 0xba2   : > { %v2109_v60 = vsel %vm831_vm1, %v2107_v58, -inf }
 0xba3   : > { %2110 = vmax.xlane.f32.xlu0 %v2109_v60  ;;  %v2103_v61 = vpop.f32.mrf.mxu1  ;;  %p4098_p3 = pnand %p4097_p2, %p4091_p13 }
 0xba4   : > { %v2108_v62 = vmul.f32 0.25, %v2103_v61  ;;  %v3918_v61 = vld [vmem:[%s5075_s7 + $0xc4] ss:$16 sps:$4 sm:$0xff]  }
 0xba5   : > { %v3760_v63 = vpop.f32.mrf.mxu1 }
 0xba6   : > { %v2112_v0 = vsel %vm831_vm1, %v2108_v62, -inf  ;;  %v3916_v63 = vld [vmem:[%s5075_s7 + $0xc0] ss:$16 sps:$4 sm:$0xff]  }
 0xba7   : > { %2113 = vmax.xlane.f32.xlu0 %v2112_v0  ;;  %v3919_v0 = vld [vmem:[%s5075_s7 + $0xc8] ss:$16 sps:$4 sm:$0xff]  }
 0xbbd   : > { %2128 = vrot.lane.b32.xlu0 %v4429_v55, %s4159_s18 }
 0xc2c   : > { %v2111_v1 = vpop.xlane.xlu0 %2110 }
 0xc2d   : > { %v2115_v3 = vsub.f32 %v2107_v58, %v2111_v1  ;;  %v3924_v1 = vld [vmem:[%s5075_s7 + $0xa4] ss:$16 sps:$4 sm:$0xff]  }
 0xc2f   : > { %v2117_v5 = vmul.f32 1.442695, %v2115_v3  ;;  %v3927_v3 = vld [vmem:[%s5075_s7 + $0xac] ss:$16 sps:$4 sm:$0xff]  }
 0xc30   : > { %v2114_v6 = vpop.xlane.xlu0 %2113 }
 0xc31   : > { %4046 = vpow2.f32 %v2117_v5  ;;  %v2116_v7 = vsub.f32 %v2108_v62, %v2114_v6  ;;  %v3921_v62 = vld [vmem:[%s5075_s7 + $0xcc] ss:$16 sps:$4 sm:$0xff]   ;;  %v3922_v5 = vld [vmem:[%s5075_s7 + $0xa0] ss:$16 sps:$4 sm:$0xff]   ;;  %v3925_v6 = vld [vmem:[%s5075_s7 + $0xa8] ss:$16 sps:$4 sm:$0xff]  }
 0xc33   : > { %v2119_v8 = vmul.f32 1.442695, %v2116_v7  ;;  %v3928_v7 = vld [vmem:[%s5075_s7 + $0x80] ss:$16 sps:$4 sm:$0xff]  }
 0xc34   : > { %v2129_v9 = vpop.permute.xlu0 %2128 }
 0xc35   : > { %4048 = vpow2.f32 %v2119_v8  ;;  %3762 = vmatpush3.bf16.msra.mxu0 %v2129_v9  ;;  %v3930_v8 = vld [vmem:[%s5075_s7 + $0x84] ss:$16 sps:$4 sm:$0xff]   ;;  %v3931_v9 = vld [vmem:[%s5075_s7 + $0x88] ss:$16 sps:$4 sm:$0xff]  }
 0xc36   : > { %2499 = vmatprep.subr.bf16.mxu0 %v3912_v49  ;;  %v3961_v49 = vld [vmem:[%s5077_s9 + $0xb8] sm:$0xff]  }
 0xc3e   : > { %v4047_v10 = vpop.eup %4046 }
 0xc3f   : > { %v2121_v11 = vsel %vm831_vm1, %v4047_v10, 0.0 }
 0xc40   : > { %2122 = vadd.xlane.f32.xlu0 %v2121_v11  ;;  %v3936_v11 = vld [vmem:[%s5075_s7 + $0x64] ss:$16 sps:$4 sm:$0xff]  }
 0xc42   : > { %v4049_v12 = vpop.eup %4048 }
 0xc43   : > { %v2124_v13 = vsel %vm831_vm1, %v4049_v12, 0.0  ;;  %v2127_v14 = vpack.c.bf16 %v4049_v12, %v4047_v10  ;;  %v3933_v10 = vld [vmem:[%s5075_s7 + $0x8c] ss:$16 sps:$4 sm:$0xff]  }
 0xc44   : > { %2125 = vadd.xlane.f32.xlu1 %v2124_v13  ;;  %v3939_v12 = vld [vmem:[%s5075_s7 + $0x6c] ss:$16 sps:$4 sm:$0xff]   ;;  %v3934_v13 = vld [vmem:[%s5075_s7 + $0x60] ss:$16 sps:$4 sm:$0xff]  }
 0xc45   : > { %3764 = vmatmul.mubr.msk.bf16.vlgmr.msra.gmra.mxu0 %vm831_vm1, %v2127_v14  ;;  %v3937_v14 = vld [vmem:[%s5075_s7 + $0x68] ss:$16 sps:$4 sm:$0xff]  }
 0xc46   : > { %2531 = vmatprep.mubr.bf16.mxu0 %v4150_v2 }
 0xc60   : > { %v2047_v55 = vpop.f32.mrf.mxu0 }
 0xc61   : > { %v2054_v15 = vadd.f32 %v2047_v55, %v1878_v37  ;;  %v3942_v55 = vld [vmem:[%s5075_s7 + $0x44] ss:$16 sps:$4 sm:$0xff]  }
 0xc62   : > { %v3753_v16 = vpop.f32.mrf.mxu0 }
 0xc63   : > { %v3940_v16 = vld [vmem:[%s5075_s7 + $0x40] ss:$16 sps:$4 sm:$0xff]  }
 0xc64   : > { %v2050_v17 = vpop.f32.mrf.mxu0 }
 0xc65   : > { %v2055_v19 = vadd.f32 %v2050_v17, %v1879_v25  ;;  %v3943_v17 = vld [vmem:[%s5075_s7 + $0x48] ss:$16 sps:$4 sm:$0xff]  }
 0xc66   : > { %v3754_v20 = vpop.f32.mrf.mxu0 }
 0xc67   : > { %v3951_v20 = vld [vmem:[%s5075_s7 + $0x2c] ss:$16 sps:$4 sm:$0xff]  }
 0xcc9   : > { %v2123_v22 = vpop.xlane.xlu0 %2122 }
 0xcca   : > { %4050 = vrcp.f32 %v2123_v22  ;;  %v3949_v22 = vld [vmem:[%s5075_s7 + $0x28] ss:$16 sps:$4 sm:$0xff]  }
 0xccd   : > { %v2126_v23 = vpop.xlane.xlu1 %2125 }
 0xcce   : > { %4052 = vrcp.f32 %v2126_v23  ;;  %v3954_v23 = vld [vmem:[%s5075_s7 + $0x4] ss:$16 sps:$4 sm:$0xff]  }
 0xcd7   : > { %v4051_v27 = vpop.eup %4050 }
 0xcdb   : > { %v4053_v28 = vpop.eup %4052 }
 0xd05   : > { %v2168_v24 = vpop.f32.mrf.mxu0 }
 0xd06   : > { %v2176_v32 = vmul.f32 %v4051_v27, %v2168_v24  ;;  %v3957_v24 = vld [vmem:[%s5075_s7 + $0xc] ss:$16 sps:$4 sm:$0xff]   ;;  %v3955_v27 = vld [vmem:[%s5075_s7 + $0x8] ss:$16 sps:$4 sm:$0xff]  }
 0xd07   : > { %v3765_v26 = vpop.f32.mrf.mxu0 }
 0xd08   : > { %v3952_v26 = vld [vmem:[%s5075_s7] ss:$16 sps:$4 sm:$0xff]  }
 0xd09   : > { %v2171_v29 = vpop.f32.mrf.mxu0 }
 0xd0a   : > { %v2178_v33 = vmul.f32 %v4053_v28, %v2171_v29 }
 0xd0b   : > { %v3766_v34 = vpop.f32.mrf.mxu0 }
 0xd0c   : > { %v2179_v43 = vpack.c.bf16 %v2178_v33, %v2176_v32 }
 0xd0e   : > { %3770 = vmatmul.mubr.msk.bf16.vlgmr.msra.gmra.mxu1 %vm831_vm1, %v2179_v43 }
 0xd0f   : > { %2574 = vmatprep.mubr.bf16.mxu1 %v4150_v2  ;;  %v3910_v2 = vld [vmem:[%s5075_s7 + $0xe0] ss:$16 sps:$4 sm:$0xff]   ;;  %2543 = vmatpush1.bf16.msra.mxu1 %v3913_v50 }
 0xd10   : > { %2500 = vmatpush1.bf16.msra.mxu0 %v3910_v2  ;;  %2544 = vmatprep.subr.bf16.mxu1 %v3921_v62  ;;  %v3960_v2 = vld [vmem:[%s5077_s9 + $0x38] sm:$0xff]   ;;  %v3962_v50 = vld [vmem:[%s5077_s9 + $0x70] sm:$0xff]   ;;  %v3973_v62 = vld [vmem:[%s5077_s9 + $0xa0] sm:$0xff]  }
 0xd11   : > { %2501 = vmatprep.subr.bf16.mxu0 %v3918_v61  ;;  %v3972_v61 = vld [vmem:[%s5077_s9 + $0x20] sm:$0xff]  }
 0xd13   : > { %2545 = vmatpush1.bf16.msra.mxu1 %v3919_v0  ;;  %v3975_v0 = vld [vmem:[%s5077_s9 + $0xd8] sm:$0xff]  }
 0xd14   : > { %2502 = vmatpush1.bf16.msra.mxu0 %v3916_v63  ;;  %2546 = vmatprep.subr.bf16.mxu1 %v3927_v3  ;;  %v3974_v63 = vld [vmem:[%s5077_s9 + $0x58] sm:$0xff]  }
 0xd15   : > { %2503 = vmatprep.subr.bf16.mxu0 %v3924_v1  ;;  %v3976_v1 = vld [vmem:[%s5077_s9 + $0x18] sm:$0xff]  }
 0xd16   : > { %v3977_v3 = vld [vmem:[%s5077_s9 + $0x98] sm:$0xff]  }
 0xd17   : > { %2547 = vmatpush1.bf16.msra.mxu1 %v3925_v6  ;;  %v3979_v6 = vld [vmem:[%s5077_s9 + $0xd0] sm:$0xff]  }
 0xd18   : > { %2504 = vmatpush1.bf16.msra.mxu0 %v3922_v5  ;;  %2548 = vmatprep.subr.bf16.mxu1 %v3933_v10  ;;  %v3978_v5 = vld [vmem:[%s5077_s9 + $0x50] sm:$0xff]   ;;  %v3983_v10 = vld [vmem:[%s5077_s9 + $0xc8] sm:$0xff]  }
 0xd19   : > { %2505 = vmatprep.subr.bf16.mxu0 %v3930_v8  ;;  %v3981_v8 = vld [vmem:[%s5077_s9 + $0x90] sm:$0xff]  }
 0xd1b   : > { %2549 = vmatpush1.bf16.msra.mxu1 %v3931_v9  ;;  %v3982_v9 = vld [vmem:[%s5077_s9 + $0x48] sm:$0xff]  }
 0xd1c   : > { %2506 = vmatpush1.bf16.msra.mxu0 %v3928_v7  ;;  %2550 = vmatprep.subr.bf16.mxu1 %v3939_v12  ;;  %v3980_v7 = vld [vmem:[%s5077_s9 + $0x10] sm:$0xff]   ;;  %v3985_v12 = vld [vmem:[%s5077_s9 + $0x88] sm:$0xff]  }
 0xd1d   : > { %2507 = vmatprep.subr.bf16.mxu0 %v3936_v11  ;;  %v3984_v11 = vld [vmem:[%s5077_s9 + $0x8] sm:$0xff]  }
 0xd1f   : > { %2551 = vmatpush1.bf16.msra.mxu1 %v3937_v14  ;;  %v3987_v14 = vld [vmem:[%s5077_s9 + $0xc0] sm:$0xff]  }
 0xd20   : > { %2508 = vmatpush1.bf16.msra.mxu0 %v3934_v13  ;;  %v3986_v13 = vld [vmem:[%s5077_s9 + $0x40] sm:$0xff]  }
 0xd21   : > { %2509 = vmatprep.subr.bf16.mxu0 %v3942_v55  ;;  %v3988_v55 = vld [vmem:[%s5077_s9] sm:$0xff]  }
 0xd24   : > { %2510 = vmatpush1.bf16.msra.mxu0 %v3940_v16  ;;  %v2317_v16 = vld [vmem:[%s5076_s8] sm:$0xf] }
 0xdce   : > { %v2223_v46 = vpop.f32.mrf.mxu1 }
 0xdcf   : > { %v2230_v36 = vadd.f32 %v2223_v46, %v2054_v15  ;;  %v3945_v15 = vld [vmem:[%s5075_s7 + $0x4c] ss:$16 sps:$4 sm:$0xff]  }
 0xdd0   : > { %v3771_v37 = vpop.f32.mrf.mxu1  ;;  %2552 = vmatprep.subr.bf16.mxu1 %v3945_v15  ;;  %v3989_v15 = vld [vmem:[%s5077_s9 + $0x80] sm:$0xff]  }
 0xdd1   : > { %v2239_v38 = vadd.f32 %v3408_v18, %v2230_v36  ;;  %2553 = vmatpush1.bf16.msra.mxu1 %v3943_v17  ;;  %v3409_v36 = vld [vmem:[%s5073_s5] ss:$0 sm:$0xff]  ;;  %v2333_v17 = vsub.s32 3, %v4399_v30 }
 0xdd2   : > { %v2226_v39 = vpop.f32.mrf.mxu1  ;;  %2554 = vmatprep.subr.bf16.mxu1 %v3951_v20  ;;  %v2330_v20 = vrot.slane %v2317_v16, %v595_v47 }
 0xdd3   : > { %v2231_v25 = vadd.f32 %v2226_v39, %v2055_v19  ;;  %v2241_v41 = vadd.f32 %v4086_v40, %v2239_v38  ;;  %v3948_v19 = vld [vmem:[%s5075_s7 + $0x24] ss:$16 sps:$4 sm:$0xff]  }
 0xdd4   : > { %v3772_v42 = vpop.f32.mrf.mxu1  ;;  %2511 = vmatprep.subr.bf16.mxu0 %v3948_v19  ;;  %v2322_v19 = vrot.slane %v2317_v16, %v4406_v35 }
 0xdd5   : > { %v2240_v44 = vadd.f32 %v3408_v18, %v2231_v25  ;;  %2243 = vadd.xlane.f32.xlu1 %v2241_v41  ;;  %2512 = vmatpush1.bf16.msra.mxu0 %v3946_v21  ;;  %v3410_v25 = vld [vmem:[%s5074_s6] ss:$0 sm:$0xff] }
 0xdd6   : > { %2555 = vmatpush1.bf16.msra.mxu1 %v3949_v22  ;;  %2513 = vmatprep.subr.bf16.mxu0 %v3954_v23  ;;  %v2326_v23 = vrot.slane %v2317_v16, %v591_v31 }
 0xdd7   : > { %v2242_v48 = vadd.f32 %v4087_v45, %v2240_v44  ;;  %2556 = vmatprep.subr.bf16.mxu1 %v3957_v24  ;;  %v3958_v45 = vld [vmem:[%s5077_s9 + $0x78] sm:$0xff]   ;;  %v2334_v24 = vrot.slane %v2317_v16, %v2333_v17 }
 0xdd9   : > { %2245 = vadd.xlane.f32.xlu1 %v2242_v48  ;;  %2514 = vmatpush1.bf16.msra.mxu0 %v3952_v26 }
 0xdda   : > { %2557 = vmatpush1.bf16.msra.mxu1 %v3955_v27  ;;  %3543 = vmatprep.subr.bf16.mxu0 %v3958_v45 }
 0xe5e   : > { %v2244_v52 = vpop.xlane.xlu1 %2243 }
 0xe5f   : > { %v2248_v53 = vmul.f32 0.0078125, %v2244_v52  ;;  %v3964_v52 = vld [vmem:[%s5077_s9 + $0x30] sm:$0xff]  }
 0xe61   : > { %v4653_v54 = vsub.f32 %v2241_v41, %v2248_v53  ;;  %v3965_v53 = vld [vmem:[%s5077_s9 + $0xb0] sm:$0xff]  }
 0xe62   : > { %v2246_v56 = vpop.xlane.xlu1 %2245 }
 0xe63   : > { %v2249_v57 = vmul.f32 0.0078125, %v2246_v56  ;;  %v2252_v58 = vmul.f32 %v4653_v54, %v4653_v54  ;;  %v3967_v56 = vld [vmem:[%s5077_s9 + $0xe8] sm:$0xff]  }
 0xe65   : > { %v4657_v59 = vsub.f32 %v2242_v48, %v2249_v57  ;;  %2254 = vadd.xlane.f32.xlu1 %v2252_v58  ;;  %v3959_v48 = vld [vmem:[%s5077_s9 + $0xf8] sm:$0xff]   ;;  %v3968_v57 = vld [vmem:[%s5077_s9 + $0x28] sm:$0xff]  }
 0xe66   : > { %3565 = vmatprep.subr.bf16.mxu1 %v3959_v48  ;;  %v3969_v58 = vld [vmem:[%s5077_s9 + $0xa8] sm:$0xff]  }
 0xe67   : > { %v2253_v60 = vmul.f32 %v4657_v59, %v4657_v59 }
 0xe69   : > { %2256 = vadd.xlane.f32.xlu1 %v2253_v60  ;;  %v3971_v60 = vld [vmem:[%s5077_s9 + $0xe0] sm:$0xff]  }
 0xeee   : > { %v2255_v28 = vpop.xlane.xlu1 %2254 }
 0xeef   : > { %v2258_v29 = vmul.f32 0.0078125, %v2255_v28 }
 0xef1   : > { %v2260_v32 = vadd.f32 1e-06, %v2258_v29 }
 0xef2   : > { %v2257_v33 = vpop.xlane.xlu1 %2256 }
 0xef3   : > { %4054 = vrsqrt.f32 %v2260_v32  ;;  %v2259_v34 = vmul.f32 0.0078125, %v2257_v33 }
 0xef5   : > { %v2261_v43 = vadd.f32 1e-06, %v2259_v34 }
 0xef7   : > { %4056 = vrsqrt.f32 %v2261_v43 }
 0xf00   : > { %v4055_v46 = vpop.eup %4054 }
 0xf01   : > { %v2264_v18 = vmul.f32 %v4055_v46, %v4653_v54  ;;  %v3966_v54 = vld [vmem:[%s5077_s9 + $0x68] sm:$0xff]  }
 0xf03   : > { %v2273_v39 = vmul.f32 %v3409_v36, %v2264_v18 }
 0xf04   : > { %v4057_v37 = vpop.eup %4056 }
 0xf05   : > { %v2265_v38 = vmul.f32 %v4057_v37, %v4657_v59  ;;  %v4753_v41 = vadd.f32 %v3410_v25, %v2273_v39  ;;  %v3970_v59 = vld [vmem:[%s5077_s9 + $0x60] sm:$0xff]  }
 0xf07   : > { %v2274_v40 = vmul.f32 %v3409_v36, %v2265_v38 }
 0xf09   : > { %v4755_v42 = vadd.f32 %v3410_v25, %v2274_v40 }
 0xf0b   : > { %v2284_v44 = vpack.c.bf16 %v4755_v42, %v4753_v41 }
 0xf0d   : > { %2532 = vmatmul.mubr.bf16.vlgmr.msra.gmra.mxu0 %v2284_v44  ;;  %2575 = vmatmul.mubr.bf16.vlgmr.msra.gmra.mxu1 %v2284_v44 }
 0xf0e   : > { %3544 = vmatpush3.bf16.msra.mxu0 %v3960_v2  ;;  %3566 = vmatpush3.bf16.msra.mxu1 %v3961_v49 }
 0xf0f   : > { %3545 = vmatprep.subr.bf16.mxu0 %v3962_v50  ;;  %3567 = vmatprep.subr.bf16.mxu1 %v3963_v51 }
 0xf12   : > { %3546 = vmatpush3.bf16.msra.mxu0 %v3964_v52  ;;  %3568 = vmatpush3.bf16.msra.mxu1 %v3965_v53 }
 0xf13   : > { %3547 = vmatprep.subr.bf16.mxu0 %v3966_v54  ;;  %3569 = vmatprep.subr.bf16.mxu1 %v3967_v56 }
 0xf16   : > { %3548 = vmatpush3.bf16.msra.mxu0 %v3968_v57  ;;  %3570 = vmatpush3.bf16.msra.mxu1 %v3969_v58 }
 0xf17   : > { %3549 = vmatprep.subr.bf16.mxu0 %v3970_v59  ;;  %3571 = vmatprep.subr.bf16.mxu1 %v3971_v60 }
 0xf1a   : > { %3550 = vmatpush3.bf16.msra.mxu0 %v3972_v61  ;;  %3572 = vmatpush3.bf16.msra.mxu1 %v3973_v62 }
 0xf1b   : > { %3551 = vmatprep.subr.bf16.mxu0 %v3974_v63  ;;  %3573 = vmatprep.subr.bf16.mxu1 %v3975_v0 }
 0xf1e   : > { %3552 = vmatpush3.bf16.msra.mxu0 %v3976_v1  ;;  %3574 = vmatpush3.bf16.msra.mxu1 %v3977_v3 }
 0xf1f   : > { %3553 = vmatprep.subr.bf16.mxu0 %v3978_v5  ;;  %3575 = vmatprep.subr.bf16.mxu1 %v3979_v6 }
 0xf22   : > { %3554 = vmatpush3.bf16.msra.mxu0 %v3980_v7  ;;  %3576 = vmatpush3.bf16.msra.mxu1 %v3981_v8 }
 0xf23   : > { %3555 = vmatprep.subr.bf16.mxu0 %v3982_v9  ;;  %3577 = vmatprep.subr.bf16.mxu1 %v3983_v10 }
 0xf26   : > { %3556 = vmatpush3.bf16.msra.mxu0 %v3984_v11  ;;  %3578 = vmatpush3.bf16.msra.mxu1 %v3985_v12 }
 0xf27   : > { %3557 = vmatprep.subr.bf16.mxu0 %v3986_v13  ;;  %3579 = vmatprep.subr.bf16.mxu1 %v3987_v14 }
 0xf2a   : > { %3558 = vmatpush3.bf16.msra.mxu0 %v3988_v55  ;;  %3580 = vmatpush3.bf16.msra.mxu1 %v3989_v15 }
 0xf2b   : > { %3773 = vmatprep.subr.mxu0 %v4151_v4  ;;  %3808 = vmatprep.subr.mxu1 %v4151_v4 }
 0xfcd   : > { %v2533_v21 = vpop.f32.mrf.mxu0  ;;  %v2576_v22 = vpop.f32.mrf.mxu1 }
 0xfce   : > { %v4866_v26 = vadd.f32 %v2533_v21, %v2322_v19  ;;  %v4868_v27 = vadd.f32 %v2576_v22, %v2330_v20 }
 0xfcf   : > { %v2535_v28 = vpop.f32.mrf.mxu0  ;;  %v2578_v29 = vpop.f32.mrf.mxu1 }
 0xfd0   : > { %v2593_v32 = vmul.f32 %v4866_v26, %v4866_v26  ;;  %v2595_v33 = vmul.f32 %v4868_v27, %v4868_v27  ;;  %v4874_v34 = vadd.f32 %v2535_v28, %v2326_v23  ;;  %v4876_v47 = vadd.f32 %v2578_v29, %v2334_v24 }
 0xfd1   : > { %v2537_v43 = vpop.f32.mrf.mxu0  ;;  %v2580_v30 = vpop.f32.mrf.mxu1 }
 0xfd2   : > { %v2601_v31 = vmul.f32 %v2593_v32, %v4866_v26  ;;  %v2603_v46 = vmul.f32 %v2595_v33, %v4868_v27  ;;  %v2538_v18 = vadd.f32 %v2537_v43, %v2322_v19  ;;  %v4880_v36 = vadd.f32 %v2580_v30, %v2330_v20 }
 0xfd3   : > { %v2594_v37 = vmul.f32 %v4874_v34, %v4874_v34  ;;  %v2596_v38 = vmul.f32 %v4876_v47, %v4876_v47  ;;  %v2539_v39 = vpop.f32.mrf.mxu0  ;;  %v2582_v45 = vpop.f32.mrf.mxu1  ;;  %v2585_v33 = vmul.f32 0.5, %v4866_v26 }
 0xfd4   : > { %v2609_v25 = vmul.f32 0.044715, %v2601_v31  ;;  %v2611_v40 = vmul.f32 0.044715, %v2603_v46  ;;  %v2597_v44 = vmul.f32 %v2538_v18, %v2538_v18  ;;  %v2599_v49 = vmul.f32 %v4880_v36, %v4880_v36 }
 0xfd5   : > { %v2602_v48 = vmul.f32 %v2594_v37, %v4874_v34  ;;  %v2604_v2 = vmul.f32 %v2596_v38, %v4876_v47  ;;  %v2540_v52 = vadd.f32 %v2539_v39, %v2326_v23  ;;  %v2583_v57 = vadd.f32 %v2582_v45, %v2334_v24 }
 0xfd6   : > { %v2617_v50 = vadd.f32 %v2609_v25, %v4866_v26  ;;  %v2605_v51 = vmul.f32 %v2597_v44, %v2538_v18  ;;  %v2607_v56 = vmul.f32 %v2599_v49, %v4880_v36  ;;  %v2619_v59 = vadd.f32 %v2611_v40, %v4868_v27 }
 0xfd7   : > { %v2610_v53 = vmul.f32 0.044715, %v2602_v48  ;;  %v2612_v54 = vmul.f32 0.044715, %v2604_v2  ;;  %v2598_v61 = vmul.f32 %v2540_v52, %v2540_v52  ;;  %v2600_v1 = vmul.f32 %v2583_v57, %v2583_v57 }
 0xfd8   : > { %v2625_v58 = vmul.f32 0.7978846, %v2617_v50  ;;  %v2613_v60 = vmul.f32 0.044715, %v2605_v51  ;;  %v2615_v0 = vmul.f32 0.044715, %v2607_v56 }
 0xfd9   : > { %v2618_v62 = vadd.f32 %v2610_v53, %v4874_v34  ;;  %v2620_v63 = vadd.f32 %v2612_v54, %v4876_v47  ;;  %v2606_v5 = vmul.f32 %v2598_v61, %v2540_v52  ;;  %v2608_v11 = vmul.f32 %v2600_v1, %v2583_v57 }
 0xfda   : > { %v2621_v3 = vadd.f32 %v2613_v60, %v2538_v18  ;;  %v2623_v8 = vadd.f32 %v2615_v0, %v4880_v36  ;;  %4058 = vtanh.f32 %v2625_v58  ;;  %v2627_v12 = vmul.f32 0.7978846, %v2619_v59 }
 0xfdb   : > { %v2626_v6 = vmul.f32 0.7978846, %v2618_v62  ;;  %v2628_v7 = vmul.f32 0.7978846, %v2620_v63  ;;  %v2614_v10 = vmul.f32 0.044715, %v2606_v5 }
 0xfdc   : > { %v2629_v9 = vmul.f32 0.7978846, %v2621_v3  ;;  %v2631_v13 = vmul.f32 0.7978846, %v2623_v8  ;;  %v2616_v55 = vmul.f32 0.044715, %v2608_v11 }
 0xfdd   : > { %4060 = vtanh.f32 %v2626_v6  ;;  %v2622_v14 = vadd.f32 %v2614_v10, %v2540_v52  ;;  %v2589_v43 = vmul.f32 0.5, %v2538_v18  ;;  %v2586_v46 = vmul.f32 0.5, %v4874_v34 }
 0xfde   : > { %4062 = vtanh.f32 %v2628_v7  ;;  %v2624_v16 = vadd.f32 %v2616_v55, %v2583_v57  ;;  %v2590_v37 = vmul.f32 0.5, %v2540_v52  ;;  %v2591_v40 = vmul.f32 0.5, %v4880_v36 }
 0xfdf   : > { %4064 = vtanh.f32 %v2629_v9  ;;  %v2630_v15 = vmul.f32 0.7978846, %v2622_v14  ;;  %v2588_v44 = vmul.f32 0.5, %v4876_v47  ;;  %v2592_v50 = vmul.f32 0.5, %v2583_v57  ;;  %v3443_v57 = vld [vmem:[%s5078_s10] ss:$0 sm:$0xff] }
 0xfe0   : > { %4066 = vtanh.f32 %v2631_v13  ;;  %v2632_v17 = vmul.f32 0.7978846, %v2624_v16  ;;  %v2587_v26 = vmul.f32 0.5, %v4868_v27 }
 0xfe1   : > { %4068 = vtanh.f32 %v2627_v12 }
 0xfe2   : > { %4070 = vtanh.f32 %v2630_v15 }
 0xfe3   : > { %4072 = vtanh.f32 %v2632_v17 }
 0xfe7   : > { %v4059_v19 = vpop.eup %4058 }
 0xfe8   : > { %v2641_v30 = vadd.f32 1.0, %v4059_v19 }
 0xfea   : > { %v4061_v20 = vpop.eup %4060  ;;  %v2649_v18 = vmul.f32 %v2641_v30, %v2585_v33  ;;  %v3065_v33 = vld [vmem:[%s5081_s13 + $0x38] sm:$0xff]  ;;  %v3063_v30 = vld [vmem:[%s5081_s13 + $0x28] sm:$0xff] }
 0xfeb   : > { %v4063_v21 = vpop.eup %4062  ;;  %v2642_v29 = vadd.f32 1.0, %v4061_v20 }
 0xfec   : > { %v4065_v22 = vpop.eup %4064  ;;  %v2644_v39 = vadd.f32 1.0, %v4063_v21  ;;  %v3072_v21 = vld [vmem:[%s5081_s13 + $0x70] sm:$0xff] }
 0xfed   : > { %v4067_v23 = vpop.eup %4066  ;;  %v2645_v24 = vadd.f32 1.0, %v4065_v22  ;;  %v2650_v2 = vmul.f32 %v2642_v29, %v2586_v46  ;;  %v3071_v22 = vld [vmem:[%s5081_s13 + $0x68] sm:$0xff]  ;;  %v3061_v46 = vld [vmem:[%s5081_s13 + $0x18] sm:$0xff] }
 0xfee   : > { %v4069_v28 = vpop.eup %4068  ;;  %v2647_v31 = vadd.f32 1.0, %v4067_v23  ;;  %v2652_v34 = vmul.f32 %v2644_v39, %v2588_v44  ;;  %v3070_v23 = vld [vmem:[%s5081_s13 + $0x60] sm:$0xff]  ;;  %v3067_v29 = vld [vmem:[%s5081_s13 + $0x48] sm:$0xff] }
 0xfef   : > { %v4071_v32 = vpop.eup %4070  ;;  %v2653_v45 = vmul.f32 %v2645_v24, %v2589_v43  ;;  %v2643_v48 = vadd.f32 1.0, %v4069_v28  ;;  %v3069_v24 = vld [vmem:[%s5081_s13 + $0x58] sm:$0xff]  ;;  %v3068_v28 = vld [vmem:[%s5081_s13 + $0x50] sm:$0xff]  ;;  %v3058_v39 = vld [vmem:[%s5081_s13] sm:$0xff] }
 0xff0   : > { %v2646_v38 = vadd.f32 1.0, %v4071_v32  ;;  %v4073_v25 = vpop.eup %4072  ;;  %v2655_v53 = vmul.f32 %v2647_v31, %v2591_v40  ;;  %v3066_v32 = vld [vmem:[%s5081_s13 + $0x40] sm:$0xff]  ;;  %v3064_v43 = vld [vmem:[%s5081_s13 + $0x30] sm:$0xff] }
 0xff1   : > { %v2648_v51 = vadd.f32 1.0, %v4073_v25  ;;  %v2657_v56 = vpack.c.bf16 %v2653_v45, %v2649_v18  ;;  %v2651_v58 = vmul.f32 %v2643_v48, %v2587_v26  ;;  %v3062_v31 = vld [vmem:[%s5081_s13 + $0x20] sm:$0xff] }
 0xff2   : > { %v2654_v49 = vmul.f32 %v2646_v38, %v2590_v37  ;;  %v3060_v37 = vld [vmem:[%s5081_s13 + $0x10] sm:$0xff]  ;;  %v3059_v38 = vld [vmem:[%s5081_s13 + $0x8] sm:$0xff] }
 0xff3   : > { %v2656_v52 = vmul.f32 %v2648_v51, %v2592_v50  ;;  %v2659_v36 = vpack.c.bf16 %v2655_v53, %v2651_v58  ;;  %v3476_v51 = vld [vmem:[%s5079_s11] ss:$0 sm:$0xff] }
 0xff4   : > { %v2658_v54 = vpack.c.bf16 %v2654_v49, %v2650_v2 }
 0xff5   : > { %v2660_v59 = vpack.c.bf16 %v2656_v52, %v2652_v34 }
 0xff6   : > { %2956 = vmatprep.mubr.bf16.mxu0 %v2658_v54  ;;  %v3477_v54 = vld [vmem:[%s5080_s12] ss:$0 sm:$0xff] }
 0xff7   : > { %2957 = vmatmul.mubr.bf16.vlgmr.msra.gmra.mxu0 %v2657_v56  ;;  %2997 = vmatprep.mubr.bf16.mxu1 %v2660_v59 }
 0xff8   : > { %3805 = vmatprep.mubr.msk.f32.mxu0 %vm4152_vm0, %v4151_v4  ;;  %2998 = vmatmul.mubr.bf16.vlgmr.msra.gmra.mxu1 %v2659_v36 }
 0xff9   : > { %3816 = vmatprep.mubr.msk.f32.mxu1 %vm4152_vm0, %v4151_v4 }
0x10b7   : > { %v3559_v27 = vpop.f32.mrf.mxu0 }
0x10b8   : > { %v3581_v47 = vpop.f32.mrf.mxu1 }
0x10b9   : > { %v3560_v60 = vpop.f32.mrf.mxu0 }
0x10ba   : > { %v3561_v61 = vadd.f32 %v3560_v60, %v3559_v27  ;;  %v3582_v62 = vpop.f32.mrf.mxu1 }
0x10bb   : > { %v3562_v63 = vpop.f32.mrf.mxu0  ;;  %v3583_v1 = vadd.f32 %v3582_v62, %v3581_v47  ;;  %v3179_v62 = vld [vmem:[%s5083_s15 + $0x18] sm:$0xff] }
0x10bc   : > { %v2959_v0 = vadd.f32 %v3561_v61, %v3443_v57  ;;  %v3584_v3 = vpop.f32.mrf.mxu1  ;;  %3809 = vmatpush3.msra.mxu1 %v3179_v62 }
0x10bd   : > { %v3563_v5 = vpop.f32.mrf.mxu0  ;;  %3810 = vmatprep.subr.mxu1 %v4151_v4 }
0x10be   : > { %v3000_v6 = vadd.f32 %v3583_v1, %v2959_v0  ;;  %v3564_v7 = vadd.f32 %v3563_v5, %v3562_v63  ;;  %v3585_v8 = vpop.f32.mrf.mxu1  ;;  %v3178_v63 = vld [vmem:[%s5083_s15 + $0x10] sm:$0xff]  ;;  %v3177_v0 = vld [vmem:[%s5083_s15 + $0x8] sm:$0xff]  ;;  %v3176_v1 = vld [vmem:[%s5083_s15] sm:$0xff] }
0x10bf   : > { %v3586_v10 = vadd.f32 %v3585_v8, %v3584_v3  ;;  %3811 = vmatpush3.msra.mxu1 %v3178_v63  ;;  %v3048_v3 = vld [vmem:[%s5082_s14] sm:$0x1f] }
0x10c0   : > { %v2962_v9 = vadd.f32 %v3564_v7, %v3443_v57  ;;  %v3006_v11 = vadd.f32 %v3000_v6, %v4753_v41  ;;  %3812 = vmatprep.subr.mxu1 %v4151_v4  ;;  %v3146_v5 = vrot.slane %v3048_v3, 1 }
0x10c1   : > { %3813 = vmatpush3.msra.mxu1 %v3177_v0 }
0x10c2   : > { %v3003_v12 = vadd.f32 %v3586_v10, %v2962_v9  ;;  %3008 = vadd.xlane.f32.xlu1 %v3006_v11  ;;  %3814 = vmatprep.subr.mxu1 %v4151_v4 }
0x10c3   : > { %3815 = vmatpush3.msra.mxu1 %v3176_v1 }
0x10c4   : > { %v3007_v13 = vadd.f32 %v3003_v12, %v4755_v42  ;;  %v3073_v42 = vld [vmem:[%s5081_s13 + $0x78] sm:$0xff] }
0x10c5   : > { %3774 = vmatpush3.msra.mxu0 %v3073_v42 }
0x10c6   : > { %3010 = vadd.xlane.f32.xlu1 %v3007_v13  ;;  %3775 = vmatprep.subr.mxu0 %v4151_v4 }
0x10c7   : > { %3776 = vmatpush3.msra.mxu0 %v3072_v21 }
0x10c8   : > { %3777 = vmatprep.subr.mxu0 %v4151_v4 }
0x10c9   : > { %3778 = vmatpush3.msra.mxu0 %v3071_v22 }
0x10ca   : > { %3779 = vmatprep.subr.mxu0 %v4151_v4 }
0x10cb   : > { %3780 = vmatpush3.msra.mxu0 %v3070_v23 }
0x10cc   : > { %3781 = vmatprep.subr.mxu0 %v4151_v4 }
0x10cd   : > { %3782 = vmatpush3.msra.mxu0 %v3069_v24 }
0x10ce   : > { %3783 = vmatprep.subr.mxu0 %v4151_v4 }
0x10cf   : > { %3784 = vmatpush3.msra.mxu0 %v3068_v28 }
0x10d0   : > { %3785 = vmatprep.subr.mxu0 %v4151_v4 }
0x10d1   : > { %3786 = vmatpush3.msra.mxu0 %v3067_v29 }
0x10d2   : > { %3787 = vmatprep.subr.mxu0 %v4151_v4 }
0x10d3   : > { %3788 = vmatpush3.msra.mxu0 %v3066_v32 }
0x10d4   : > { %3789 = vmatprep.subr.mxu0 %v4151_v4 }
0x10d5   : > { %3790 = vmatpush3.msra.mxu0 %v3065_v33 }
0x10d6   : > { %3791 = vmatprep.subr.mxu0 %v4151_v4 }
0x10d7   : > { %3792 = vmatpush3.msra.mxu0 %v3064_v43 }
0x10d8   : > { %3793 = vmatprep.subr.mxu0 %v4151_v4 }
0x10d9   : > { %3794 = vmatpush3.msra.mxu0 %v3063_v30 }
0x10da   : > { %3795 = vmatprep.subr.mxu0 %v4151_v4 }
0x10db   : > { %3796 = vmatpush3.msra.mxu0 %v3062_v31  ;;  %v3180_v31 = vld [vmem:[%s5084_s16] sm:$0x1] }
0x10dc   : > { %3797 = vmatprep.subr.mxu0 %v4151_v4 }
0x10dd   : > { %3798 = vmatpush3.msra.mxu0 %v3061_v46 }
0x10de   : > { %3799 = vmatprep.subr.mxu0 %v4151_v4 }
0x10df   : > { %3800 = vmatpush3.msra.mxu0 %v3060_v37 }
0x10e0   : > { %3801 = vmatprep.subr.mxu0 %v4151_v4 }
0x10e1   : > { %3802 = vmatpush3.msra.mxu0 %v3059_v38 }
0x10e2   : > { %3803 = vmatprep.subr.mxu0 %v4151_v4  ;;  %v3158_v4 = vrot.slane %v3048_v3, 2 }
0x10e3   : > { %3804 = vmatpush3.msra.mxu0 %v3058_v39 }
0x114b   : > { %v3009_v14 = vpop.xlane.xlu1 %3008 }
0x114c   : > { %v3012_v55 = vmul.f32 0.0078125, %v3009_v14 }
0x114e   : > { %v4910_v15 = vsub.f32 %v3006_v11, %v3012_v55 }
0x114f   : > { %v3011_v16 = vpop.xlane.xlu1 %3010 }
0x1150   : > { %v3013_v17 = vmul.f32 0.0078125, %v3011_v16  ;;  %v3016_v19 = vmul.f32 %v4910_v15, %v4910_v15 }
0x1152   : > { %v4914_v20 = vsub.f32 %v3007_v13, %v3013_v17  ;;  %3018 = vadd.xlane.f32.xlu0 %v3016_v19  ;;  %v3161_v19 = vrot.slane %v3048_v3, 3 }
0x1154   : > { %v3017_v41 = vmul.f32 %v4914_v20, %v4914_v20 }
0x1156   : > { %3020 = vadd.xlane.f32.xlu1 %v3017_v41  ;;  %v3164_v41 = vrot.slane %v3048_v3, 4 }
0x11db   : > { %v3019_v25 = vpop.xlane.xlu0 %3018 }
0x11dc   : > { %v3022_v40 = vmul.f32 0.0078125, %v3019_v25 }
0x11de   : > { %v3024_v44 = vadd.f32 1e-06, %v3022_v40 }
0x11df   : > { %v3021_v45 = vpop.xlane.xlu1 %3020 }
0x11e0   : > { %4074 = vrsqrt.f32 %v3024_v44  ;;  %v3023_v48 = vmul.f32 0.0078125, %v3021_v45 }
0x11e2   : > { %v3025_v2 = vadd.f32 1e-06, %v3023_v48 }
0x11e4   : > { %4076 = vrsqrt.f32 %v3025_v2 }
0x11ed   : > { %v4075_v49 = vpop.eup %4074 }
0x11ee   : > { %v3028_v50 = vmul.f32 %v4075_v49, %v4910_v15 }
0x11f0   : > { %v3037_v18 = vmul.f32 %v3476_v51, %v3028_v50 }
0x11f1   : > { %v4077_v26 = vpop.eup %4076 }
0x11f2   : > { %v3029_v53 = vmul.f32 %v4077_v26, %v4914_v20  ;;  %v4989_v52 = vadd.f32 %v3477_v54, %v3037_v18 }
0x11f4   : > { %v3038_v34 = vmul.f32 %v3476_v51, %v3029_v53 }
0x11f6   : > { %v4991_v56 = vadd.f32 %v3477_v54, %v3038_v34 }
0x11f8   : > { %v3049_v58 = vadd.f32 %v4991_v56, %v4989_v52 }
0x11fa   : > { %v3050_v59 = vrot.slane %v3049_v58, 4 }
0x11fc   : > { %v3051_v36 = vadd.f32 %v3050_v59, %v3049_v58 }
0x11fe   : > { %v3052_v27 = vrot.slane %v3051_v36, 2 }
0x1200   : > { %v3053_v47 = vadd.f32 %v3052_v27, %v3051_v36 }
0x1202   : > { %v3054_v57 = vrot.slane %v3053_v47, 1 }
0x1204   : > { %v3055_v60 = vadd.f32 %v3054_v57, %v3053_v47 }
0x1206   : > { %v3057_v61 = vmul.f32 0.0625, %v3055_v60 }
0x1208   : > { %3806 = vmatmul.mubr.f32.vlgmr.msra.gmra.mxu0 %v3057_v61 }
0x12c8   : > { %v3140_v6 = vpop.f32.mrf.mxu0 }
0x12c9   : > { %v3144_v7 = vmul.f32 %v3140_v6, %v3048_v3 }
0x12ca   : > { %v3807_v8 = vpop.f32.mrf.mxu0 }
0x12cb   : > { %v3148_v9 = vadd.f32 %v3146_v5, %v3144_v7 }
0x12cd   : > { %v3150_v10 = vmul.f32 %v3148_v9, %v3148_v9  ;;  %v3149_v15 = vmul.f32 0.5, %v3148_v9 }
0x12cf   : > { %v3151_v11 = vmul.f32 %v3150_v10, %v3148_v9 }
0x12d1   : > { %v3152_v12 = vmul.f32 0.044715, %v3151_v11 }
0x12d3   : > { %v3153_v13 = vadd.f32 %v3152_v12, %v3148_v9 }
0x12d5   : > { %v3154_v14 = vmul.f32 0.7978846, %v3153_v13 }
0x12d7   : > { %4078 = vtanh.f32 %v3154_v14 }
0x12e4   : > { %v4079_v55 = vpop.eup %4078 }
0x12e5   : > { %v3156_v16 = vadd.f32 1.0, %v4079_v55 }
0x12e7   : > { %v3157_v17 = vmul.f32 %v3156_v16, %v3149_v15 }
0x12e9   : > { %v3160_v20 = vmul.f32 %v3158_v4, %v3157_v17 }
0x12eb   : > { %v3163_v42 = vmul.f32 %v3161_v19, %v3160_v20 }
0x12ed   : > { %v3166_v21 = vadd.f32 %v3164_v41, %v3163_v42 }
0x12ef   : > { %v3168_v22 = vmul.f32 %v3166_v21, %v3166_v21  ;;  %v3167_v33 = vmul.f32 0.5, %v3166_v21 }
0x12f1   : > { %v3169_v23 = vmul.f32 %v3168_v22, %v3166_v21 }
0x12f3   : > { %v3170_v24 = vmul.f32 0.044715, %v3169_v23 }
0x12f5   : > { %v3171_v28 = vadd.f32 %v3170_v24, %v3166_v21 }
0x12f7   : > { %v3172_v29 = vmul.f32 0.7978846, %v3171_v28 }
0x12f9   : > { %4080 = vtanh.f32 %v3172_v29 }
0x1306   : > { %v4081_v32 = vpop.eup %4080 }
0x1307   : > { %v3174_v43 = vadd.f32 1.0, %v4081_v32 }
0x1309   : > { %v3175_v30 = vmul.f32 %v3174_v43, %v3167_v33 }
0x130b   : > { %3817 = vmatmul.mubr.msk.f32.vlgmr.msra.gmra.mxu1 %vm3181_vm2, %v3175_v30 }
0x13cb   : > { %v3251_v46 = vpop.f32.mrf.mxu1 }
0x13cc   : > { %v3252_v37 = vadd.f32 %v3251_v46, %v3180_v31 }
0x13cd   : > { %v3818_v38 = vpop.f32.mrf.mxu1 }
0x13ce   : > { %v3255_v39 = vsub.f32 0.0, %v3252_v37 }
0x13d0   : > { %v3256_v25 = vmul.f32 1.442695, %v3255_v39 }
0x13d2   : > { %4082 = vpow2.f32 %v3256_v25 }
0x13df   : > { %v4083_v40 = vpop.eup %4082 }
0x13e0   : > { %v3258_v44 = vadd.f32 1.0, %v4083_v40 }
0x13e2   : > { %4084 = vrcp.f32 %v3258_v44 }
0x13ef   : > { %v4085_v45 = vpop.eup %4084 }
0x13f0   : > { %v3264_v48 = vrot.slane %v4085_v45, %v4406_v35 }
0x13f2   : > { %v3265_v2 = vmul.f32 %v3264_v48, %v4989_v52  ;;  %v3266_v49 = vmul.f32 %v3264_v48, %v4991_v56 }
0x13f4   : > { %3267 = vst [vmem:[%s541_s20] sm:$0xff] %v3265_v2  ;;  %3268 = vst [vmem:[%s541_s20 + $0x8] sm:$0xff] %v3266_v49 }
0x13f5   : > { %4101 = shalt.err (!%p4098_p3)
}
0x13f6   : > { %s4102_s19 = scalar_lea.hbm %s5022_s24, 256  ;;  %s4106_s0 = scalar_lea.hbm %s5085_s17, 512 }
0x13f7   : > { %p4103_p4 = scmp.ne.s32.totalorder %s5022_s24, %s4102_s19  ;;  %p4107_p9 = scmp.lt.s32.totalorder %s5022_s24, %s5085_s17 }
0x13f8   : > { %p4108_p10 = scmp.lt.s32.totalorder %s4106_s0, %s4102_s19 }
0x13f9   : > { %p4104_p7 = pnand %p4103_p4, %p4291_p5 }
0x13fa   : > { %p4109_p11 = por %p4108_p10, %p4107_p9 }
0x13fb   : > { %p4105_p8 = pneg %p4104_p7 }
0x13fd   : > { %p4110_p12 = pnand %p4109_p11, %p4105_p8 }
0x13ff   : > { %4113 = shalt.err (!%p4110_p12)
}
0x1400   : > { %s4161_s21 = smov 128   ;;  %s4162_s26 = smov 8  }
0x1401   : > { %3819 = dma.vmem_to_hbm [thread:$0]  (%p4291_p5), %s5024_s30, 256, %s5022_s24, %s5028_s28, %s4161_s21, %s4161_s21, %s4162_s26  }
0x1402 PF: > { %s5107_s27 = sld [smem:[#allocation7_spill]] }
0x1403   : > { %s5108_s29 = sld [smem:[#allocation5_spill]] }
0x1408   : > { %p3825_p13 = scmp.ge.s32.totalorder %s5107_s27, 2 }
0x1409   : > { %s3298_s2 = sand.u32 1, %s5108_s29  }
0x140a   : > { %p3822_p0 = pnand %p3825_p13, %p4295_p6  ;;  %s3299_s19 = scalar_lea.sflag [#allocation3], %s3298_s2 }
0x140c   : > { %p3823_p1 = pneg %p3822_p0 }
0x140e   : > { %4131 = dma.done.wait (%p3823_p1), %s3299_s19, 256  }
0x140f   : > { %4133 = vsyncadd (%p3823_p1), %s3299_s19, 4294967040  ;;  %s5110_s27 = sld [smem:[#allocation8_spill]]  ;;  %s5113_s24 = smov %s4140_s25 }
0x1410   : > { %s5111_s0 = sld [smem:[#allocation6_spill]] }
0x1411   : > { %s5112_s26 = sld [smem:[#allocation9_spill]] }
0x1415   : > { %p27_p2 = scmp.ge.s32.totalorder %s5110_s27, 4  }
0x1416   : > { %s5114_s25 = smov %s5111_s0 }
0x1417   :  { %29 = sbr.rel (!%p27_p2) target bundleno = 7 (0x7), region = 123 }
0x141c   :  { %3304 = vsyncpa [#allocation3], 1 }
0x141d   :  { %3306 = vsyncpa [#allocation3 + $0x1], 1 }

</bundles_post_ra>
